<compile_context>
chip_gen: v7x
topology: tpu7x:2x2x1
jax: 0.10.0
libtpu: 0.0.40
codegen_flags: <defaults>
</compile_context>

<pallas_src>
import jax
import jax.numpy as jnp
from jax import lax
from jax.experimental import pallas as pl
from jax.experimental.pallas import tpu as pltpu


# ----------------------------------------------------------------------------
# Fused conv stack kernel (one grid step per batch element):
#   conv1(k=5,pad=2) + BN1 + ReLU + MaxPool1d(2)
#   conv2(k=5,pad=2) + BN2 + ReLU + MaxPool1d(2)
#
# conv1 is a single im2col matmul over all four (output position mod 4)
# phases; maxes over phases {0,1}/{2,3} give the even/odd pooled h1 sequences
# ec/oc.  conv2 outputs 2p / 2p+1 (the pool2 partners) are 5-tap sums over
# {ec,oc} windows shifted by -1/0/+1 pooled positions; the shifts are
# pltpu.roll + boundary-row zeroing, and the taps are stacked along K so each
# parity is one bf16 (n,640)@(640,256) matmul.
# ----------------------------------------------------------------------------
def conv_stack_kernel(p_ref, w1_ref, s1_ref, t1_ref, w2_ref, s2_ref, t2_ref,
                      out_ref, ts_ref):
    n = out_ref.shape[0]          # pooled positions after both pools (L // 4)
    f32 = jnp.float32
    bf16 = jnp.bfloat16

    # conv1 + BN1 + ReLU: one (4n,8)@(8,128) matmul covering all four phases.
    a = jnp.maximum(
        jnp.dot(p_ref[...], w1_ref[...], preferred_element_type=f32)
        * s1_ref[...] + t1_ref[...], 0.0)                    # (4n, 128)

    # MaxPool1d(2): even / odd elements of the pooled sequence h1.
    ec = jnp.maximum(a[0:n], a[n:2 * n])                     # h1[2q]   (n,128)
    oc = jnp.maximum(a[2 * n:3 * n], a[3 * n:4 * n])         # h1[2q+1] (n,128)

    # +-1 pooled-position shifts via XLU roll; zero the wrapped boundary row
    # (== conv2 zero padding applied after pool1).
    rows = lax.broadcasted_iota(jnp.int32, (n, 1), 0)
    e0 = jnp.where(rows == 0, 0.0, pltpu.roll(ec, shift=1, axis=0))       # ec[p-1]
    o0 = jnp.where(rows == 0, 0.0, pltpu.roll(oc, shift=1, axis=0))       # oc[p-1]
    e2 = jnp.where(rows == n - 1, 0.0, pltpu.roll(ec, shift=n - 1, axis=0))  # ec[p+1]
    o2 = jnp.where(rows == n - 1, 0.0, pltpu.roll(oc, shift=n - 1, axis=0))  # oc[p+1]

    # K-stack the conv2 taps in bf16:  S = [e0 | o0 | e1 | o1 | e2 | o2]
    #   c2[2p]   = S[:,   0:640] @ [W0;W1;W2;W3;W4]
    #   c2[2p+1] = S[:, 128:768] @ [W0;W1;W2;W3;W4]
    ts_ref[:, 0:128] = e0.astype(bf16)
    ts_ref[:, 128:256] = o0.astype(bf16)
    ts_ref[:, 256:384] = ec.astype(bf16)
    ts_ref[:, 384:512] = oc.astype(bf16)
    ts_ref[:, 512:640] = e2.astype(bf16)
    ts_ref[:, 640:768] = o2.astype(bf16)

    ye = jnp.dot(ts_ref[:, 0:640], w2_ref[...], preferred_element_type=f32)
    yo = jnp.dot(ts_ref[:, 128:768], w2_ref[...], preferred_element_type=f32)

    s2 = s2_ref[...]
    t2 = t2_ref[...]
    ye = jnp.maximum(ye * s2 + t2, 0.0)                      # BN2 + ReLU
    yo = jnp.maximum(yo * s2 + t2, 0.0)
    out_ref[...] = jnp.maximum(ye, yo).astype(out_ref.dtype)  # MaxPool1d(2)


def conv_stack(pat, w1, s1, t1, w2, s2, t2):
    B, fn, kk = pat.shape             # fn = 4 * (L // 4) = L, kk = 8 padded taps
    n = fn // 4
    c2 = w2.shape[1]                  # 256 output channels
    return pl.pallas_call(
        conv_stack_kernel,
        out_shape=jax.ShapeDtypeStruct((B, n, c2), jnp.bfloat16),
        grid_spec=pltpu.PrefetchScalarGridSpec(
            num_scalar_prefetch=0,
            grid=(B,),
            in_specs=[
                pl.BlockSpec((None, fn, kk), lambda b: (b, 0, 0)),
                pl.BlockSpec((kk, 128), lambda b: (0, 0)),
                pl.BlockSpec((1, 128), lambda b: (0, 0)),
                pl.BlockSpec((1, 128), lambda b: (0, 0)),
                pl.BlockSpec((5 * 128, c2), lambda b: (0, 0)),
                pl.BlockSpec((1, c2), lambda b: (0, 0)),
                pl.BlockSpec((1, c2), lambda b: (0, 0)),
            ],
            out_specs=pl.BlockSpec((None, n, c2), lambda b: (b, 0, 0)),
            scratch_shapes=[pltpu.VMEM((n, 6 * 128), jnp.bfloat16)],
        ),
        compiler_params=pltpu.CompilerParams(
            dimension_semantics=("parallel",)),
    )(pat, w1, s1, t1, w2, s2, t2)


# ----------------------------------------------------------------------------
# FC head: fc1 as a K-tiled, f32-accumulated bf16 matmul whose K reduction is
# split over a leading "parallel" axis (both v7x TensorCores stream half the
# 16 MB weight each); a tiny second kernel sums the partials, adds bias,
# applies ReLU and fc2.  Dropout is identity in eval mode.
# ----------------------------------------------------------------------------
def fc1_partial_kernel(x_ref, w1_ref, part_ref, acc_ref):
    k = pl.program_id(1)

    @pl.when(k == 0)
    def _():
        acc_ref[...] = jnp.zeros_like(acc_ref)

    acc_ref[...] += jnp.dot(x_ref[...], w1_ref[...],
                            preferred_element_type=jnp.float32)

    @pl.when(k == pl.num_programs(1) - 1)
    def _():
        part_ref[...] = acc_ref[...]


def fc_combine_kernel(part_ref, b1_ref, w2_ref, b2_ref, out_ref):
    h = part_ref[0]
    for c in range(1, part_ref.shape[0]):
        h = h + part_ref[c]
    h = jnp.maximum(h + b1_ref[...], 0.0)                    # fc1 bias + ReLU
    out_ref[...] = jnp.dot(h, w2_ref[...],
                           preferred_element_type=jnp.float32) + b2_ref[...]


def fc_head(x, w1, b1, w2, b2, *, tk=16384, nc=2):
    B, K = x.shape
    H = w1.shape[1]
    O = w2.shape[1]
    assert K % (nc * tk) == 0
    kt = K // (nc * tk)
    # bf16 w1 block: tk*H*2 = 4 MB, double-buffered 8 MB -> fits the default
    # scoped VMEM on v5e (16 MiB), v6e and v7x.  Do NOT raise tk on v5e.
    part = pl.pallas_call(
        fc1_partial_kernel,
        out_shape=jax.ShapeDtypeStruct((nc, B, H), jnp.float32),
        grid_spec=pltpu.PrefetchScalarGridSpec(
            num_scalar_prefetch=0,
            grid=(nc, kt),
            in_specs=[
                pl.BlockSpec((B, tk), lambda c, k: (0, c * kt + k)),
                pl.BlockSpec((tk, H), lambda c, k: (c * kt + k, 0)),
            ],
            out_specs=pl.BlockSpec((None, B, H), lambda c, k: (c, 0, 0)),
            scratch_shapes=[pltpu.VMEM((B, H), jnp.float32)],
        ),
        compiler_params=pltpu.CompilerParams(
            dimension_semantics=("parallel", "arbitrary")),
    )(x, w1)

    out = pl.pallas_call(
        fc_combine_kernel,
        out_shape=jax.ShapeDtypeStruct((B, O), jnp.float32),
        in_specs=[pl.BlockSpec(memory_space=pltpu.MemorySpace.VMEM)] * 4,
        out_specs=pl.BlockSpec(memory_space=pltpu.MemorySpace.VMEM),
    )(part, b1, w2, b2)
    return out


# ----------------------------------------------------------------------------
# Glue: parameter setup, BN folding, conv1 im2col, flatten ordering.
# ----------------------------------------------------------------------------
def fold_bn(conv_bias, gamma, beta, mean, var, eps=1e-5):
    s = gamma / jnp.sqrt(var + eps)
    t = beta + s * (conv_bias - mean)
    return s.reshape(1, -1).astype(jnp.float32), t.reshape(1, -1).astype(jnp.float32)


def init_params(key):
    ks = jax.random.split(key, 16)
    p = {}
    # conv1: PyTorch weight (128, 1, 5), bias (128,); taps padded 5 -> 8.
    w1 = jax.random.normal(ks[0], (128, 1, 5), jnp.float32) * 0.1
    p["w1p"] = jnp.zeros((8, 128), jnp.float32).at[:5, :].set(w1[:, 0, :].T)
    p["conv1_b"] = jax.random.normal(ks[1], (128,), jnp.float32) * 0.1
    p["bn1_gamma"] = 1.0 + 0.1 * jax.random.normal(ks[2], (128,), jnp.float32)
    p["bn1_beta"] = 0.1 * jax.random.normal(ks[3], (128,), jnp.float32)
    p["bn1_mean"] = 0.1 * jax.random.normal(ks[4], (128,), jnp.float32)
    p["bn1_var"] = 1.0 + 0.1 * jnp.abs(jax.random.normal(ks[5], (128,), jnp.float32))
    # conv2: PyTorch weight (256, 128, 5), bias (256,) -> K-stacked (5*128, 256)
    # rows [128k : 128(k+1)] = W_k[cin, cout]; stored bf16 (f32 accumulate in-kernel).
    w2 = jax.random.normal(ks[6], (256, 128, 5), jnp.float32) * 0.02
    p["w2p"] = (jnp.transpose(w2, (2, 1, 0))      # (5, 128, 256) [k, cin, cout]
                .reshape(5 * 128, 256)
                .astype(jnp.bfloat16))
    p["conv2_b"] = jax.random.normal(ks[7], (256,), jnp.float32) * 0.1
    p["bn2_gamma"] = 1.0 + 0.1 * jax.random.normal(ks[8], (256,), jnp.float32)
    p["bn2_beta"] = 0.1 * jax.random.normal(ks[9], (256,), jnp.float32)
    p["bn2_mean"] = 0.1 * jax.random.normal(ks[10], (256,), jnp.float32)
    p["bn2_var"] = 1.0 + 0.1 * jnp.abs(jax.random.normal(ks[11], (256,), jnp.float32))
    # fc1: PyTorch (128, 65536) acting on the flatten of (C=256, L=256), i.e.
    # row index of W^T is c*256 + l.  Fold the (C, L) -> (L, C) permutation
    # into the weight once at init and store it bf16 (streamed weight; the
    # matmul accumulates in f32 in-kernel).
    fc1_wt = jax.random.normal(ks[12], (256 * 256, 128), jnp.float32) * 0.01
    p["fc1_w"] = (fc1_wt.reshape(256, 256, 128)     # [c, l, h]
                  .transpose(1, 0, 2)               # [l, c, h]
                  .reshape(256 * 256, 128)
                  .astype(jnp.bfloat16))
    p["fc1_b"] = (jax.random.normal(ks[13], (128,), jnp.float32) * 0.1).reshape(1, 128)
    # fc2: PyTorch (3, 128) -> stored transposed (128, 3)
    p["fc2_w"] = jax.random.normal(ks[14], (128, 3), jnp.float32) * 0.1
    p["fc2_b"] = (jax.random.normal(ks[15], (3,), jnp.float32) * 0.1).reshape(1, 3)
    return p


@jax.jit
def improved_cnn_forward(x, params):
    # x: (B, 1, L) NCL, like PyTorch. L must be 1024 (forced by view(-1, 256*256)).
    B, _, L = x.shape
    assert L == 1024 and L % 4 == 0
    xs = x[:, 0, :].astype(jnp.float32)                                # (B, L)

    # conv1 im2col (k=5, pad=2), taps padded 5 -> 8, rows grouped by output
    # position mod 4 so pool1 parities come out of plain elementwise maxes.
    # TODO(synk): at large B/L build this im2col in-kernel to avoid the 8x
    # HBM inflation of the conv1 input stream (negligible at B=2, L=1024).
    xp = jnp.pad(xs, ((0, 0), (2, 2)))                                 # (B, L+4)
    pat = jnp.stack([xp[:, k:k + L] for k in range(5)], axis=-1)       # (B, L, 5)
    pat = jnp.pad(pat, ((0, 0), (0, 0), (0, 3)))                       # (B, L, 8)
    pat = (pat.reshape(B, L // 4, 4, 8)
           .transpose(0, 2, 1, 3)                                      # (B, 4, L/4, 8)
           .reshape(B, L, 8))                                          # phase-major rows

    s1, t1 = fold_bn(params["conv1_b"], params["bn1_gamma"], params["bn1_beta"],
                     params["bn1_mean"], params["bn1_var"])
    s2, t2 = fold_bn(params["conv2_b"], params["bn2_gamma"], params["bn2_beta"],
                     params["bn2_mean"], params["bn2_var"])

    feat = conv_stack(pat, params["w1p"], s1, t1,
                      params["w2p"], s2, t2)            # (B, L/4, 256) bf16
    # PyTorch (C, L) flatten order is folded into fc1_w; flatten row-major.
    feat = feat.reshape(B, 256 * (L // 4))
    out = fc_head(feat, params["fc1_w"], params["fc1_b"],
                  params["fc2_w"], params["fc2_b"], tk=16384, nc=2)    # (B, 3)
    return out


if __name__ == "__main__":
    key = jax.random.PRNGKey(0)
    k_param, k_in = jax.random.split(key)
    params = init_params(k_param)
    # L = 1024 is implied by fc1 = Linear(256*256, 128) after two /2 pools.
    x = jax.random.normal(k_in, (2, 1, 1024), jnp.float32)
    out = improved_cnn_forward(x, params)
    jax.block_until_ready(out)
    assert out.shape == (2, 3) and out.dtype == jnp.float32
    print("KERNEL_OK")
</pallas_src>

<mosaic_0001>
module attributes {stable_mosaic.version = 11 : i64} {
  func.func @conv_stack_kernel(%arg0: i32, %arg1: memref<1x1024x8xf32, #tpu.memory_space<vmem>>, %arg2: memref<8x128xf32, #tpu.memory_space<vmem>>, %arg3: memref<1x128xf32, #tpu.memory_space<vmem>>, %arg4: memref<1x128xf32, #tpu.memory_space<vmem>>, %arg5: memref<640x256xbf16, #tpu.memory_space<vmem>>, %arg6: memref<1x256xf32, #tpu.memory_space<vmem>>, %arg7: memref<1x256xf32, #tpu.memory_space<vmem>>, %arg8: memref<1x256x256xbf16, #tpu.memory_space<vmem>>, %arg9: memref<256x768xbf16, #tpu.memory_space<vmem>>) attributes {dimension_semantics = [#tpu.dimension_semantics<parallel>], iteration_bounds = array<i64: 2>, scalar_prefetch = 0 : i64, scratch_operands = 1 : i64, tpu.core_type = #tpu.core_type<tc>, window_params = [{transform_indices = @transform_0, window_bounds = array<i64: 1, 1024, 8>}, {pipeline_mode = #tpu.pipeline_mode<synchronous>, transform_indices = @transform_1, window_bounds = array<i64: 8, 128>}, {pipeline_mode = #tpu.pipeline_mode<synchronous>, transform_indices = @transform_2, window_bounds = array<i64: 1, 128>}, {pipeline_mode = #tpu.pipeline_mode<synchronous>, transform_indices = @transform_3, window_bounds = array<i64: 1, 128>}, {pipeline_mode = #tpu.pipeline_mode<synchronous>, transform_indices = @transform_4, window_bounds = array<i64: 640, 256>}, {pipeline_mode = #tpu.pipeline_mode<synchronous>, transform_indices = @transform_5, window_bounds = array<i64: 1, 256>}, {pipeline_mode = #tpu.pipeline_mode<synchronous>, transform_indices = @transform_6, window_bounds = array<i64: 1, 256>}, {transform_indices = @transform_7, window_bounds = array<i64: 1, 256, 256>}]} {
    %c0 = arith.constant 0 : index
    %c0_0 = arith.constant 0 : index
    %c0_1 = arith.constant 0 : index
    %0 = vector.load %arg1[%c0, %c0_0, %c0_1] : memref<1x1024x8xf32, #tpu.memory_space<vmem>>, vector<1x1024x8xf32>
    %1 = vector.shape_cast %0 : vector<1x1024x8xf32> to vector<1024x8xf32>
    %c0_2 = arith.constant 0 : index
    %c0_3 = arith.constant 0 : index
    %2 = vector.load %arg2[%c0_2, %c0_3] : memref<8x128xf32, #tpu.memory_space<vmem>>, vector<8x128xf32>
    %cst = arith.constant dense<0.000000e+00> : vector<1024x128xf32>
    %3 = tpu.matmul %1, %2, %cst {dimension_numbers = #tpu.dot_dimension_numbers<[1], [0], [0], [1], [0, 0, 1, 1], [], []>} : vector<1024x8xf32>, vector<8x128xf32>, vector<1024x128xf32> -> vector<1024x128xf32>
    %c0_4 = arith.constant 0 : index
    %c0_5 = arith.constant 0 : index
    %4 = vector.load %arg3[%c0_4, %c0_5] : memref<1x128xf32, #tpu.memory_space<vmem>>, vector<1x128xf32>
    %5 = vector.broadcast %4 : vector<1x128xf32> to vector<1024x128xf32>
    %6 = arith.mulf %3, %5 : vector<1024x128xf32>
    %c0_6 = arith.constant 0 : index
    %c0_7 = arith.constant 0 : index
    %7 = vector.load %arg4[%c0_6, %c0_7] : memref<1x128xf32, #tpu.memory_space<vmem>>, vector<1x128xf32>
    %8 = vector.broadcast %7 : vector<1x128xf32> to vector<1024x128xf32>
    %9 = arith.addf %6, %8 : vector<1024x128xf32>
    %cst_8 = arith.constant 0.000000e+00 : f32
    %10 = vector.broadcast %cst_8 : f32 to vector<1024x128xf32>
    %11 = arith.maximumf %9, %10 : vector<1024x128xf32>
    %12 = vector.extract_strided_slice %11 {offsets = [0, 0], sizes = [256, 128], strides = [1, 1]} : vector<1024x128xf32> to vector<256x128xf32>
    %13 = vector.extract_strided_slice %11 {offsets = [256, 0], sizes = [256, 128], strides = [1, 1]} : vector<1024x128xf32> to vector<256x128xf32>
    %14 = arith.maximumf %12, %13 : vector<256x128xf32>
    %15 = vector.extract_strided_slice %11 {offsets = [512, 0], sizes = [256, 128], strides = [1, 1]} : vector<1024x128xf32> to vector<256x128xf32>
    %16 = vector.extract_strided_slice %11 {offsets = [768, 0], sizes = [256, 128], strides = [1, 1]} : vector<1024x128xf32> to vector<256x128xf32>
    %17 = arith.maximumf %15, %16 : vector<256x128xf32>
    %18 = tpu.iota {dimensions = array<i32: 0>} : vector<256x1xi32>
    %c0_i32 = arith.constant 0 : i32
    %19 = vector.broadcast %c0_i32 : i32 to vector<256x1xi32>
    %20 = arith.cmpi eq, %18, %19 : vector<256x1xi32>
    %c1_i32 = arith.constant 1 : i32
    %21 = tpu.dynamic_rotate %14 by %c1_i32 dim 0 : vector<256x128xf32>, i32 -> vector<256x128xf32>
    %cst_9 = arith.constant 0.000000e+00 : f32
    %22 = vector.shape_cast %20 : vector<256x1xi1> to vector<256x1xi1>
    %23 = vector.broadcast %22 : vector<256x1xi1> to vector<256x128xi1>
    %24 = vector.broadcast %cst_9 : f32 to vector<256x128xf32>
    %25 = arith.select %23, %24, %21 : vector<256x128xi1>, vector<256x128xf32>
    %c0_i32_10 = arith.constant 0 : i32
    %26 = vector.broadcast %c0_i32_10 : i32 to vector<256x1xi32>
    %27 = arith.cmpi eq, %18, %26 : vector<256x1xi32>
    %c1_i32_11 = arith.constant 1 : i32
    %28 = tpu.dynamic_rotate %17 by %c1_i32_11 dim 0 : vector<256x128xf32>, i32 -> vector<256x128xf32>
    %cst_12 = arith.constant 0.000000e+00 : f32
    %29 = vector.shape_cast %27 : vector<256x1xi1> to vector<256x1xi1>
    %30 = vector.broadcast %29 : vector<256x1xi1> to vector<256x128xi1>
    %31 = vector.broadcast %cst_12 : f32 to vector<256x128xf32>
    %32 = arith.select %30, %31, %28 : vector<256x128xi1>, vector<256x128xf32>
    %c255_i32 = arith.constant 255 : i32
    %33 = vector.broadcast %c255_i32 : i32 to vector<256x1xi32>
    %34 = arith.cmpi eq, %18, %33 : vector<256x1xi32>
    %c255_i32_13 = arith.constant 255 : i32
    %35 = tpu.dynamic_rotate %14 by %c255_i32_13 dim 0 : vector<256x128xf32>, i32 -> vector<256x128xf32>
    %cst_14 = arith.constant 0.000000e+00 : f32
    %36 = vector.shape_cast %34 : vector<256x1xi1> to vector<256x1xi1>
    %37 = vector.broadcast %36 : vector<256x1xi1> to vector<256x128xi1>
    %38 = vector.broadcast %cst_14 : f32 to vector<256x128xf32>
    %39 = arith.select %37, %38, %35 : vector<256x128xi1>, vector<256x128xf32>
    %c255_i32_15 = arith.constant 255 : i32
    %40 = vector.broadcast %c255_i32_15 : i32 to vector<256x1xi32>
    %41 = arith.cmpi eq, %18, %40 : vector<256x1xi32>
    %c255_i32_16 = arith.constant 255 : i32
    %42 = tpu.dynamic_rotate %17 by %c255_i32_16 dim 0 : vector<256x128xf32>, i32 -> vector<256x128xf32>
    %cst_17 = arith.constant 0.000000e+00 : f32
    %43 = vector.shape_cast %41 : vector<256x1xi1> to vector<256x1xi1>
    %44 = vector.broadcast %43 : vector<256x1xi1> to vector<256x128xi1>
    %45 = vector.broadcast %cst_17 : f32 to vector<256x128xf32>
    %46 = arith.select %44, %45, %42 : vector<256x128xi1>, vector<256x128xf32>
    %47 = arith.truncf %25 : vector<256x128xf32> to vector<256x128xbf16>
    %c0_18 = arith.constant 0 : index
    %c0_19 = arith.constant 0 : index
    %48 = vector.load %arg9[%c0_18, %c0_19] : memref<256x768xbf16, #tpu.memory_space<vmem>>, vector<256x128xbf16>
    tpu.vector_store %arg9[%c0_18, %c0_19], %47 {strides = array<i32>} : memref<256x768xbf16, #tpu.memory_space<vmem>>, vector<256x128xbf16>,
    %49 = arith.truncf %32 : vector<256x128xf32> to vector<256x128xbf16>
    %c0_20 = arith.constant 0 : index
    %c128 = arith.constant 128 : index
    %50 = vector.load %arg9[%c0_20, %c128] : memref<256x768xbf16, #tpu.memory_space<vmem>>, vector<256x128xbf16>
    tpu.vector_store %arg9[%c0_20, %c128], %49 {strides = array<i32>} : memref<256x768xbf16, #tpu.memory_space<vmem>>, vector<256x128xbf16>,
    %51 = arith.truncf %14 : vector<256x128xf32> to vector<256x128xbf16>
    %c0_21 = arith.constant 0 : index
    %c256 = arith.constant 256 : index
    %52 = vector.load %arg9[%c0_21, %c256] : memref<256x768xbf16, #tpu.memory_space<vmem>>, vector<256x128xbf16>
    tpu.vector_store %arg9[%c0_21, %c256], %51 {strides = array<i32>} : memref<256x768xbf16, #tpu.memory_space<vmem>>, vector<256x128xbf16>,
    %53 = arith.truncf %17 : vector<256x128xf32> to vector<256x128xbf16>
    %c0_22 = arith.constant 0 : index
    %c384 = arith.constant 384 : index
    %54 = vector.load %arg9[%c0_22, %c384] : memref<256x768xbf16, #tpu.memory_space<vmem>>, vector<256x128xbf16>
    tpu.vector_store %arg9[%c0_22, %c384], %53 {strides = array<i32>} : memref<256x768xbf16, #tpu.memory_space<vmem>>, vector<256x128xbf16>,
    %55 = arith.truncf %39 : vector<256x128xf32> to vector<256x128xbf16>
    %c0_23 = arith.constant 0 : index
    %c512 = arith.constant 512 : index
    %56 = vector.load %arg9[%c0_23, %c512] : memref<256x768xbf16, #tpu.memory_space<vmem>>, vector<256x128xbf16>
    tpu.vector_store %arg9[%c0_23, %c512], %55 {strides = array<i32>} : memref<256x768xbf16, #tpu.memory_space<vmem>>, vector<256x128xbf16>,
    %57 = arith.truncf %46 : vector<256x128xf32> to vector<256x128xbf16>
    %c0_24 = arith.constant 0 : index
    %c640 = arith.constant 640 : index
    %58 = vector.load %arg9[%c0_24, %c640] : memref<256x768xbf16, #tpu.memory_space<vmem>>, vector<256x128xbf16>
    tpu.vector_store %arg9[%c0_24, %c640], %57 {strides = array<i32>} : memref<256x768xbf16, #tpu.memory_space<vmem>>, vector<256x128xbf16>,
    %c0_25 = arith.constant 0 : index
    %c0_26 = arith.constant 0 : index
    %59 = vector.load %arg9[%c0_25, %c0_26] : memref<256x768xbf16, #tpu.memory_space<vmem>>, vector<256x640xbf16>
    %c0_27 = arith.constant 0 : index
    %c0_28 = arith.constant 0 : index
    %60 = vector.load %arg5[%c0_27, %c0_28] : memref<640x256xbf16, #tpu.memory_space<vmem>>, vector<640x256xbf16>
    %cst_29 = arith.constant dense<0.000000e+00> : vector<256x256xf32>
    %61 = tpu.matmul %59, %60, %cst_29 {dimension_numbers = #tpu.dot_dimension_numbers<[1], [0], [0], [1], [0, 0, 1, 1], [], []>} : vector<256x640xbf16>, vector<640x256xbf16>, vector<256x256xf32> -> vector<256x256xf32>
    %c0_30 = arith.constant 0 : index
    %c128_31 = arith.constant 128 : index
    %62 = vector.load %arg9[%c0_30, %c128_31] : memref<256x768xbf16, #tpu.memory_space<vmem>>, vector<256x640xbf16>
    %c0_32 = arith.constant 0 : index
    %c0_33 = arith.constant 0 : index
    %63 = vector.load %arg5[%c0_32, %c0_33] : memref<640x256xbf16, #tpu.memory_space<vmem>>, vector<640x256xbf16>
    %cst_34 = arith.constant dense<0.000000e+00> : vector<256x256xf32>
    %64 = tpu.matmul %62, %63, %cst_34 {dimension_numbers = #tpu.dot_dimension_numbers<[1], [0], [0], [1], [0, 0, 1, 1], [], []>} : vector<256x640xbf16>, vector<640x256xbf16>, vector<256x256xf32> -> vector<256x256xf32>
    %c0_35 = arith.constant 0 : index
    %c0_36 = arith.constant 0 : index
    %65 = vector.load %arg6[%c0_35, %c0_36] : memref<1x256xf32, #tpu.memory_space<vmem>>, vector<1x256xf32>
    %c0_37 = arith.constant 0 : index
    %c0_38 = arith.constant 0 : index
    %66 = vector.load %arg7[%c0_37, %c0_38] : memref<1x256xf32, #tpu.memory_space<vmem>>, vector<1x256xf32>
    %67 = vector.broadcast %65 : vector<1x256xf32> to vector<256x256xf32>
    %68 = arith.mulf %61, %67 : vector<256x256xf32>
    %69 = vector.broadcast %66 : vector<1x256xf32> to vector<256x256xf32>
    %70 = arith.addf %68, %69 : vector<256x256xf32>
    %cst_39 = arith.constant 0.000000e+00 : f32
    %71 = vector.broadcast %cst_39 : f32 to vector<256x256xf32>
    %72 = arith.maximumf %70, %71 : vector<256x256xf32>
    %73 = vector.broadcast %65 : vector<1x256xf32> to vector<256x256xf32>
    %74 = arith.mulf %64, %73 : vector<256x256xf32>
    %75 = vector.broadcast %66 : vector<1x256xf32> to vector<256x256xf32>
    %76 = arith.addf %74, %75 : vector<256x256xf32>
    %cst_40 = arith.constant 0.000000e+00 : f32
    %77 = vector.broadcast %cst_40 : f32 to vector<256x256xf32>
    %78 = arith.maximumf %76, %77 : vector<256x256xf32>
    %79 = arith.maximumf %72, %78 : vector<256x256xf32>
    %80 = arith.truncf %79 : vector<256x256xf32> to vector<256x256xbf16>
    %c0_41 = arith.constant 0 : index
    %c0_42 = arith.constant 0 : index
    %c0_43 = arith.constant 0 : index
    %81 = vector.load %arg8[%c0_41, %c0_42, %c0_43] : memref<1x256x256xbf16, #tpu.memory_space<vmem>>, vector<1x256x256xbf16>
    %82 = vector.shape_cast %81 : vector<1x256x256xbf16> to vector<256x256xbf16>
    %83 = vector.shape_cast %80 : vector<256x256xbf16> to vector<1x256x256xbf16>
    tpu.vector_store %arg8[%c0_41, %c0_42, %c0_43], %83 {strides = array<i32>} : memref<1x256x256xbf16, #tpu.memory_space<vmem>>, vector<1x256x256xbf16>,
    return
  }
  func.func @transform_0(%arg0: i32) -> (i32, i32, i32) {
    %c0_i32 = arith.constant 0 : i32
    %c0_i32_0 = arith.constant 0 : i32
    %c0_i32_1 = arith.constant 0 : i32
    return %arg0, %c0_i32, %c0_i32_0 : i32, i32, i32
  }
  func.func @transform_1(%arg0: i32) -> (i32, i32) {
    %c0_i32 = arith.constant 0 : i32
    %c0_i32_0 = arith.constant 0 : i32
    %c0_i32_1 = arith.constant 0 : i32
    return %c0_i32, %c0_i32_0 : i32, i32
  }
  func.func @transform_2(%arg0: i32) -> (i32, i32) {
    %c0_i32 = arith.constant 0 : i32
    %c0_i32_0 = arith.constant 0 : i32
    %c0_i32_1 = arith.constant 0 : i32
    return %c0_i32, %c0_i32_0 : i32, i32
  }
  func.func @transform_3(%arg0: i32) -> (i32, i32) {
    %c0_i32 = arith.constant 0 : i32
    %c0_i32_0 = arith.constant 0 : i32
    %c0_i32_1 = arith.constant 0 : i32
    return %c0_i32, %c0_i32_0 : i32, i32
  }
  func.func @transform_4(%arg0: i32) -> (i32, i32) {
    %c0_i32 = arith.constant 0 : i32
    %c0_i32_0 = arith.constant 0 : i32
    %c0_i32_1 = arith.constant 0 : i32
    return %c0_i32, %c0_i32_0 : i32, i32
  }
  func.func @transform_5(%arg0: i32) -> (i32, i32) {
    %c0_i32 = arith.constant 0 : i32
    %c0_i32_0 = arith.constant 0 : i32
    %c0_i32_1 = arith.constant 0 : i32
    return %c0_i32, %c0_i32_0 : i32, i32
  }
  func.func @transform_6(%arg0: i32) -> (i32, i32) {
    %c0_i32 = arith.constant 0 : i32
    %c0_i32_0 = arith.constant 0 : i32
    %c0_i32_1 = arith.constant 0 : i32
    return %c0_i32, %c0_i32_0 : i32, i32
  }
  func.func @transform_7(%arg0: i32) -> (i32, i32, i32) {
    %c0_i32 = arith.constant 0 : i32
    %c0_i32_0 = arith.constant 0 : i32
    %c0_i32_1 = arith.constant 0 : i32
    return %arg0, %c0_i32, %c0_i32_0 : i32, i32, i32
  }
}

module attributes {stable_mosaic.version = 11 : i64} {
  func.func @fc1_partial_kernel(%arg0: i32, %arg1: i32, %arg2: memref<2x16384xbf16, #tpu.memory_space<vmem>>, %arg3: memref<16384x128xbf16, #tpu.memory_space<vmem>>, %arg4: memref<1x2x128xf32, #tpu.memory_space<vmem>>, %arg5: memref<2x128xf32, #tpu.memory_space<vmem>>) attributes {dimension_semantics = [#tpu.dimension_semantics<parallel>, #tpu.dimension_semantics<arbitrary>], iteration_bounds = array<i64: 2, 2>, scalar_prefetch = 0 : i64, scratch_operands = 1 : i64, tpu.core_type = #tpu.core_type<tc>, window_params = [{transform_indices = @transform_0, window_bounds = array<i64: 2, 16384>}, {transform_indices = @transform_1, window_bounds = array<i64: 16384, 128>}, {transform_indices = @transform_2, window_bounds = array<i64: 1, 2, 128>}]} {
    %c0_i32 = arith.constant 0 : i32
    %0 = arith.cmpi eq, %arg1, %c0_i32 : i32
    %1 = arith.extui %0 : i1 to i32
    %c0_i32_0 = arith.constant 0 : i32
    %2 = arith.cmpi ne, %1, %c0_i32_0 : i32
    scf.if %2 {
      %cst_9 = arith.constant 0.000000e+00 : f32
      %12 = vector.broadcast %cst_9 : f32 to vector<2x128xf32>
      %c0_10 = arith.constant 0 : index
      %c0_11 = arith.constant 0 : index
      %13 = vector.load %arg5[%c0_10, %c0_11] : memref<2x128xf32, #tpu.memory_space<vmem>>, vector<2x128xf32>
      tpu.vector_store %arg5[%c0_10, %c0_11], %12 {strides = array<i32>} : memref<2x128xf32, #tpu.memory_space<vmem>>, vector<2x128xf32>,
    } else {
    }
    %c0 = arith.constant 0 : index
    %c0_1 = arith.constant 0 : index
    %3 = vector.load %arg5[%c0, %c0_1] : memref<2x128xf32, #tpu.memory_space<vmem>>, vector<2x128xf32>
    %c0_2 = arith.constant 0 : index
    %c0_3 = arith.constant 0 : index
    %4 = vector.load %arg2[%c0_2, %c0_3] : memref<2x16384xbf16, #tpu.memory_space<vmem>>, vector<2x16384xbf16>
    %c0_4 = arith.constant 0 : index
    %c0_5 = arith.constant 0 : index
    %5 = vector.load %arg3[%c0_4, %c0_5] : memref<16384x128xbf16, #tpu.memory_space<vmem>>, vector<16384x128xbf16>
    %cst = arith.constant dense<0.000000e+00> : vector<2x128xf32>
    %6 = tpu.matmul %4, %5, %cst {dimension_numbers = #tpu.dot_dimension_numbers<[1], [0], [0], [1], [0, 0, 1, 1], [], []>} : vector<2x16384xbf16>, vector<16384x128xbf16>, vector<2x128xf32> -> vector<2x128xf32>
    %7 = arith.addf %3, %6 : vector<2x128xf32>
    %c0_6 = arith.constant 0 : index
    %c0_7 = arith.constant 0 : index
    %8 = vector.load %arg5[%c0_6, %c0_7] : memref<2x128xf32, #tpu.memory_space<vmem>>, vector<2x128xf32>
    tpu.vector_store %arg5[%c0_6, %c0_7], %7 {strides = array<i32>} : memref<2x128xf32, #tpu.memory_space<vmem>>, vector<2x128xf32>,
    %c1_i32 = arith.constant 1 : i32
    %9 = arith.cmpi eq, %arg1, %c1_i32 : i32
    %10 = arith.extui %9 : i1 to i32
    %c0_i32_8 = arith.constant 0 : i32
    %11 = arith.cmpi ne, %10, %c0_i32_8 : i32
    scf.if %11 {
      %c0_9 = arith.constant 0 : index
      %c0_10 = arith.constant 0 : index
      %12 = vector.load %arg5[%c0_9, %c0_10] : memref<2x128xf32, #tpu.memory_space<vmem>>, vector<2x128xf32>
      %c0_11 = arith.constant 0 : index
      %c0_12 = arith.constant 0 : index
      %c0_13 = arith.constant 0 : index
      %13 = vector.load %arg4[%c0_11, %c0_12, %c0_13] : memref<1x2x128xf32, #tpu.memory_space<vmem>>, vector<1x2x128xf32>
      %14 = vector.shape_cast %13 : vector<1x2x128xf32> to vector<2x128xf32>
      %15 = vector.shape_cast %12 : vector<2x128xf32> to vector<1x2x128xf32>
      tpu.vector_store %arg4[%c0_11, %c0_12, %c0_13], %15 {strides = array<i32>} : memref<1x2x128xf32, #tpu.memory_space<vmem>>, vector<1x2x128xf32>,
    } else {
    }
    return
  }
  func.func @transform_0(%arg0: i32, %arg1: i32) -> (i32, i32) {
    %c2_i32 = arith.constant 2 : i32
    %0 = arith.muli %arg0, %c2_i32 : i32
    %1 = arith.addi %0, %arg1 : i32
    %c0_i32 = arith.constant 0 : i32
    %c0_i32_0 = arith.constant 0 : i32
    return %c0_i32, %1 : i32, i32
  }
  func.func @transform_1(%arg0: i32, %arg1: i32) -> (i32, i32) {
    %c2_i32 = arith.constant 2 : i32
    %0 = arith.muli %arg0, %c2_i32 : i32
    %1 = arith.addi %0, %arg1 : i32
    %c0_i32 = arith.constant 0 : i32
    %c0_i32_0 = arith.constant 0 : i32
    return %1, %c0_i32 : i32, i32
  }
  func.func @transform_2(%arg0: i32, %arg1: i32) -> (i32, i32, i32) {
    %c0_i32 = arith.constant 0 : i32
    %c0_i32_0 = arith.constant 0 : i32
    %c0_i32_1 = arith.constant 0 : i32
    return %arg0, %c0_i32, %c0_i32_0 : i32, i32, i32
  }
}

module attributes {stable_mosaic.version = 11 : i64} {
  func.func @fc_combine_kernel(%arg0: memref<2x2x128xf32, #tpu.memory_space<vmem>>, %arg1: memref<1x128xf32, #tpu.memory_space<vmem>>, %arg2: memref<128x3xf32, #tpu.memory_space<vmem>>, %arg3: memref<1x3xf32, #tpu.memory_space<vmem>>, %arg4: memref<2x3xf32, #tpu.memory_space<vmem>>) attributes {dimension_semantics = [], scalar_prefetch = 0 : i64, scratch_operands = 0 : i64, tpu.core_type = #tpu.core_type<tc>} {
    %c0 = arith.constant 0 : index
    %c0_0 = arith.constant 0 : index
    %c0_1 = arith.constant 0 : index
    %0 = vector.load %arg0[%c0, %c0_0, %c0_1] : memref<2x2x128xf32, #tpu.memory_space<vmem>>, vector<1x2x128xf32>
    %1 = vector.shape_cast %0 : vector<1x2x128xf32> to vector<2x128xf32>
    %c1 = arith.constant 1 : index
    %c0_2 = arith.constant 0 : index
    %c0_3 = arith.constant 0 : index
    %2 = vector.load %arg0[%c1, %c0_2, %c0_3] : memref<2x2x128xf32, #tpu.memory_space<vmem>>, vector<1x2x128xf32>
    %3 = vector.shape_cast %2 : vector<1x2x128xf32> to vector<2x128xf32>
    %4 = arith.addf %1, %3 : vector<2x128xf32>
    %c0_4 = arith.constant 0 : index
    %c0_5 = arith.constant 0 : index
    %5 = vector.load %arg1[%c0_4, %c0_5] : memref<1x128xf32, #tpu.memory_space<vmem>>, vector<1x128xf32>
    %6 = vector.broadcast %5 : vector<1x128xf32> to vector<2x128xf32>
    %7 = arith.addf %4, %6 : vector<2x128xf32>
    %cst = arith.constant 0.000000e+00 : f32
    %8 = vector.broadcast %cst : f32 to vector<2x128xf32>
    %9 = arith.maximumf %7, %8 : vector<2x128xf32>
    %c0_6 = arith.constant 0 : index
    %c0_7 = arith.constant 0 : index
    %10 = vector.load %arg2[%c0_6, %c0_7] : memref<128x3xf32, #tpu.memory_space<vmem>>, vector<128x3xf32>
    %cst_8 = arith.constant dense<0.000000e+00> : vector<2x3xf32>
    %11 = tpu.matmul %9, %10, %cst_8 {dimension_numbers = #tpu.dot_dimension_numbers<[1], [0], [0], [1], [0, 0, 1, 1], [], []>} : vector<2x128xf32>, vector<128x3xf32>, vector<2x3xf32> -> vector<2x3xf32>
    %c0_9 = arith.constant 0 : index
    %c0_10 = arith.constant 0 : index
    %12 = vector.load %arg3[%c0_9, %c0_10] : memref<1x3xf32, #tpu.memory_space<vmem>>, vector<1x3xf32>
    %13 = vector.broadcast %12 : vector<1x3xf32> to vector<2x3xf32>
    %14 = arith.addf %11, %13 : vector<2x3xf32>
    %c0_11 = arith.constant 0 : index
    %c0_12 = arith.constant 0 : index
    %15 = vector.load %arg4[%c0_11, %c0_12] : memref<2x3xf32, #tpu.memory_space<vmem>>, vector<2x3xf32>
    tpu.vector_store %arg4[%c0_11, %c0_12], %14 {strides = array<i32>} : memref<2x3xf32, #tpu.memory_space<vmem>>, vector<2x3xf32>,
    return
  }
}

</mosaic_0001>

<bundles_post_ra>
// kernel: improved_cnn_forward.5
= control target key start
LH: loop header
LB: loop body
LE: loop exit
PB: predicated region body
PF: predicated region fallthrough
CT: control target
= control target key end

     0   :  { %v247_v3 = vmov 0.0|0.0   ;;  %vm248_vm0 = vmmov 0   ;;  %v249_v6 = vmov 0.0   ;;  %s348_s0 = inlined_call_operand.vmem [shape: f32[2,2,128], index: 0, kind: input, shape index: {}]   ;;  %s349_s1 = inlined_call_operand.vmem [shape: f32[1,128], index: 1, kind: input, shape index: {}]   ;;  %s350_s2 = inlined_call_operand.vmem [shape: f32[128,3], index: 2, kind: input, shape index: {}]   ;;  %s351_s3 = inlined_call_operand.vmem [shape: f32[1,3], index: 3, kind: input, shape index: {}]   ;;  %s352_s4 = inlined_call_operand.hbm [shape: f32[2,3], index: 4, kind: output, shape index: {}]  }
   0x1   :  { %v31_v0 = vld [vmem:[%s350_s2] sm:$0xff]  ;;  %v32_v1 = vld [vmem:[%s350_s2 + $0x8] sm:$0xff]  ;;  %v33_v2 = vld [vmem:[%s350_s2 + $0x10] sm:$0xff]  ;;  %195 = vmatprep.subr.bf16.mxu0 %v247_v3  ;;  %192 = vmatprep.mubr.msk.f32.mxu0 %vm248_vm0, %v249_v6 }
   0x2   :  { %v196_v4 = vpack.c.bf16 %v32_v1, %v31_v0  ;;  %v34_v5 = vld [vmem:[%s350_s2 + $0x18] sm:$0xff]  ;;  %v35_v8 = vld [vmem:[%s350_s2 + $0x20] sm:$0xff]  ;;  %v36_v9 = vld [vmem:[%s350_s2 + $0x28] sm:$0xff] }
   0x3   :  { %v199_v7 = vpack.c.bf16 %v34_v5, %v33_v2 }
   0x4   :  { %197 = vmatpush3.bf16.msra.mxu0 %v196_v4 }
   0x5   :  { %198 = vmatprep.subr.bf16.mxu0 %v247_v3 }
   0x6   :  { %9 = vsyncpa [#allocation3], 0  ;;  %v202_v10 = vpack.c.bf16 %v36_v9, %v35_v8  ;;  %v37_v11 = vld [vmem:[%s350_s2 + $0x30] sm:$0xff]  ;;  %v38_v12 = vld [vmem:[%s350_s2 + $0x38] sm:$0xff]  ;;  %vm124_vm1 = vcmask 17408  }
   0x7   :  { %v205_v13 = vpack.c.bf16 %v38_v12, %v37_v11  ;;  %v39_v14 = vld [vmem:[%s350_s2 + $0x40] sm:$0xff]  ;;  %v40_v15 = vld [vmem:[%s350_s2 + $0x48] sm:$0xff]  ;;  %v41_v17 = vld [vmem:[%s350_s2 + $0x50] sm:$0xff] }
   0x8   :  { %200 = vmatpush3.bf16.msra.mxu0 %v199_v7  ;;  %v208_v16 = vpack.c.bf16 %v40_v15, %v39_v14  ;;  %v42_v18 = vld [vmem:[%s350_s2 + $0x58] sm:$0xff]  ;;  %v18_v20 = vld [vmem:[%s348_s0] sm:$0x3]  ;;  %v140_v21 = vld [vmem:[%s348_s0 + $0x2] sm:$0x3] }
   0x9   :  { %201 = vmatprep.subr.bf16.mxu0 %v247_v3  ;;  %v211_v19 = vpack.c.bf16 %v42_v18, %v41_v17  ;;  %v43_v22 = vld [vmem:[%s350_s2 + $0x60] sm:$0xff]  ;;  %v44_v23 = vld [vmem:[%s350_s2 + $0x68] sm:$0xff]  ;;  %v21_v24 = vadd.f32 %v140_v21, %v18_v20  ;;  %v45_v27 = vld [vmem:[%s350_s2 + $0x70] sm:$0xff] }
   0xa   :  { %v214_v25 = vpack.c.bf16 %v44_v23, %v43_v22  ;;  %v141_v26 = vld [vmem:[%s349_s1] ss:$0 sm:$0xff]  ;;  %v46_v28 = vld [vmem:[%s350_s2 + $0x78] sm:$0xff]  ;;  %s250_s1 = smov [#allocation2]  }
   0xb   :  { %v29_v29 = vadd.f32 %v141_v26, %v21_v24  ;;  %v217_v30 = vpack.c.bf16 %v46_v28, %v45_v27  ;;  %v142_v32 = vld [vmem:[%s351_s3] ss:$0 sm:$0xff]  ;;  %s132_s28 = sshll.u32 %s250_s1, 4  ;;  %s133_s28 = int_to_ptr.vmem [resolvable:$true] %s132_s28 }
   0xc   :  { %203 = vmatpush3.bf16.msra.mxu0 %v202_v10  ;;  %s223_s2 = scalar_lea.vmem %s133_s28, 32  ;;  %p228_p1 = scmp.lt.s32.totalorder %s133_s28, %s133_s28 }
   0xd   :  { %204 = vmatprep.subr.bf16.mxu0 %v247_v3  ;;  %v30_v31 = vmax.f32 %v29_v29, 0.0  ;;  %p224_p0 = scmp.ne.s32.totalorder %s133_s28, %s223_s2  ;;  %p229_p2 = scmp.lt.s32.totalorder %s223_s2, %s223_s2 }
   0xf   :  { %p230_p3 = por %p229_p2, %p228_p1 }
  0x10   :  { %206 = vmatpush3.bf16.msra.mxu0 %v205_v13 }
  0x11   :  { %207 = vmatprep.subr.bf16.mxu0 %v247_v3  ;;  %p231_p4 = pnand %p230_p3, %p224_p0 }
  0x14   :  { %209 = vmatpush3.bf16.msra.mxu0 %v208_v16 }
  0x15   :  { %210 = vmatprep.subr.bf16.mxu0 %v247_v3 }
  0x18   :  { %212 = vmatpush3.bf16.msra.mxu0 %v211_v19 }
  0x19   :  { %213 = vmatprep.subr.bf16.mxu0 %v247_v3 }
  0x1c   :  { %215 = vmatpush3.bf16.msra.mxu0 %v214_v25 }
  0x1d   :  { %216 = vmatprep.subr.bf16.mxu0 %v247_v3 }
  0x20   :  { %218 = vmatpush3.bf16.msra.mxu0 %v217_v30 }
  0x23   :  { %193 = vmatmul.mubr.f32.vlgmr.msra.gmra.mrb[0].mxu0 %v30_v31 }
  0xf6   :  { %v120_v33 = vpop.f32.mrb[0].mxu0 }
  0xf7   :  { %v121_v34 = vadd.f32 %v142_v32, %v120_v33  ;;  %v194_v35 = vpop.f32.mrb[1].mxu0 }
  0xf9   :  { %125 = vst.msk [vmem:[#allocation2] sm:$0x3] %vm124_vm1, %v121_v34 }
  0xfa   :  { %234 = shalt.err (!%p231_p4)
}
  0xfb   :  { %s235_s5 = scalar_lea.hbm %s352_s4, 32 }
  0xfc   :  { %p236_p5 = scmp.ne.s32.totalorder %s352_s4, %s235_s5  ;;  %p239_p6 = scmp.lt.u32.totalorder %s235_s5, %s352_s4 }
  0xfe   :  { %p241_p7 = pnand %p239_p6, %p236_p5 }
 0x100   :  { %244 = shalt.err (!%p241_p7)
}
 0x101   :  { %135 = dma.vmem_to_hbm [thread:$0]  %s133_s28, 32, %s352_s4, [#allocation3]  }
 0x102   :  { %245 = dma.done.wait [#allocation3], 32  }
 0x103   :  { %246 = vsyncadd [#allocation3], 4294967264 }
 0x104   :  { %139 = vsyncpa [#allocation3], 1 }

// kernel: improved_cnn_forward.3
= control target key start
LH: loop header
LB: loop body
LE: loop exit
PB: predicated region body
PF: predicated region fallthrough
CT: control target
= control target key end

     0   :  { %12 = vsyncpa [#allocation4], 0  ;;  %s8951_s0 = inlined_call_operand.vmem [shape: f32[2,1024,8], index: 0, kind: input, shape index: {}]   ;;  %s8952_s1 = inlined_call_operand.hbm [shape: f32[8,128], index: 1, kind: input, shape index: {}]   ;;  %s8953_s2 = inlined_call_operand.vmem [shape: f32[1,128], index: 2, kind: input, shape index: {}]   ;;  %s8954_s3 = inlined_call_operand.vmem [shape: f32[1,128], index: 3, kind: input, shape index: {}]   ;;  %s8955_s4 = inlined_call_operand.hbm [shape: bf16[640,256], index: 4, kind: input, shape index: {}]   ;;  %s8956_s5 = inlined_call_operand.vmem [shape: f32[1,256], index: 5, kind: input, shape index: {}]   ;;  %s8957_s6 = inlined_call_operand.vmem [shape: f32[1,256], index: 6, kind: input, shape index: {}]   ;;  %s8958_s7 = inlined_call_operand.vmem [shape: bf16[2,256,256], index: 7, kind: output, shape index: {}]  }
   0x1   :  { %13 = vsyncpa [#allocation6], 0  ;;  %s6534_s24 = smov 0  }
   0x2 LB: > { %s6540_s25 = sadd.s32 4294967295, %s6486_s24   ;;  %p5365_p0 = scmp.ge.s32.totalorder %s6486_s24, 1  ;;  %s6486_s24 = sphi %s6534_s24, %s19_s24  }
   0x3   : > { %p202_p1 = scmp.lt.s32.totalorder %s6486_s24, 3  ;;  %p8959_p2 = scmp.eq.s32.totalorder %s6540_s25, 0 }
   0x4   : > { %s6488_s26 = smov [#allocation3]   ;;  %s6489_s29 = smov [#allocation5]  }
   0x5   : > { %s215_s27 = sshll.u32 %s6488_s26, 4  ;;  %p6545_p3 = pnand %p5365_p0, %p202_p1  ;;  %s216_s27 = int_to_ptr.vmem [resolvable:$true] %s215_s27 }
   0x6   : > { %s231_s30 = sshll.u32 %s6489_s29, 4  ;;  %s6416_s11 = scalar_lea.hbm %s8952_s1, 128  ;;  %s6557_s30 = int_to_ptr.vmem [resolvable:$true] %s231_s30 }
   0x7   : > { %s9103_s28 = scalar_select %p6545_p3, 1, 0 }
   0x8   : > { %p6267_p4 = pneg %p6545_p3  ;;  %p6417_p6 = scmp.ne.s32.totalorder %s8952_s1, %s6416_s11 }
   0x9   : > { %p6423_p10 = scmp.lt.u32.totalorder %s6416_s11, %s8952_s1 }
   0xa   : > { %p6553_p5 = pnand %p8959_p2, %p6267_p4 }
   0xc   : > { %p6418_p7 = pneg %p6553_p5 }
   0xe   : > { %p6419_p8 = pnand %p6418_p7, %p6417_p6 }
  0x10   : > { %p6420_p9 = pneg %p6419_p8 }
  0x12   : > { %p6425_p11 = pnand %p6423_p10, %p6420_p9 }
  0x14   : > { %6428 = shalt.err (!%p6425_p11)
}
  0x15   : > { %s6429_s16 = scalar_lea.vmem %s216_s27, 128  ;;  %p6437_p1 = scmp.lt.s32.totalorder %s216_s27, %s216_s27 }
  0x16   : > { %p6430_p12 = scmp.ne.s32.totalorder %s216_s27, %s6429_s16  ;;  %p6438_p4 = scmp.lt.s32.totalorder %s6429_s16, %s6429_s16 }
  0x18   : > { %p6432_p13 = pnand %p6430_p12, %p6418_p7  ;;  %p6439_p2 = por %p6438_p4, %p6437_p1 }
  0x1a   : > { %p6433_p0 = pneg %p6432_p13 }
  0x1c   : > { %p6440_p3 = pnand %p6439_p2, %p6433_p0 }
  0x1e   : > { %6443 = shalt.err (!%p6440_p3)
}
  0x1f   : > { %6270 = dma.hbm_to_vmem [thread:$0]  (!%p6553_p5), %s8952_s1, 128, %s216_s27, [#allocation4]  }
  0x20   : > { %s6444_s21 = scalar_lea.hbm %s8955_s4, 10240 }
  0x21   : > { %p6445_p6 = scmp.ne.s32.totalorder %s8955_s4, %s6444_s21  ;;  %p6451_p3 = scmp.lt.u32.totalorder %s6444_s21, %s8955_s4 }
  0x23   : > { %p6447_p8 = pnand %p6445_p6, %p6418_p7 }
  0x25   : > { %p6448_p2 = pneg %p6447_p8 }
  0x27   : > { %p6453_p9 = pnand %p6451_p3, %p6448_p2 }
  0x29   : > { %6456 = shalt.err (!%p6453_p9)
}
  0x2a   : > { %s6457_s27 = scalar_lea.vmem %s6557_s30, 10240  ;;  %p6465_p13 = scmp.lt.s32.totalorder %s6557_s30, %s6557_s30 }
  0x2b   : > { %p6458_p10 = scmp.ne.s32.totalorder %s6557_s30, %s6457_s27  ;;  %p6466_p0 = scmp.lt.s32.totalorder %s6457_s27, %s6457_s27 }
  0x2d   : > { %p6460_p11 = pnand %p6458_p10, %p6418_p7  ;;  %p6467_p1 = por %p6466_p0, %p6465_p13 }
  0x2f   : > { %p6461_p12 = pneg %p6460_p11 }
  0x31   : > { %p6468_p4 = pnand %p6467_p1, %p6461_p12 }
  0x33   : > { %6471 = shalt.err (!%p6468_p4)
}
  0x34   : > { %s6490_s9 = smov 128   ;;  %s6491_s10 = smov 8  }
  0x35   : > { %6273 = dma.hbm_to_vmem [thread:$0]  (!%p6553_p5), %s8955_s4, 10240, %s6557_s30, [#allocation6], %s6490_s9, %s6490_s9, %s6491_s10  }
  0x36   : > { %p9105_p6 = scmp.ne.s32.totalorder %s9103_s28, 0 }
  0x38   : > { %261 = sbr.rel (%p9105_p6) target bundleno = 1051 (0x41b), region = 48 }
  0x3f   : > { %p9106_p7 = scmp.eq.s32.totalorder %s6540_s25, 0 }
  0x41   : > { %6477 = dma.done.wait (%p9106_p7), [#allocation4], 128   ;;  %p9107_p8 = pmov %p9106_p7 }
  0x42   : > { %p9108_p2 = pmov %p9106_p7 }
  0x43   : > { %6479 = vsyncadd (%p9107_p8), [#allocation4], 4294967168 }
  0x44   : > { %6481 = dma.done.wait (%p9108_p2), [#allocation6], 10240   ;;  %p9109_p3 = pmov %p9108_p2 }
  0x45   : > { %p297_p9 = scmp.lt.s32.totalorder %s6540_s25, 1  ;;  %v436_v0 = vld [vmem:[#allocation3] sm:$0xff]  ;;  %vm437_vm0 = vcmask 64512   ;;  %vm6492_vm3 = vmmov 1  }
  0x46   : > { %6483 = vsyncadd (%p9109_p3), [#allocation6], 4294957056  ;;  %5807 = vmatprep.subr.mxu0 %v436_v0  ;;  %6001 = vmatprep.subr.mxu1 %v436_v0 }
  0x47   : > { %s9487_s25 = smov (!%p297_p9, %s6540_s25), 1  ;;  %5808 = vmatpush3.msra.mxu0 %v436_v0  ;;  %6002 = vmatpush3.msra.mxu1 %v436_v0 }
  0x48   : > { %s5620_s28 = sshll.u32 %s9487_s25, 10  ;;  %s5621_s27 = sshll.u32 %s9487_s25, 8 }
  0x49   : > { %s6624_s13 = scalar_lea.vmem %s8951_s0, %s5620_s28  ;;  %s8675_s11 = scalar_lea.vmem %s8958_s7, %s5621_s27 }
  0x4a   : > { %v308_v1 = vld [vmem:[%s6624_s13] sm:$0xff]  ;;  %v309_v3 = vld [vmem:[%s6624_s13 + $0x8] sm:$0xff]  ;;  %v310_v5 = vld [vmem:[%s6624_s13 + $0x10] sm:$0xff] }
  0x4b   : > { %v372_v2 = vld [vmem:[%s6624_s13 + $0x200] sm:$0xff]  ;;  %v373_v4 = vld [vmem:[%s6624_s13 + $0x208] sm:$0xff]  ;;  %v374_v6 = vld [vmem:[%s6624_s13 + $0x210] sm:$0xff]  ;;  %5809 = vmatprep.mubr.msk.f32.mxu0 %vm437_vm0, %v308_v1 }
  0x4c   : > { %5905 = vmatprep.mubr.msk.f32.mxu1 %vm437_vm0, %v372_v2  ;;  %5810 = vmatmul.mubr.msk.f32.vlgmr.msra.gmra.mrb[0].mxu0 %vm437_vm0, %v309_v3  ;;  %v311_v7 = vld [vmem:[%s6624_s13 + $0x18] sm:$0xff]  ;;  %v312_v9 = vld [vmem:[%s6624_s13 + $0x20] sm:$0xff]  ;;  %v313_v11 = vld [vmem:[%s6624_s13 + $0x28] sm:$0xff] }
  0x4d   : > { %5906 = vmatmul.mubr.msk.f32.vlgmr.msra.gmra.mrb[0].mxu1 %vm437_vm0, %v373_v4  ;;  %5812 = vmatprep.mubr.msk.f32.mxu0 %vm437_vm0, %v310_v5  ;;  %v375_v8 = vld [vmem:[%s6624_s13 + $0x218] sm:$0xff]  ;;  %v376_v10 = vld [vmem:[%s6624_s13 + $0x220] sm:$0xff]  ;;  %v377_v12 = vld [vmem:[%s6624_s13 + $0x228] sm:$0xff] }
  0x4e   : > { %5908 = vmatprep.mubr.msk.f32.mxu1 %vm437_vm0, %v374_v6  ;;  %v314_v13 = vld [vmem:[%s6624_s13 + $0x30] sm:$0xff]  ;;  %v315_v15 = vld [vmem:[%s6624_s13 + $0x38] sm:$0xff]  ;;  %v316_v17 = vld [vmem:[%s6624_s13 + $0x40] sm:$0xff] }
  0x4f   : > { %v378_v14 = vld [vmem:[%s6624_s13 + $0x230] sm:$0xff]  ;;  %v379_v16 = vld [vmem:[%s6624_s13 + $0x238] sm:$0xff]  ;;  %v380_v18 = vld [vmem:[%s6624_s13 + $0x240] sm:$0xff] }
  0x50   : > { %5813 = vmatmul.mubr.msk.f32.gmra.mrb[2].mxu0 %vm437_vm0, %v311_v7  ;;  %v317_v19 = vld [vmem:[%s6624_s13 + $0x48] sm:$0xff]  ;;  %v318_v21 = vld [vmem:[%s6624_s13 + $0x50] sm:$0xff]  ;;  %v319_v23 = vld [vmem:[%s6624_s13 + $0x58] sm:$0xff] }
  0x51   : > { %5909 = vmatmul.mubr.msk.f32.gmra.mrb[2].mxu1 %vm437_vm0, %v375_v8  ;;  %5815 = vmatprep.mubr.msk.f32.mxu0 %vm437_vm0, %v312_v9  ;;  %v381_v20 = vld [vmem:[%s6624_s13 + $0x248] sm:$0xff]  ;;  %v382_v22 = vld [vmem:[%s6624_s13 + $0x250] sm:$0xff]  ;;  %v383_v24 = vld [vmem:[%s6624_s13 + $0x258] sm:$0xff] }
  0x52   : > { %5911 = vmatprep.mubr.msk.f32.mxu1 %vm437_vm0, %v376_v10  ;;  %v320_v25 = vld [vmem:[%s6624_s13 + $0x60] sm:$0xff]  ;;  %v321_v27 = vld [vmem:[%s6624_s13 + $0x68] sm:$0xff]  ;;  %v322_v29 = vld [vmem:[%s6624_s13 + $0x70] sm:$0xff] }
  0x53   : > { %v384_v26 = vld [vmem:[%s6624_s13 + $0x260] sm:$0xff]  ;;  %v385_v28 = vld [vmem:[%s6624_s13 + $0x268] sm:$0xff]  ;;  %v386_v30 = vld [vmem:[%s6624_s13 + $0x270] sm:$0xff] }
  0x54   : > { %5816 = vmatmul.mubr.msk.f32.gmra.mrb[4].mxu0 %vm437_vm0, %v313_v11  ;;  %v323_v31 = vld [vmem:[%s6624_s13 + $0x78] sm:$0xff]  ;;  %v324_v33 = vld [vmem:[%s6624_s13 + $0x80] sm:$0xff]  ;;  %v325_v35 = vld [vmem:[%s6624_s13 + $0x88] sm:$0xff] }
  0x55   : > { %5912 = vmatmul.mubr.msk.f32.gmra.mrb[4].mxu1 %vm437_vm0, %v377_v12  ;;  %5818 = vmatprep.mubr.msk.f32.mxu0 %vm437_vm0, %v314_v13  ;;  %v387_v32 = vld [vmem:[%s6624_s13 + $0x278] sm:$0xff]  ;;  %v388_v34 = vld [vmem:[%s6624_s13 + $0x280] sm:$0xff]  ;;  %v389_v36 = vld [vmem:[%s6624_s13 + $0x288] sm:$0xff] }
  0x56   : > { %5914 = vmatprep.mubr.msk.f32.mxu1 %vm437_vm0, %v378_v14  ;;  %v326_v37 = vld [vmem:[%s6624_s13 + $0x90] sm:$0xff]  ;;  %v327_v39 = vld [vmem:[%s6624_s13 + $0x98] sm:$0xff]  ;;  %v328_v41 = vld [vmem:[%s6624_s13 + $0xa0] sm:$0xff] }
  0x57   : > { %v390_v38 = vld [vmem:[%s6624_s13 + $0x290] sm:$0xff]  ;;  %v391_v40 = vld [vmem:[%s6624_s13 + $0x298] sm:$0xff]  ;;  %v392_v42 = vld [vmem:[%s6624_s13 + $0x2a0] sm:$0xff] }
  0x58   : > { %5819 = vmatmul.mubr.msk.f32.gmra.mrb[6].mxu0 %vm437_vm0, %v315_v15  ;;  %v329_v43 = vld [vmem:[%s6624_s13 + $0xa8] sm:$0xff]  ;;  %v330_v45 = vld [vmem:[%s6624_s13 + $0xb0] sm:$0xff]  ;;  %v331_v47 = vld [vmem:[%s6624_s13 + $0xb8] sm:$0xff] }
  0x59   : > { %5915 = vmatmul.mubr.msk.f32.gmra.mrb[6].mxu1 %vm437_vm0, %v379_v16  ;;  %5821 = vmatprep.mubr.msk.f32.mxu0 %vm437_vm0, %v316_v17  ;;  %v393_v44 = vld [vmem:[%s6624_s13 + $0x2a8] sm:$0xff]  ;;  %v394_v46 = vld [vmem:[%s6624_s13 + $0x2b0] sm:$0xff]  ;;  %v395_v48 = vld [vmem:[%s6624_s13 + $0x2b8] sm:$0xff] }
  0x5a   : > { %5917 = vmatprep.mubr.msk.f32.mxu1 %vm437_vm0, %v380_v18  ;;  %v332_v49 = vld [vmem:[%s6624_s13 + $0xc0] sm:$0xff]  ;;  %v333_v51 = vld [vmem:[%s6624_s13 + $0xc8] sm:$0xff]  ;;  %v334_v53 = vld [vmem:[%s6624_s13 + $0xd0] sm:$0xff] }
  0x5b   : > { %v396_v50 = vld [vmem:[%s6624_s13 + $0x2c0] sm:$0xff]  ;;  %v397_v52 = vld [vmem:[%s6624_s13 + $0x2c8] sm:$0xff]  ;;  %v398_v54 = vld [vmem:[%s6624_s13 + $0x2d0] sm:$0xff] }
  0x5c   : > { %5822 = vmatmul.mubr.msk.f32.gmra.mrb[8].mxu0 %vm437_vm0, %v317_v19  ;;  %v335_v55 = vld [vmem:[%s6624_s13 + $0xd8] sm:$0xff]  ;;  %v336_v57 = vld [vmem:[%s6624_s13 + $0xe0] sm:$0xff]  ;;  %v337_v59 = vld [vmem:[%s6624_s13 + $0xe8] sm:$0xff] }
  0x5d   : > { %5918 = vmatmul.mubr.msk.f32.gmra.mrb[8].mxu1 %vm437_vm0, %v381_v20  ;;  %5824 = vmatprep.mubr.msk.f32.mxu0 %vm437_vm0, %v318_v21  ;;  %v399_v56 = vld [vmem:[%s6624_s13 + $0x2d8] sm:$0xff]  ;;  %v400_v58 = vld [vmem:[%s6624_s13 + $0x2e0] sm:$0xff]  ;;  %v401_v60 = vld [vmem:[%s6624_s13 + $0x2e8] sm:$0xff] }
  0x5e   : > { %5920 = vmatprep.mubr.msk.f32.mxu1 %vm437_vm0, %v382_v22  ;;  %v338_v61 = vld [vmem:[%s6624_s13 + $0xf0] sm:$0xff]  ;;  %v339_v63 = vld [vmem:[%s6624_s13 + $0xf8] sm:$0xff]  ;;  %v340_v1 = vld [vmem:[%s6624_s13 + $0x100] sm:$0xff] }
  0x5f   : > { %v402_v62 = vld [vmem:[%s6624_s13 + $0x2f0] sm:$0xff]  ;;  %v403_v0 = vld [vmem:[%s6624_s13 + $0x2f8] sm:$0xff]  ;;  %v404_v2 = vld [vmem:[%s6624_s13 + $0x300] sm:$0xff] }
  0x60   : > { %5825 = vmatmul.mubr.msk.f32.gmra.mrb[10].mxu0 %vm437_vm0, %v319_v23  ;;  %v341_v3 = vld [vmem:[%s6624_s13 + $0x108] sm:$0xff]  ;;  %v342_v5 = vld [vmem:[%s6624_s13 + $0x110] sm:$0xff]  ;;  %v343_v7 = vld [vmem:[%s6624_s13 + $0x118] sm:$0xff] }
  0x61   : > { %5921 = vmatmul.mubr.msk.f32.gmra.mrb[10].mxu1 %vm437_vm0, %v383_v24  ;;  %5827 = vmatprep.mubr.msk.f32.mxu0 %vm437_vm0, %v320_v25  ;;  %v405_v4 = vld [vmem:[%s6624_s13 + $0x308] sm:$0xff]  ;;  %v406_v6 = vld [vmem:[%s6624_s13 + $0x310] sm:$0xff]  ;;  %v407_v8 = vld [vmem:[%s6624_s13 + $0x318] sm:$0xff] }
  0x62   : > { %5923 = vmatprep.mubr.msk.f32.mxu1 %vm437_vm0, %v384_v26  ;;  %v344_v9 = vld [vmem:[%s6624_s13 + $0x120] sm:$0xff]  ;;  %v345_v11 = vld [vmem:[%s6624_s13 + $0x128] sm:$0xff]  ;;  %v346_v13 = vld [vmem:[%s6624_s13 + $0x130] sm:$0xff] }
  0x63   : > { %v408_v10 = vld [vmem:[%s6624_s13 + $0x320] sm:$0xff]  ;;  %v409_v12 = vld [vmem:[%s6624_s13 + $0x328] sm:$0xff]  ;;  %v410_v14 = vld [vmem:[%s6624_s13 + $0x330] sm:$0xff] }
  0x64   : > { %5828 = vmatmul.mubr.msk.f32.gmra.mrb[12].mxu0 %vm437_vm0, %v321_v27  ;;  %v347_v15 = vld [vmem:[%s6624_s13 + $0x138] sm:$0xff]  ;;  %v348_v17 = vld [vmem:[%s6624_s13 + $0x140] sm:$0xff]  ;;  %v349_v19 = vld [vmem:[%s6624_s13 + $0x148] sm:$0xff] }
  0x65   : > { %5924 = vmatmul.mubr.msk.f32.gmra.mrb[12].mxu1 %vm437_vm0, %v385_v28  ;;  %5830 = vmatprep.mubr.msk.f32.mxu0 %vm437_vm0, %v322_v29  ;;  %v411_v16 = vld [vmem:[%s6624_s13 + $0x338] sm:$0xff]  ;;  %v412_v18 = vld [vmem:[%s6624_s13 + $0x340] sm:$0xff]  ;;  %v413_v20 = vld [vmem:[%s6624_s13 + $0x348] sm:$0xff] }
  0x66   : > { %5926 = vmatprep.mubr.msk.f32.mxu1 %vm437_vm0, %v386_v30  ;;  %v350_v21 = vld [vmem:[%s6624_s13 + $0x150] sm:$0xff]  ;;  %v351_v23 = vld [vmem:[%s6624_s13 + $0x158] sm:$0xff]  ;;  %v352_v25 = vld [vmem:[%s6624_s13 + $0x160] sm:$0xff] }
  0x67   : > { %v414_v22 = vld [vmem:[%s6624_s13 + $0x350] sm:$0xff]  ;;  %v415_v24 = vld [vmem:[%s6624_s13 + $0x358] sm:$0xff]  ;;  %v416_v26 = vld [vmem:[%s6624_s13 + $0x360] sm:$0xff] }
  0x68   : > { %5831 = vmatmul.mubr.msk.f32.gmra.mrb[14].mxu0 %vm437_vm0, %v323_v31  ;;  %v353_v27 = vld [vmem:[%s6624_s13 + $0x168] sm:$0xff]  ;;  %v354_v29 = vld [vmem:[%s6624_s13 + $0x170] sm:$0xff]  ;;  %v355_v31 = vld [vmem:[%s6624_s13 + $0x178] sm:$0xff] }
  0x69   : > { %5927 = vmatmul.mubr.msk.f32.gmra.mrb[14].mxu1 %vm437_vm0, %v387_v32  ;;  %5833 = vmatprep.mubr.msk.f32.mxu0 %vm437_vm0, %v324_v33  ;;  %v417_v28 = vld [vmem:[%s6624_s13 + $0x368] sm:$0xff]  ;;  %v418_v30 = vld [vmem:[%s6624_s13 + $0x370] sm:$0xff]  ;;  %v419_v32 = vld [vmem:[%s6624_s13 + $0x378] sm:$0xff] }
  0x6a   : > { %5929 = vmatprep.mubr.msk.f32.mxu1 %vm437_vm0, %v388_v34  ;;  %v356_v33 = vld [vmem:[%s6624_s13 + $0x180] sm:$0xff] }
  0x6b   : > { %v420_v34 = vld [vmem:[%s6624_s13 + $0x380] sm:$0xff] }
  0x6c   : > { %5834 = vmatmul.mubr.msk.f32.gmra.mrb[16].mxu0 %vm437_vm0, %v325_v35  ;;  %v357_v35 = vld [vmem:[%s6624_s13 + $0x188] sm:$0xff] }
  0x6d   : > { %5930 = vmatmul.mubr.msk.f32.gmra.mrb[16].mxu1 %vm437_vm0, %v389_v36  ;;  %5836 = vmatprep.mubr.msk.f32.mxu0 %vm437_vm0, %v326_v37  ;;  %v421_v36 = vld [vmem:[%s6624_s13 + $0x388] sm:$0xff]  ;;  %v358_v37 = vld [vmem:[%s6624_s13 + $0x190] sm:$0xff] }
  0x6e   : > { %5932 = vmatprep.mubr.msk.f32.mxu1 %vm437_vm0, %v390_v38  ;;  %v422_v38 = vld [vmem:[%s6624_s13 + $0x390] sm:$0xff] }
  0x70   : > { %5837 = vmatmul.mubr.msk.f32.gmra.mrb[18].mxu0 %vm437_vm0, %v327_v39  ;;  %v359_v39 = vld [vmem:[%s6624_s13 + $0x198] sm:$0xff] }
  0x71   : > { %5933 = vmatmul.mubr.msk.f32.gmra.mrb[18].mxu1 %vm437_vm0, %v391_v40  ;;  %5839 = vmatprep.mubr.msk.f32.mxu0 %vm437_vm0, %v328_v41  ;;  %v423_v40 = vld [vmem:[%s6624_s13 + $0x398] sm:$0xff]  ;;  %v6296_v41 = vld [vmem:[#allocation5 + $0x4] ss:$8 sps:$4 sm:$0xff]  }
  0x72   : > { %5935 = vmatprep.mubr.msk.f32.mxu1 %vm437_vm0, %v392_v42  ;;  %v360_v42 = vld [vmem:[%s6624_s13 + $0x1a0] sm:$0xff]  ;;  %3352 = vmatprep.subr.bf16.mxu1 %v6296_v41 }
  0x73   : > { %4011 = vmatprep.subr.bf16.mxu0 %v6296_v41 }
  0x74   : > { %5840 = vmatmul.mubr.msk.f32.gmra.mrb[20].mxu0 %vm437_vm0, %v329_v43  ;;  %v424_v43 = vld [vmem:[%s6624_s13 + $0x3a0] sm:$0xff] }
  0x75   : > { %5936 = vmatmul.mubr.msk.f32.gmra.mrb[20].mxu1 %vm437_vm0, %v393_v44  ;;  %5842 = vmatprep.mubr.msk.f32.mxu0 %vm437_vm0, %v330_v45  ;;  %v6294_v44 = vld [vmem:[#allocation5] ss:$8 sps:$4 sm:$0xff]  }
  0x76   : > { %5938 = vmatprep.mubr.msk.f32.mxu1 %vm437_vm0, %v394_v46  ;;  %v361_v45 = vld [vmem:[%s6624_s13 + $0x1a8] sm:$0xff]  ;;  %3353 = vmatpush1.bf16.msra.mxu1 %v6294_v44 }
  0x77   : > { %v425_v46 = vld [vmem:[%s6624_s13 + $0x3a8] sm:$0xff]  ;;  %4012 = vmatpush1.bf16.msra.mxu0 %v6294_v44 }
  0x78   : > { %5843 = vmatmul.mubr.msk.f32.gmra.mrb[22].mxu0 %vm437_vm0, %v331_v47  ;;  %v362_v47 = vld [vmem:[%s6624_s13 + $0x1b0] sm:$0xff] }
  0x79   : > { %5939 = vmatmul.mubr.msk.f32.gmra.mrb[22].mxu1 %vm437_vm0, %v395_v48  ;;  %5845 = vmatprep.mubr.msk.f32.mxu0 %vm437_vm0, %v332_v49  ;;  %v426_v48 = vld [vmem:[%s6624_s13 + $0x3b0] sm:$0xff]  ;;  %v363_v49 = vld [vmem:[%s6624_s13 + $0x1b8] sm:$0xff] }
  0x7a   : > { %5941 = vmatprep.mubr.msk.f32.mxu1 %vm437_vm0, %v396_v50  ;;  %v427_v50 = vld [vmem:[%s6624_s13 + $0x3b8] sm:$0xff] }
  0x7c   : > { %5846 = vmatmul.mubr.msk.f32.gmra.mrb[24].mxu0 %vm437_vm0, %v333_v51  ;;  %v6299_v51 = vld [vmem:[#allocation5 + $0x14] ss:$8 sps:$4 sm:$0xff]  }
  0x7d   : > { %5942 = vmatmul.mubr.msk.f32.gmra.mrb[24].mxu1 %vm437_vm0, %v397_v52  ;;  %5848 = vmatprep.mubr.msk.f32.mxu0 %vm437_vm0, %v334_v53  ;;  %v364_v52 = vld [vmem:[%s6624_s13 + $0x1c0] sm:$0xff] }
  0x7e   : > { %5944 = vmatprep.mubr.msk.f32.mxu1 %vm437_vm0, %v398_v54  ;;  %v428_v53 = vld [vmem:[%s6624_s13 + $0x3c0] sm:$0xff]  ;;  %3354 = vmatprep.subr.bf16.mxu1 %v6299_v51 }
  0x7f   : > { %v6297_v54 = vld [vmem:[#allocation5 + $0x10] ss:$8 sps:$4 sm:$0xff]   ;;  %4013 = vmatprep.subr.bf16.mxu0 %v6299_v51 }
  0x80   : > { %5849 = vmatmul.mubr.msk.f32.gmra.mrb[26].mxu0 %vm437_vm0, %v335_v55  ;;  %v365_v55 = vld [vmem:[%s6624_s13 + $0x1c8] sm:$0xff]  ;;  %3355 = vmatpush1.bf16.msra.mxu1 %v6297_v54 }
  0x81   : > { %5945 = vmatmul.mubr.msk.f32.gmra.mrb[26].mxu1 %vm437_vm0, %v399_v56  ;;  %5851 = vmatprep.mubr.msk.f32.mxu0 %vm437_vm0, %v336_v57  ;;  %v429_v56 = vld [vmem:[%s6624_s13 + $0x3c8] sm:$0xff]  ;;  %v366_v57 = vld [vmem:[%s6624_s13 + $0x1d0] sm:$0xff] }
  0x82   : > { %5947 = vmatprep.mubr.msk.f32.mxu1 %vm437_vm0, %v400_v58  ;;  %v430_v58 = vld [vmem:[%s6624_s13 + $0x3d0] sm:$0xff]  ;;  %4014 = vmatpush1.bf16.msra.mxu0 %v6297_v54 }
  0x84   : > { %5852 = vmatmul.mubr.msk.f32.gmra.mrb[28].mxu0 %vm437_vm0, %v337_v59  ;;  %v367_v59 = vld [vmem:[%s6624_s13 + $0x1d8] sm:$0xff] }
  0x85   : > { %5948 = vmatmul.mubr.msk.f32.gmra.mrb[28].mxu1 %vm437_vm0, %v401_v60  ;;  %5854 = vmatprep.mubr.msk.f32.mxu0 %vm437_vm0, %v338_v61  ;;  %v431_v60 = vld [vmem:[%s6624_s13 + $0x3d8] sm:$0xff]  ;;  %v6302_v61 = vld [vmem:[#allocation5 + $0x24] ss:$8 sps:$4 sm:$0xff]  }
  0x86   : > { %5950 = vmatprep.mubr.msk.f32.mxu1 %vm437_vm0, %v402_v62  ;;  %v368_v62 = vld [vmem:[%s6624_s13 + $0x1e0] sm:$0xff]  ;;  %3356 = vmatprep.subr.bf16.mxu1 %v6302_v61 }
  0x87   : > { %4015 = vmatprep.subr.bf16.mxu0 %v6302_v61 }
  0x88   : > { %5855 = vmatmul.mubr.msk.f32.gmra.mrb[30].mxu0 %vm437_vm0, %v339_v63  ;;  %v432_v63 = vld [vmem:[%s6624_s13 + $0x3e0] sm:$0xff] }
  0x89   : > { %5951 = vmatmul.mubr.msk.f32.gmra.mrb[30].mxu1 %vm437_vm0, %v403_v0  ;;  %5857 = vmatprep.mubr.msk.f32.mxu0 %vm437_vm0, %v340_v1  ;;  %v6300_v0 = vld [vmem:[#allocation5 + $0x20] ss:$8 sps:$4 sm:$0xff]  }
  0x8a   : > { %5953 = vmatprep.mubr.msk.f32.mxu1 %vm437_vm0, %v404_v2  ;;  %v369_v1 = vld [vmem:[%s6624_s13 + $0x1e8] sm:$0xff]  ;;  %3357 = vmatpush1.bf16.msra.mxu1 %v6300_v0 }
  0x8b   : > { %v433_v2 = vld [vmem:[%s6624_s13 + $0x3e8] sm:$0xff]  ;;  %4016 = vmatpush1.bf16.msra.mxu0 %v6300_v0 }
  0x8c   : > { %5858 = vmatmul.mubr.msk.f32.gmra.mrb[32].mxu0 %vm437_vm0, %v341_v3  ;;  %v370_v3 = vld [vmem:[%s6624_s13 + $0x1f0] sm:$0xff] }
  0x8d   : > { %5954 = vmatmul.mubr.msk.f32.gmra.mrb[32].mxu1 %vm437_vm0, %v405_v4  ;;  %5860 = vmatprep.mubr.msk.f32.mxu0 %vm437_vm0, %v342_v5  ;;  %v434_v4 = vld [vmem:[%s6624_s13 + $0x3f0] sm:$0xff]  ;;  %v371_v5 = vld [vmem:[%s6624_s13 + $0x1f8] sm:$0xff] }
  0x8e   : > { %5956 = vmatprep.mubr.msk.f32.mxu1 %vm437_vm0, %v406_v6  ;;  %v435_v6 = vld [vmem:[%s6624_s13 + $0x3f8] sm:$0xff] }
  0x90   : > { %5861 = vmatmul.mubr.msk.f32.gmra.mrb[34].mxu0 %vm437_vm0, %v343_v7  ;;  %v6303_v7 = vld [vmem:[#allocation5 + $0x30] ss:$8 sps:$4 sm:$0xff]  }
  0x91   : > { %5957 = vmatmul.mubr.msk.f32.gmra.mrb[34].mxu1 %vm437_vm0, %v407_v8  ;;  %5863 = vmatprep.mubr.msk.f32.mxu0 %vm437_vm0, %v344_v9  ;;  %v6305_v8 = vld [vmem:[#allocation5 + $0x34] ss:$8 sps:$4 sm:$0xff]   ;;  %v6306_v9 = vld [vmem:[#allocation5 + $0x40] ss:$8 sps:$4 sm:$0xff]  }
  0x92   : > { %5959 = vmatprep.mubr.msk.f32.mxu1 %vm437_vm0, %v408_v10  ;;  %3358 = vmatprep.subr.bf16.mxu1 %v6305_v8  ;;  %v6308_v10 = vld [vmem:[#allocation5 + $0x44] ss:$8 sps:$4 sm:$0xff]  }
  0x93   : > { %4017 = vmatprep.subr.bf16.mxu0 %v6305_v8  ;;  %3359 = vmatpush1.bf16.msra.mxu1 %v6303_v7 }
  0x94   : > { %5864 = vmatmul.mubr.msk.f32.gmra.mrb[36].mxu0 %vm437_vm0, %v345_v11  ;;  %3360 = vmatprep.subr.bf16.mxu1 %v6308_v10  ;;  %v6309_v11 = vld [vmem:[#allocation5 + $0x50] ss:$8 sps:$4 sm:$0xff]  }
  0x95   : > { %5960 = vmatmul.mubr.msk.f32.gmra.mrb[36].mxu1 %vm437_vm0, %v409_v12  ;;  %5866 = vmatprep.mubr.msk.f32.mxu0 %vm437_vm0, %v346_v13  ;;  %v6311_v12 = vld [vmem:[#allocation5 + $0x54] ss:$8 sps:$4 sm:$0xff]   ;;  %v6312_v13 = vld [vmem:[#allocation5 + $0x60] ss:$8 sps:$4 sm:$0xff]  }
  0x96   : > { %5962 = vmatprep.mubr.msk.f32.mxu1 %vm437_vm0, %v410_v14  ;;  %4018 = vmatpush1.bf16.msra.mxu0 %v6303_v7  ;;  %v6314_v14 = vld [vmem:[#allocation5 + $0x64] ss:$8 sps:$4 sm:$0xff]  }
  0x97   : > { %4019 = vmatprep.subr.bf16.mxu0 %v6308_v10  ;;  %3361 = vmatpush1.bf16.msra.mxu1 %v6306_v9 }
  0x98   : > { %5867 = vmatmul.mubr.msk.f32.gmra.mrb[38].mxu0 %vm437_vm0, %v347_v15  ;;  %3362 = vmatprep.subr.bf16.mxu1 %v6311_v12  ;;  %v1989_v15 = vlaneseq }
  0x99   : > { %5963 = vmatmul.mubr.msk.f32.gmra.mrb[38].mxu1 %vm437_vm0, %v411_v16  ;;  %5869 = vmatprep.mubr.msk.f32.mxu0 %vm437_vm0, %v348_v17  ;;  %v6315_v17 = vld [vmem:[#allocation5 + $0x70] ss:$8 sps:$4 sm:$0xff]  }
  0x9a   : > { %5965 = vmatprep.mubr.msk.f32.mxu1 %vm437_vm0, %v412_v18  ;;  %4020 = vmatpush1.bf16.msra.mxu0 %v6306_v9  ;;  %v6882_v16 = vshrl.u32 %v1989_v15, 7  ;;  %v6317_v18 = vld [vmem:[#allocation5 + $0x74] ss:$8 sps:$4 sm:$0xff]  }
  0x9b   : > { %4021 = vmatprep.subr.bf16.mxu0 %v6311_v12  ;;  %3363 = vmatpush1.bf16.msra.mxu1 %v6309_v11 }
  0x9c   : > { %5870 = vmatmul.mubr.msk.f32.gmra.mrb[40].mxu0 %vm437_vm0, %v349_v19  ;;  %3364 = vmatprep.subr.bf16.mxu1 %v6314_v14  ;;  %9110 = vst [vmem:[#allocation9_spill] sm:$0xff] %v6882_v16  ;;  %v6318_v19 = vld [vmem:[#allocation5 + $0x80] ss:$8 sps:$4 sm:$0xff]  }
  0x9d   : > { %5966 = vmatmul.mubr.msk.f32.gmra.mrb[40].mxu1 %vm437_vm0, %v413_v20  ;;  %5872 = vmatprep.mubr.msk.f32.mxu0 %vm437_vm0, %v350_v21  ;;  %v6320_v20 = vld [vmem:[#allocation5 + $0x84] ss:$8 sps:$4 sm:$0xff]   ;;  %v6321_v21 = vld [vmem:[#allocation5 + $0x90] ss:$8 sps:$4 sm:$0xff]  }
  0x9e   : > { %5968 = vmatprep.mubr.msk.f32.mxu1 %vm437_vm0, %v414_v22  ;;  %4022 = vmatpush1.bf16.msra.mxu0 %v6309_v11  ;;  %v6323_v22 = vld [vmem:[#allocation5 + $0x94] ss:$8 sps:$4 sm:$0xff]  }
  0x9f   : > { %4023 = vmatprep.subr.bf16.mxu0 %v6314_v14  ;;  %3365 = vmatpush1.bf16.msra.mxu1 %v6312_v13 }
  0xa0   : > { %5873 = vmatmul.mubr.msk.f32.gmra.mrb[42].mxu0 %vm437_vm0, %v351_v23  ;;  %3366 = vmatprep.subr.bf16.mxu1 %v6317_v18  ;;  %v6324_v23 = vld [vmem:[#allocation5 + $0xa0] ss:$8 sps:$4 sm:$0xff]  }
  0xa1   : > { %5969 = vmatmul.mubr.msk.f32.gmra.mrb[42].mxu1 %vm437_vm0, %v415_v24  ;;  %5875 = vmatprep.mubr.msk.f32.mxu0 %vm437_vm0, %v352_v25  ;;  %v6326_v24 = vld [vmem:[#allocation5 + $0xa4] ss:$8 sps:$4 sm:$0xff]   ;;  %v6327_v25 = vld [vmem:[#allocation5 + $0xb0] ss:$8 sps:$4 sm:$0xff]  }
  0xa2   : > { %5971 = vmatprep.mubr.msk.f32.mxu1 %vm437_vm0, %v416_v26  ;;  %4024 = vmatpush1.bf16.msra.mxu0 %v6312_v13  ;;  %v6329_v26 = vld [vmem:[#allocation5 + $0xb4] ss:$8 sps:$4 sm:$0xff]  }
  0xa3   : > { %4025 = vmatprep.subr.bf16.mxu0 %v6317_v18  ;;  %3367 = vmatpush1.bf16.msra.mxu1 %v6315_v17 }
  0xa4   : > { %5876 = vmatmul.mubr.msk.f32.gmra.mrb[44].mxu0 %vm437_vm0, %v353_v27  ;;  %3368 = vmatprep.subr.bf16.mxu1 %v6320_v20  ;;  %v6330_v27 = vld [vmem:[#allocation5 + $0xc0] ss:$8 sps:$4 sm:$0xff]  }
  0xa5   : > { %5972 = vmatmul.mubr.msk.f32.gmra.mrb[44].mxu1 %vm437_vm0, %v417_v28  ;;  %5878 = vmatprep.mubr.msk.f32.mxu0 %vm437_vm0, %v354_v29  ;;  %v6332_v28 = vld [vmem:[#allocation5 + $0xc4] ss:$8 sps:$4 sm:$0xff]   ;;  %v6333_v29 = vld [vmem:[#allocation5 + $0xd0] ss:$8 sps:$4 sm:$0xff]  }
  0xa6   : > { %5974 = vmatprep.mubr.msk.f32.mxu1 %vm437_vm0, %v418_v30  ;;  %4026 = vmatpush1.bf16.msra.mxu0 %v6315_v17  ;;  %v6335_v30 = vld [vmem:[#allocation5 + $0xd4] ss:$8 sps:$4 sm:$0xff]  }
  0xa7   : > { %4027 = vmatprep.subr.bf16.mxu0 %v6320_v20  ;;  %3369 = vmatpush1.bf16.msra.mxu1 %v6318_v19 }
  0xa8   : > { %5879 = vmatmul.mubr.msk.f32.gmra.mrb[46].mxu0 %vm437_vm0, %v355_v31  ;;  %3370 = vmatprep.subr.bf16.mxu1 %v6323_v22 }
  0xa9   : > { %5975 = vmatmul.mubr.msk.f32.gmra.mrb[46].mxu1 %vm437_vm0, %v419_v32  ;;  %5881 = vmatprep.mubr.msk.f32.mxu0 %vm437_vm0, %v356_v33 }
  0xaa   : > { %5977 = vmatprep.mubr.msk.f32.mxu1 %vm437_vm0, %v420_v34  ;;  %4028 = vmatpush1.bf16.msra.mxu0 %v6318_v19 }
  0xab   : > { %4029 = vmatprep.subr.bf16.mxu0 %v6323_v22  ;;  %3371 = vmatpush1.bf16.msra.mxu1 %v6321_v21 }
  0xac   : > { %5882 = vmatmul.mubr.msk.f32.gmra.mrb[48].mxu0 %vm437_vm0, %v357_v35  ;;  %3372 = vmatprep.subr.bf16.mxu1 %v6326_v24  ;;  %v6336_v35 = vld [vmem:[#allocation5 + $0xe0] ss:$8 sps:$4 sm:$0xff]  }
  0xad   : > { %5978 = vmatmul.mubr.msk.f32.gmra.mrb[48].mxu1 %vm437_vm0, %v421_v36  ;;  %5884 = vmatprep.mubr.msk.f32.mxu0 %vm437_vm0, %v358_v37  ;;  %v6338_v36 = vld [vmem:[#allocation5 + $0xe4] ss:$8 sps:$4 sm:$0xff]  }
  0xae   : > { %5980 = vmatprep.mubr.msk.f32.mxu1 %vm437_vm0, %v422_v38  ;;  %4030 = vmatpush1.bf16.msra.mxu0 %v6321_v21 }
  0xaf   : > { %4031 = vmatprep.subr.bf16.mxu0 %v6326_v24  ;;  %3373 = vmatpush1.bf16.msra.mxu1 %v6324_v23 }
  0xb0   : > { %5885 = vmatmul.mubr.msk.f32.gmra.mrb[50].mxu0 %vm437_vm0, %v359_v39  ;;  %3374 = vmatprep.subr.bf16.mxu1 %v6329_v26 }
  0xb1   : > { %5981 = vmatmul.mubr.msk.f32.gmra.mrb[50].mxu1 %vm437_vm0, %v423_v40  ;;  %5887 = vmatprep.mubr.msk.f32.mxu0 %vm437_vm0, %v360_v42 }
  0xb2   : > { %5983 = vmatprep.mubr.msk.f32.mxu1 %vm437_vm0, %v424_v43  ;;  %4032 = vmatpush1.bf16.msra.mxu0 %v6324_v23 }
  0xb3   : > { %4033 = vmatprep.subr.bf16.mxu0 %v6329_v26  ;;  %3375 = vmatpush1.bf16.msra.mxu1 %v6327_v25 }
  0xb4   : > { %5888 = vmatmul.mubr.msk.f32.gmra.mrb[52].mxu0 %vm437_vm0, %v361_v45  ;;  %3376 = vmatprep.subr.bf16.mxu1 %v6332_v28  ;;  %v6339_v45 = vld [vmem:[#allocation5 + $0xf0] ss:$8 sps:$4 sm:$0xff]  }
  0xb5   : > { %5984 = vmatmul.mubr.msk.f32.gmra.mrb[52].mxu1 %vm437_vm0, %v425_v46  ;;  %5890 = vmatprep.mubr.msk.f32.mxu0 %vm437_vm0, %v362_v47  ;;  %v6341_v46 = vld [vmem:[#allocation5 + $0xf4] ss:$8 sps:$4 sm:$0xff]   ;;  %v6344_v47 = vld [vmem:[#allocation5 + $0x104] ss:$8 sps:$4 sm:$0xff]  }
  0xb6   : > { %5986 = vmatprep.mubr.msk.f32.mxu1 %vm437_vm0, %v426_v48  ;;  %4034 = vmatpush1.bf16.msra.mxu0 %v6327_v25 }
  0xb7   : > { %4035 = vmatprep.subr.bf16.mxu0 %v6332_v28  ;;  %3377 = vmatpush1.bf16.msra.mxu1 %v6330_v27 }
  0xb8   : > { %5891 = vmatmul.mubr.msk.f32.gmra.mrb[54].mxu0 %vm437_vm0, %v363_v49  ;;  %3378 = vmatprep.subr.bf16.mxu1 %v6335_v30 }
  0xb9   : > { %5987 = vmatmul.mubr.msk.f32.gmra.mrb[54].mxu1 %vm437_vm0, %v427_v50  ;;  %5893 = vmatprep.mubr.msk.f32.mxu0 %vm437_vm0, %v364_v52  ;;  %v6887_v52 = vld [vmem:[%s8953_s2] ss:$0 sm:$0xff] }
  0xba   : > { %5989 = vmatprep.mubr.msk.f32.mxu1 %vm437_vm0, %v428_v53  ;;  %4036 = vmatpush1.bf16.msra.mxu0 %v6330_v27 }
  0xbb   : > { %4037 = vmatprep.subr.bf16.mxu0 %v6335_v30  ;;  %3379 = vmatpush1.bf16.msra.mxu1 %v6333_v29 }
  0xbc   : > { %5894 = vmatmul.mubr.msk.f32.gmra.mrb[56].mxu0 %vm437_vm0, %v365_v55  ;;  %3380 = vmatprep.subr.bf16.mxu1 %v6338_v36 }
  0xbd   : > { %5990 = vmatmul.mubr.msk.f32.gmra.mrb[56].mxu1 %vm437_vm0, %v429_v56  ;;  %5896 = vmatprep.mubr.msk.f32.mxu0 %vm437_vm0, %v366_v57 }
  0xbe   : > { %5992 = vmatprep.mubr.msk.f32.mxu1 %vm437_vm0, %v430_v58  ;;  %4038 = vmatpush1.bf16.msra.mxu0 %v6333_v29  ;;  %v6893_v58 = vld [vmem:[%s8954_s3] ss:$0 sm:$0xff] }
  0xbf   : > { %4039 = vmatprep.subr.bf16.mxu0 %v6338_v36  ;;  %3381 = vmatpush1.bf16.msra.mxu1 %v6336_v35 }
  0xc0   : > { %5897 = vmatmul.mubr.msk.f32.gmra.mrb[58].mxu0 %vm437_vm0, %v367_v59  ;;  %3382 = vmatprep.subr.bf16.mxu1 %v6341_v46 }
  0xc1   : > { %5993 = vmatmul.mubr.msk.f32.gmra.mrb[58].mxu1 %vm437_vm0, %v431_v60  ;;  %5899 = vmatprep.mubr.msk.f32.mxu0 %vm437_vm0, %v368_v62 }
  0xc2   : > { %5995 = vmatprep.mubr.msk.f32.mxu1 %vm437_vm0, %v432_v63  ;;  %4040 = vmatpush1.bf16.msra.mxu0 %v6336_v35 }
  0xc3   : > { %4041 = vmatprep.subr.bf16.mxu0 %v6341_v46  ;;  %3383 = vmatpush1.bf16.msra.mxu1 %v6339_v45 }
  0xc4   : > { %5900 = vmatmul.mubr.msk.f32.gmra.mrb[60].mxu0 %vm437_vm0, %v369_v1  ;;  %3545 = vmatprep.subr.bf16.mxu1 %v6344_v47 }
  0xc5   : > { %5996 = vmatmul.mubr.msk.f32.gmra.mrb[60].mxu1 %vm437_vm0, %v433_v2  ;;  %5902 = vmatprep.mubr.msk.f32.mxu0 %vm437_vm0, %v370_v3 }
  0xc6   : > { %5998 = vmatprep.mubr.msk.f32.mxu1 %vm437_vm0, %v434_v4  ;;  %4042 = vmatpush1.bf16.msra.mxu0 %v6339_v45 }
  0xc7   : > { %4204 = vmatprep.subr.bf16.mxu0 %v6344_v47 }
  0xc8   : > { %5903 = vmatmul.mubr.msk.f32.gmra.mrb[62].mxu0 %vm437_vm0, %v371_v5 }
  0xc9   : > { %5999 = vmatmul.mubr.msk.f32.gmra.mrb[62].mxu1 %vm437_vm0, %v435_v6 }
 0x11f   : > { %v5811_v31 = vpop.f32.mrb[0].mxu0 }
 0x120   : > { %v5907_v32 = vpop.f32.mrb[0].mxu1  ;;  %v888_v33 = vpop.f32.mrb[1].mxu0  ;;  %v1535_v55 = vmul.f32 %v5811_v31, %v6887_v52 }
 0x121   : > { %v1208_v34 = vpop.f32.mrb[1].mxu1  ;;  %v1599_v59 = vmul.f32 %v5907_v32, %v6887_v52  ;;  %v1534_v60 = vmul.f32 %v6887_v52, %v888_v33 }
 0x122   : > { %v1598_v61 = vmul.f32 %v6887_v52, %v1208_v34  ;;  %v6903_v4 = vadd.f32 %v6893_v58, %v1535_v55 }
 0x123   : > { %v5814_v37 = vpop.f32.mrb[2].mxu0  ;;  %v6908_v9 = vadd.f32 %v6893_v58, %v1599_v59  ;;  %v6911_v10 = vadd.f32 %v6893_v58, %v1534_v60 }
 0x124   : > { %v5910_v38 = vpop.f32.mrb[2].mxu1  ;;  %v898_v39 = vpop.f32.mrb[3].mxu0  ;;  %v1537_v62 = vmul.f32 %v5814_v37, %v6887_v52  ;;  %v6916_v13 = vadd.f32 %v6893_v58, %v1598_v61 }
 0x125   : > { %v1218_v40 = vpop.f32.mrb[3].mxu1  ;;  %v1601_v63 = vmul.f32 %v5910_v38, %v6887_v52  ;;  %v1536_v0 = vmul.f32 %v6887_v52, %v898_v39 }
 0x126   : > { %v1600_v1 = vmul.f32 %v6887_v52, %v1218_v40  ;;  %v6919_v14 = vadd.f32 %v6893_v58, %v1537_v62 }
 0x127   : > { %v5817_v41 = vpop.f32.mrb[4].mxu0  ;;  %v6922_v15 = vadd.f32 %v6893_v58, %v1601_v63  ;;  %v6925_v17 = vadd.f32 %v6893_v58, %v1536_v0 }
 0x128   : > { %v5913_v42 = vpop.f32.mrb[4].mxu1  ;;  %v908_v43 = vpop.f32.mrb[5].mxu0  ;;  %v1539_v5 = vmul.f32 %v5817_v41, %v6887_v52  ;;  %v6928_v18 = vadd.f32 %v6893_v58, %v1600_v1 }
 0x129   : > { %v1228_v44 = vpop.f32.mrb[5].mxu1  ;;  %v1603_v6 = vmul.f32 %v5913_v42, %v6887_v52  ;;  %v1538_v11 = vmul.f32 %v6887_v52, %v908_v43 }
 0x12a   : > { %v1602_v12 = vmul.f32 %v6887_v52, %v1228_v44  ;;  %v6932_v22 = vadd.f32 %v6893_v58, %v1539_v5 }
 0x12b   : > { %v5820_v48 = vpop.f32.mrb[6].mxu0  ;;  %v6935_v23 = vadd.f32 %v6893_v58, %v1603_v6  ;;  %v6940_v28 = vadd.f32 %v6893_v58, %v1538_v11 }
 0x12c   : > { %v5916_v49 = vpop.f32.mrb[6].mxu1  ;;  %v918_v50 = vpop.f32.mrb[7].mxu0  ;;  %v6943_v29 = vadd.f32 %v6893_v58, %v1602_v12  ;;  %v1541_v33 = vmul.f32 %v5820_v48, %v6887_v52 }
 0x12d   : > { %v1238_v51 = vpop.f32.mrb[7].mxu1  ;;  %v1605_v36 = vmul.f32 %v5916_v49, %v6887_v52  ;;  %v1540_v37 = vmul.f32 %v6887_v52, %v918_v50 }
 0x12e   : > { %v1604_v42 = vmul.f32 %v6887_v52, %v1238_v51  ;;  %v6962_v50 = vadd.f32 %v6893_v58, %v1541_v33 }
 0x12f   : > { %v5823_v53 = vpop.f32.mrb[8].mxu0  ;;  %v6971_v60 = vadd.f32 %v6893_v58, %v1540_v37 }
 0x130   : > { %v5919_v54 = vpop.f32.mrb[8].mxu1  ;;  %v928_v56 = vpop.f32.mrb[9].mxu0  ;;  %v1543_v43 = vmul.f32 %v5823_v53, %v6887_v52  ;;  %v6968_v53 = vadd.f32 %v6893_v58, %v1605_v36  ;;  %v6976_v63 = vadd.f32 %v6893_v58, %v1604_v42 }
 0x131   : > { %v1248_v57 = vpop.f32.mrb[9].mxu1  ;;  %v1607_v48 = vmul.f32 %v5919_v54, %v6887_v52  ;;  %v1542_v49 = vmul.f32 %v6887_v52, %v928_v56 }
 0x132   : > { %v1606_v55 = vmul.f32 %v6887_v52, %v1248_v57  ;;  %v6979_v57 = vadd.f32 %v6893_v58, %v1543_v43 }
 0x133   : > { %v5826_v2 = vpop.f32.mrb[10].mxu0  ;;  %v6984_v5 = vadd.f32 %v6893_v58, %v1607_v48  ;;  %v6987_v6 = vadd.f32 %v6893_v58, %v1542_v49 }
 0x134   : > { %v5922_v3 = vpop.f32.mrb[10].mxu1  ;;  %v938_v7 = vpop.f32.mrb[11].mxu0  ;;  %v1545_v59 = vmul.f32 %v5826_v2, %v6887_v52  ;;  %v6993_v12 = vadd.f32 %v6893_v58, %v1606_v55 }
 0x135   : > { %v1258_v8 = vpop.f32.mrb[11].mxu1  ;;  %v1609_v51 = vmul.f32 %v5922_v3, %v6887_v52  ;;  %v1544_v61 = vmul.f32 %v6887_v52, %v938_v7 }
 0x136   : > { %v1608_v54 = vmul.f32 %v6887_v52, %v1258_v8 }
 0x137   : > { %v5829_v19 = vpop.f32.mrb[12].mxu0  ;;  %v7004_v37 = vadd.f32 %v6893_v58, %v1544_v61 }
 0x138   : > { %v5925_v20 = vpop.f32.mrb[12].mxu1  ;;  %v948_v24 = vpop.f32.mrb[13].mxu0  ;;  %v1547_v0 = vmul.f32 %v5829_v19, %v6887_v52  ;;  %v6996_v19 = vadd.f32 %v6893_v58, %v1545_v59 }
 0x139   : > { %v1268_v25 = vpop.f32.mrb[13].mxu1  ;;  %v1611_v1 = vmul.f32 %v5925_v20, %v6887_v52  ;;  %v1546_v7 = vmul.f32 %v6887_v52, %v948_v24  ;;  %v6999_v20 = vadd.f32 %v6893_v58, %v1609_v51  ;;  %v7007_v24 = vadd.f32 %v6893_v58, %v1608_v54 }
 0x13a   : > { %v1610_v8 = vmul.f32 %v6887_v52, %v1268_v25  ;;  %v7012_v49 = vadd.f32 %v6893_v58, %v1547_v0 }
 0x13b   : > { %v5832_v38 = vpop.f32.mrb[14].mxu0  ;;  %v7015_v55 = vadd.f32 %v6893_v58, %v1611_v1  ;;  %v7020_v54 = vadd.f32 %v6893_v58, %v1546_v7 }
 0x13c   : > { %v5928_v39 = vpop.f32.mrb[14].mxu1  ;;  %v958_v44 = vpop.f32.mrb[15].mxu0  ;;  %v7023_v33 = vadd.f32 %v6893_v58, %v1610_v8  ;;  %v1549_v1 = vmul.f32 %v5832_v38, %v6887_v52 }
 0x13d   : > { %v1278_v45 = vpop.f32.mrb[15].mxu1  ;;  %v1613_v36 = vmul.f32 %v5928_v39, %v6887_v52  ;;  %v1548_v7 = vmul.f32 %v6887_v52, %v958_v44 }
 0x13e   : > { %v1612_v0 = vmul.f32 %v6887_v52, %v1278_v45  ;;  %v7042_v40 = vadd.f32 %v6893_v58, %v1549_v1 }
 0x13f   : > { %v5835_v56 = vpop.f32.mrb[16].mxu0  ;;  %v7051_v11 = vadd.f32 %v6893_v58, %v1548_v7 }
 0x140   : > { %v5931_v62 = vpop.f32.mrb[16].mxu1  ;;  %v968_v2 = vpop.f32.mrb[17].mxu0  ;;  %v1551_v43 = vmul.f32 %v5835_v56, %v6887_v52  ;;  %v7048_v56 = vadd.f32 %v6893_v58, %v1613_v36  ;;  %v7056_v1 = vadd.f32 %v6893_v58, %v1612_v0 }
 0x141   : > { %v1288_v3 = vpop.f32.mrb[17].mxu1  ;;  %v1615_v39 = vmul.f32 %v5931_v62, %v6887_v52  ;;  %v1550_v44 = vmul.f32 %v6887_v52, %v968_v2 }
 0x142   : > { %v1614_v8 = vmul.f32 %v6887_v52, %v1288_v3  ;;  %v7059_v3 = vadd.f32 %v6893_v58, %v1551_v43 }
 0x143   : > { %v5838_v25 = vpop.f32.mrb[18].mxu0  ;;  %v7064_v7 = vadd.f32 %v6893_v58, %v1615_v39 }
 0x144   : > { %v5934_v42 = vpop.f32.mrb[18].mxu1  ;;  %v978_v59 = vpop.f32.mrb[19].mxu0  ;;  %v1553_v48 = vmul.f32 %v5838_v25, %v6887_v52  ;;  %v7073_v43 = vadd.f32 %v6893_v58, %v1614_v8 }
 0x145   : > { %v1298_v51 = vpop.f32.mrb[19].mxu1  ;;  %v1617_v45 = vmul.f32 %v5934_v42, %v6887_v52  ;;  %v1552_v61 = vmul.f32 %v6887_v52, %v978_v59  ;;  %v7067_v59 = vadd.f32 %v6893_v58, %v1550_v44 }
 0x146   : > { %v1616_v62 = vmul.f32 %v6887_v52, %v1298_v51 }
 0x147   : > { %v5841_v47 = vpop.f32.mrb[20].mxu0  ;;  %9111 = vst [vmem:[#allocation10_spill] sm:$0xff] %v7067_v59  ;;  %v7084_v31 = vadd.f32 %v6893_v58, %v1552_v61 }
 0x148   : > { %v5937_v46 = vpop.f32.mrb[20].mxu1  ;;  %v988_v41 = vpop.f32.mrb[21].mxu0  ;;  %v1555_v25 = vmul.f32 %v5841_v47, %v6887_v52  ;;  %v7076_v47 = vadd.f32 %v6893_v58, %v1553_v48 }
 0x149   : > { %v1308_v38 = vpop.f32.mrb[21].mxu1  ;;  %v1619_v36 = vmul.f32 %v5937_v46, %v6887_v52  ;;  %v1554_v51 = vmul.f32 %v6887_v52, %v988_v41  ;;  %v7079_v46 = vadd.f32 %v6893_v58, %v1617_v45  ;;  %v7087_v41 = vadd.f32 %v6893_v58, %v1616_v62 }
 0x14a   : > { %v1618_v0 = vmul.f32 %v6887_v52, %v1308_v38  ;;  %v7092_v30 = vadd.f32 %v6893_v58, %v1555_v25 }
 0x14b   : > { %v5844_v2 = vpop.f32.mrb[22].mxu0  ;;  %9112 = vst [vmem:[#allocation11_spill] sm:$0xff] %v7079_v46  ;;  %9113 = vst [vmem:[#allocation12_spill] sm:$0xff] %v7087_v41  ;;  %v7095_v45 = vadd.f32 %v6893_v58, %v1619_v36  ;;  %v7100_v62 = vadd.f32 %v6893_v58, %v1554_v51 }
 0x14c   : > { %v5940_v35 = vpop.f32.mrb[22].mxu1  ;;  %v998_v42 = vpop.f32.mrb[23].mxu0  ;;  %9114 = vst [vmem:[#allocation13_spill] sm:$0xff] %v7092_v30  ;;  %v7103_v26 = vadd.f32 %v6893_v58, %v1618_v0  ;;  %v1557_v36 = vmul.f32 %v5844_v2, %v6887_v52 }
 0x14d   : > { %v1318_v34 = vpop.f32.mrb[23].mxu1  ;;  %9115 = vst [vmem:[#allocation14_spill] sm:$0xff] %v7095_v45  ;;  %9116 = vst [vmem:[#allocation15_spill] sm:$0xff] %v7100_v62  ;;  %v1621_v27 = vmul.f32 %v5940_v35, %v6887_v52  ;;  %v1556_v51 = vmul.f32 %v6887_v52, %v998_v42 }
 0x14e   : > { %9117 = vst [vmem:[#allocation16_spill] sm:$0xff] %v7103_v26  ;;  %v1620_v25 = vmul.f32 %v6887_v52, %v1318_v34  ;;  %v7122_v41 = vadd.f32 %v6893_v58, %v1557_v36 }
 0x14f   : > { %v5847_v38 = vpop.f32.mrb[24].mxu0  ;;  %v7131_v21 = vadd.f32 %v6893_v58, %v1556_v51 }
 0x150   : > { %v5943_v32 = vpop.f32.mrb[24].mxu1  ;;  %v1008_v39 = vpop.f32.mrb[25].mxu0  ;;  %v1559_v8 = vmul.f32 %v5847_v38, %v6887_v52  ;;  %9118 = vst [vmem:[#allocation17_spill] sm:$0xff] %v7122_v41  ;;  %v7128_v38 = vadd.f32 %v6893_v58, %v1621_v27  ;;  %v7136_v36 = vadd.f32 %v6893_v58, %v1620_v25 }
 0x151   : > { %v1328_v44 = vpop.f32.mrb[25].mxu1  ;;  %v1623_v35 = vmul.f32 %v5943_v32, %v6887_v52  ;;  %v1558_v42 = vmul.f32 %v6887_v52, %v1008_v39  ;;  %9120 = vst [vmem:[#allocation19_spill] sm:$0xff] %v7131_v21 }
 0x152   : > { %v1622_v0 = vmul.f32 %v6887_v52, %v1328_v44  ;;  %9119 = vst [vmem:[#allocation18_spill] sm:$0xff] %v7128_v38  ;;  %v7139_v44 = vadd.f32 %v6893_v58, %v1559_v8 }
 0x153   : > { %v5850_v16 = vpop.f32.mrb[26].mxu0  ;;  %v7144_v51 = vadd.f32 %v6893_v58, %v1623_v35 }
 0x154   : > { %v5946_v59 = vpop.f32.mrb[26].mxu1  ;;  %v1018_v46 = vpop.f32.mrb[27].mxu0  ;;  %v1561_v48 = vmul.f32 %v5850_v16, %v6887_v52  ;;  %9121 = vst [vmem:[#allocation20_spill] sm:$0xff] %v7139_v44  ;;  %v7153_v8 = vadd.f32 %v6893_v58, %v1622_v0 }
 0x155   : > { %v1338_v2 = vpop.f32.mrb[27].mxu1  ;;  %v1625_v34 = vmul.f32 %v5946_v59, %v6887_v52  ;;  %v1560_v61 = vmul.f32 %v6887_v52, %v1018_v46  ;;  %9122 = vst [vmem:[#allocation21_spill] sm:$0xff] %v7144_v51  ;;  %v7147_v46 = vadd.f32 %v6893_v58, %v1558_v42 }
 0x156   : > { %v1624_v32 = vmul.f32 %v6887_v52, %v1338_v2 }
 0x157   : > { %v5853_v39 = vpop.f32.mrb[28].mxu0  ;;  %9123 = vst [vmem:[#allocation22_spill] sm:$0xff] %v7147_v46  ;;  %v7164_v30 = vadd.f32 %v6893_v58, %v1560_v61 }
 0x158   : > { %v5949_v26 = vpop.f32.mrb[28].mxu1  ;;  %v1563_v16 = vmul.f32 %v5853_v39, %v6887_v52  ;;  %v1028_v59 = vpop.f32.mrb[29].mxu0  ;;  %v7156_v39 = vadd.f32 %v6893_v58, %v1561_v48 }
 0x159   : > { %v1627_v27 = vmul.f32 %v5949_v26, %v6887_v52  ;;  %v1348_v62 = vpop.f32.mrb[29].mxu1  ;;  %v1562_v2 = vmul.f32 %v6887_v52, %v1028_v59  ;;  %v7159_v26 = vadd.f32 %v6893_v58, %v1625_v34  ;;  %9126 = vst [vmem:[#allocation25_spill] sm:$0xff] %v7164_v30 }
 0x15a   : > { %v1626_v25 = vmul.f32 %v6887_v52, %v1348_v62  ;;  %9124 = vst [vmem:[#allocation23_spill] sm:$0xff] %v7156_v39  ;;  %v7167_v62 = vadd.f32 %v6893_v58, %v1624_v32  ;;  %v7172_v41 = vadd.f32 %v6893_v58, %v1563_v16 }
 0x15b   : > { %9125 = vst [vmem:[#allocation24_spill] sm:$0xff] %v7159_v26  ;;  %v5856_v59 = vpop.f32.mrb[30].mxu0  ;;  %v7175_v34 = vadd.f32 %v6893_v58, %v1627_v27  ;;  %v7180_v32 = vadd.f32 %v6893_v58, %v1562_v2 }
 0x15c   : > { %9127 = vst [vmem:[#allocation26_spill] sm:$0xff] %v7167_v62  ;;  %v5952_v45 = vpop.f32.mrb[30].mxu1  ;;  %9128 = vst [vmem:[#allocation27_spill] sm:$0xff] %v7172_v41  ;;  %v1038_v35 = vpop.f32.mrb[31].mxu0  ;;  %v7183_v38 = vadd.f32 %v6893_v58, %v1626_v25  ;;  %v1565_v27 = vmul.f32 %v5856_v59, %v6887_v52 }
 0x15d   : > { %9129 = vst [vmem:[#allocation28_spill] sm:$0xff] %v7175_v34  ;;  %v1358_v42 = vpop.f32.mrb[31].mxu1  ;;  %9130 = vst [vmem:[#allocation29_spill] sm:$0xff] %v7180_v32  ;;  %v1629_v21 = vmul.f32 %v5952_v45, %v6887_v52  ;;  %v1564_v2 = vmul.f32 %v6887_v52, %v1038_v35 }
 0x15e   : > { %9131 = vst [vmem:[#allocation30_spill] sm:$0xff] %v7183_v38  ;;  %v7202_v62 = vadd.f32 %v6893_v58, %v1565_v27  ;;  %v1628_v25 = vmul.f32 %v6887_v52, %v1358_v42 }
 0x15f   : > { %v5859_v46 = vpop.f32.mrb[32].mxu0  ;;  %v7211_v44 = vadd.f32 %v6893_v58, %v1564_v2 }
 0x160   : > { %v5955_v51 = vpop.f32.mrb[32].mxu1  ;;  %v1567_v16 = vmul.f32 %v5859_v46, %v6887_v52  ;;  %v1048_v26 = vpop.f32.mrb[33].mxu0 }
 0x161   : > { %v1631_v0 = vmul.f32 %v5955_v51, %v6887_v52  ;;  %v1368_v59 = vpop.f32.mrb[33].mxu1  ;;  %v1566_v45 = vmul.f32 %v6887_v52, %v1048_v26  ;;  %v7208_v51 = vadd.f32 %v6893_v58, %v1629_v21  ;;  %9133 = vst [vmem:[#allocation32_spill] sm:$0xff] %v7211_v44 }
 0x162   : > { %v1630_v35 = vmul.f32 %v6887_v52, %v1368_v59  ;;  %v1702_v48 = vadd.f32 %v6893_v58, %v1567_v16 }
 0x163   : > { %v1766_v46 = vadd.f32 %v6893_v58, %v1631_v0  ;;  %9132 = vst [vmem:[#allocation31_spill] sm:$0xff] %v7208_v51  ;;  %v1701_v61 = vadd.f32 %v6893_v58, %v1566_v45  ;;  %v5862_v59 = vpop.f32.mrb[34].mxu0  ;;  %v9134_v45 = vmax.f32 %v6903_v4, 0.0 }
 0x164   : > { %v1765_v26 = vadd.f32 %v6893_v58, %v1630_v35  ;;  %v5958_v38 = vpop.f32.mrb[34].mxu1  ;;  %v1830_v27 = vmax.f32 %v1702_v48, 0.0  ;;  %v1569_v42 = vmul.f32 %v5862_v59, %v6887_v52  ;;  %v1058_v34 = vpop.f32.mrb[35].mxu0  ;;  %v9136_v35 = vmax.f32 %v6908_v9, 0.0 }
 0x165   : > { %v1894_v32 = vmax.f32 %v1766_v46, 0.0  ;;  %v1633_v16 = vmul.f32 %v5958_v38, %v6887_v52  ;;  %v1378_v0 = vpop.f32.mrb[35].mxu1  ;;  %v1829_v41 = vmax.f32 %v1701_v61, 0.0  ;;  %v1568_v30 = vmul.f32 %v6887_v52, %v1058_v34 }
 0x166   : > { %v1893_v21 = vmax.f32 %v1765_v26, 0.0  ;;  %v1632_v2 = vmul.f32 %v6887_v52, %v1378_v0  ;;  %v7221_v39 = vmax.f32 %v9134_v45, %v1830_v27  ;;  %v1704_v46 = vadd.f32 %v6893_v58, %v1569_v42 }
 0x167   : > { %v7225_v48 = vmax.f32 %v9136_v35, %v1894_v32  ;;  %v1768_v38 = vadd.f32 %v6893_v58, %v1633_v16  ;;  %v9138_v59 = vmax.f32 %v6911_v10, 0.0  ;;  %v9139_v34 = vmax.f32 %v6916_v13, 0.0  ;;  %v5865_v0 = vpop.f32.mrb[36].mxu0 }
 0x168   : > { %9135 = vst [vmem:[#allocation33_spill] sm:$0xff] %v7221_v39  ;;  %v1703_v4 = vadd.f32 %v6893_v58, %v1568_v30  ;;  %v1767_v27 = vadd.f32 %v6893_v58, %v1632_v2  ;;  %v5961_v9 = vpop.f32.mrb[36].mxu1  ;;  %v7242_v16 = vadd.f32 %v6893_v58, %v1628_v25  ;;  %v1832_v10 = vmax.f32 %v1704_v46, 0.0 }
 0x169   : > { %9137 = vst [vmem:[#allocation34_spill] sm:$0xff] %v7225_v48  ;;  %v7231_v61 = vmax.f32 %v9138_v59, %v1829_v41  ;;  %v7235_v26 = vmax.f32 %v9139_v34, %v1893_v21  ;;  %v1068_v41 = vpop.f32.mrb[37].mxu0  ;;  %v1388_v45 = vpop.f32.mrb[37].mxu1  ;;  %v1896_v35 = vmax.f32 %v1768_v38, 0.0  ;;  %v9141_v2 = vmax.f32 %v6919_v14, 0.0 }
 0x16a   : > { %v1831_v34 = vmax.f32 %v1703_v4, 0.0  ;;  %v1895_v32 = vmax.f32 %v1767_v27, 0.0  ;;  %v1571_v42 = vmul.f32 %v5865_v0, %v6887_v52  ;;  %v9142_v46 = vmax.f32 %v6922_v15, 0.0 }
 0x16b   : > { %9140 = vst [vmem:[#allocation35_spill] sm:$0xff] %v7235_v26  ;;  %v7249_v59 = vmax.f32 %v9141_v2, %v1832_v10  ;;  %v1635_v13 = vmul.f32 %v5961_v9, %v6887_v52  ;;  %v1570_v21 = vmul.f32 %v6887_v52, %v1068_v41  ;;  %v5868_v30 = vpop.f32.mrb[38].mxu0  ;;  %v9144_v14 = vmax.f32 %v6925_v17, 0.0 }
 0x16c   : > { %v7255_v51 = vmax.f32 %v9142_v46, %v1896_v35  ;;  %v5964_v38 = vpop.f32.mrb[38].mxu1  ;;  %v9146_v4 = vmax.f32 %v6928_v18, 0.0  ;;  %v1706_v0 = vadd.f32 %v6893_v58, %v1571_v42  ;;  %v1634_v15 = vmul.f32 %v6887_v52, %v1388_v45  ;;  %v1078_v35 = vpop.f32.mrb[39].mxu0 }
 0x16d   : > { %v7261_v10 = vmax.f32 %v9144_v14, %v1831_v34  ;;  %v1398_v2 = vpop.f32.mrb[39].mxu1  ;;  %v1770_v9 = vadd.f32 %v6893_v58, %v1635_v13  ;;  %v1705_v41 = vadd.f32 %v6893_v58, %v1570_v21  ;;  %v1573_v46 = vmul.f32 %v5868_v30, %v6887_v52 }
 0x16e   : > { %9143 = vst [vmem:[#allocation36_spill] sm:$0xff] %v7255_v51  ;;  %v7265_v27 = vmax.f32 %v9146_v4, %v1895_v32  ;;  %v1637_v17 = vmul.f32 %v5964_v38, %v6887_v52  ;;  %v1834_v14 = vmax.f32 %v1706_v0, 0.0  ;;  %v1769_v18 = vadd.f32 %v6893_v58, %v1634_v15 }
 0x16f   : > { %9145 = vst [vmem:[#allocation37_spill] sm:$0xff] %v7261_v10  ;;  %v7277_v32 = vpack.c.bf16 %v7221_v39, %v7231_v61  ;;  %v1898_v42 = vmax.f32 %v1770_v9, 0.0  ;;  %v1833_v45 = vmax.f32 %v1705_v41, 0.0  ;;  %v1708_v4 = vadd.f32 %v6893_v58, %v1573_v46  ;;  %v5871_v21 = vpop.f32.mrb[40].mxu0 }
 0x170   : > { %v1772_v13 = vadd.f32 %v6893_v58, %v1637_v17  ;;  %v5967_v25 = vpop.f32.mrb[40].mxu1  ;;  %v9148_v30 = vmax.f32 %v6932_v22, 0.0  ;;  %v1897_v34 = vmax.f32 %v1769_v18, 0.0  ;;  %v1572_v0 = vmul.f32 %v6887_v52, %v1078_v35  ;;  %v1088_v44 = vpop.f32.mrb[41].mxu0 }
 0x171   : > { %9147 = vst [vmem:[#allocation38_spill] sm:$0xff] %v7277_v32  ;;  %4043 = vmatprep.mubr.bf16.mxu0 %v7277_v32  ;;  %v1636_v15 = vmul.f32 %v6887_v52, %v1398_v2  ;;  %v1408_v9 = vpop.f32.mrb[41].mxu1  ;;  %v9149_v41 = vmax.f32 %v6935_v23, 0.0  ;;  %v9150_v17 = vmax.f32 %v6940_v28, 0.0  ;;  %v1836_v22 = vmax.f32 %v1708_v4, 0.0 }
 0x172   : > { %v7283_v38 = vmax.f32 %v9148_v30, %v1834_v14  ;;  %v1900_v14 = vmax.f32 %v1772_v13, 0.0  ;;  %v9151_v18 = vmax.f32 %v6943_v29, 0.0  ;;  %v1707_v35 = vadd.f32 %v6893_v58, %v1572_v0 }
 0x173   : > { %v7290_v46 = vmax.f32 %v9149_v41, %v1898_v42  ;;  %v7294_v26 = vmax.f32 %v9150_v17, %v1833_v45  ;;  %v1771_v2 = vadd.f32 %v6893_v58, %v1636_v15  ;;  %v1575_v32 = vmul.f32 %v5871_v21, %v6887_v52 }
 0x174   : > { %v7298_v30 = vmax.f32 %v9151_v18, %v1897_v34  ;;  %v9152_v23 = vmax.f32 %v6962_v50, 0.0  ;;  %v9153_v28 = vmax.f32 %v6968_v53, 0.0  ;;  %v1639_v4 = vmul.f32 %v5967_v25, %v6887_v52  ;;  %v5874_v34 = vpop.f32.mrb[42].mxu0  ;;  %v5970_v13 = vpop.f32.mrb[42].mxu1 }
 0x175   : > { %v1574_v29 = vmul.f32 %v6887_v52, %v1088_v44  ;;  %v1835_v41 = vmax.f32 %v1707_v35, 0.0  ;;  %v1899_v0 = vmax.f32 %v1771_v2, 0.0  ;;  %v1710_v15 = vadd.f32 %v6893_v58, %v1575_v32  ;;  %v1098_v17 = vpop.f32.mrb[43].mxu0  ;;  %v1418_v50 = vpop.f32.mrb[43].mxu1 }
 0x176   : > { %v7305_v42 = vmax.f32 %v9152_v23, %v1836_v22  ;;  %v7309_v45 = vmax.f32 %v9153_v28, %v1900_v14  ;;  %v1638_v21 = vmul.f32 %v6887_v52, %v1408_v9  ;;  %v1774_v22 = vadd.f32 %v6893_v58, %v1639_v4 }
 0x177   : > { %v1709_v53 = vadd.f32 %v6893_v58, %v1574_v29  ;;  %v1577_v14 = vmul.f32 %v5874_v34, %v6887_v52  ;;  %v1641_v25 = vmul.f32 %v5970_v13, %v6887_v52  ;;  %v9155_v44 = vmax.f32 %v6971_v60, 0.0  ;;  %v5877_v34 = vpop.f32.mrb[44].mxu0 }
 0x178   : > { %9154 = vst [vmem:[#allocation39_spill] sm:$0xff] %v7309_v45  ;;  %v9156_v35 = vmax.f32 %v6976_v63, 0.0  ;;  %v1838_v32 = vmax.f32 %v1710_v15, 0.0  ;;  %v1773_v9 = vadd.f32 %v6893_v58, %v1638_v21  ;;  %v1902_v23 = vmax.f32 %v1774_v22, 0.0  ;;  %v5973_v45 = vpop.f32.mrb[44].mxu1  ;;  %v1108_v15 = vpop.f32.mrb[45].mxu0 }
 0x179   : > { %v7321_v18 = vmax.f32 %v9155_v44, %v1835_v41  ;;  %v1837_v28 = vmax.f32 %v1709_v53, 0.0  ;;  %v1712_v4 = vadd.f32 %v6893_v58, %v1577_v14  ;;  %v1776_v29 = vadd.f32 %v6893_v58, %v1641_v25  ;;  %v1428_v44 = vpop.f32.mrb[45].mxu1 }
 0x17a   : > { %v7325_v2 = vmax.f32 %v9156_v35, %v1899_v0  ;;  %v9158_v13 = vmax.f32 %v6979_v57, 0.0  ;;  %v1901_v41 = vmax.f32 %v1773_v9, 0.0  ;;  %v1576_v63 = vmul.f32 %v6887_v52, %v1098_v17 }
 0x17b   : > { %v1640_v0 = vmul.f32 %v6887_v52, %v1418_v50  ;;  %v9159_v21 = vmax.f32 %v6984_v5, 0.0  ;;  %v9161_v53 = vmax.f32 %v6987_v6, 0.0  ;;  %v1840_v25 = vmax.f32 %v1712_v4, 0.0 }
 0x17c   : > { %9157 = vst [vmem:[#allocation40_spill] sm:$0xff] %v7325_v2  ;;  %v7332_v60 = vmax.f32 %v9158_v13, %v1838_v32  ;;  %v1904_v35 = vmax.f32 %v1776_v29, 0.0  ;;  %v9162_v57 = vmax.f32 %v6993_v12, 0.0  ;;  %v1711_v17 = vadd.f32 %v6893_v58, %v1576_v63  ;;  %v5880_v29 = vpop.f32.mrb[46].mxu0  ;;  %v5976_v13 = vpop.f32.mrb[46].mxu1 }
 0x17d   : > { %v7338_v22 = vmax.f32 %v9159_v21, %v1902_v23  ;;  %v7342_v14 = vmax.f32 %v9161_v53, %v1837_v28  ;;  %v1775_v50 = vadd.f32 %v6893_v58, %v1640_v0  ;;  %v1579_v9 = vmul.f32 %v5877_v34, %v6887_v52  ;;  %v1118_v21 = vpop.f32.mrb[47].mxu0 }
 0x17e   : > { %v7346_v32 = vmax.f32 %v9162_v57, %v1901_v41  ;;  %v9164_v5 = vmax.f32 %v6996_v19, 0.0  ;;  %v9165_v6 = vmax.f32 %v6999_v20, 0.0  ;;  %v1643_v4 = vmul.f32 %v5973_v45, %v6887_v52  ;;  %v1438_v19 = vpop.f32.mrb[47].mxu1 }
 0x17f   : > { %9160 = vst [vmem:[#allocation41_spill] sm:$0xff] %v7338_v22  ;;  %v1578_v12 = vmul.f32 %v6887_v52, %v1108_v15  ;;  %v1839_v41 = vmax.f32 %v1711_v17, 0.0  ;;  %v1903_v63 = vmax.f32 %v1775_v50, 0.0  ;;  %v1714_v0 = vadd.f32 %v6893_v58, %v1579_v9 }
 0x180   : > { %9163 = vst [vmem:[#allocation42_spill] sm:$0xff] %v7346_v32  ;;  %v7353_v23 = vmax.f32 %v9164_v5, %v1840_v25  ;;  %v7357_v28 = vmax.f32 %v9165_v6, %v1904_v35  ;;  %v1642_v34 = vmul.f32 %v6887_v52, %v1428_v44  ;;  %v1778_v53 = vadd.f32 %v6893_v58, %v1643_v4 }
 0x181   : > { %v1713_v20 = vadd.f32 %v6893_v58, %v1578_v12  ;;  %v1581_v25 = vmul.f32 %v5880_v29, %v6887_v52  ;;  %v1645_v45 = vmul.f32 %v5976_v13, %v6887_v52  ;;  %v9167_v15 = vmax.f32 %v7004_v37, 0.0  ;;  %v5883_v12 = vpop.f32.mrb[48].mxu0  ;;  %v5979_v29 = vpop.f32.mrb[48].mxu1 }
 0x182   : > { %9166 = vst [vmem:[#allocation43_spill] sm:$0xff] %v7357_v28  ;;  %v9168_v57 = vmax.f32 %v7007_v24, 0.0  ;;  %v1842_v50 = vmax.f32 %v1714_v0, 0.0  ;;  %v1777_v44 = vadd.f32 %v6893_v58, %v1642_v34  ;;  %v1906_v9 = vmax.f32 %v1778_v53, 0.0  ;;  %v1128_v0 = vpop.f32.mrb[49].mxu0 }
 0x183   : > { %v7369_v35 = vmax.f32 %v9167_v15, %v1839_v41  ;;  %v1841_v5 = vmax.f32 %v1713_v20, 0.0  ;;  %v1716_v6 = vadd.f32 %v6893_v58, %v1581_v25  ;;  %v1780_v4 = vadd.f32 %v6893_v58, %v1645_v45  ;;  %v1448_v15 = vpop.f32.mrb[49].mxu1 }
 0x184   : > { %v7373_v17 = vmax.f32 %v9168_v57, %v1903_v63  ;;  %v9170_v13 = vmax.f32 %v7012_v49, 0.0  ;;  %v1905_v41 = vmax.f32 %v1777_v44, 0.0  ;;  %v1580_v24 = vmul.f32 %v6887_v52, %v1118_v21 }
 0x185   : > { %v1644_v63 = vmul.f32 %v6887_v52, %v1438_v19  ;;  %v9172_v34 = vmax.f32 %v7015_v55, 0.0  ;;  %v9174_v20 = vmax.f32 %v7020_v54, 0.0  ;;  %v1844_v45 = vmax.f32 %v1716_v6, 0.0 }
 0x186   : > { %9169 = vst [vmem:[#allocation44_spill] sm:$0xff] %v7373_v17  ;;  %v7380_v37 = vmax.f32 %v9170_v13, %v1842_v50  ;;  %v1908_v57 = vmax.f32 %v1780_v4, 0.0  ;;  %v9175_v49 = vmax.f32 %v7023_v33, 0.0  ;;  %v1715_v21 = vadd.f32 %v6893_v58, %v1580_v24  ;;  %v5886_v4 = vpop.f32.mrb[50].mxu0  ;;  %v5982_v13 = vpop.f32.mrb[50].mxu1 }
 0x187   : > { %v7386_v53 = vmax.f32 %v9172_v34, %v1906_v9  ;;  %v7390_v25 = vmax.f32 %v9174_v20, %v1841_v5  ;;  %v1779_v19 = vadd.f32 %v6893_v58, %v1644_v63  ;;  %v1583_v44 = vmul.f32 %v5883_v12, %v6887_v52  ;;  %v1138_v34 = vpop.f32.mrb[51].mxu0 }
 0x188   : > { %9171 = vst [vmem:[#allocation45_spill] sm:$0xff] %v7380_v37  ;;  %v7394_v50 = vmax.f32 %v9175_v49, %v1905_v41  ;;  %v9177_v55 = vmax.f32 %v7042_v40, 0.0  ;;  %v9179_v54 = vmax.f32 %v7048_v56, 0.0  ;;  %v1647_v6 = vmul.f32 %v5979_v29, %v6887_v52  ;;  %v1458_v40 = vpop.f32.mrb[51].mxu1 }
 0x189   : > { %9173 = vst [vmem:[#allocation46_spill] sm:$0xff] %v7386_v53  ;;  %v1582_v33 = vmul.f32 %v6887_v52, %v1128_v0  ;;  %v1843_v41 = vmax.f32 %v1715_v21, 0.0  ;;  %v1907_v24 = vmax.f32 %v1779_v19, 0.0  ;;  %v1718_v63 = vadd.f32 %v6893_v58, %v1583_v44 }
 0x18a   : > { %9176 = vst [vmem:[#allocation47_spill] sm:$0xff] %v7394_v50  ;;  %v7401_v9 = vmax.f32 %v9177_v55, %v1844_v45  ;;  %v7405_v5 = vmax.f32 %v9179_v54, %v1908_v57  ;;  %v1646_v12 = vmul.f32 %v6887_v52, %v1448_v15  ;;  %v1782_v20 = vadd.f32 %v6893_v58, %v1647_v6 }
 0x18b   : > { %v1717_v56 = vadd.f32 %v6893_v58, %v1582_v33  ;;  %v1585_v45 = vmul.f32 %v5886_v4, %v6887_v52  ;;  %v1649_v29 = vmul.f32 %v5982_v13, %v6887_v52  ;;  %v9181_v0 = vmax.f32 %v7051_v11, 0.0  ;;  %v5889_v33 = vpop.f32.mrb[52].mxu0  ;;  %v5985_v4 = vpop.f32.mrb[52].mxu1 }
 0x18c   : > { %9178 = vst [vmem:[#allocation48_spill] sm:$0xff] %v7401_v9  ;;  %9180 = vst [vmem:[#allocation49_spill] sm:$0xff] %v7405_v5  ;;  %v9183_v49 = vmax.f32 %v7056_v1, 0.0  ;;  %v1846_v19 = vmax.f32 %v1718_v63, 0.0  ;;  %v1781_v15 = vadd.f32 %v6893_v58, %v1646_v12  ;;  %v1910_v44 = vmax.f32 %v1782_v20, 0.0  ;;  %v1148_v63 = vpop.f32.mrb[53].mxu0 }
 0x18d   : > { %v7417_v57 = vmax.f32 %v9181_v0, %v1843_v41  ;;  %v1845_v55 = vmax.f32 %v1717_v56, 0.0  ;;  %v1720_v54 = vadd.f32 %v6893_v58, %v1585_v45  ;;  %v1784_v6 = vadd.f32 %v6893_v58, %v1649_v29  ;;  %v1468_v0 = vpop.f32.mrb[53].mxu1  ;;  %v9188_v56 = vld [vmem:[#allocation10_spill] sm:$0xff] }
 0x18e   : > { %v7421_v21 = vmax.f32 %v9183_v49, %v1907_v24  ;;  %v9185_v13 = vmax.f32 %v7059_v3, 0.0  ;;  %v1909_v41 = vmax.f32 %v1781_v15, 0.0  ;;  %v1584_v1 = vmul.f32 %v6887_v52, %v1138_v34 }
 0x18f   : > { %9182 = vst [vmem:[#allocation50_spill] sm:$0xff] %v7417_v57  ;;  %v1648_v24 = vmul.f32 %v6887_v52, %v1458_v40  ;;  %v9186_v12 = vmax.f32 %v7064_v7, 0.0  ;;  %v9189_v45 = vmax.f32 %v9188_v56, 0.0  ;;  %v1848_v49 = vmax.f32 %v1720_v54, 0.0 }
 0x190   : > { %9184 = vst [vmem:[#allocation51_spill] sm:$0xff] %v7421_v21  ;;  %v7428_v11 = vmax.f32 %v9185_v13, %v1846_v19  ;;  %v1912_v5 = vmax.f32 %v1784_v6, 0.0  ;;  %v9190_v3 = vmax.f32 %v7073_v43, 0.0  ;;  %v1719_v34 = vadd.f32 %v6893_v58, %v1584_v1  ;;  %v9194_v13 = vld [vmem:[#allocation11_spill] sm:$0xff]  ;;  %v5892_v6 = vpop.f32.mrb[54].mxu0 }
 0x191   : > { %v7434_v20 = vmax.f32 %v9186_v12, %v1910_v44  ;;  %v7438_v29 = vmax.f32 %v9189_v45, %v1845_v55  ;;  %v1783_v40 = vadd.f32 %v6893_v58, %v1648_v24  ;;  %v1587_v15 = vmul.f32 %v5889_v33, %v6887_v52  ;;  %v1158_v45 = vpop.f32.mrb[55].mxu0 }
 0x192   : > { %v7442_v19 = vmax.f32 %v9190_v3, %v1909_v41  ;;  %v9192_v7 = vmax.f32 %v7076_v47, 0.0  ;;  %v9195_v12 = vmax.f32 %v9194_v13, 0.0  ;;  %v1651_v54 = vmul.f32 %v5985_v4, %v6887_v52  ;;  %v5988_v41 = vpop.f32.mrb[54].mxu1 }
 0x193   : > { %9187 = vst [vmem:[#allocation52_spill] sm:$0xff] %v7434_v20  ;;  %v1586_v43 = vmul.f32 %v6887_v52, %v1148_v63  ;;  %v1847_v56 = vmax.f32 %v1719_v34, 0.0  ;;  %v1911_v1 = vmax.f32 %v1783_v40, 0.0  ;;  %v1722_v24 = vadd.f32 %v6893_v58, %v1587_v15  ;;  %v1478_v47 = vpop.f32.mrb[55].mxu1  ;;  %v9199_v34 = vld [vmem:[#allocation12_spill] sm:$0xff] }
 0x194   : > { %9191 = vst [vmem:[#allocation10_spill] sm:$0xff] %v7442_v19  ;;  %v7449_v44 = vmax.f32 %v9192_v7, %v1848_v49  ;;  %v7453_v55 = vmax.f32 %v9195_v12, %v1912_v5  ;;  %v1650_v33 = vmul.f32 %v6887_v52, %v1468_v0  ;;  %v1786_v49 = vadd.f32 %v6893_v58, %v1651_v54 }
 0x195   : > { %v1721_v3 = vadd.f32 %v6893_v58, %v1586_v43  ;;  %v1589_v5 = vmul.f32 %v5892_v6, %v6887_v52  ;;  %v1653_v4 = vmul.f32 %v5988_v41, %v6887_v52  ;;  %v9197_v63 = vmax.f32 %v7084_v31, 0.0  ;;  %v5895_v6 = vpop.f32.mrb[56].mxu0  ;;  %v9202_v41 = vld [vmem:[#allocation13_spill] sm:$0xff] }
 0x196   : > { %9193 = vst [vmem:[#allocation53_spill] sm:$0xff] %v7449_v44  ;;  %9196 = vst [vmem:[#allocation11_spill] sm:$0xff] %v7453_v55  ;;  %v9200_v40 = vmax.f32 %v9199_v34, 0.0  ;;  %v1850_v15 = vmax.f32 %v1722_v24, 0.0  ;;  %v1785_v0 = vadd.f32 %v6893_v58, %v1650_v33  ;;  %v1914_v12 = vmax.f32 %v1786_v49, 0.0  ;;  %v5991_v44 = vpop.f32.mrb[56].mxu1 }
 0x197   : > { %v7465_v7 = vmax.f32 %v9197_v63, %v1847_v56  ;;  %v1849_v55 = vmax.f32 %v1721_v3, 0.0  ;;  %v1724_v54 = vadd.f32 %v6893_v58, %v1589_v5  ;;  %v1788_v43 = vadd.f32 %v6893_v58, %v1653_v4  ;;  %v1168_v24 = vpop.f32.mrb[57].mxu0  ;;  %v1488_v34 = vpop.f32.mrb[57].mxu1  ;;  %v9205_v33 = vld [vmem:[#allocation14_spill] sm:$0xff]  ;;  %v9208_v5 = vld [vmem:[#allocation15_spill] sm:$0xff] }
 0x198   : > { %v7469_v13 = vmax.f32 %v9200_v40, %v1911_v1  ;;  %v9203_v20 = vmax.f32 %v9202_v41, 0.0  ;;  %v1913_v56 = vmax.f32 %v1785_v0, 0.0  ;;  %v1588_v63 = vmul.f32 %v6887_v52, %v1158_v45  ;;  %v9211_v41 = vld [vmem:[#allocation16_spill] sm:$0xff] }
 0x199   : > { %9198 = vst [vmem:[#allocation54_spill] sm:$0xff] %v7465_v7  ;;  %v1652_v1 = vmul.f32 %v6887_v52, %v1478_v47  ;;  %v9206_v49 = vmax.f32 %v9205_v33, 0.0  ;;  %v9209_v40 = vmax.f32 %v9208_v5, 0.0  ;;  %v1916_v7 = vmax.f32 %v1788_v43, 0.0 }
 0x19a   : > { %9201 = vst [vmem:[#allocation12_spill] sm:$0xff] %v7469_v13  ;;  %v7476_v31 = vmax.f32 %v9203_v20, %v1850_v15  ;;  %v1852_v13 = vmax.f32 %v1724_v54, 0.0  ;;  %v9212_v20 = vmax.f32 %v9211_v41, 0.0  ;;  %v1723_v45 = vadd.f32 %v6893_v58, %v1588_v63 }
 0x19b   : > { %v7482_v3 = vmax.f32 %v9206_v49, %v1914_v12  ;;  %v7486_v4 = vmax.f32 %v9209_v40, %v1849_v55  ;;  %v1787_v47 = vadd.f32 %v6893_v58, %v1652_v1  ;;  %v1591_v0 = vmul.f32 %v5895_v6, %v6887_v52  ;;  %v9217_v49 = vld [vmem:[#allocation18_spill] sm:$0xff]  ;;  %v5994_v40 = vpop.f32.mrb[58].mxu1 }
 0x19c   : > { %9204 = vst [vmem:[#allocation13_spill] sm:$0xff] %v7476_v31  ;;  %v7490_v15 = vmax.f32 %v9212_v20, %v1913_v56  ;;  %v9214_v31 = vld [vmem:[#allocation17_spill] sm:$0xff]  ;;  %v9218_v5 = vmax.f32 %v9217_v49, 0.0  ;;  %v1655_v54 = vmul.f32 %v5991_v44, %v6887_v52  ;;  %v1590_v43 = vmul.f32 %v6887_v52, %v1168_v24  ;;  %v5898_v56 = vpop.f32.mrb[58].mxu0  ;;  %v9220_v49 = vld [vmem:[#allocation19_spill] sm:$0xff] }
 0x19d   : > { %9207 = vst [vmem:[#allocation14_spill] sm:$0xff] %v7482_v3  ;;  %9210 = vst [vmem:[#allocation15_spill] sm:$0xff] %v7486_v4  ;;  %v9215_v33 = vmax.f32 %v9214_v31, 0.0  ;;  %v1851_v41 = vmax.f32 %v1723_v45, 0.0  ;;  %v1915_v63 = vmax.f32 %v1787_v47, 0.0  ;;  %v1726_v1 = vadd.f32 %v6893_v58, %v1591_v0  ;;  %v1178_v20 = vpop.f32.mrb[59].mxu0 }
 0x19e   : > { %9213 = vst [vmem:[#allocation16_spill] sm:$0xff] %v7490_v15  ;;  %v7501_v55 = vmax.f32 %v9218_v5, %v1916_v7  ;;  %v1654_v6 = vmul.f32 %v6887_v52, %v1488_v34  ;;  %v1498_v31 = vpop.f32.mrb[59].mxu1  ;;  %v1593_v7 = vmul.f32 %v5898_v56, %v6887_v52  ;;  %v1657_v44 = vmul.f32 %v5994_v40, %v6887_v52  ;;  %v5901_v56 = vpop.f32.mrb[60].mxu0  ;;  %v9225_v52 = vld [vmem:[#allocation20_spill] sm:$0xff]  ;;  %v9248_v4 = vld [vmem:[#allocation27_spill] sm:$0xff] }
 0x19f   : > { %v7497_v12 = vmax.f32 %v9215_v33, %v1852_v13  ;;  %v1790_v13 = vadd.f32 %v6893_v58, %v1655_v54  ;;  %v1725_v33 = vadd.f32 %v6893_v58, %v1590_v43  ;;  %v9221_v24 = vmax.f32 %v9220_v49, 0.0  ;;  %v5997_v3 = vpop.f32.mrb[60].mxu1 }
 0x1a0   : > { %9219 = vst [vmem:[#allocation18_spill] sm:$0xff] %v7501_v55  ;;  %v9223_v45 = vmax.f32 %v7136_v36, 0.0  ;;  %v1854_v0 = vmax.f32 %v1726_v1, 0.0  ;;  %v1789_v34 = vadd.f32 %v6893_v58, %v1654_v6  ;;  %v1728_v54 = vadd.f32 %v6893_v58, %v1593_v7  ;;  %v6414_v36 = vld [vmem:[%s8953_s2] ss:$0 sm:$0xff]  ;;  %v1188_v6 = vpop.f32.mrb[61].mxu0 }
 0x1a1   : > { %9216 = vst [vmem:[#allocation17_spill] sm:$0xff] %v7497_v12  ;;  %v7513_v5 = vmax.f32 %v9221_v24, %v1851_v41  ;;  %v1918_v55 = vmax.f32 %v1790_v13, 0.0  ;;  %v1853_v12 = vmax.f32 %v1725_v33, 0.0  ;;  %v1792_v43 = vadd.f32 %v6893_v58, %v1657_v44  ;;  %v1508_v13 = vpop.f32.mrb[61].mxu1  ;;  %v9228_v33 = vld [vmem:[#allocation21_spill] sm:$0xff]  ;;  %v9231_v58 = vld [vmem:[#allocation22_spill] sm:$0xff] }
 0x1a2   : > { %v7517_v47 = vmax.f32 %v9223_v45, %v1915_v63  ;;  %v9226_v40 = vmax.f32 %v9225_v52, 0.0  ;;  %v1917_v41 = vmax.f32 %v1789_v34, 0.0  ;;  %v1592_v63 = vmul.f32 %v6414_v36, %v1178_v20  ;;  %v6415_v20 = vld [vmem:[%s8954_s3] ss:$0 sm:$0xff] }
 0x1a3   : > { %9222 = vst [vmem:[#allocation19_spill] sm:$0xff] %v7513_v5  ;;  %v1656_v1 = vmul.f32 %v6414_v36, %v1498_v31  ;;  %v9229_v24 = vmax.f32 %v9228_v33, 0.0  ;;  %v9232_v44 = vmax.f32 %v9231_v58, 0.0  ;;  %v1856_v52 = vmax.f32 %v1728_v54, 0.0 }
 0x1a4   : > { %9224 = vst [vmem:[#allocation55_spill] sm:$0xff] %v7517_v47  ;;  %v7524_v49 = vmax.f32 %v9226_v40, %v1854_v0  ;;  %v1920_v0 = vmax.f32 %v1792_v43, 0.0  ;;  %v9234_v40 = vld [vmem:[#allocation9_spill] sm:$0xff]  ;;  %v9235_v34 = vmax.f32 %v7153_v8, 0.0  ;;  %v1727_v31 = vadd.f32 %v6415_v20, %v1592_v63  ;;  %v5904_v8 = vpop.f32.mrb[62].mxu0 }
 0x1a5   : > { %v7531_v7 = vmax.f32 %v9229_v24, %v1918_v55  ;;  %v7535_v45 = vmax.f32 %v9232_v44, %v1853_v12  ;;  %vm2086_vm1 = vcmp.lt.s32.totalorder %v9234_v40, 1  ;;  %v1791_v33 = vadd.f32 %v6415_v20, %v1656_v1  ;;  %v9237_v24 = vld [vmem:[#allocation23_spill] sm:$0xff]  ;;  %v9240_v12 = vld [vmem:[#allocation24_spill] sm:$0xff]  ;;  %v1198_v15 = vpop.f32.mrb[63].mxu0 }
 0x1a6   : > { %9227 = vst [vmem:[#allocation20_spill] sm:$0xff] %v7524_v49  ;;  %v7540_v49 = vmax.f32 %v9235_v34, %v1917_v41  ;;  %v1595_v55 = vmul.f32 %v6414_v36, %v5901_v56  ;;  %v9241_v54 = vmax.f32 %v9240_v12, 0.0  ;;  %v1659_v44 = vmul.f32 %v6414_v36, %v5997_v3  ;;  %v6000_v41 = vpop.f32.mrb[62].mxu1  ;;  %v9245_v3 = vld [vmem:[#allocation26_spill] sm:$0xff] }
 0x1a7   : > { %9230 = vst [vmem:[#allocation21_spill] sm:$0xff] %v7531_v7  ;;  %9233 = vst [vmem:[#allocation22_spill] sm:$0xff] %v7535_v45  ;;  %v9238_v7 = vmax.f32 %v9237_v24, 0.0  ;;  %v1594_v45 = vmul.f32 %v6414_v36, %v1188_v6  ;;  %v1855_v34 = vmax.f32 %v1727_v31, 0.0  ;;  %v1658_v5 = vmul.f32 %v6414_v36, %v1508_v13  ;;  %v1518_v63 = vpop.f32.mrb[63].mxu1  ;;  %v9243_v24 = vld [vmem:[#allocation25_spill] sm:$0xff] }
 0x1a8   : > { %9236 = vst [vmem:[#allocation9_spill] sm:$0xff] %v7540_v49  ;;  %v7551_v43 = vmax.f32 %v9241_v54, %v1920_v0  ;;  %v1919_v49 = vmax.f32 %v1791_v33, 0.0  ;;  %v1730_v47 = vadd.f32 %v6415_v20, %v1595_v55  ;;  %vm6278_vm2 = vcmp.ne.s32.totalorder %v9234_v40, 0 }
 0x1a9   : > { %v7547_v58 = vmax.f32 %v9238_v7, %v1856_v52  ;;  %v1794_v56 = vadd.f32 %v6415_v20, %v1659_v44  ;;  %v1729_v1 = vadd.f32 %v6415_v20, %v1594_v45  ;;  %v1597_v7 = vmul.f32 %v6414_v36, %v5904_v8  ;;  %vm7635_vm4 = vmpackc.low %vm6492_vm3, %vm6278_vm2 }
 0x1aa   : > { %9242 = vst [vmem:[#allocation24_spill] sm:$0xff] %v7551_v43  ;;  %v1661_v52 = vmul.f32 %v6414_v36, %v6000_v41  ;;  %v9244_v12 = vmax.f32 %v9243_v24, 0.0  ;;  %v9246_v6 = vmax.f32 %v9245_v3, 0.0  ;;  %v1858_v31 = vmax.f32 %v1730_v47, 0.0  ;;  %v9250_v24 = vld [vmem:[#allocation28_spill] sm:$0xff]  ;;  %v9252_v3 = vld [vmem:[#allocation29_spill] sm:$0xff] }
 0x1ab   : > { %9239 = vst [vmem:[#allocation23_spill] sm:$0xff] %v7547_v58  ;;  %v1793_v33 = vadd.f32 %v6415_v20, %v1658_v5  ;;  %v1922_v55 = vmax.f32 %v1794_v56, 0.0  ;;  %v1857_v13 = vmax.f32 %v1729_v1, 0.0  ;;  %v1732_v43 = vadd.f32 %v6415_v20, %v1597_v7  ;;  %v9254_v1 = vld [vmem:[#allocation30_spill] sm:$0xff] }
 0x1ac   : > { %v7556_v0 = vmax.f32 %v9244_v12, %v1855_v34  ;;  %v7560_v54 = vmax.f32 %v9246_v6, %v1919_v49  ;;  %v1796_v58 = vadd.f32 %v6415_v20, %v1661_v52  ;;  %v9249_v19 = vmax.f32 %v9248_v4, 0.0 }
 0x1ad   : > { %v1921_v45 = vmax.f32 %v1793_v33, 0.0  ;;  %v1596_v8 = vmul.f32 %v6414_v36, %v1198_v15  ;;  %v1660_v41 = vmul.f32 %v6414_v36, %v1518_v63  ;;  %v9251_v34 = vmax.f32 %v9250_v24, 0.0  ;;  %v9257_v63 = vld [vmem:[#allocation31_spill] sm:$0xff] }
 0x1ae   : > { %9247 = vst [vmem:[#allocation25_spill] sm:$0xff] %v7560_v54  ;;  %v7564_v44 = vmax.f32 %v9249_v19, %v1858_v31  ;;  %v9253_v49 = vmax.f32 %v9252_v3, 0.0  ;;  %v1860_v5 = vmax.f32 %v1732_v43, 0.0  ;;  %v1924_v47 = vmax.f32 %v1796_v58, 0.0  ;;  %v9263_v3 = vld [vmem:[#allocation35_spill] sm:$0xff] }
 0x1af   : > { %v7568_v12 = vmax.f32 %v9251_v34, %v1922_v55  ;;  %v1891_v56 = vmax.f32 %v7242_v16, 0.0  ;;  %v9255_v7 = vmax.f32 %v9254_v1, 0.0  ;;  %v1731_v19 = vadd.f32 %v6415_v20, %v1596_v8 }
 0x1b0   : > { %v7572_v6 = vmax.f32 %v9253_v49, %v1857_v13  ;;  %v1795_v52 = vadd.f32 %v6415_v20, %v1660_v41  ;;  %v9256_v15 = vmax.f32 %v7202_v62, 0.0  ;;  %v9258_v31 = vmax.f32 %v9257_v63, 0.0 }
 0x1b1   : > { %v7577_v4 = vmax.f32 %v9255_v7, %v1921_v45  ;;  %v7589_v43 = vpack.c.bf16 %v7249_v59, %v7261_v10  ;;  %v2217_v16 = vrot.slane %v7265_v27, 7  ;;  %v1859_v58 = vmax.f32 %v1731_v19, 0.0 }
 0x1b2   : > { %v7581_v36 = vmax.f32 %v9256_v15, %v1860_v5  ;;  %v7585_v33 = vmax.f32 %v9258_v31, %v1924_v47  ;;  %v1923_v55 = vmax.f32 %v1795_v52, 0.0  ;;  %v2218_v13 = vrot.slane %v7255_v51, 7  ;;  %v9265_v47 = vld [vmem:[#allocation32_spill] sm:$0xff] }
 0x1b3   : > { %9259 = vst [vmem:[#allocation26_spill] sm:$0xff] %v7589_v43  ;;  %v2056_v20 = vrot.slane %v7261_v10, 7  ;;  %v9260_v62 = vrot.slane %v7221_v39, 7  ;;  %v9261_v45 = vrot.slane %v7231_v61, 7  ;;  %v9262_v34 = vrot.slane %v7225_v48, 7 }
 0x1b4   : > { %v9010_v41 = vrot.slane %v7581_v36, 7  ;;  %v9011_v24 = vrot.slane %v7585_v33, 7  ;;  %v9264_v49 = vrot.slane %v9263_v3, 7  ;;  %v9266_v1 = vmax.f32 %v9265_v47, 0.0  ;;  %v6342_v47 = vld [vmem:[#allocation5 + $0x100] ss:$8 sps:$4 sm:$0xff]  }
 0x1b5   : > { %v2117_v8 = vsel %vm2086_vm1, %v9261_v45, %v9260_v62  ;;  %v7612_v19 = vmax.f32 %v1891_v56, %v1923_v55  ;;  %v2275_v52 = vsel %vm2086_vm1, %v2217_v16, %v2218_v13  ;;  %v9267_v15 = vmov %v9262_v34  ;;  %v6345_v48 = vld [vmem:[#allocation5 + $0x110] ss:$8 sps:$4 sm:$0xff]  }
 0x1b6   : > { %v2277_v5 = vsel %vm2086_vm1, %v9264_v49, %v9262_v34  ;;  %v7610_v7 = vmax.f32 %v9266_v1, %v1859_v58  ;;  %v2276_v63 = vsel %vm2086_vm1, %v9267_v15, %v2217_v16  ;;  %v9268_v31 = vmov %v9261_v45 }
 0x1b7   : > { %v2118_v62 = vsel %vm2086_vm1, %v9010_v41, %v9268_v31  ;;  %v9269_v58 = vmov %v9264_v49  ;;  %v2633_v55 = vpack.c.bf16 %v2275_v52, %v2276_v63  ;;  %v2057_v45 = vrot.slane %v7249_v59, 7 }
 0x1b8   : > { %v2278_v56 = vsel %vm2086_vm1, %v9011_v24, %v9269_v58  ;;  %v5660_v34 = vpack.c.bf16 %v2117_v8, %v2118_v62  ;;  %v9272_v1 = vrot.slane %v7221_v39, 7  ;;  %v7646_v31 = vpack.c.bf16 %v7283_v38, %v7294_v26  ;;  %v6347_v58 = vld [vmem:[#allocation5 + $0x114] ss:$8 sps:$4 sm:$0xff]  }
 0x1b9   : > { %v5656_v49 = vpack.c.bf16 %v2277_v5, %v2278_v56  ;;  %v2115_v41 = vsel %vm2086_vm1, %v2056_v20, %v2057_v45  ;;  %v2219_v52 = vrot.slane %v7298_v30, 7  ;;  %v2220_v63 = vrot.slane %v7290_v46, 7 }
 0x1ba   : > { %v2116_v15 = vsel %vm2086_vm1, %v9272_v1, %v2056_v20  ;;  %9273 = vst [vmem:[#allocation27_spill] sm:$0xff] %v7646_v31  ;;  %v2058_v8 = vrot.slane %v7294_v26, 7  ;;  %v2059_v62 = vrot.slane %v7283_v38, 7  ;;  %v7660_v56 = vpack.c.bf16 %v7305_v42, %v7321_v18 }
 0x1bb   : > { %5657 = vmatprep.mubr.msk.bf16.mxu1 %vm7635_vm4, %v5656_v49  ;;  %5669 = vmatmul.mubr.msk.bf16.vlgmr.msra.gmra.mrb[64].mxu0 %vm7635_vm4, %v5656_v49  ;;  %v2601_v5 = vpack.c.bf16 %v2115_v41, %v2116_v15  ;;  %v2221_v20 = vrot.slane %v7325_v2, 7  ;;  %v2273_v1 = vsel %vm2086_vm1, %v2219_v52, %v2220_v63  ;;  %v2274_v49 = vsel %vm2086_vm1, %v2218_v13, %v2219_v52  ;;  %v9275_v15 = vld [vmem:[#allocation39_spill] sm:$0xff] }
 0x1bc   : > { %9274 = vst [vmem:[#allocation28_spill] sm:$0xff] %v7660_v56  ;;  %5661 = vmatmul.mubr.msk.bf16.vlgmr.msra.gmra.mrb[64].mxu1 %vm7635_vm4, %v5660_v34  ;;  %4053 = vmatprep.mubr.bf16.mxu0 %v7589_v43  ;;  %v7672_v41 = vsel %vm2086_vm1, %v2057_v45, %v2058_v8  ;;  %v2222_v24 = vrot.slane %v9275_v15, 7  ;;  %v7675_v39 = vpack.c.bf16 %v2273_v1, %v2274_v49  ;;  %v2060_v13 = vrot.slane %v7321_v18, 7  ;;  %v6350_v45 = vld [vmem:[#allocation5 + $0x124] ss:$8 sps:$4 sm:$0xff]  }
 0x1bd   : > { %3546 = vmatpush1.bf16.msra.mxu1 %v6342_v47  ;;  %4205 = vmatpush1.bf16.msra.mxu0 %v6342_v47  ;;  %v7679_v16 = vsel %vm2086_vm1, %v2058_v8, %v2059_v62  ;;  %v2272_v34 = vsel %vm2086_vm1, %v2220_v63, %v2221_v20  ;;  %v2061_v1 = vrot.slane %v7305_v42, 7  ;;  %v7691_v8 = vpack.c.bf16 %v7332_v60, %v7342_v14 }
 0x1be   : > { %3394 = vmatprep.mubr.bf16.mxu1 %v2633_v55  ;;  %3547 = vmatprep.subr.bf16.mxu1 %v6347_v58  ;;  %v2271_v47 = vsel %vm2086_vm1, %v2221_v20, %v2222_v24  ;;  %v7697_v63 = vsel %vm2086_vm1, %v2059_v62, %v2060_v13  ;;  %v2223_v43 = vrot.slane %v7346_v32, 7  ;;  %v2224_v52 = vrot.slane %v7338_v22, 7  ;;  %v6348_v62 = vld [vmem:[#allocation5 + $0x120] ss:$8 sps:$4 sm:$0xff]   ;;  %v6353_v32 = vld [vmem:[#allocation5 + $0x134] ss:$8 sps:$4 sm:$0xff]  }
 0x1bf   : > { %9276 = vst [vmem:[#allocation29_spill] sm:$0xff] %v7691_v8  ;;  %4206 = vmatprep.subr.bf16.mxu0 %v6347_v58  ;;  %v7693_v49 = vpack.c.bf16 %v2271_v47, %v2272_v34  ;;  %v7703_v20 = vsel %vm2086_vm1, %v2060_v13, %v2061_v1  ;;  %v2062_v3 = vrot.slane %v7342_v14, 7  ;;  %v2063_v51 = vrot.slane %v7332_v60, 7 }
 0x1c0   : > { %v7709_v58 = vpack.c.bf16 %v7353_v23, %v7369_v35  ;;  %v2269_v47 = vsel %vm2086_vm1, %v2223_v43, %v2224_v52  ;;  %v2270_v13 = vsel %vm2086_vm1, %v2222_v24, %v2223_v43  ;;  %v2225_v22 = vrot.slane %v7373_v17, 7 }
 0x1c1   : > { %3548 = vmatpush1.bf16.msra.mxu1 %v6345_v48  ;;  %4207 = vmatpush1.bf16.msra.mxu0 %v6345_v48  ;;  %v7718_v15 = vpack.c.bf16 %v2269_v47, %v2270_v13  ;;  %v7722_v48 = vsel %vm2086_vm1, %v2062_v3, %v2063_v51  ;;  %v7726_v34 = vsel %vm2086_vm1, %v2061_v1, %v2062_v3  ;;  %v2226_v2 = vrot.slane %v7357_v28, 7 }
 0x1c2   : > { %9277 = vst [vmem:[#allocation30_spill] sm:$0xff] %v7709_v58  ;;  %3549 = vmatprep.subr.bf16.mxu1 %v6350_v45  ;;  %4208 = vmatprep.subr.bf16.mxu0 %v6350_v45  ;;  %v2268_v24 = vsel %vm2086_vm1, %v2224_v52, %v2225_v22  ;;  %v2064_v45 = vrot.slane %v7369_v35, 7  ;;  %v2065_v47 = vrot.slane %v7353_v23, 7  ;;  %v7740_v1 = vpack.c.bf16 %v7380_v37, %v7390_v25  ;;  %v6351_v52 = vld [vmem:[#allocation5 + $0x130] ss:$8 sps:$4 sm:$0xff]  }
 0x1c3   : > { %4054 = vmatmul.mubr.bf16.gmra.mrb[68].mxu0 %v2633_v55  ;;  %v2267_v3 = vsel %vm2086_vm1, %v2225_v22, %v2226_v2  ;;  %v2227_v55 = vrot.slane %v7394_v50, 7  ;;  %v2228_v13 = vrot.slane %v7386_v53, 7  ;;  %v6356_v50 = vld [vmem:[#allocation5 + $0x144] ss:$8 sps:$4 sm:$0xff]   ;;  %v2067_v28 = vrot.slane %v7380_v37, 7 }
 0x1c4   : > { %3395 = vmatmul.mubr.bf16.gmra.mrb[68].mxu1 %v2601_v5  ;;  %4063 = vmatprep.mubr.bf16.mxu0 %v7646_v31  ;;  %9278 = vst [vmem:[#allocation31_spill] sm:$0xff] %v7740_v1  ;;  %v7745_v43 = vpack.c.bf16 %v2267_v3, %v2268_v24  ;;  %v7749_v5 = vsel %vm2086_vm1, %v2064_v45, %v2065_v47  ;;  %v2066_v31 = vrot.slane %v7390_v25, 7  ;;  %vm2375_vm5 = vcmp.lt.s32.totalorder %v9234_v40, 7 }
 0x1c5   : > { %3404 = vmatprep.mubr.bf16.mxu1 %v7675_v39  ;;  %3550 = vmatpush1.bf16.msra.mxu1 %v6348_v62  ;;  %v7753_v22 = vsel %vm2086_vm1, %v2063_v51, %v2064_v45  ;;  %v2265_v24 = vsel %vm2086_vm1, %v2227_v55, %v2228_v13  ;;  %v2266_v3 = vsel %vm2086_vm1, %v2226_v2, %v2227_v55  ;;  %v2229_v45 = vrot.slane %v7421_v21, 7  ;;  %v9282_v2 = vld [vmem:[#allocation49_spill] sm:$0xff] }
 0x1c6   : > { %4209 = vmatpush1.bf16.msra.mxu0 %v6348_v62  ;;  %3551 = vmatprep.subr.bf16.mxu1 %v6353_v32  ;;  %v7763_v17 = vpack.c.bf16 %v2265_v24, %v2266_v3  ;;  %v7767_v51 = vsel %vm2086_vm1, %v2065_v47, %v2066_v31  ;;  %v7771_v62 = vpack.c.bf16 %v7401_v9, %v7417_v57  ;;  %v2230_v55 = vrot.slane %v9282_v2, 7  ;;  %v6354_v3 = vld [vmem:[#allocation5 + $0x140] ss:$8 sps:$4 sm:$0xff]   ;;  %v6359_v2 = vld [vmem:[#allocation5 + $0x154] ss:$8 sps:$4 sm:$0xff]  }
 0x1c7   : > { %4210 = vmatprep.subr.bf16.mxu0 %v6353_v32  ;;  %9279 = vst [vmem:[#allocation32_spill] sm:$0xff] %v7767_v51  ;;  %v7776_v53 = vsel %vm2086_vm1, %v2066_v31, %v2067_v28  ;;  %v2068_v32 = vrot.slane %v7417_v57, 7  ;;  %v2069_v24 = vrot.slane %v7401_v9, 7  ;;  %v7787_v21 = vpack.c.bf16 %v7428_v11, %v7438_v29  ;;  %v9284_v31 = vld [vmem:[#allocation10_spill] sm:$0xff] }
 0x1c8   : > { %9280 = vst [vmem:[#allocation56_spill] sm:$0xff] %v7771_v62  ;;  %9281 = vst [vmem:[#allocation57_spill] sm:$0xff] %v7776_v53  ;;  %v2264_v62 = vsel %vm2086_vm1, %v2228_v13, %v2229_v45  ;;  %v2231_v37 = vrot.slane %v9284_v31, 7  ;;  %v2263_v9 = vsel %vm2086_vm1, %v2229_v45, %v2230_v55  ;;  %v9287_v13 = vld [vmem:[#allocation52_spill] sm:$0xff]  ;;  %v2070_v31 = vrot.slane %v7438_v29, 7 }
 0x1c9   : > { %3552 = vmatpush1.bf16.msra.mxu1 %v6351_v52  ;;  %9283 = vst [vmem:[#allocation58_spill] sm:$0xff] %v7787_v21  ;;  %v7794_v57 = vsel %vm2086_vm1, %v2068_v32, %v2069_v24  ;;  %v7798_v47 = vsel %vm2086_vm1, %v2067_v28, %v2068_v32  ;;  %v2232_v51 = vrot.slane %v9287_v13, 7  ;;  %v7802_v21 = vpack.c.bf16 %v2263_v9, %v2264_v62  ;;  %v9291_v9 = vld [vmem:[#allocation53_spill] sm:$0xff]  ;;  %v9293_v32 = vld [vmem:[#allocation12_spill] sm:$0xff] }
 0x1ca   : > { %4211 = vmatpush1.bf16.msra.mxu0 %v6351_v52  ;;  %3553 = vmatprep.subr.bf16.mxu1 %v6356_v50  ;;  %9285 = vst [vmem:[#allocation59_spill] sm:$0xff] %v7794_v57  ;;  %9286 = vst [vmem:[#allocation60_spill] sm:$0xff] %v7798_v47  ;;  %v2262_v45 = vsel %vm2086_vm1, %v2230_v55, %v2231_v37  ;;  %v9289_v53 = vpack.c.bf16 %v7679_v16, %v7672_v41  ;;  %v2071_v28 = vrot.slane %v7428_v11, 7  ;;  %v6357_v55 = vld [vmem:[#allocation5 + $0x150] ss:$8 sps:$4 sm:$0xff]  }
 0x1cb   : > { %4064 = vmatmul.mubr.bf16.gmra.mrb[72].mxu0 %v7675_v39  ;;  %4212 = vmatprep.subr.bf16.mxu0 %v6356_v50  ;;  %9288 = vst [vmem:[#allocation61_spill] sm:$0xff] %v7802_v21  ;;  %v2261_v39 = vsel %vm2086_vm1, %v2231_v37, %v2232_v51  ;;  %v9290_v50 = vld [vmem:[#allocation54_spill] sm:$0xff]  ;;  %v2233_v52 = vrot.slane %v9293_v32, 7  ;;  %v9296_v41 = vld [vmem:[#allocation11_spill] sm:$0xff]  ;;  %v9302_v32 = vld [vmem:[#allocation16_spill] sm:$0xff] }
 0x1cc   : > { %3405 = vmatmul.mubr.bf16.gmra.mrb[72].mxu1 %v9289_v53  ;;  %4073 = vmatprep.mubr.bf16.mxu0 %v7660_v56  ;;  %v7818_v62 = vpack.c.bf16 %v9291_v9, %v9290_v50  ;;  %v7822_v47 = vpack.c.bf16 %v2261_v39, %v2262_v45  ;;  %v7826_v53 = vsel %vm2086_vm1, %v2069_v24, %v2070_v31  ;;  %v2234_v37 = vrot.slane %v9296_v41, 7  ;;  %v6362_v56 = vld [vmem:[#allocation5 + $0x164] ss:$8 sps:$4 sm:$0xff]   ;;  %v9298_v39 = vld [vmem:[#allocation15_spill] sm:$0xff]  ;;  %v6360_v41 = vld [vmem:[#allocation5 + $0x160] ss:$8 sps:$4 sm:$0xff]  }
 0x1cd   : > { %3414 = vmatprep.mubr.bf16.mxu1 %v7693_v49  ;;  %3554 = vmatpush1.bf16.msra.mxu1 %v6354_v3  ;;  %9295 = vst [vmem:[#allocation63_spill] sm:$0xff] %v7826_v53  ;;  %v2072_v16 = vrot.slane %v9290_v50, 7  ;;  %v2260_v57 = vsel %vm2086_vm1, %v2232_v51, %v2233_v52  ;;  %v2073_v45 = vrot.slane %v9291_v9, 7  ;;  %v2235_v21 = vrot.slane %v9302_v32, 7 }
 0x1ce   : > { %9292 = vst [vmem:[#allocation54_spill] sm:$0xff] %v7818_v62  ;;  %9294 = vst [vmem:[#allocation62_spill] sm:$0xff] %v7822_v47  ;;  %4213 = vmatpush1.bf16.msra.mxu0 %v6354_v3  ;;  %3555 = vmatprep.subr.bf16.mxu1 %v6359_v2  ;;  %v7832_v62 = vsel %vm2086_vm1, %v2070_v31, %v2071_v28  ;;  %v9299_v47 = vld [vmem:[#allocation13_spill] sm:$0xff]  ;;  %v2259_v3 = vsel %vm2086_vm1, %v2233_v52, %v2234_v37  ;;  %v2074_v13 = vrot.slane %v9298_v39, 7  ;;  %v9310_v52 = vld [vmem:[#allocation55_spill] sm:$0xff] }
 0x1cf   : > { %9297 = vst [vmem:[#allocation64_spill] sm:$0xff] %v7832_v62  ;;  %v7839_v24 = vpack.c.bf16 %v9299_v47, %v9298_v39  ;;  %4214 = vmatprep.subr.bf16.mxu0 %v6359_v2  ;;  %v7847_v31 = vsel %vm2086_vm1, %v2071_v28, %v2072_v16  ;;  %v7850_v51 = vpack.c.bf16 %v2259_v3, %v2260_v57  ;;  %v2075_v53 = vrot.slane %v9299_v47, 7  ;;  %v9306_v57 = vld [vmem:[#allocation19_spill] sm:$0xff]  ;;  %v9307_v3 = vld [vmem:[#allocation17_spill] sm:$0xff] }
 0x1d0   : > { %9301 = vst [vmem:[#allocation13_spill] sm:$0xff] %v7847_v31  ;;  %v7854_v9 = vsel %vm2086_vm1, %v2072_v16, %v2073_v45  ;;  %v2258_v28 = vsel %vm2086_vm1, %v2234_v37, %v2235_v21  ;;  %v6365_v16 = vld [vmem:[#allocation5 + $0x174] ss:$8 sps:$4 sm:$0xff]   ;;  %v2237_v31 = vrot.slane %v9310_v52, 7 }
 0x1d1   : > { %9300 = vst [vmem:[#allocation15_spill] sm:$0xff] %v7839_v24  ;;  %9303 = vst [vmem:[#allocation65_spill] sm:$0xff] %v7850_v51  ;;  %v9305_v24 = vld [vmem:[#allocation14_spill] sm:$0xff]  ;;  %3556 = vmatpush1.bf16.msra.mxu1 %v6357_v55  ;;  %v7865_v51 = vpack.c.bf16 %v9307_v3, %v9306_v57 }
 0x1d2   : > { %9304 = vst [vmem:[#allocation66_spill] sm:$0xff] %v7854_v9  ;;  %v2236_v2 = vrot.slane %v9305_v24, 7  ;;  %4215 = vmatpush1.bf16.msra.mxu0 %v6357_v55  ;;  %3557 = vmatprep.subr.bf16.mxu1 %v6362_v56  ;;  %v7871_v24 = vsel %vm2086_vm1, %v2073_v45, %v2074_v13  ;;  %v9311_v9 = vld [vmem:[#allocation18_spill] sm:$0xff]  ;;  %v7880_v55 = vsel %vm2086_vm1, %v2074_v13, %v2075_v53 }
 0x1d3   : > { %9308 = vst [vmem:[#allocation19_spill] sm:$0xff] %v7865_v51  ;;  %9309 = vst [vmem:[#allocation17_spill] sm:$0xff] %v7871_v24  ;;  %v2238_v37 = vrot.slane %v9311_v9, 7  ;;  %4074 = vmatmul.mubr.bf16.gmra.mrb[76].mxu0 %v7693_v49  ;;  %4216 = vmatprep.subr.bf16.mxu0 %v6362_v56  ;;  %v2076_v51 = vrot.slane %v9306_v57, 7  ;;  %v9314_v45 = vpack.c.bf16 %v7703_v20, %v7697_v63  ;;  %v9321_v24 = vld [vmem:[#allocation20_spill] sm:$0xff] }
 0x1d4   : > { %v2257_v62 = vsel %vm2086_vm1, %v2235_v21, %v2236_v2  ;;  %9313 = vst [vmem:[#allocation67_spill] sm:$0xff] %v7880_v55  ;;  %v2077_v21 = vrot.slane %v9307_v3, 7  ;;  %4083 = vmatprep.mubr.bf16.mxu0 %v7691_v8  ;;  %v2256_v13 = vsel %vm2086_vm1, %v2236_v2, %v2237_v31  ;;  %v9320_v8 = vld [vmem:[#allocation22_spill] sm:$0xff]  ;;  %v2241_v2 = vrot.slane %v7560_v54, 7 }
 0x1d5   : > { %v7876_v32 = vpack.c.bf16 %v2257_v62, %v2258_v28  ;;  %3415 = vmatmul.mubr.bf16.gmra.mrb[76].mxu1 %v9314_v45  ;;  %v2255_v56 = vsel %vm2086_vm1, %v2237_v31, %v2238_v37  ;;  %v9315_v62 = vld [vmem:[#allocation9_spill] sm:$0xff]  ;;  %v7904_v20 = vsel %vm2086_vm1, %v2075_v53, %v2076_v51 }
 0x1d6   : > { %v2239_v28 = vrot.slane %v9315_v62, 7  ;;  %3424 = vmatprep.mubr.bf16.mxu1 %v7718_v15  ;;  %3558 = vmatpush1.bf16.msra.mxu1 %v6360_v41  ;;  %v7896_v9 = vpack.c.bf16 %v2255_v56, %v2256_v13  ;;  %v7900_v63 = vsel %vm2086_vm1, %v2076_v51, %v2077_v21  ;;  %9318 = vst [vmem:[#allocation69_spill] sm:$0xff] %v7904_v20  ;;  %v9319_v45 = vld [vmem:[#allocation21_spill] sm:$0xff]  ;;  %v9323_v51 = vld [vmem:[#allocation23_spill] sm:$0xff] }
 0x1d7   : > { %9312 = vst [vmem:[#allocation55_spill] sm:$0xff] %v7876_v32  ;;  %v6363_v32 = vld [vmem:[#allocation5 + $0x170] ss:$8 sps:$4 sm:$0xff]   ;;  %9317 = vst [vmem:[#allocation68_spill] sm:$0xff] %v7900_v63  ;;  %v2240_v49 = vrot.slane %v9319_v45, 7  ;;  %4217 = vmatpush1.bf16.msra.mxu0 %v6360_v41  ;;  %3559 = vmatprep.subr.bf16.mxu1 %v6365_v16  ;;  %v7911_v56 = vpack.c.bf16 %v9321_v24, %v9320_v8  ;;  %v2079_v41 = vrot.slane %v9321_v24, 7 }
 0x1d8   : > { %9316 = vst [vmem:[#allocation9_spill] sm:$0xff] %v7896_v9  ;;  %v6368_v31 = vld [vmem:[#allocation5 + $0x184] ss:$8 sps:$4 sm:$0xff]   ;;  %v2254_v13 = vsel %vm2086_vm1, %v2238_v37, %v2239_v28  ;;  %v2078_v9 = vrot.slane %v9320_v8, 7  ;;  %4218 = vmatprep.subr.bf16.mxu0 %v6365_v16  ;;  %v7921_v55 = vpack.c.bf16 %v9323_v51, %v7556_v0  ;;  %v9326_v37 = vld [vmem:[#allocation24_spill] sm:$0xff]  ;;  %v2080_v16 = vrot.slane %v7556_v0, 7 }
 0x1d9   : > { %9322 = vst [vmem:[#allocation22_spill] sm:$0xff] %v7911_v56  ;;  %v2253_v53 = vsel %vm2086_vm1, %v2239_v28, %v2240_v49  ;;  %v2242_v63 = vrot.slane %v9326_v37, 7  ;;  %v6366_v28 = vld [vmem:[#allocation5 + $0x180] ss:$8 sps:$4 sm:$0xff]  }
 0x1da   : > { %9324 = vst [vmem:[#allocation20_spill] sm:$0xff] %v7921_v55  ;;  %v7924_v20 = vpack.c.bf16 %v2253_v53, %v2254_v13  ;;  %v7928_v56 = vsel %vm2086_vm1, %v2077_v21, %v2078_v9  ;;  %3560 = vmatpush1.bf16.msra.mxu1 %v6363_v32  ;;  %v7934_v45 = vsel %vm2086_vm1, %v2078_v9, %v2079_v41  ;;  %v2081_v13 = vrot.slane %v9323_v51, 7  ;;  %v6371_v21 = vld [vmem:[#allocation5 + $0x194] ss:$8 sps:$4 sm:$0xff]  }
 0x1db   : > { %v2252_v55 = vsel %vm2086_vm1, %v2240_v49, %v2241_v2  ;;  %v7941_v53 = vpack.c.bf16 %v7564_v44, %v7572_v6  ;;  %4219 = vmatpush1.bf16.msra.mxu0 %v6363_v32  ;;  %3561 = vmatprep.subr.bf16.mxu1 %v6368_v31  ;;  %v2251_v37 = vsel %vm2086_vm1, %v2241_v2, %v2242_v63  ;;  %v2243_v49 = vrot.slane %v7577_v4, 7 }
 0x1dc   : > { %9325 = vst [vmem:[#allocation23_spill] sm:$0xff] %v7924_v20  ;;  %v7949_v9 = vsel %vm2086_vm1, %v2079_v41, %v2080_v16  ;;  %4084 = vmatmul.mubr.bf16.gmra.mrb[80].mxu0 %v7718_v15  ;;  %4220 = vmatprep.subr.bf16.mxu0 %v6368_v31  ;;  %v7953_v54 = vpack.c.bf16 %v2251_v37, %v2252_v55  ;;  %v2244_v20 = vrot.slane %v7568_v12, 7  ;;  %v2083_v31 = vrot.slane %v7564_v44, 7  ;;  %v6369_v37 = vld [vmem:[#allocation5 + $0x190] ss:$8 sps:$4 sm:$0xff]  }
 0x1dd   : > { %9327 = vst [vmem:[#allocation70_spill] sm:$0xff] %v7941_v53  ;;  %9328 = vst [vmem:[#allocation71_spill] sm:$0xff] %v7949_v9  ;;  %v7957_v32 = vsel %vm2086_vm1, %v2080_v16, %v2081_v13  ;;  %v2082_v53 = vrot.slane %v7572_v6, 7  ;;  %v9329_v2 = vpack.c.bf16 %v7722_v48, %v7726_v34  ;;  %4093 = vmatprep.mubr.bf16.mxu0 %v7709_v58  ;;  %v2245_v16 = vrot.slane %v7612_v19, 7 }
 0x1de   : > { %v2250_v55 = vsel %vm2086_vm1, %v2242_v63, %v2243_v49  ;;  %v7972_v41 = vpack.c.bf16 %v7581_v36, %v7610_v7  ;;  %3562 = vmatpush1.bf16.msra.mxu1 %v6366_v28  ;;  %v2249_v34 = vsel %vm2086_vm1, %v2243_v49, %v2244_v20  ;;  %v2084_v63 = vrot.slane %v7610_v7, 7  ;;  %v6372_v49 = vld [vmem:[#allocation5 + $0x1a0] ss:$8 sps:$4 sm:$0xff]  }
 0x1df   : > { %3425 = vmatmul.mubr.bf16.gmra.mrb[80].mxu1 %v9329_v2  ;;  %v7979_v48 = vsel %vm2086_vm1, %v2081_v13, %v2082_v53  ;;  %4221 = vmatpush1.bf16.msra.mxu0 %v6366_v28  ;;  %v6374_v2 = vld [vmem:[#allocation5 + $0x1a4] ss:$8 sps:$4 sm:$0xff]   ;;  %v7983_v15 = vpack.c.bf16 %v2249_v34, %v2250_v55  ;;  %v7987_v58 = vsel %vm2086_vm1, %v2082_v53, %v2083_v31  ;;  %v9331_v13 = vrot.slane %v7585_v33, 7 }
 0x1e0   : > { %9330 = vst [vmem:[#allocation72_spill] sm:$0xff] %v7972_v41  ;;  %3434 = vmatprep.mubr.bf16.mxu1 %v7745_v43  ;;  %3563 = vmatprep.subr.bf16.mxu1 %v6371_v21  ;;  %v2248_v28 = vsel %vm2086_vm1, %v2244_v20, %v2245_v16  ;;  %v9332_v9 = vrot.slane %v7581_v36, 7  ;;  %v9073_v34 = vrot.slane %v7261_v10, 1  ;;  %v2346_v20 = vrot.slane %v7249_v59, 1  ;;  %v9374_v10 = vld [vmem:[#allocation14_spill] sm:$0xff] }
 0x1e1   : > { %4222 = vmatprep.subr.bf16.mxu0 %v6371_v21  ;;  %v2247_v41 = vsel %vm2086_vm1, %v2245_v16, %v9331_v13  ;;  %v8007_v21 = vsel %vm2086_vm1, %v2083_v31, %v2084_v63  ;;  %v6377_v31 = vld [vmem:[#allocation5 + $0x1b4] ss:$8 sps:$4 sm:$0xff]  }
 0x1e2   : > { %v8001_v55 = vsel %vm2086_vm1, %v2084_v63, %v9332_v9  ;;  %v8003_v53 = vpack.c.bf16 %v2247_v41, %v2248_v28  ;;  %9334 = vst [vmem:[#allocation74_spill] sm:$0xff] %v8007_v21  ;;  %3564 = vmatpush1.bf16.msra.mxu1 %v6369_v37  ;;  %v2347_v9 = vrot.slane %v7294_v26, 1  ;;  %v2348_v63 = vrot.slane %v7283_v38, 1 }
 0x1e3   : > { %9333 = vst [vmem:[#allocation73_spill] sm:$0xff] %v8001_v55  ;;  %4223 = vmatpush1.bf16.msra.mxu0 %v6369_v37  ;;  %3565 = vmatprep.subr.bf16.mxu1 %v6374_v2  ;;  %v2349_v28 = vrot.slane %v7321_v18, 1  ;;  %v2404_v26 = vsel %vm2375_vm5, %v9073_v34, %v2346_v20  ;;  %v2350_v37 = vrot.slane %v7305_v42, 1  ;;  %v9335_v38 = vpack.c.bf16 %v7749_v5, %v7753_v22  ;;  %v6375_v42 = vld [vmem:[#allocation5 + $0x1b0] ss:$8 sps:$4 sm:$0xff]   ;;  %v9343_v34 = vld [vmem:[#allocation41_spill] sm:$0xff] }
 0x1e4   : > { %4094 = vmatmul.mubr.bf16.gmra.mrb[84].mxu0 %v7745_v43  ;;  %4224 = vmatprep.subr.bf16.mxu0 %v6374_v2  ;;  %v2403_v59 = vsel %vm2375_vm5, %v2346_v20, %v2347_v9  ;;  %v2402_v2 = vsel %vm2375_vm5, %v2347_v9, %v2348_v63  ;;  %v2351_v41 = vrot.slane %v7342_v14, 1  ;;  %v8044_v5 = vpack.c.bf16 %v7290_v46, %v7298_v30  ;;  %v6380_v9 = vld [vmem:[#allocation5 + $0x1c4] ss:$8 sps:$4 sm:$0xff]  }
 0x1e5   : > { %4103 = vmatprep.mubr.bf16.mxu0 %v7740_v1  ;;  %v8032_v18 = vpack.c.bf16 %v2403_v59, %v2404_v26  ;;  %v2401_v43 = vsel %vm2375_vm5, %v2348_v63, %v2349_v28  ;;  %v2400_v22 = vsel %vm2375_vm5, %v2349_v28, %v2350_v37  ;;  %v2352_v59 = vrot.slane %v7332_v60, 1  ;;  %v9339_v63 = vld [vmem:[#allocation40_spill] sm:$0xff]  ;;  %v9340_v26 = vld [vmem:[#allocation39_spill] sm:$0xff] }
 0x1e6   : > { %3566 = vmatpush1.bf16.msra.mxu1 %v6372_v49  ;;  %v8040_v20 = vpack.c.bf16 %v2401_v43, %v2402_v2  ;;  %9338 = vst [vmem:[#allocation77_spill] sm:$0xff] %v8044_v5  ;;  %v2399_v14 = vsel %vm2375_vm5, %v2350_v37, %v2351_v41  ;;  %v2353_v43 = vrot.slane %v7369_v35, 1  ;;  %v9342_v2 = vld [vmem:[#allocation42_spill] sm:$0xff]  ;;  %v2355_v37 = vrot.slane %v7390_v25, 1  ;;  %v9346_v1 = vld [vmem:[#allocation44_spill] sm:$0xff]  ;;  %v9349_v5 = vld [vmem:[#allocation45_spill] sm:$0xff] }
 0x1e7   : > { %3435 = vmatmul.mubr.bf16.gmra.mrb[84].mxu1 %v9335_v38  ;;  %9336 = vst [vmem:[#allocation75_spill] sm:$0xff] %v8032_v18  ;;  %4225 = vmatpush1.bf16.msra.mxu0 %v6372_v49  ;;  %v8053_v38 = vpack.c.bf16 %v9340_v26, %v9339_v63  ;;  %v8058_v16 = vpack.c.bf16 %v9343_v34, %v9342_v2  ;;  %v2354_v49 = vrot.slane %v7353_v23, 1  ;;  %v2364_v55 = vrot.slane %v9299_v47, 1 }
 0x1e8   : > { %3444 = vmatprep.mubr.bf16.mxu1 %v7763_v17  ;;  %9337 = vst [vmem:[#allocation76_spill] sm:$0xff] %v8040_v20  ;;  %3567 = vmatprep.subr.bf16.mxu1 %v6377_v31  ;;  %v8060_v28 = vpack.c.bf16 %v2399_v14, %v2400_v22  ;;  %v2398_v60 = vsel %vm2375_vm5, %v2351_v41, %v2352_v59  ;;  %v2356_v20 = vrot.slane %v9349_v5, 1  ;;  %v6378_v22 = vld [vmem:[#allocation5 + $0x1c0] ss:$8 sps:$4 sm:$0xff]   ;;  %v9352_v41 = vld [vmem:[#allocation47_spill] sm:$0xff]  ;;  %v2367_v47 = vrot.slane %v9320_v8, 1 }
 0x1e9   : > { %9341 = vst [vmem:[#allocation40_spill] sm:$0xff] %v8053_v38  ;;  %9344 = vst [vmem:[#allocation39_spill] sm:$0xff] %v8058_v16  ;;  %4226 = vmatprep.subr.bf16.mxu0 %v6377_v31  ;;  %v2397_v13 = vsel %vm2375_vm5, %v2352_v59, %v2353_v43  ;;  %v9347_v38 = vld [vmem:[#allocation43_spill] sm:$0xff]  ;;  %v9350_v16 = vld [vmem:[#allocation50_spill] sm:$0xff]  ;;  %v2395_v23 = vsel %vm2375_vm5, %v2354_v49, %v2355_v37  ;;  %v2396_v25 = vsel %vm2375_vm5, %v2353_v43, %v2354_v49 }
 0x1ea   : > { %9345 = vst [vmem:[#allocation42_spill] sm:$0xff] %v8060_v28  ;;  %v8070_v35 = vpack.c.bf16 %v9347_v38, %v9346_v1  ;;  %v2357_v31 = vrot.slane %v9350_v16, 1  ;;  %3568 = vmatpush1.bf16.msra.mxu1 %v6375_v42  ;;  %v8074_v14 = vpack.c.bf16 %v2397_v13, %v2398_v60  ;;  %v9353_v59 = vld [vmem:[#allocation46_spill] sm:$0xff]  ;;  %v8084_v5 = vpack.c.bf16 %v2395_v23, %v2396_v25  ;;  %v9356_v60 = vld [vmem:[#allocation48_spill] sm:$0xff]  ;;  %v9361_v25 = vld [vmem:[#allocation57_spill] sm:$0xff] }
 0x1eb   : > { %v8082_v28 = vpack.c.bf16 %v9353_v59, %v9352_v41  ;;  %4227 = vmatpush1.bf16.msra.mxu0 %v6375_v42  ;;  %3569 = vmatprep.subr.bf16.mxu1 %v6380_v9  ;;  %v2394_v13 = vsel %vm2375_vm5, %v2355_v37, %v2356_v20  ;;  %v2359_v49 = vrot.slane %v7438_v29, 1  ;;  %v9358_v42 = vld [vmem:[#allocation51_spill] sm:$0xff]  ;;  %v2360_v23 = vrot.slane %v7428_v11, 1  ;;  %v9365_v37 = vld [vmem:[#allocation10_spill] sm:$0xff] }
 0x1ec   : > { %9348 = vst [vmem:[#allocation41_spill] sm:$0xff] %v8070_v35  ;;  %9351 = vst [vmem:[#allocation44_spill] sm:$0xff] %v8074_v14  ;;  %v6383_v35 = vld [vmem:[#allocation5 + $0x1d4] ss:$8 sps:$4 sm:$0xff]   ;;  %v2393_v16 = vsel %vm2375_vm5, %v2356_v20, %v2357_v31  ;;  %v2358_v14 = vrot.slane %v9356_v60, 1  ;;  %4104 = vmatmul.mubr.bf16.gmra.mrb[88].mxu0 %v7763_v17  ;;  %4228 = vmatprep.subr.bf16.mxu0 %v6380_v9  ;;  %v2361_v9 = vrot.slane %v9290_v50, 1 }
 0x1ed   : > { %9354 = vst [vmem:[#allocation43_spill] sm:$0xff] %v8082_v28  ;;  %9355 = vst [vmem:[#allocation45_spill] sm:$0xff] %v8084_v5  ;;  %v8092_v43 = vpack.c.bf16 %v2393_v16, %v2394_v13  ;;  %v9359_v28 = vld [vmem:[#allocation49_spill] sm:$0xff]  ;;  %v9362_v5 = vld [vmem:[#allocation32_spill] sm:$0xff] }
 0x1ee   : > { %v8097_v18 = vpack.c.bf16 %v9359_v28, %v9358_v42  ;;  %v9363_v21 = vpack.c.bf16 %v9361_v25, %v9362_v5  ;;  %v9364_v20 = vld [vmem:[#allocation56_spill] sm:$0xff]  ;;  %v2392_v17 = vsel %vm2375_vm5, %v2357_v31, %v2358_v14  ;;  %v9368_v13 = vld [vmem:[#allocation53_spill] sm:$0xff]  ;;  %3570 = vmatpush1.bf16.msra.mxu1 %v6378_v22  ;;  %v2390_v5 = vsel %vm2375_vm5, %v2359_v49, %v2360_v23  ;;  %v9371_v50 = vld [vmem:[#allocation11_spill] sm:$0xff] }
 0x1ef   : > { %9357 = vst [vmem:[#allocation50_spill] sm:$0xff] %v8092_v43  ;;  %4113 = vmatprep.mubr.bf16.mxu0 %v9364_v20  ;;  %v9366_v16 = vld [vmem:[#allocation52_spill] sm:$0xff]  ;;  %v2362_v60 = vrot.slane %v9368_v13, 1  ;;  %v2363_v31 = vrot.slane %v9298_v39, 1  ;;  %4229 = vmatpush1.bf16.msra.mxu0 %v6378_v22  ;;  %v2389_v43 = vsel %vm2375_vm5, %v2360_v23, %v2361_v9  ;;  %v2365_v22 = vrot.slane %v9306_v57, 1  ;;  %v9376_v57 = vld [vmem:[#allocation18_spill] sm:$0xff] }
 0x1f0   : > { %9360 = vst [vmem:[#allocation47_spill] sm:$0xff] %v8097_v18  ;;  %3445 = vmatmul.mubr.bf16.gmra.mrb[88].mxu1 %v9363_v21  ;;  %v8109_v29 = vpack.c.bf16 %v9366_v16, %v9365_v37  ;;  %v9369_v18 = vld [vmem:[#allocation61_spill] sm:$0xff]  ;;  %v6381_v11 = vld [vmem:[#allocation5 + $0x1d0] ss:$8 sps:$4 sm:$0xff]   ;;  %v2391_v21 = vsel %vm2375_vm5, %v2358_v14, %v2359_v49  ;;  %3571 = vmatprep.subr.bf16.mxu1 %v6383_v35 }
 0x1f1   : > { %3454 = vmatprep.mubr.bf16.mxu1 %v9369_v18  ;;  %v9370_v25 = vld [vmem:[#allocation12_spill] sm:$0xff]  ;;  %v8122_v13 = vpack.c.bf16 %v2391_v21, %v2392_v17  ;;  %v2388_v14 = vsel %vm2375_vm5, %v2361_v9, %v2362_v60  ;;  %4230 = vmatprep.subr.bf16.mxu0 %v6383_v35  ;;  %v8129_v49 = vpack.c.bf16 %v2389_v43, %v2390_v5  ;;  %v2366_v9 = vrot.slane %v9307_v3, 1  ;;  %v6384_v35 = vld [vmem:[#allocation5 + $0x1e0] ss:$8 sps:$4 sm:$0xff]  }
 0x1f2   : > { %9367 = vst [vmem:[#allocation46_spill] sm:$0xff] %v8109_v29  ;;  %v8120_v20 = vpack.c.bf16 %v9371_v50, %v9370_v25  ;;  %v6386_v29 = vld [vmem:[#allocation5 + $0x1e4] ss:$8 sps:$4 sm:$0xff]   ;;  %v2387_v39 = vsel %vm2375_vm5, %v2362_v60, %v2363_v31  ;;  %v2386_v23 = vsel %vm2375_vm5, %v2363_v31, %v2364_v55  ;;  %3572 = vmatpush1.bf16.msra.mxu1 %v6381_v11  ;;  %v2368_v5 = vrot.slane %v9321_v24, 1  ;;  %v6389_v31 = vld [vmem:[#allocation5 + $0x1f4] ss:$8 sps:$4 sm:$0xff]  }
 0x1f3   : > { %v8138_v21 = vpack.c.bf16 %v2387_v39, %v2388_v14  ;;  %v2385_v43 = vsel %vm2375_vm5, %v2364_v55, %v2365_v22  ;;  %v8148_v60 = vpack.c.bf16 %v9376_v57, %v9310_v52  ;;  %v2369_v14 = vrot.slane %v7556_v0, 1  ;;  %4231 = vmatpush1.bf16.msra.mxu0 %v6381_v11  ;;  %3573 = vmatprep.subr.bf16.mxu1 %v6386_v29 }
 0x1f4   : > { %9372 = vst [vmem:[#allocation48_spill] sm:$0xff] %v8120_v20  ;;  %v9373_v20 = vld [vmem:[#allocation16_spill] sm:$0xff]  ;;  %v8152_v39 = vpack.c.bf16 %v2385_v43, %v2386_v23  ;;  %v2383_v8 = vsel %vm2375_vm5, %v2366_v9, %v2367_v47  ;;  %v2384_v3 = vsel %vm2375_vm5, %v2365_v22, %v2366_v9  ;;  %v2370_v55 = vrot.slane %v9323_v51, 1  ;;  %4114 = vmatmul.mubr.bf16.gmra.mrb[92].mxu0 %v9369_v18  ;;  %v9380_v23 = vld [vmem:[#allocation59_spill] sm:$0xff]  ;;  %v9383_v22 = vld [vmem:[#allocation58_spill] sm:$0xff] }
 0x1f5   : > { %v8136_v17 = vpack.c.bf16 %v9374_v10, %v9373_v20  ;;  %9377 = vst [vmem:[#allocation49_spill] sm:$0xff] %v8148_v60  ;;  %4232 = vmatprep.subr.bf16.mxu0 %v6386_v29  ;;  %v8160_v60 = vpack.c.bf16 %v2383_v8, %v2384_v3  ;;  %v2381_v0 = vsel %vm2375_vm5, %v2368_v5, %v2369_v14  ;;  %v2371_v11 = vrot.slane %v7572_v6, 1  ;;  %v9381_v43 = vld [vmem:[#allocation60_spill] sm:$0xff]  ;;  %v9385_v18 = vld [vmem:[#allocation21_spill] sm:$0xff] }
 0x1f6   : > { %9378 = vst [vmem:[#allocation57_spill] sm:$0xff] %v8152_v39  ;;  %v2382_v24 = vsel %vm2375_vm5, %v2367_v47, %v2368_v5  ;;  %4123 = vmatprep.mubr.bf16.mxu0 %v9383_v22  ;;  %v8175_v29 = vpack.c.bf16 %v9385_v18, %v9315_v62  ;;  %v2380_v9 = vsel %vm2375_vm5, %v2369_v14, %v2370_v55  ;;  %v2372_v8 = vrot.slane %v7564_v44, 1  ;;  %v9387_v47 = vld [vmem:[#allocation62_spill] sm:$0xff]  ;;  %v6387_v6 = vld [vmem:[#allocation5 + $0x1f0] ss:$8 sps:$4 sm:$0xff]   ;;  %v9388_v5 = vld [vmem:[#allocation25_spill] sm:$0xff] }
 0x1f7   : > { %9375 = vst [vmem:[#allocation51_spill] sm:$0xff] %v8136_v17  ;;  %9379 = vst [vmem:[#allocation32_spill] sm:$0xff] %v8160_v60  ;;  %v9382_v17 = vpack.c.bf16 %v9380_v23, %v9381_v43  ;;  %v8171_v51 = vpack.c.bf16 %v2381_v0, %v2382_v24  ;;  %3574 = vmatpush1.bf16.msra.mxu1 %v6384_v35  ;;  %v9389_v3 = vld [vmem:[#allocation24_spill] sm:$0xff]  ;;  %v2373_v24 = vrot.slane %v7610_v7, 1  ;;  %4233 = vmatpush1.bf16.msra.mxu0 %v6384_v35  ;;  %v6392_v44 = vld [vmem:[#allocation5 + $0x204] ss:$8 sps:$4 sm:$0xff]  }
 0x1f8   : > { %9386 = vst [vmem:[#allocation52_spill] sm:$0xff] %v8175_v29  ;;  %v8185_v0 = vpack.c.bf16 %v9389_v3, %v9388_v5  ;;  %v8190_v23 = vpack.c.bf16 %v7568_v12, %v7577_v4  ;;  %3575 = vmatprep.subr.bf16.mxu1 %v6389_v31  ;;  %v2378_v43 = vsel %vm2375_vm5, %v2371_v11, %v2372_v8  ;;  %v9394_v29 = vrot.slane %v7581_v36, 1  ;;  %v9395_v7 = vld [vmem:[#allocation36_spill] sm:$0xff] }
 0x1f9   : > { %3455 = vmatmul.mubr.bf16.gmra.mrb[92].mxu1 %v9382_v17  ;;  %9384 = vst [vmem:[#allocation10_spill] sm:$0xff] %v8171_v51  ;;  %v2379_v17 = vsel %vm2375_vm5, %v2370_v55, %v2371_v11  ;;  %v9393_v55 = vrot.slane %v7231_v61, 1  ;;  %v2507_v51 = vrot.slane %v9395_v7, 1  ;;  %4234 = vmatprep.subr.bf16.mxu0 %v6389_v31  ;;  %v2377_v35 = vsel %vm2375_vm5, %v2372_v8, %v2373_v24 }
 0x1fa   : > { %3464 = vmatprep.mubr.bf16.mxu1 %v9387_v47  ;;  %9390 = vst [vmem:[#allocation53_spill] sm:$0xff] %v8185_v0  ;;  %9391 = vst [vmem:[#allocation61_spill] sm:$0xff] %v8190_v23  ;;  %v8192_v14 = vpack.c.bf16 %v2379_v17, %v2380_v9  ;;  %v9396_v23 = vmov %v9394_v29  ;;  %v9397_v17 = vld [vmem:[#allocation35_spill] sm:$0xff]  ;;  %v2508_v39 = vrot.slane %v7298_v30, 1  ;;  %v9398_v31 = vrot.slane %v7265_v27, 1 }
 0x1fb   : > { %v2407_v0 = vsel %vm2375_vm5, %v9394_v29, %v9393_v55  ;;  %v2376_v9 = vsel %vm2375_vm5, %v2373_v24, %v9396_v23  ;;  %v9101_v11 = vrot.slane %v9397_v17, 1  ;;  %v2535_v29 = vrot.slane %v7585_v33, 1  ;;  %3576 = vmatpush1.bf16.msra.mxu1 %v6387_v6  ;;  %4235 = vmatpush1.bf16.msra.mxu0 %v6387_v6  ;;  %v9399_v6 = vld [vmem:[#allocation64_spill] sm:$0xff] }
 0x1fc   : > { %9392 = vst [vmem:[#allocation12_spill] sm:$0xff] %v8192_v14  ;;  %v8210_v14 = vpack.c.bf16 %v2377_v35, %v2378_v43  ;;  %v8212_v60 = vpack.c.bf16 %v2407_v0, %v2376_v9  ;;  %v8220_v8 = vsel %vm2375_vm5, %v9398_v31, %v2507_v51  ;;  %v2509_v36 = vrot.slane %v7290_v46, 1  ;;  %3738 = vmatprep.subr.bf16.mxu1 %v6392_v44  ;;  %v9405_v9 = vld [vmem:[#allocation13_spill] sm:$0xff] }
 0x1fd   : > { %v2510_v24 = vrot.slane %v9339_v63, 1  ;;  %v8226_v0 = vsel %vm2375_vm5, %v2507_v51, %v2508_v39  ;;  %v2511_v30 = vrot.slane %v9340_v26, 1  ;;  %v2512_v23 = vrot.slane %v9342_v2, 1  ;;  %4124 = vmatmul.mubr.bf16.gmra.mrb[96].mxu0 %v9387_v47  ;;  %4397 = vmatprep.subr.bf16.mxu0 %v6392_v44  ;;  %v9400_v2 = vld [vmem:[#allocation63_spill] sm:$0xff]  ;;  %v9414_v46 = vld [vmem:[#allocation9_spill] sm:$0xff] }
 0x1fe   : > { %v2513_v43 = vrot.slane %v9343_v34, 1  ;;  %v8240_v51 = vsel %vm2375_vm5, %v2508_v39, %v2509_v36  ;;  %v2514_v26 = vrot.slane %v9346_v1, 1  ;;  %v9401_v55 = vpack.c.bf16 %v9399_v6, %v9400_v2  ;;  %v9402_v34 = vld [vmem:[#allocation54_spill] sm:$0xff]  ;;  %v9403_v1 = vld [vmem:[#allocation65_spill] sm:$0xff] }
 0x1ff   : > { %v8236_v63 = vsel %vm2375_vm5, %v2509_v36, %v2510_v24  ;;  %4133 = vmatprep.mubr.bf16.mxu0 %v9402_v34  ;;  %v8251_v44 = vsel %vm2375_vm5, %v2511_v30, %v2512_v23  ;;  %v8255_v35 = vsel %vm2375_vm5, %v2510_v24, %v2511_v30  ;;  %v2515_v39 = vrot.slane %v9347_v38, 1 }
 0x200   : > { %v8263_v31 = vsel %vm2375_vm5, %v2513_v43, %v2514_v26  ;;  %v8267_v36 = vsel %vm2375_vm5, %v2512_v23, %v2513_v43  ;;  %v2516_v6 = vrot.slane %v9352_v41, 1  ;;  %v2517_v30 = vrot.slane %v9353_v59, 1 }
 0x201   : > { %3465 = vmatmul.mubr.bf16.gmra.mrb[96].mxu1 %v9401_v55  ;;  %v8274_v38 = vsel %vm2375_vm5, %v2514_v26, %v2515_v39  ;;  %v2518_v2 = vrot.slane %v9358_v42, 1  ;;  %v2519_v23 = vrot.slane %v9359_v28, 1  ;;  %v2520_v43 = vrot.slane %v9365_v37, 1 }
 0x202   : > { %3474 = vmatprep.mubr.bf16.mxu1 %v9403_v1  ;;  %v8280_v55 = vsel %vm2375_vm5, %v2515_v39, %v2516_v6  ;;  %v2521_v41 = vrot.slane %v9366_v16, 1  ;;  %v8293_v59 = vsel %vm2375_vm5, %v2516_v6, %v2517_v30  ;;  %v2522_v42 = vrot.slane %v9370_v25, 1  ;;  %v9404_v6 = vld [vmem:[#allocation66_spill] sm:$0xff] }
 0x203   : > { %v8289_v26 = vsel %vm2375_vm5, %v2517_v30, %v2518_v2  ;;  %v8300_v37 = vsel %vm2375_vm5, %v2519_v23, %v2520_v43  ;;  %v8304_v16 = vsel %vm2375_vm5, %v2518_v2, %v2519_v23  ;;  %v2523_v30 = vrot.slane %v9371_v50, 1 }
 0x204   : > { %v8308_v39 = vsel %vm2375_vm5, %v2520_v43, %v2521_v41  ;;  %v8314_v25 = vsel %vm2375_vm5, %v2521_v41, %v2522_v42  ;;  %v2524_v28 = vrot.slane %v9373_v20, 1  ;;  %v2525_v23 = vrot.slane %v9374_v10, 1  ;;  %v9407_v41 = vld [vmem:[#allocation15_spill] sm:$0xff] }
 0x205   : > { %4134 = vmatmul.mubr.bf16.gmra.mrb[100].mxu0 %v9403_v1  ;;  %v2526_v43 = vrot.slane %v9310_v52, 1  ;;  %v2527_v24 = vrot.slane %v9376_v57, 1  ;;  %v9406_v47 = vpack.c.bf16 %v9404_v6, %v9405_v9  ;;  %v8334_v50 = vsel %vm2375_vm5, %v2522_v42, %v2523_v30  ;;  %v9408_v1 = vld [vmem:[#allocation55_spill] sm:$0xff] }
 0x206   : > { %4143 = vmatprep.mubr.bf16.mxu0 %v9407_v41  ;;  %v8330_v20 = vsel %vm2375_vm5, %v2523_v30, %v2524_v28  ;;  %v2528_v10 = vrot.slane %v9315_v62, 1  ;;  %v2529_v52 = vrot.slane %v9385_v18, 1  ;;  %v8347_v9 = vsel %vm2375_vm5, %v2524_v28, %v2525_v23 }
 0x207   : > { %v8351_v42 = vsel %vm2375_vm5, %v2526_v43, %v2527_v24  ;;  %v2530_v6 = vrot.slane %v9388_v5, 1  ;;  %v2533_v57 = vrot.slane %v7568_v12, 1  ;;  %v8380_v5 = vsel %vm2375_vm5, %v2535_v29, %v9101_v11 }
 0x208   : > { %v8357_v18 = vsel %vm2375_vm5, %v2527_v24, %v2528_v10  ;;  %v8362_v30 = vsel %vm2375_vm5, %v2528_v10, %v2529_v52  ;;  %v2534_v24 = vrot.slane %v7612_v19, 1 }
 0x209   : > { %3475 = vmatmul.mubr.bf16.gmra.mrb[100].mxu1 %v9406_v47  ;;  %v8343_v47 = vsel %vm2375_vm5, %v2525_v23, %v2526_v43  ;;  %v2531_v23 = vrot.slane %v9389_v3, 1  ;;  %v2532_v43 = vrot.slane %v7577_v4, 1  ;;  %v8371_v62 = vsel %vm2375_vm5, %v2529_v52, %v2530_v6  ;;  %v9411_v52 = vld [vmem:[#allocation17_spill] sm:$0xff] }
 0x20a   : > { %3484 = vmatprep.mubr.bf16.mxu1 %v9408_v1  ;;  %v8400_v28 = vsel %vm2375_vm5, %v2533_v57, %v2534_v24  ;;  %v8406_v3 = vsel %vm2375_vm5, %v2534_v24, %v2535_v29  ;;  %v9415_v29 = vld [vmem:[#allocation68_spill] sm:$0xff]  ;;  %v9416_v24 = vld [vmem:[#allocation69_spill] sm:$0xff] }
 0x20b   : > { %v8386_v12 = vsel %vm2375_vm5, %v2531_v23, %v2532_v43  ;;  %v8390_v4 = vsel %vm2375_vm5, %v2530_v6, %v2531_v23  ;;  %v8394_v10 = vsel %vm2375_vm5, %v2532_v43, %v2533_v57  ;;  %9409 = vst [vmem:[#allocation11_spill] sm:$0xff] %v8406_v3  ;;  %v9410_v43 = vld [vmem:[#allocation67_spill] sm:$0xff]  ;;  %v9417_v11 = vpack.c.bf16 %v9415_v29, %v9416_v24  ;;  %v9428_v29 = vld [vmem:[#allocation37_spill] sm:$0xff]  ;;  %v9433_v23 = vld [vmem:[#allocation74_spill] sm:$0xff] }
 0x20c   : > { %v9412_v2 = vpack.c.bf16 %v9410_v43, %v9411_v52  ;;  %v9413_v57 = vld [vmem:[#allocation19_spill] sm:$0xff]  ;;  %v9420_v52 = vpack.c.bf16 %v7934_v45, %v7928_v56  ;;  %v9425_v45 = vpack.c.bf16 %v7987_v58, %v7979_v48  ;;  %v9426_v56 = vld [vmem:[#allocation72_spill] sm:$0xff]  ;;  %v9429_v24 = vrot.slane %v9428_v29, 1  ;;  %v6390_v29 = vld [vmem:[#allocation5 + $0x200] ss:$8 sps:$4 sm:$0xff]  }
 0x20d   : > { %4144 = vmatmul.mubr.bf16.gmra.mrb[104].mxu0 %v9408_v1  ;;  %v9418_v1 = vld [vmem:[#allocation22_spill] sm:$0xff]  ;;  %v9419_v6 = vld [vmem:[#allocation23_spill] sm:$0xff] }
 0x20e   : > { %4153 = vmatprep.mubr.bf16.mxu0 %v9413_v57  ;;  %v6411_v3 = vld [vmem:[#allocation5 + $0x270] ss:$8 sps:$4 sm:$0xff]  }
 0x211   : > { %3485 = vmatmul.mubr.bf16.gmra.mrb[104].mxu1 %v9412_v2  ;;  %v9421_v2 = vld [vmem:[#allocation20_spill] sm:$0xff] }
 0x212   : > { %3494 = vmatprep.mubr.bf16.mxu1 %v9414_v46 }
 0x215   : > { %4154 = vmatmul.mubr.bf16.gmra.mrb[108].mxu0 %v9414_v46  ;;  %v9422_v46 = vld [vmem:[#allocation71_spill] sm:$0xff] }
 0x216   : > { %4163 = vmatprep.mubr.bf16.mxu0 %v9418_v1  ;;  %v9423_v43 = vpack.c.bf16 %v7957_v32, %v9422_v46  ;;  %v9431_v46 = vld [vmem:[#allocation34_spill] sm:$0xff] }
 0x219   : > { %3495 = vmatmul.mubr.bf16.gmra.mrb[108].mxu1 %v9417_v11  ;;  %v9424_v11 = vld [vmem:[#allocation70_spill] sm:$0xff] }
 0x21a   : > { %3504 = vmatprep.mubr.bf16.mxu1 %v9419_v6 }
 0x21d   : > { %4164 = vmatmul.mubr.bf16.gmra.mrb[112].mxu0 %v9419_v6  ;;  %v8442_v6 = vadd.s32 248, %v9234_v40 }
 0x21e   : > { %4173 = vmatprep.mubr.bf16.mxu0 %v9421_v2 }
 0x21f   : > { %vm6279_vm6 = vcmp.ne.s32.totalorder %v8442_v6, 255  ;;  %v6493_v6 = vmov 0  }
 0x220   : > { %vm8520_vm7 = vmpackc.low %vm6279_vm6, %vm6492_vm3 }
 0x221   : > { %3505 = vmatmul.mubr.bf16.gmra.mrb[112].mxu1 %v9420_v52 }
 0x222   : > { %3514 = vmatprep.mubr.bf16.mxu1 %v7953_v54 }
 0x225   : > { %4174 = vmatmul.mubr.bf16.gmra.mrb[116].mxu0 %v7953_v54  ;;  %v9427_v54 = vld [vmem:[#allocation33_spill] sm:$0xff] }
 0x226   : > { %4183 = vmatprep.mubr.bf16.mxu0 %v9424_v11  ;;  %v2344_v32 = vrot.slane %v9427_v54, 1 }
 0x228   : > { %v2405_v52 = vsel %vm2375_vm5, %v2344_v32, %v9429_v24  ;;  %v6395_v24 = vld [vmem:[#allocation5 + $0x214] ss:$8 sps:$4 sm:$0xff]  }
 0x229   : > { %3515 = vmatmul.mubr.bf16.gmra.mrb[116].mxu1 %v9423_v43  ;;  %v2696_v43 = vpack.c.bf16 %v9431_v46, %v9397_v17 }
 0x22a   : > { %3524 = vmatprep.mubr.bf16.mxu1 %v7983_v15 }
 0x22d   : > { %4184 = vmatmul.mubr.bf16.gmra.mrb[120].mxu0 %v7983_v15  ;;  %v9430_v15 = vrot.slane %v7231_v61, 1  ;;  %v9435_v61 = vld [vmem:[#allocation38_spill] sm:$0xff] }
 0x22e   : > { %4193 = vmatprep.mubr.bf16.mxu0 %v9426_v56 }
 0x22f   : > { %v2406_v58 = vsel %vm2375_vm5, %v9430_v15, %v2344_v32  ;;  %v9436_v32 = vld [vmem:[#allocation75_spill] sm:$0xff]  ;;  %v6396_v15 = vld [vmem:[#allocation5 + $0x220] ss:$8 sps:$4 sm:$0xff]  }
 0x230   : > { %v8454_v48 = vpack.c.bf16 %v2405_v52, %v2406_v58  ;;  %v6393_v52 = vld [vmem:[#allocation5 + $0x210] ss:$8 sps:$4 sm:$0xff]   ;;  %v6401_v58 = vld [vmem:[#allocation5 + $0x234] ss:$8 sps:$4 sm:$0xff]  }
 0x231   : > { %3525 = vmatmul.mubr.bf16.gmra.mrb[120].mxu1 %v9425_v45  ;;  %v9432_v45 = vld [vmem:[#allocation73_spill] sm:$0xff] }
 0x232   : > { %3534 = vmatprep.mubr.bf16.mxu1 %v8003_v53  ;;  %v9434_v54 = vpack.c.bf16 %v9432_v45, %v9433_v23  ;;  %v6398_v23 = vld [vmem:[#allocation5 + $0x224] ss:$8 sps:$4 sm:$0xff]   ;;  %v9438_v45 = vld [vmem:[#allocation76_spill] sm:$0xff] }
 0x235   : > { %4194 = vmatmul.mubr.bf16.gmra.mrb[124].mxu0 %v8003_v53  ;;  %v2697_v53 = vpack.c.bf16 %v9395_v7, %v7265_v27  ;;  %v6399_v7 = vld [vmem:[#allocation5 + $0x230] ss:$8 sps:$4 sm:$0xff]  }
 0x236   : > { %4236 = vmatprep.mubr.bf16.mxu0 %v8454_v48 }
 0x239   : > { %3535 = vmatmul.mubr.bf16.gmra.mrb[124].mxu1 %v9434_v54  ;;  %v9439_v54 = vld [vmem:[#allocation77_spill] sm:$0xff] }
 0x23a   : > { %3577 = vmatprep.mubr.bf16.mxu1 %v2696_v43 }
 0x23d   : > { %4237 = vmatmul.mubr.bf16.vlgmr.msra.gmra.mrb[64].mxu0 %v2696_v43  ;;  %v9437_v43 = vld [vmem:[#allocation26_spill] sm:$0xff] }
 0x23e   : > { %4246 = vmatprep.mubr.bf16.mxu0 %v9436_v32  ;;  %4398 = vmatpush1.bf16.msra.mxu0 %v6390_v29 }
 0x23f   : > { %4399 = vmatprep.subr.bf16.mxu0 %v6395_v24 }
 0x241   : > { %3578 = vmatmul.mubr.bf16.vlgmr.msra.gmra.mrb[64].mxu1 %v9435_v61  ;;  %v6407_v61 = vld [vmem:[#allocation5 + $0x254] ss:$8 sps:$4 sm:$0xff]  }
 0x242   : > { %3739 = vmatpush1.bf16.msra.mxu1 %v6390_v29  ;;  %3587 = vmatprep.mubr.bf16.mxu1 %v2697_v53  ;;  %v6404_v29 = vld [vmem:[#allocation5 + $0x244] ss:$8 sps:$4 sm:$0xff]  }
 0x243   : > { %3740 = vmatprep.subr.bf16.mxu1 %v6395_v24  ;;  %4400 = vmatpush1.bf16.msra.mxu0 %v6393_v52  ;;  %v6402_v24 = vld [vmem:[#allocation5 + $0x240] ss:$8 sps:$4 sm:$0xff]  }
 0x244   : > { %4401 = vmatprep.subr.bf16.mxu0 %v6398_v23 }
 0x245   : > { %4247 = vmatmul.mubr.bf16.gmra.mrb[68].mxu0 %v2697_v53  ;;  %v9440_v53 = vld [vmem:[#allocation27_spill] sm:$0xff] }
 0x246   : > { %3741 = vmatpush1.bf16.msra.mxu1 %v6393_v52  ;;  %4256 = vmatprep.mubr.bf16.mxu0 %v9438_v45  ;;  %v9441_v52 = vld [vmem:[#allocation42_spill] sm:$0xff] }
 0x247   : > { %3742 = vmatprep.subr.bf16.mxu1 %v6398_v23  ;;  %4402 = vmatpush1.bf16.msra.mxu0 %v6396_v15  ;;  %v9442_v23 = vld [vmem:[#allocation40_spill] sm:$0xff] }
 0x248   : > { %4403 = vmatprep.subr.bf16.mxu0 %v6401_v58 }
 0x249   : > { %3588 = vmatmul.mubr.bf16.gmra.mrb[68].mxu1 %v9437_v43  ;;  %v6405_v43 = vld [vmem:[#allocation5 + $0x250] ss:$8 sps:$4 sm:$0xff]  }
 0x24a   : > { %3597 = vmatprep.mubr.bf16.mxu1 %v9439_v54  ;;  %3743 = vmatpush1.bf16.msra.mxu1 %v6396_v15  ;;  %v6410_v15 = vld [vmem:[#allocation5 + $0x264] ss:$8 sps:$4 sm:$0xff]  }
 0x24b   : > { %3744 = vmatprep.subr.bf16.mxu1 %v6401_v58  ;;  %4404 = vmatpush1.bf16.msra.mxu0 %v6399_v7  ;;  %v6408_v58 = vld [vmem:[#allocation5 + $0x260] ss:$8 sps:$4 sm:$0xff]  }
 0x24c   : > { %4405 = vmatprep.subr.bf16.mxu0 %v6404_v29 }
 0x24d   : > { %4257 = vmatmul.mubr.bf16.gmra.mrb[72].mxu0 %v9439_v54  ;;  %v9443_v54 = vld [vmem:[#allocation28_spill] sm:$0xff] }
 0x24e   : > { %3745 = vmatpush1.bf16.msra.mxu1 %v6399_v7  ;;  %4266 = vmatprep.mubr.bf16.mxu0 %v9441_v52  ;;  %v6413_v7 = vld [vmem:[#allocation5 + $0x274] ss:$8 sps:$4 sm:$0xff]  }
 0x24f   : > { %3746 = vmatprep.subr.bf16.mxu1 %v6404_v29  ;;  %4406 = vmatpush1.bf16.msra.mxu0 %v6402_v24  ;;  %v9444_v29 = vld [vmem:[#allocation44_spill] sm:$0xff] }
 0x250   : > { %4407 = vmatprep.subr.bf16.mxu0 %v6407_v61 }
 0x251   : > { %3598 = vmatmul.mubr.bf16.gmra.mrb[72].mxu1 %v9440_v53  ;;  %v9445_v53 = vld [vmem:[#allocation39_spill] sm:$0xff] }
 0x252   : > { %3607 = vmatprep.mubr.bf16.mxu1 %v9442_v23  ;;  %3747 = vmatpush1.bf16.msra.mxu1 %v6402_v24  ;;  %v9446_v24 = vld [vmem:[#allocation29_spill] sm:$0xff] }
 0x253   : > { %3748 = vmatprep.subr.bf16.mxu1 %v6407_v61  ;;  %4408 = vmatpush1.bf16.msra.mxu0 %v6405_v43  ;;  %v9447_v61 = vld [vmem:[#allocation45_spill] sm:$0xff] }
 0x254   : > { %4409 = vmatprep.subr.bf16.mxu0 %v6410_v15 }
 0x255   : > { %4267 = vmatmul.mubr.bf16.gmra.mrb[76].mxu0 %v9442_v23  ;;  %v9448_v23 = vld [vmem:[#allocation41_spill] sm:$0xff] }
 0x256   : > { %3749 = vmatpush1.bf16.msra.mxu1 %v6405_v43  ;;  %4276 = vmatprep.mubr.bf16.mxu0 %v9444_v29  ;;  %v9449_v43 = vld [vmem:[#allocation30_spill] sm:$0xff] }
 0x257   : > { %3750 = vmatprep.subr.bf16.mxu1 %v6410_v15  ;;  %4410 = vmatpush1.bf16.msra.mxu0 %v6408_v58  ;;  %v9450_v15 = vld [vmem:[#allocation50_spill] sm:$0xff] }
 0x258   : > { %4411 = vmatprep.subr.bf16.mxu0 %v6413_v7 }
 0x259   : > { %3608 = vmatmul.mubr.bf16.gmra.mrb[76].mxu1 %v9443_v54  ;;  %v9451_v54 = vld [vmem:[#allocation43_spill] sm:$0xff] }
 0x25a   : > { %3617 = vmatprep.mubr.bf16.mxu1 %v9445_v53  ;;  %3751 = vmatpush1.bf16.msra.mxu1 %v6408_v58  ;;  %v9452_v58 = vld [vmem:[#allocation31_spill] sm:$0xff] }
 0x25b   : > { %3752 = vmatprep.subr.bf16.mxu1 %v6413_v7  ;;  %4412 = vmatpush1.bf16.msra.mxu0 %v6411_v3  ;;  %v9454_v7 = vld [vmem:[#allocation56_spill] sm:$0xff] }
 0x25d   : > { %4277 = vmatmul.mubr.bf16.gmra.mrb[80].mxu0 %v9445_v53  ;;  %v9455_v53 = vld [vmem:[#allocation46_spill] sm:$0xff] }
 0x25e   : > { %3753 = vmatpush1.bf16.msra.mxu1 %v6411_v3  ;;  %4286 = vmatprep.mubr.bf16.mxu0 %v9447_v61  ;;  %v9453_v3 = vld [vmem:[#allocation47_spill] sm:$0xff] }
 0x261   : > { %3618 = vmatmul.mubr.bf16.gmra.mrb[80].mxu1 %v9446_v24  ;;  %v9456_v24 = vld [vmem:[#allocation48_spill] sm:$0xff] }
 0x262   : > { %3627 = vmatprep.mubr.bf16.mxu1 %v9448_v23 }
 0x265   : > { %4287 = vmatmul.mubr.bf16.gmra.mrb[84].mxu0 %v9448_v23  ;;  %v9457_v23 = vld [vmem:[#allocation57_spill] sm:$0xff] }
 0x266   : > { %4296 = vmatprep.mubr.bf16.mxu0 %v9450_v15 }
 0x269   : > { %3628 = vmatmul.mubr.bf16.gmra.mrb[84].mxu1 %v9449_v43  ;;  %v9458_v43 = vld [vmem:[#allocation51_spill] sm:$0xff] }
 0x26a   : > { %3637 = vmatprep.mubr.bf16.mxu1 %v9451_v54 }
 0x26d   : > { %4297 = vmatmul.mubr.bf16.gmra.mrb[88].mxu0 %v9451_v54  ;;  %v9459_v54 = vld [vmem:[#allocation32_spill] sm:$0xff] }
 0x26e   : > { %4306 = vmatprep.mubr.bf16.mxu0 %v8122_v13 }
 0x271   : > { %3638 = vmatmul.mubr.bf16.gmra.mrb[88].mxu1 %v9452_v58  ;;  %v9460_v58 = vld [vmem:[#allocation49_spill] sm:$0xff] }
 0x272   : > { %3647 = vmatprep.mubr.bf16.mxu1 %v9453_v3 }
 0x275   : > { %4307 = vmatmul.mubr.bf16.gmra.mrb[92].mxu0 %v9453_v3  ;;  %v9462_v3 = vld [vmem:[#allocation52_spill] sm:$0xff] }
 0x276   : > { %4316 = vmatprep.mubr.bf16.mxu0 %v8129_v49 }
 0x279   : > { %3648 = vmatmul.mubr.bf16.gmra.mrb[92].mxu1 %v9454_v7  ;;  %v9464_v7 = vld [vmem:[#allocation53_spill] sm:$0xff] }
 0x27a   : > { %3657 = vmatprep.mubr.bf16.mxu1 %v9455_v53 }
 0x27d   : > { %4317 = vmatmul.mubr.bf16.gmra.mrb[96].mxu0 %v9455_v53  ;;  %v9468_v53 = vrot.slane %v7265_v27, 1  ;;  %v9471_v27 = vpack.c.bf16 %v8236_v63, %v8240_v51  ;;  %v9475_v63 = vpack.c.bf16 %v8289_v26, %v8293_v59  ;;  %v9476_v51 = vpack.c.bf16 %v8300_v37, %v8304_v16  ;;  %v4591_v37 = vld [vmem:[%s8957_s6] sm:$0x3] }
 0x27e   : > { %4326 = vmatprep.mubr.bf16.mxu0 %v8138_v21  ;;  %v4595_v26 = vsub.s32 0, %v9234_v40  ;;  %v4599_v59 = vsub.s32 1, %v9234_v40 }
 0x281   : > { %3658 = vmatmul.mubr.bf16.gmra.mrb[96].mxu1 %v9383_v22  ;;  %v9461_v22 = vld [vmem:[#allocation10_spill] sm:$0xff] }
 0x282   : > { %3667 = vmatprep.mubr.bf16.mxu1 %v9456_v24 }
 0x285   : > { %4327 = vmatmul.mubr.bf16.gmra.mrb[100].mxu0 %v9456_v24 }
 0x286   : > { %4336 = vmatprep.mubr.bf16.mxu0 %v9457_v23 }
 0x289   : > { %3668 = vmatmul.mubr.bf16.gmra.mrb[100].mxu1 %v9402_v34  ;;  %v9463_v34 = vld [vmem:[#allocation12_spill] sm:$0xff] }
 0x28a   : > { %3677 = vmatprep.mubr.bf16.mxu1 %v9458_v43 }
 0x28d   : > { %4337 = vmatmul.mubr.bf16.gmra.mrb[104].mxu0 %v9458_v43 }
 0x28e   : > { %4346 = vmatprep.mubr.bf16.mxu0 %v9459_v54 }
 0x291   : > { %3678 = vmatmul.mubr.bf16.gmra.mrb[104].mxu1 %v9407_v41  ;;  %v9465_v41 = vld [vmem:[#allocation61_spill] sm:$0xff] }
 0x292   : > { %3687 = vmatprep.mubr.bf16.mxu1 %v9460_v58 }
 0x295   : > { %4347 = vmatmul.mubr.bf16.gmra.mrb[108].mxu0 %v9460_v58 }
 0x296   : > { %4356 = vmatprep.mubr.bf16.mxu0 %v9461_v22 }
 0x299   : > { %3688 = vmatmul.mubr.bf16.gmra.mrb[108].mxu1 %v9413_v57 }
 0x29a   : > { %3697 = vmatprep.mubr.bf16.mxu1 %v9462_v3 }
 0x29d   : > { %4357 = vmatmul.mubr.bf16.gmra.mrb[112].mxu0 %v9462_v3 }
 0x29e   : > { %4366 = vmatprep.mubr.bf16.mxu0 %v9463_v34 }
 0x2a1   : > { %3698 = vmatmul.mubr.bf16.gmra.mrb[112].mxu1 %v9418_v1  ;;  %v2711_v1 = vpack.c.bf16 %v7585_v33, %v7612_v19  ;;  %v9469_v19 = vrot.slane %v9397_v17, 1  ;;  %v9472_v17 = vpack.c.bf16 %v8251_v44, %v8255_v35  ;;  %v9477_v44 = vpack.c.bf16 %v8314_v25, %v8308_v39 }
 0x2a2   : > { %3707 = vmatprep.mubr.bf16.mxu1 %v9464_v7  ;;  %v9478_v35 = vpack.c.bf16 %v8330_v20, %v8334_v50  ;;  %v8650_v25 = vrot.slane %v4591_v37, %v4595_v26 }
 0x2a5   : > { %4367 = vmatmul.mubr.bf16.gmra.mrb[116].mxu0 %v9464_v7 }
 0x2a6   : > { %4376 = vmatprep.mubr.bf16.mxu0 %v8210_v14 }
 0x2a9   : > { %3708 = vmatmul.mubr.bf16.gmra.mrb[116].mxu1 %v9421_v2  ;;  %v2505_v2 = vrot.slane %v9431_v46, 1 }
 0x2aa   : > { %3717 = vmatprep.mubr.bf16.mxu1 %v9465_v41 }
 0x2ab   : > { %v2565_v33 = vsel %vm2375_vm5, %v2505_v2, %v9468_v53 }
 0x2ad   : > { %4377 = vmatmul.mubr.bf16.gmra.mrb[120].mxu0 %v9465_v41 }
 0x2ae   : > { %5673 = vmatprep.mubr.msk.bf16.mxu0 %vm8520_vm7, %v8212_v60 }
 0x2b1   : > { %3718 = vmatmul.mubr.bf16.gmra.mrb[120].mxu1 %v9424_v11  ;;  %v2566_v11 = vsel %vm2375_vm5, %v9469_v19, %v2505_v2 }
 0x2b2   : > { %3727 = vmatprep.mubr.bf16.mxu1 %v2711_v1  ;;  %v2760_v24 = vpack.c.bf16 %v2565_v33, %v2566_v11 }
 0x2b5   : > { %4387 = vmatmul.mubr.bf16.gmra.mrb[124].mxu0 %v2711_v1 }
 0x2b6   : > { %4429 = vmatprep.mubr.bf16.mxu0 %v6493_v6 }
 0x2b9   : > { %3728 = vmatmul.mubr.bf16.gmra.mrb[124].mxu1 %v9426_v56  ;;  %v9470_v56 = vpack.c.bf16 %v8226_v0, %v8220_v8  ;;  %v9473_v8 = vpack.c.bf16 %v8263_v31, %v8267_v36  ;;  %v9474_v0 = vpack.c.bf16 %v8280_v55, %v8274_v38  ;;  %v9482_v31 = vpack.c.bf16 %v8386_v12, %v8390_v4  ;;  %v9484_v38 = vld [vmem:[#allocation11_spill] sm:$0xff] }
 0x2ba   : > { %3770 = vmatprep.mubr.bf16.mxu1 %v6493_v6  ;;  %v9483_v36 = vpack.c.bf16 %v8400_v28, %v8394_v10  ;;  %v9485_v55 = vpack.c.bf16 %v8380_v5, %v9484_v38 }
 0x2bd   : > { %4430 = vmatmul.mubr.bf16.vlgmr.msra.gmra.mrb[64].mxu0 %v2760_v24 }
 0x2be   : > { %4439 = vmatprep.mubr.bf16.mxu0 %v6493_v6 }
 0x2c1   : > { %3771 = vmatmul.mubr.bf16.vlgmr.msra.gmra.mrb[64].mxu1 %v8454_v48 }
 0x2c2   : > { %3780 = vmatprep.mubr.bf16.mxu1 %v6493_v6 }
 0x2c5   : > { %4440 = vmatmul.mubr.bf16.gmra.mrb[68].mxu0 %v9470_v56 }
 0x2c6   : > { %4449 = vmatprep.mubr.bf16.mxu0 %v6493_v6 }
 0x2c9   : > { %3781 = vmatmul.mubr.bf16.gmra.mrb[68].mxu1 %v9436_v32 }
 0x2ca   : > { %3790 = vmatprep.mubr.bf16.mxu1 %v6493_v6 }
 0x2cd   : > { %4450 = vmatmul.mubr.bf16.gmra.mrb[72].mxu0 %v9471_v27 }
 0x2ce   : > { %4459 = vmatprep.mubr.bf16.mxu0 %v6493_v6 }
 0x2d1   : > { %3791 = vmatmul.mubr.bf16.gmra.mrb[72].mxu1 %v9438_v45 }
 0x2d2   : > { %3800 = vmatprep.mubr.bf16.mxu1 %v6493_v6 }
 0x2d5   : > { %4460 = vmatmul.mubr.bf16.gmra.mrb[76].mxu0 %v9472_v17 }
 0x2d6   : > { %4469 = vmatprep.mubr.bf16.mxu0 %v6493_v6 }
 0x2d9   : > { %3801 = vmatmul.mubr.bf16.gmra.mrb[76].mxu1 %v9441_v52 }
 0x2da   : > { %3810 = vmatprep.mubr.bf16.mxu1 %v6493_v6 }
 0x2dd   : > { %4470 = vmatmul.mubr.bf16.gmra.mrb[80].mxu0 %v9473_v8 }
 0x2de   : > { %4479 = vmatprep.mubr.bf16.mxu0 %v6493_v6 }
 0x2e1   : > { %3811 = vmatmul.mubr.bf16.gmra.mrb[80].mxu1 %v9444_v29 }
 0x2e2   : > { %3820 = vmatprep.mubr.bf16.mxu1 %v6493_v6 }
 0x2e5   : > { %4480 = vmatmul.mubr.bf16.gmra.mrb[84].mxu0 %v9474_v0 }
 0x2e6   : > { %4489 = vmatprep.mubr.bf16.mxu0 %v6493_v6 }
 0x2e9   : > { %3821 = vmatmul.mubr.bf16.gmra.mrb[84].mxu1 %v9447_v61 }
 0x2ea   : > { %3830 = vmatprep.mubr.bf16.mxu1 %v6493_v6 }
 0x2ed   : > { %4490 = vmatmul.mubr.bf16.gmra.mrb[88].mxu0 %v9475_v63 }
 0x2ee   : > { %4499 = vmatprep.mubr.bf16.mxu0 %v6493_v6 }
 0x2f1   : > { %3831 = vmatmul.mubr.bf16.gmra.mrb[88].mxu1 %v9450_v15 }
 0x2f2   : > { %3840 = vmatprep.mubr.bf16.mxu1 %v6493_v6 }
 0x2f5   : > { %4500 = vmatmul.mubr.bf16.gmra.mrb[92].mxu0 %v9476_v51 }
 0x2f6   : > { %4509 = vmatprep.mubr.bf16.mxu0 %v6493_v6 }
 0x2f9   : > { %3841 = vmatmul.mubr.bf16.gmra.mrb[92].mxu1 %v8122_v13  ;;  %v9479_v13 = vpack.c.bf16 %v8343_v47, %v8347_v9 }
 0x2fa   : > { %3850 = vmatprep.mubr.bf16.mxu1 %v6493_v6 }
 0x2fd   : > { %4510 = vmatmul.mubr.bf16.gmra.mrb[96].mxu0 %v9477_v44 }
 0x2fe   : > { %4519 = vmatprep.mubr.bf16.mxu0 %v6493_v6 }
 0x301   : > { %3851 = vmatmul.mubr.bf16.gmra.mrb[96].mxu1 %v8129_v49  ;;  %v9480_v49 = vpack.c.bf16 %v8357_v18, %v8351_v42 }
 0x302   : > { %3860 = vmatprep.mubr.bf16.mxu1 %v6493_v6 }
 0x305   : > { %4520 = vmatmul.mubr.bf16.gmra.mrb[100].mxu0 %v9478_v35 }
 0x306   : > { %4529 = vmatprep.mubr.bf16.mxu0 %v6493_v6 }
 0x309   : > { %3861 = vmatmul.mubr.bf16.gmra.mrb[100].mxu1 %v8138_v21  ;;  %v9481_v21 = vpack.c.bf16 %v8371_v62, %v8362_v30 }
 0x30a   : > { %3870 = vmatprep.mubr.bf16.mxu1 %v6493_v6 }
 0x30d   : > { %4530 = vmatmul.mubr.bf16.gmra.mrb[104].mxu0 %v9479_v13 }
 0x30e   : > { %4539 = vmatprep.mubr.bf16.mxu0 %v6493_v6 }
 0x311   : > { %3871 = vmatmul.mubr.bf16.gmra.mrb[104].mxu1 %v9457_v23 }
 0x312   : > { %3880 = vmatprep.mubr.bf16.mxu1 %v6493_v6 }
 0x315   : > { %4540 = vmatmul.mubr.bf16.gmra.mrb[108].mxu0 %v9480_v49 }
 0x316   : > { %4549 = vmatprep.mubr.bf16.mxu0 %v6493_v6 }
 0x319   : > { %3881 = vmatmul.mubr.bf16.gmra.mrb[108].mxu1 %v9459_v54 }
 0x31a   : > { %3890 = vmatprep.mubr.bf16.mxu1 %v6493_v6 }
 0x31d   : > { %4550 = vmatmul.mubr.bf16.gmra.mrb[112].mxu0 %v9481_v21 }
 0x31e   : > { %4559 = vmatprep.mubr.bf16.mxu0 %v6493_v6 }
 0x321   : > { %3891 = vmatmul.mubr.bf16.gmra.mrb[112].mxu1 %v9461_v22 }
 0x322   : > { %3900 = vmatprep.mubr.bf16.mxu1 %v6493_v6 }
 0x325   : > { %4560 = vmatmul.mubr.bf16.gmra.mrb[116].mxu0 %v9482_v31 }
 0x326   : > { %4569 = vmatprep.mubr.bf16.mxu0 %v6493_v6 }
 0x329   : > { %3901 = vmatmul.mubr.bf16.gmra.mrb[116].mxu1 %v9463_v34 }
 0x32a   : > { %3910 = vmatprep.mubr.bf16.mxu1 %v6493_v6 }
 0x32d   : > { %4570 = vmatmul.mubr.bf16.gmra.mrb[120].mxu0 %v9483_v36 }
 0x32e   : > { %4579 = vmatprep.mubr.bf16.mxu0 %v6493_v6 }
 0x331   : > { %3911 = vmatmul.mubr.bf16.gmra.mrb[120].mxu1 %v8210_v14  ;;  %v4590_v14 = vld [vmem:[%s8956_s5] sm:$0x3] }
 0x332   : > { %3920 = vmatprep.mubr.bf16.mxu1 %v6493_v6  ;;  %v8646_v16 = vrot.slane %v4590_v14, %v4595_v26  ;;  %v8648_v39 = vrot.slane %v4590_v14, %v4599_v59 }
 0x335   : > { %5677 = vmatmul.mubr.msk.bf16.gmra.mrb[124].mxu0 %vm8520_vm7, %v9485_v55 }
 0x339   : > { %5665 = vmatmul.mubr.msk.bf16.gmra.mrb[124].mxu1 %vm8520_vm7, %v8212_v60  ;;  %v8652_v60 = vrot.slane %v4591_v37, %v4599_v59 }
 0x390   : > { %v4431_v20 = vpop.f32.mrb[64].mxu0 }
 0x391   : > { %v4806_v50 = vmul.f32 %v8646_v16, %v4431_v20  ;;  %v4433_v9 = vpop.f32.mrb[65].mxu0 }
 0x392   : > { %v4807_v40 = vmul.f32 %v8648_v39, %v4433_v9  ;;  %v4435_v18 = vpop.f32.mrb[66].mxu0 }
 0x393   : > { %v4870_v30 = vadd.f32 %v4806_v50, %v8650_v25  ;;  %v4808_v5 = vmul.f32 %v8646_v16, %v4435_v18  ;;  %v4437_v4 = vpop.f32.mrb[67].mxu0 }
 0x394   : > { %v3772_v47 = vpop.f32.mrb[64].mxu1  ;;  %v4871_v48 = vadd.f32 %v4807_v40, %v8652_v60  ;;  %v4809_v32 = vmul.f32 %v8648_v39, %v4437_v4 }
 0x395   : > { %v4603_v42 = vmul.f32 %v8646_v16, %v3772_v47  ;;  %v3774_v62 = vpop.f32.mrb[65].mxu1  ;;  %v4934_v52 = vmax.f32 %v4870_v30, 0.0  ;;  %v4872_v61 = vadd.f32 %v4808_v5, %v8650_v25 }
 0x396   : > { %v4604_v28 = vmul.f32 %v8648_v39, %v3774_v62  ;;  %v3776_v12 = vpop.f32.mrb[66].mxu1  ;;  %v4935_v43 = vmax.f32 %v4871_v48, 0.0  ;;  %v4873_v58 = vadd.f32 %v4809_v32, %v8652_v60 }
 0x397   : > { %v4678_v10 = vadd.f32 %v8650_v25, %v4603_v42  ;;  %v4605_v46 = vmul.f32 %v8646_v16, %v3776_v12  ;;  %v3778_v45 = vpop.f32.mrb[67].mxu1  ;;  %v4936_v3 = vmax.f32 %v4872_v61, 0.0 }
 0x398   : > { %v4679_v29 = vadd.f32 %v8652_v60, %v4604_v28  ;;  %v4606_v15 = vmul.f32 %v8648_v39, %v3778_v45  ;;  %v4937_v57 = vmax.f32 %v4873_v58, 0.0  ;;  %v4441_v1 = vpop.f32.mrb[68].mxu0 }
 0x399   : > { %v4742_v23 = vmax.f32 %v4678_v10, 0.0  ;;  %v4680_v54 = vadd.f32 %v8650_v25, %v4605_v46  ;;  %v4810_v53 = vmul.f32 %v8646_v16, %v4441_v1  ;;  %v4443_v19 = vpop.f32.mrb[69].mxu0 }
 0x39a   : > { %v4743_v22 = vmax.f32 %v4679_v29, 0.0  ;;  %v4681_v34 = vadd.f32 %v8652_v60, %v4606_v15  ;;  %v4811_v56 = vmul.f32 %v8648_v39, %v4443_v19  ;;  %v4445_v17 = vpop.f32.mrb[70].mxu0 }
 0x39b   : > { %v4998_v7 = vmax.f32 %v4742_v23, %v4934_v52  ;;  %v4744_v41 = vmax.f32 %v4680_v54, 0.0  ;;  %v4874_v63 = vadd.f32 %v4810_v53, %v8650_v25  ;;  %v4447_v35 = vpop.f32.mrb[71].mxu0  ;;  %v4812_v21 = vmul.f32 %v8646_v16, %v4445_v17 }
 0x39c   : > { %v4999_v2 = vmax.f32 %v4743_v22, %v4935_v43  ;;  %v4745_v6 = vmax.f32 %v4681_v34, 0.0  ;;  %v3782_v33 = vpop.f32.mrb[68].mxu1  ;;  %v4875_v49 = vadd.f32 %v4811_v56, %v8652_v60  ;;  %v4813_v14 = vmul.f32 %v8648_v39, %v4447_v35 }
 0x39d   : > { %v5000_v11 = vmax.f32 %v4744_v41, %v4936_v3  ;;  %v4607_v24 = vmul.f32 %v8646_v16, %v3782_v33  ;;  %v3784_v27 = vpop.f32.mrb[69].mxu1  ;;  %v4938_v55 = vmax.f32 %v4874_v63, 0.0  ;;  %v4876_v20 = vadd.f32 %v4812_v21, %v8650_v25 }
 0x39e   : > { %v5622_v8 = vpack.c.bf16 %v4999_v2, %v4998_v7  ;;  %v5001_v0 = vmax.f32 %v4745_v6, %v4937_v57  ;;  %v4608_v51 = vmul.f32 %v8648_v39, %v3784_v27  ;;  %v3786_v44 = vpop.f32.mrb[70].mxu1  ;;  %v4939_v37 = vmax.f32 %v4875_v49, 0.0 }
 0x39f   : > { %v4682_v13 = vadd.f32 %v8650_v25, %v4607_v24  ;;  %v4609_v31 = vmul.f32 %v8646_v16, %v3786_v44  ;;  %v3788_v36 = vpop.f32.mrb[71].mxu1  ;;  %v4877_v9 = vadd.f32 %v4813_v14, %v8652_v60  ;;  %v4940_v62 = vmax.f32 %v4876_v20, 0.0 }
 0x3a0   : > { %5254 = vst [vmem:[%s8675_s11] sm:$0xff] %v5622_v8  ;;  %v5623_v38 = vpack.c.bf16 %v5001_v0, %v5000_v11  ;;  %v4683_v26 = vadd.f32 %v8652_v60, %v4608_v51  ;;  %v4610_v42 = vmul.f32 %v8648_v39, %v3788_v36  ;;  %v4451_v30 = vpop.f32.mrb[72].mxu0 }
 0x3a1   : > { %v4746_v59 = vmax.f32 %v4682_v13, 0.0  ;;  %v4684_v50 = vadd.f32 %v8650_v25, %v4609_v31  ;;  %v4941_v5 = vmax.f32 %v4877_v9, 0.0  ;;  %v4814_v4 = vmul.f32 %v8646_v16, %v4451_v30  ;;  %v4453_v48 = vpop.f32.mrb[73].mxu0 }
 0x3a2   : > { %5255 = vst [vmem:[%s8675_s11 + $0x8] sm:$0xff] %v5623_v38  ;;  %v4747_v47 = vmax.f32 %v4683_v26, 0.0  ;;  %v4685_v12 = vadd.f32 %v8652_v60, %v4610_v42  ;;  %v4815_v45 = vmul.f32 %v8648_v39, %v4453_v48  ;;  %v4455_v29 = vpop.f32.mrb[74].mxu0 }
 0x3a3   : > { %v5002_v40 = vmax.f32 %v4746_v59, %v4938_v55  ;;  %v4748_v18 = vmax.f32 %v4684_v50, 0.0  ;;  %v4878_v23 = vadd.f32 %v4814_v4, %v8650_v25  ;;  %v4457_v58 = vpop.f32.mrb[75].mxu0  ;;  %v4816_v34 = vmul.f32 %v8646_v16, %v4455_v29 }
 0x3a4   : > { %v5003_v28 = vmax.f32 %v4747_v47, %v4939_v37  ;;  %v3792_v10 = vpop.f32.mrb[72].mxu1  ;;  %v4749_v15 = vmax.f32 %v4685_v12, 0.0  ;;  %v4879_v3 = vadd.f32 %v4815_v45, %v8652_v60  ;;  %v4817_v6 = vmul.f32 %v8648_v39, %v4457_v58 }
 0x3a5   : > { %v5004_v46 = vmax.f32 %v4748_v18, %v4940_v62  ;;  %v4611_v32 = vmul.f32 %v8646_v16, %v3792_v10  ;;  %v3794_v52 = vpop.f32.mrb[73].mxu1  ;;  %v4942_v1 = vmax.f32 %v4878_v23, 0.0  ;;  %v4880_v19 = vadd.f32 %v4816_v34, %v8650_v25 }
 0x3a6   : > { %v5624_v61 = vpack.c.bf16 %v5003_v28, %v5002_v40  ;;  %v4612_v43 = vmul.f32 %v8648_v39, %v3794_v52  ;;  %v3796_v54 = vpop.f32.mrb[74].mxu1  ;;  %v5005_v57 = vmax.f32 %v4749_v15, %v4941_v5  ;;  %v4943_v33 = vmax.f32 %v4879_v3, 0.0 }
 0x3a7   : > { %v4686_v22 = vadd.f32 %v8650_v25, %v4611_v32  ;;  %v4613_v7 = vmul.f32 %v8646_v16, %v3796_v54  ;;  %v3798_v41 = vpop.f32.mrb[75].mxu1  ;;  %v4881_v27 = vadd.f32 %v4817_v6, %v8652_v60  ;;  %v4944_v0 = vmax.f32 %v4880_v19, 0.0 }
 0x3a8   : > { %5256 = vst [vmem:[%s8675_s11 + $0x10] sm:$0xff] %v5624_v61  ;;  %v4687_v2 = vadd.f32 %v8652_v60, %v4612_v43  ;;  %v5625_v24 = vpack.c.bf16 %v5005_v57, %v5004_v46  ;;  %v4614_v17 = vmul.f32 %v8648_v39, %v3798_v41  ;;  %v4461_v51 = vpop.f32.mrb[76].mxu0 }
 0x3a9   : > { %v4750_v53 = vmax.f32 %v4686_v22, 0.0  ;;  %v4688_v11 = vadd.f32 %v8650_v25, %v4613_v7  ;;  %v4945_v35 = vmax.f32 %v4881_v27, 0.0  ;;  %v4818_v49 = vmul.f32 %v8646_v16, %v4461_v51  ;;  %v4463_v31 = vpop.f32.mrb[77].mxu0 }
 0x3aa   : > { %v4751_v56 = vmax.f32 %v4687_v2, 0.0  ;;  %5257 = vst [vmem:[%s8675_s11 + $0x18] sm:$0xff] %v5625_v24  ;;  %v4689_v13 = vadd.f32 %v8652_v60, %v4614_v17  ;;  %v4819_v55 = vmul.f32 %v8648_v39, %v4463_v31  ;;  %v4465_v14 = vpop.f32.mrb[78].mxu0 }
 0x3ab   : > { %v5006_v8 = vmax.f32 %v4750_v53, %v4942_v1  ;;  %v4752_v63 = vmax.f32 %v4688_v11, 0.0  ;;  %v4882_v20 = vadd.f32 %v4818_v49, %v8650_v25  ;;  %v4467_v9 = vpop.f32.mrb[79].mxu0  ;;  %v4820_v62 = vmul.f32 %v8646_v16, %v4465_v14 }
 0x3ac   : > { %v5007_v44 = vmax.f32 %v4751_v56, %v4943_v33  ;;  %v3802_v21 = vpop.f32.mrb[76].mxu1  ;;  %v4753_v37 = vmax.f32 %v4689_v13, 0.0  ;;  %v4883_v40 = vadd.f32 %v4819_v55, %v8652_v60  ;;  %v4821_v4 = vmul.f32 %v8648_v39, %v4467_v9 }
 0x3ad   : > { %v5008_v36 = vmax.f32 %v4752_v63, %v4944_v0  ;;  %v4615_v38 = vmul.f32 %v8646_v16, %v3802_v21  ;;  %v3804_v26 = vpop.f32.mrb[77].mxu1  ;;  %v4946_v5 = vmax.f32 %v4882_v20, 0.0  ;;  %v4884_v46 = vadd.f32 %v4820_v62, %v8650_v25 }
 0x3ae   : > { %v5626_v59 = vpack.c.bf16 %v5007_v44, %v5006_v8  ;;  %v4616_v50 = vmul.f32 %v8648_v39, %v3804_v26  ;;  %v3806_v47 = vpop.f32.mrb[78].mxu1  ;;  %v5009_v28 = vmax.f32 %v4753_v37, %v4945_v35  ;;  %v4947_v48 = vmax.f32 %v4883_v40, 0.0 }
 0x3af   : > { %v4690_v42 = vadd.f32 %v8650_v25, %v4615_v38  ;;  %v4617_v18 = vmul.f32 %v8646_v16, %v3806_v47  ;;  %v3808_v30 = vpop.f32.mrb[79].mxu1  ;;  %v4885_v29 = vadd.f32 %v4821_v4, %v8652_v60  ;;  %v4948_v23 = vmax.f32 %v4884_v46, 0.0 }
 0x3b0   : > { %5258 = vst [vmem:[%s8675_s11 + $0x20] sm:$0xff] %v5626_v59  ;;  %v4691_v12 = vadd.f32 %v8652_v60, %v4616_v50  ;;  %v5627_v45 = vpack.c.bf16 %v5009_v28, %v5008_v36  ;;  %v4618_v61 = vmul.f32 %v8648_v39, %v3808_v30  ;;  %v4471_v54 = vpop.f32.mrb[80].mxu0 }
 0x3b1   : > { %v4754_v10 = vmax.f32 %v4690_v42, 0.0  ;;  %v4692_v32 = vadd.f32 %v8650_v25, %v4617_v18  ;;  %v4949_v22 = vmax.f32 %v4885_v29, 0.0  ;;  %v4822_v34 = vmul.f32 %v8646_v16, %v4471_v54  ;;  %v4473_v41 = vpop.f32.mrb[81].mxu0 }
 0x3b2   : > { %v4755_v52 = vmax.f32 %v4691_v12, 0.0  ;;  %5259 = vst [vmem:[%s8675_s11 + $0x28] sm:$0xff] %v5627_v45  ;;  %v4693_v3 = vadd.f32 %v8652_v60, %v4618_v61  ;;  %v4823_v2 = vmul.f32 %v8648_v39, %v4473_v41  ;;  %v4475_v53 = vpop.f32.mrb[82].mxu0 }
 0x3b3   : > { %v5010_v15 = vmax.f32 %v4754_v10, %v4946_v5  ;;  %v4756_v43 = vmax.f32 %v4692_v32, 0.0  ;;  %v4886_v11 = vadd.f32 %v4822_v34, %v8650_v25  ;;  %v4477_v27 = vpop.f32.mrb[83].mxu0  ;;  %v4824_v0 = vmul.f32 %v8646_v16, %v4475_v53 }
 0x3b4   : > { %v5011_v58 = vmax.f32 %v4755_v52, %v4947_v48  ;;  %v3812_v7 = vpop.f32.mrb[80].mxu1  ;;  %v4757_v19 = vmax.f32 %v4693_v3, 0.0  ;;  %v4887_v8 = vadd.f32 %v4823_v2, %v8652_v60  ;;  %v4825_v49 = vmul.f32 %v8648_v39, %v4477_v27 }
 0x3b5   : > { %v5012_v57 = vmax.f32 %v4756_v43, %v4948_v23  ;;  %v4619_v1 = vmul.f32 %v8646_v16, %v3812_v7  ;;  %v3814_v6 = vpop.f32.mrb[81].mxu1  ;;  %v4950_v35 = vmax.f32 %v4886_v11, 0.0  ;;  %v4888_v36 = vadd.f32 %v4824_v0, %v8650_v25 }
 0x3b6   : > { %v5628_v33 = vpack.c.bf16 %v5011_v58, %v5010_v15  ;;  %v4620_v24 = vmul.f32 %v8648_v39, %v3814_v6  ;;  %v3816_v56 = vpop.f32.mrb[82].mxu1  ;;  %v5013_v44 = vmax.f32 %v4757_v19, %v4949_v22  ;;  %v4951_v31 = vmax.f32 %v4887_v8, 0.0 }
 0x3b7   : > { %v4694_v17 = vadd.f32 %v8650_v25, %v4619_v1  ;;  %v4621_v63 = vmul.f32 %v8646_v16, %v3816_v56  ;;  %v3818_v51 = vpop.f32.mrb[83].mxu1  ;;  %v4889_v14 = vadd.f32 %v4825_v49, %v8652_v60  ;;  %v4952_v20 = vmax.f32 %v4888_v36, 0.0 }
 0x3b8   : > { %5260 = vst [vmem:[%s8675_s11 + $0x30] sm:$0xff] %v5628_v33  ;;  %v4695_v13 = vadd.f32 %v8652_v60, %v4620_v24  ;;  %v5629_v55 = vpack.c.bf16 %v5013_v44, %v5012_v57  ;;  %v4622_v59 = vmul.f32 %v8648_v39, %v3818_v51  ;;  %v4481_v47 = vpop.f32.mrb[84].mxu0 }
 0x3b9   : > { %v4758_v21 = vmax.f32 %v4694_v17, 0.0  ;;  %v4696_v38 = vadd.f32 %v8650_v25, %v4621_v63  ;;  %v4953_v42 = vmax.f32 %v4889_v14, 0.0  ;;  %v4826_v62 = vmul.f32 %v8646_v16, %v4481_v47  ;;  %v4483_v30 = vpop.f32.mrb[85].mxu0 }
 0x3ba   : > { %v4759_v26 = vmax.f32 %v4695_v13, 0.0  ;;  %5261 = vst [vmem:[%s8675_s11 + $0x38] sm:$0xff] %v5629_v55  ;;  %v4697_v40 = vadd.f32 %v8652_v60, %v4622_v59  ;;  %v4827_v12 = vmul.f32 %v8648_v39, %v4483_v30  ;;  %v4485_v10 = vpop.f32.mrb[86].mxu0 }
 0x3bb   : > { %v5014_v37 = vmax.f32 %v4758_v21, %v4950_v35  ;;  %v4760_v50 = vmax.f32 %v4696_v38, 0.0  ;;  %v4890_v32 = vadd.f32 %v4826_v62, %v8650_v25  ;;  %v4487_v29 = vpop.f32.mrb[87].mxu0  ;;  %v4828_v23 = vmul.f32 %v8646_v16, %v4485_v10 }
 0x3bc   : > { %v5015_v9 = vmax.f32 %v4759_v26, %v4951_v31  ;;  %v3822_v18 = vpop.f32.mrb[84].mxu1  ;;  %v4761_v46 = vmax.f32 %v4697_v40, 0.0  ;;  %v4891_v15 = vadd.f32 %v4827_v12, %v8652_v60  ;;  %v4829_v34 = vmul.f32 %v8648_v39, %v4487_v29 }
 0x3bd   : > { %v5016_v28 = vmax.f32 %v4760_v50, %v4952_v20  ;;  %v4623_v5 = vmul.f32 %v8646_v16, %v3822_v18  ;;  %v3824_v4 = vpop.f32.mrb[85].mxu1  ;;  %v4954_v22 = vmax.f32 %v4890_v32, 0.0  ;;  %v4892_v57 = vadd.f32 %v4828_v23, %v8650_v25 }
 0x3be   : > { %v5630_v48 = vpack.c.bf16 %v5015_v9, %v5014_v37  ;;  %v4624_v45 = vmul.f32 %v8648_v39, %v3824_v4  ;;  %v3826_v52 = vpop.f32.mrb[86].mxu1  ;;  %v5017_v58 = vmax.f32 %v4761_v46, %v4953_v42  ;;  %v4955_v41 = vmax.f32 %v4891_v15, 0.0 }
 0x3bf   : > { %v4698_v61 = vadd.f32 %v8650_v25, %v4623_v5  ;;  %v4625_v43 = vmul.f32 %v8646_v16, %v3826_v52  ;;  %v3828_v54 = vpop.f32.mrb[87].mxu1  ;;  %v4893_v53 = vadd.f32 %v4829_v34, %v8652_v60  ;;  %v4956_v11 = vmax.f32 %v4892_v57, 0.0 }
 0x3c0   : > { %5262 = vst [vmem:[%s8675_s11 + $0x40] sm:$0xff] %v5630_v48  ;;  %v4699_v3 = vadd.f32 %v8652_v60, %v4624_v45  ;;  %v5631_v2 = vpack.c.bf16 %v5017_v58, %v5016_v28  ;;  %v4626_v33 = vmul.f32 %v8648_v39, %v3828_v54  ;;  %v4491_v56 = vpop.f32.mrb[88].mxu0 }
 0x3c1   : > { %v4762_v7 = vmax.f32 %v4698_v61, 0.0  ;;  %v4700_v1 = vadd.f32 %v8650_v25, %v4625_v43  ;;  %v4957_v17 = vmax.f32 %v4893_v53, 0.0  ;;  %v4830_v0 = vmul.f32 %v8646_v16, %v4491_v56  ;;  %v4493_v51 = vpop.f32.mrb[89].mxu0 }
 0x3c2   : > { %v4763_v6 = vmax.f32 %v4699_v3, 0.0  ;;  %5263 = vst [vmem:[%s8675_s11 + $0x48] sm:$0xff] %v5631_v2  ;;  %v4701_v8 = vadd.f32 %v8652_v60, %v4626_v33  ;;  %v4831_v13 = vmul.f32 %v8648_v39, %v4493_v51  ;;  %v4495_v21 = vpop.f32.mrb[90].mxu0 }
 0x3c3   : > { %v5018_v19 = vmax.f32 %v4762_v7, %v4954_v22  ;;  %v4764_v24 = vmax.f32 %v4700_v1, 0.0  ;;  %v4894_v38 = vadd.f32 %v4830_v0, %v8650_v25  ;;  %v4497_v14 = vpop.f32.mrb[91].mxu0  ;;  %v4832_v20 = vmul.f32 %v8646_v16, %v4495_v21 }
 0x3c4   : > { %v5019_v27 = vmax.f32 %v4763_v6, %v4955_v41  ;;  %v3832_v63 = vpop.f32.mrb[88].mxu1  ;;  %v4765_v36 = vmax.f32 %v4701_v8, 0.0  ;;  %v4895_v37 = vadd.f32 %v4831_v13, %v8652_v60  ;;  %v4833_v62 = vmul.f32 %v8648_v39, %v4497_v14 }
 0x3c5   : > { %v5020_v44 = vmax.f32 %v4764_v24, %v4956_v11  ;;  %v4627_v35 = vmul.f32 %v8646_v16, %v3832_v63  ;;  %v3834_v49 = vpop.f32.mrb[89].mxu1  ;;  %v4958_v42 = vmax.f32 %v4894_v38, 0.0  ;;  %v4896_v28 = vadd.f32 %v4832_v20, %v8650_v25 }
 0x3c6   : > { %v5632_v31 = vpack.c.bf16 %v5019_v27, %v5018_v19  ;;  %v4628_v55 = vmul.f32 %v8648_v39, %v3834_v49  ;;  %v3836_v26 = vpop.f32.mrb[90].mxu1  ;;  %v5021_v9 = vmax.f32 %v4765_v36, %v4957_v17  ;;  %v4959_v30 = vmax.f32 %v4895_v37, 0.0 }
 0x3c7   : > { %v4702_v59 = vadd.f32 %v8650_v25, %v4627_v35  ;;  %v4629_v50 = vmul.f32 %v8646_v16, %v3836_v26  ;;  %v3838_v47 = vpop.f32.mrb[91].mxu1  ;;  %v4897_v10 = vadd.f32 %v4833_v62, %v8652_v60  ;;  %v4960_v32 = vmax.f32 %v4896_v28, 0.0 }
 0x3c8   : > { %5264 = vst [vmem:[%s8675_s11 + $0x50] sm:$0xff] %v5632_v31  ;;  %v4703_v40 = vadd.f32 %v8652_v60, %v4628_v55  ;;  %v5633_v12 = vpack.c.bf16 %v5021_v9, %v5020_v44  ;;  %v4630_v48 = vmul.f32 %v8648_v39, %v3838_v47  ;;  %v4501_v52 = vpop.f32.mrb[92].mxu0 }
 0x3c9   : > { %v4766_v18 = vmax.f32 %v4702_v59, 0.0  ;;  %v4704_v5 = vadd.f32 %v8650_v25, %v4629_v50  ;;  %v4961_v61 = vmax.f32 %v4897_v10, 0.0  ;;  %v4834_v23 = vmul.f32 %v8646_v16, %v4501_v52  ;;  %v4503_v54 = vpop.f32.mrb[93].mxu0 }
 0x3ca   : > { %v4767_v4 = vmax.f32 %v4703_v40, 0.0  ;;  %5265 = vst [vmem:[%s8675_s11 + $0x58] sm:$0xff] %v5633_v12  ;;  %v4705_v15 = vadd.f32 %v8652_v60, %v4630_v48  ;;  %v4835_v3 = vmul.f32 %v8648_v39, %v4503_v54  ;;  %v4505_v7 = vpop.f32.mrb[94].mxu0 }
 0x3cb   : > { %v5022_v46 = vmax.f32 %v4766_v18, %v4958_v42  ;;  %v4768_v45 = vmax.f32 %v4704_v5, 0.0  ;;  %v4898_v1 = vadd.f32 %v4834_v23, %v8650_v25  ;;  %v4507_v53 = vpop.f32.mrb[95].mxu0  ;;  %v4836_v11 = vmul.f32 %v8646_v16, %v4505_v7 }
 0x3cc   : > { %v5023_v29 = vmax.f32 %v4767_v4, %v4959_v30  ;;  %v3842_v43 = vpop.f32.mrb[92].mxu1  ;;  %v4769_v57 = vmax.f32 %v4705_v15, 0.0  ;;  %v4899_v19 = vadd.f32 %v4835_v3, %v8652_v60  ;;  %v4837_v0 = vmul.f32 %v8648_v39, %v4507_v53 }
 0x3cd   : > { %v5024_v58 = vmax.f32 %v4768_v45, %v4960_v32  ;;  %v4631_v22 = vmul.f32 %v8646_v16, %v3842_v43  ;;  %v3844_v34 = vpop.f32.mrb[93].mxu1  ;;  %v4962_v17 = vmax.f32 %v4898_v1, 0.0  ;;  %v4900_v44 = vadd.f32 %v4836_v11, %v8650_v25 }
 0x3ce   : > { %v5634_v41 = vpack.c.bf16 %v5023_v29, %v5022_v46  ;;  %v4632_v2 = vmul.f32 %v8648_v39, %v3844_v34  ;;  %v3846_v6 = vpop.f32.mrb[94].mxu1  ;;  %v5025_v27 = vmax.f32 %v4769_v57, %v4961_v61  ;;  %v4963_v51 = vmax.f32 %v4899_v19, 0.0 }
 0x3cf   : > { %v4706_v33 = vadd.f32 %v8650_v25, %v4631_v22  ;;  %v4633_v24 = vmul.f32 %v8646_v16, %v3846_v6  ;;  %v3848_v56 = vpop.f32.mrb[95].mxu1  ;;  %v4901_v21 = vadd.f32 %v4837_v0, %v8652_v60  ;;  %v4964_v38 = vmax.f32 %v4900_v44, 0.0 }
 0x3d0   : > { %5266 = vst [vmem:[%s8675_s11 + $0x60] sm:$0xff] %v5634_v41  ;;  %v4707_v8 = vadd.f32 %v8652_v60, %v4632_v2  ;;  %v5635_v13 = vpack.c.bf16 %v5025_v27, %v5024_v58  ;;  %v4634_v31 = vmul.f32 %v8648_v39, %v3848_v56  ;;  %v4511_v26 = vpop.f32.mrb[96].mxu0 }
 0x3d1   : > { %v4770_v63 = vmax.f32 %v4706_v33, 0.0  ;;  %v4708_v35 = vadd.f32 %v8650_v25, %v4633_v24  ;;  %v4965_v59 = vmax.f32 %v4901_v21, 0.0  ;;  %v4838_v20 = vmul.f32 %v8646_v16, %v4511_v26  ;;  %v4513_v47 = vpop.f32.mrb[97].mxu0 }
 0x3d2   : > { %v4771_v49 = vmax.f32 %v4707_v8, 0.0  ;;  %5267 = vst [vmem:[%s8675_s11 + $0x68] sm:$0xff] %v5635_v13  ;;  %v4709_v37 = vadd.f32 %v8652_v60, %v4634_v31  ;;  %v4839_v40 = vmul.f32 %v8648_v39, %v4513_v47  ;;  %v4515_v18 = vpop.f32.mrb[98].mxu0 }
 0x3d3   : > { %v5026_v36 = vmax.f32 %v4770_v63, %v4962_v17  ;;  %v4772_v55 = vmax.f32 %v4708_v35, 0.0  ;;  %v4902_v5 = vadd.f32 %v4838_v20, %v8650_v25  ;;  %v4517_v10 = vpop.f32.mrb[99].mxu0  ;;  %v4840_v32 = vmul.f32 %v8646_v16, %v4515_v18 }
 0x3d4   : > { %v5027_v14 = vmax.f32 %v4771_v49, %v4963_v51  ;;  %v3852_v50 = vpop.f32.mrb[96].mxu1  ;;  %v4773_v28 = vmax.f32 %v4709_v37, 0.0  ;;  %v4903_v46 = vadd.f32 %v4839_v40, %v8652_v60  ;;  %v4841_v23 = vmul.f32 %v8648_v39, %v4517_v10 }
 0x3d5   : > { %v5028_v9 = vmax.f32 %v4772_v55, %v4964_v38  ;;  %v4635_v42 = vmul.f32 %v8646_v16, %v3852_v50  ;;  %v3854_v62 = vpop.f32.mrb[97].mxu1  ;;  %v4966_v61 = vmax.f32 %v4902_v5, 0.0  ;;  %v4904_v58 = vadd.f32 %v4840_v32, %v8650_v25 }
 0x3d6   : > { %v5636_v30 = vpack.c.bf16 %v5027_v14, %v5026_v36  ;;  %v4636_v12 = vmul.f32 %v8648_v39, %v3854_v62  ;;  %v3856_v4 = vpop.f32.mrb[98].mxu1  ;;  %v5029_v29 = vmax.f32 %v4773_v28, %v4965_v59  ;;  %v4967_v54 = vmax.f32 %v4903_v46, 0.0 }
 0x3d7   : > { %v4710_v48 = vadd.f32 %v8650_v25, %v4635_v42  ;;  %v4637_v45 = vmul.f32 %v8646_v16, %v3856_v4  ;;  %v3858_v52 = vpop.f32.mrb[99].mxu1  ;;  %v4905_v7 = vadd.f32 %v4841_v23, %v8652_v60  ;;  %v4968_v1 = vmax.f32 %v4904_v58, 0.0 }
 0x3d8   : > { %5268 = vst [vmem:[%s8675_s11 + $0x70] sm:$0xff] %v5636_v30  ;;  %v4711_v15 = vadd.f32 %v8652_v60, %v4636_v12  ;;  %v5637_v3 = vpack.c.bf16 %v5029_v29, %v5028_v9  ;;  %v4638_v41 = vmul.f32 %v8648_v39, %v3858_v52  ;;  %v4521_v6 = vpop.f32.mrb[100].mxu0 }
 0x3d9   : > { %v4774_v43 = vmax.f32 %v4710_v48, 0.0  ;;  %v4712_v22 = vadd.f32 %v8650_v25, %v4637_v45  ;;  %v4969_v33 = vmax.f32 %v4905_v7, 0.0  ;;  %v4842_v11 = vmul.f32 %v8646_v16, %v4521_v6  ;;  %v4523_v56 = vpop.f32.mrb[101].mxu0 }
 0x3da   : > { %v4775_v34 = vmax.f32 %v4711_v15, 0.0  ;;  %5269 = vst [vmem:[%s8675_s11 + $0x78] sm:$0xff] %v5637_v3  ;;  %v4713_v19 = vadd.f32 %v8652_v60, %v4638_v41  ;;  %v4843_v8 = vmul.f32 %v8648_v39, %v4523_v56  ;;  %v4525_v63 = vpop.f32.mrb[102].mxu0 }
 0x3db   : > { %v5030_v57 = vmax.f32 %v4774_v43, %v4966_v61  ;;  %v4776_v2 = vmax.f32 %v4712_v22, 0.0  ;;  %v4906_v35 = vadd.f32 %v4842_v11, %v8650_v25  ;;  %v4527_v21 = vpop.f32.mrb[103].mxu0  ;;  %v4844_v38 = vmul.f32 %v8646_v16, %v4525_v63 }
 0x3dc   : > { %v5031_v53 = vmax.f32 %v4775_v34, %v4967_v54  ;;  %v3862_v24 = vpop.f32.mrb[100].mxu1  ;;  %v4777_v44 = vmax.f32 %v4713_v19, 0.0  ;;  %v4907_v36 = vadd.f32 %v4843_v8, %v8652_v60  ;;  %v4845_v20 = vmul.f32 %v8648_v39, %v4527_v21 }
 0x3dd   : > { %v5032_v27 = vmax.f32 %v4776_v2, %v4968_v1  ;;  %v4639_v17 = vmul.f32 %v8646_v16, %v3862_v24  ;;  %v3864_v0 = vpop.f32.mrb[101].mxu1  ;;  %v4970_v59 = vmax.f32 %v4906_v35, 0.0  ;;  %v4908_v9 = vadd.f32 %v4844_v38, %v8650_v25 }
 0x3de   : > { %v5638_v51 = vpack.c.bf16 %v5031_v53, %v5030_v57  ;;  %v4640_v13 = vmul.f32 %v8648_v39, %v3864_v0  ;;  %v3866_v49 = vpop.f32.mrb[102].mxu1  ;;  %v5033_v14 = vmax.f32 %v4777_v44, %v4969_v33  ;;  %v4971_v47 = vmax.f32 %v4907_v36, 0.0 }
 0x3df   : > { %v4714_v31 = vadd.f32 %v8650_v25, %v4639_v17  ;;  %v4641_v55 = vmul.f32 %v8646_v16, %v3866_v49  ;;  %v3868_v26 = vpop.f32.mrb[103].mxu1  ;;  %v4909_v18 = vadd.f32 %v4845_v20, %v8652_v60  ;;  %v4972_v5 = vmax.f32 %v4908_v9, 0.0 }
 0x3e0   : > { %5270 = vst [vmem:[%s8675_s11 + $0x80] sm:$0xff] %v5638_v51  ;;  %v4715_v37 = vadd.f32 %v8652_v60, %v4640_v13  ;;  %v5639_v40 = vpack.c.bf16 %v5033_v14, %v5032_v27  ;;  %v4642_v30 = vmul.f32 %v8648_v39, %v3868_v26  ;;  %v4531_v4 = vpop.f32.mrb[104].mxu0 }
 0x3e1   : > { %v4778_v50 = vmax.f32 %v4714_v31, 0.0  ;;  %v4716_v42 = vadd.f32 %v8650_v25, %v4641_v55  ;;  %v4973_v48 = vmax.f32 %v4909_v18, 0.0  ;;  %v4846_v32 = vmul.f32 %v8646_v16, %v4531_v4  ;;  %v4533_v52 = vpop.f32.mrb[105].mxu0 }
 0x3e2   : > { %v4779_v62 = vmax.f32 %v4715_v37, 0.0  ;;  %5271 = vst [vmem:[%s8675_s11 + $0x88] sm:$0xff] %v5639_v40  ;;  %v4717_v46 = vadd.f32 %v8652_v60, %v4642_v30  ;;  %v4847_v15 = vmul.f32 %v8648_v39, %v4533_v52  ;;  %v4535_v43 = vpop.f32.mrb[106].mxu0 }
 0x3e3   : > { %v5034_v28 = vmax.f32 %v4778_v50, %v4970_v59  ;;  %v4780_v12 = vmax.f32 %v4716_v42, 0.0  ;;  %v4910_v22 = vadd.f32 %v4846_v32, %v8650_v25  ;;  %v4537_v7 = vpop.f32.mrb[107].mxu0  ;;  %v4848_v1 = vmul.f32 %v8646_v16, %v4535_v43 }
 0x3e4   : > { %v5035_v10 = vmax.f32 %v4779_v62, %v4971_v47  ;;  %v3872_v45 = vpop.f32.mrb[104].mxu1  ;;  %v4781_v58 = vmax.f32 %v4717_v46, 0.0  ;;  %v4911_v57 = vadd.f32 %v4847_v15, %v8652_v60  ;;  %v4849_v11 = vmul.f32 %v8648_v39, %v4537_v7 }
 0x3e5   : > { %v5036_v29 = vmax.f32 %v4780_v12, %v4972_v5  ;;  %v4643_v61 = vmul.f32 %v8646_v16, %v3872_v45  ;;  %v3874_v23 = vpop.f32.mrb[105].mxu1  ;;  %v4974_v33 = vmax.f32 %v4910_v22, 0.0  ;;  %v4912_v27 = vadd.f32 %v4848_v1, %v8650_v25 }
 0x3e6   : > { %v5640_v54 = vpack.c.bf16 %v5035_v10, %v5034_v28  ;;  %v4644_v3 = vmul.f32 %v8648_v39, %v3874_v23  ;;  %v3876_v34 = vpop.f32.mrb[106].mxu1  ;;  %v5037_v53 = vmax.f32 %v4781_v58, %v4973_v48  ;;  %v4975_v56 = vmax.f32 %v4911_v57, 0.0 }
 0x3e7   : > { %v4718_v41 = vadd.f32 %v8650_v25, %v4643_v61  ;;  %v4645_v2 = vmul.f32 %v8646_v16, %v3876_v34  ;;  %v3878_v6 = vpop.f32.mrb[107].mxu1  ;;  %v4913_v63 = vadd.f32 %v4849_v11, %v8652_v60  ;;  %v4976_v35 = vmax.f32 %v4912_v27, 0.0 }
 0x3e8   : > { %5272 = vst [vmem:[%s8675_s11 + $0x90] sm:$0xff] %v5640_v54  ;;  %v4719_v19 = vadd.f32 %v8652_v60, %v4644_v3  ;;  %v5641_v8 = vpack.c.bf16 %v5037_v53, %v5036_v29  ;;  %v4646_v51 = vmul.f32 %v8648_v39, %v3878_v6  ;;  %v4541_v49 = vpop.f32.mrb[108].mxu0 }
 0x3e9   : > { %v4782_v24 = vmax.f32 %v4718_v41, 0.0  ;;  %v4720_v17 = vadd.f32 %v8650_v25, %v4645_v2  ;;  %v4977_v31 = vmax.f32 %v4913_v63, 0.0  ;;  %v4850_v38 = vmul.f32 %v8646_v16, %v4541_v49  ;;  %v4543_v26 = vpop.f32.mrb[109].mxu0 }
 0x3ea   : > { %v4783_v0 = vmax.f32 %v4719_v19, 0.0  ;;  %5273 = vst [vmem:[%s8675_s11 + $0x98] sm:$0xff] %v5641_v8  ;;  %v4721_v36 = vadd.f32 %v8652_v60, %v4646_v51  ;;  %v4851_v37 = vmul.f32 %v8648_v39, %v4543_v26  ;;  %v4545_v50 = vpop.f32.mrb[110].mxu0 }
 0x3eb   : > { %v5038_v44 = vmax.f32 %v4782_v24, %v4974_v33  ;;  %v4784_v13 = vmax.f32 %v4720_v17, 0.0  ;;  %v4914_v42 = vadd.f32 %v4850_v38, %v8650_v25  ;;  %v4547_v18 = vpop.f32.mrb[111].mxu0  ;;  %v4852_v5 = vmul.f32 %v8646_v16, %v4545_v50 }
 0x3ec   : > { %v5039_v21 = vmax.f32 %v4783_v0, %v4975_v56  ;;  %v3882_v55 = vpop.f32.mrb[108].mxu1  ;;  %v4785_v9 = vmax.f32 %v4721_v36, 0.0  ;;  %v4915_v28 = vadd.f32 %v4851_v37, %v8652_v60  ;;  %v4853_v32 = vmul.f32 %v8648_v39, %v4547_v18 }
 0x3ed   : > { %v5040_v14 = vmax.f32 %v4784_v13, %v4976_v35  ;;  %v4647_v59 = vmul.f32 %v8646_v16, %v3882_v55  ;;  %v3884_v20 = vpop.f32.mrb[109].mxu1  ;;  %v4978_v48 = vmax.f32 %v4914_v42, 0.0  ;;  %v4916_v29 = vadd.f32 %v4852_v5, %v8650_v25 }
 0x3ee   : > { %v5642_v47 = vpack.c.bf16 %v5039_v21, %v5038_v44  ;;  %v4648_v40 = vmul.f32 %v8648_v39, %v3884_v20  ;;  %v3886_v62 = vpop.f32.mrb[110].mxu1  ;;  %v5041_v10 = vmax.f32 %v4785_v9, %v4977_v31  ;;  %v4979_v52 = vmax.f32 %v4915_v28, 0.0 }
 0x3ef   : > { %v4722_v30 = vadd.f32 %v8650_v25, %v4647_v59  ;;  %v4649_v12 = vmul.f32 %v8646_v16, %v3886_v62  ;;  %v3888_v4 = vpop.f32.mrb[111].mxu1  ;;  %v4917_v43 = vadd.f32 %v4853_v32, %v8652_v60  ;;  %v4980_v22 = vmax.f32 %v4916_v29, 0.0 }
 0x3f0   : > { %5274 = vst [vmem:[%s8675_s11 + $0xa0] sm:$0xff] %v5642_v47  ;;  %v4723_v46 = vadd.f32 %v8652_v60, %v4648_v40  ;;  %v5643_v15 = vpack.c.bf16 %v5041_v10, %v5040_v14  ;;  %v4650_v54 = vmul.f32 %v8648_v39, %v3888_v4  ;;  %v4551_v34 = vpop.f32.mrb[112].mxu0 }
 0x3f1   : > { %v4786_v45 = vmax.f32 %v4722_v30, 0.0  ;;  %v4724_v61 = vadd.f32 %v8650_v25, %v4649_v12  ;;  %v4981_v41 = vmax.f32 %v4917_v43, 0.0  ;;  %v4854_v1 = vmul.f32 %v8646_v16, %v4551_v34  ;;  %v4553_v6 = vpop.f32.mrb[113].mxu0 }
 0x3f2   : > { %v4787_v23 = vmax.f32 %v4723_v46, 0.0  ;;  %5275 = vst [vmem:[%s8675_s11 + $0xa8] sm:$0xff] %v5643_v15  ;;  %v4725_v57 = vadd.f32 %v8652_v60, %v4650_v54  ;;  %v4855_v19 = vmul.f32 %v8648_v39, %v4553_v6  ;;  %v4555_v24 = vpop.f32.mrb[114].mxu0 }
 0x3f3   : > { %v5042_v58 = vmax.f32 %v4786_v45, %v4978_v48  ;;  %v4788_v3 = vmax.f32 %v4724_v61, 0.0  ;;  %v4918_v17 = vadd.f32 %v4854_v1, %v8650_v25  ;;  %v4557_v63 = vpop.f32.mrb[115].mxu0  ;;  %v4856_v35 = vmul.f32 %v8646_v16, %v4555_v24 }
 0x3f4   : > { %v5043_v7 = vmax.f32 %v4787_v23, %v4979_v52  ;;  %v3892_v2 = vpop.f32.mrb[112].mxu1  ;;  %v4789_v27 = vmax.f32 %v4725_v57, 0.0  ;;  %v4919_v44 = vadd.f32 %v4855_v19, %v8652_v60  ;;  %v4857_v38 = vmul.f32 %v8648_v39, %v4557_v63 }
 0x3f5   : > { %v5044_v53 = vmax.f32 %v4788_v3, %v4980_v22  ;;  %v4651_v33 = vmul.f32 %v8646_v16, %v3892_v2  ;;  %v3894_v11 = vpop.f32.mrb[113].mxu1  ;;  %v4982_v31 = vmax.f32 %v4918_v17, 0.0  ;;  %v4920_v14 = vadd.f32 %v4856_v35, %v8650_v25 }
 0x3f6   : > { %v5644_v56 = vpack.c.bf16 %v5043_v7, %v5042_v58  ;;  %v4652_v8 = vmul.f32 %v8648_v39, %v3894_v11  ;;  %v3896_v0 = vpop.f32.mrb[114].mxu1  ;;  %v5045_v21 = vmax.f32 %v4789_v27, %v4981_v41  ;;  %v4983_v26 = vmax.f32 %v4919_v44, 0.0 }
 0x3f7   : > { %v4726_v51 = vadd.f32 %v8650_v25, %v4651_v33  ;;  %v4653_v13 = vmul.f32 %v8646_v16, %v3896_v0  ;;  %v3898_v49 = vpop.f32.mrb[115].mxu1  ;;  %v4921_v50 = vadd.f32 %v4857_v38, %v8652_v60  ;;  %v4984_v42 = vmax.f32 %v4920_v14, 0.0 }
 0x3f8   : > { %5276 = vst [vmem:[%s8675_s11 + $0xb0] sm:$0xff] %v5644_v56  ;;  %v4727_v36 = vadd.f32 %v8652_v60, %v4652_v8  ;;  %v5645_v37 = vpack.c.bf16 %v5045_v21, %v5044_v53  ;;  %v4654_v47 = vmul.f32 %v8648_v39, %v3898_v49  ;;  %v4561_v62 = vpop.f32.mrb[116].mxu0 }
 0x3f9   : > { %v4790_v55 = vmax.f32 %v4726_v51, 0.0  ;;  %v4728_v59 = vadd.f32 %v8650_v25, %v4653_v13  ;;  %v4985_v30 = vmax.f32 %v4921_v50, 0.0  ;;  %v4858_v5 = vmul.f32 %v8646_v16, %v4561_v62  ;;  %v4563_v4 = vpop.f32.mrb[117].mxu0 }
 0x3fa   : > { %v4791_v20 = vmax.f32 %v4727_v36, 0.0  ;;  %5277 = vst [vmem:[%s8675_s11 + $0xb8] sm:$0xff] %v5645_v37  ;;  %v4729_v28 = vadd.f32 %v8652_v60, %v4654_v47  ;;  %v4859_v46 = vmul.f32 %v8648_v39, %v4563_v4  ;;  %v4565_v45 = vpop.f32.mrb[118].mxu0 }
 0x3fb   : > { %v5046_v9 = vmax.f32 %v4790_v55, %v4982_v31  ;;  %v4792_v40 = vmax.f32 %v4728_v59, 0.0  ;;  %v4922_v61 = vadd.f32 %v4858_v5, %v8650_v25  ;;  %v4567_v43 = vpop.f32.mrb[119].mxu0  ;;  %v4860_v22 = vmul.f32 %v8646_v16, %v4565_v45 }
 0x3fc   : > { %v5047_v18 = vmax.f32 %v4791_v20, %v4983_v26  ;;  %v3902_v12 = vpop.f32.mrb[116].mxu1  ;;  %v4793_v29 = vmax.f32 %v4729_v28, 0.0  ;;  %v4923_v58 = vadd.f32 %v4859_v46, %v8652_v60  ;;  %v4861_v1 = vmul.f32 %v8648_v39, %v4567_v43 }
 0x3fd   : > { %v5048_v10 = vmax.f32 %v4792_v40, %v4984_v42  ;;  %v4655_v48 = vmul.f32 %v8646_v16, %v3902_v12  ;;  %v3904_v32 = vpop.f32.mrb[117].mxu1  ;;  %v4986_v41 = vmax.f32 %v4922_v61, 0.0  ;;  %v4924_v53 = vadd.f32 %v4860_v22, %v8650_v25 }
 0x3fe   : > { %v5646_v52 = vpack.c.bf16 %v5047_v18, %v5046_v9  ;;  %v4656_v15 = vmul.f32 %v8648_v39, %v3904_v32  ;;  %v3906_v23 = vpop.f32.mrb[118].mxu1  ;;  %v5049_v7 = vmax.f32 %v4793_v29, %v4985_v30  ;;  %v4987_v6 = vmax.f32 %v4923_v58, 0.0 }
 0x3ff   : > { %v4730_v54 = vadd.f32 %v8650_v25, %v4655_v48  ;;  %v4657_v3 = vmul.f32 %v8646_v16, %v3906_v23  ;;  %v3908_v34 = vpop.f32.mrb[119].mxu1  ;;  %v4925_v24 = vadd.f32 %v4861_v1, %v8652_v60  ;;  %v4988_v17 = vmax.f32 %v4924_v53, 0.0 }
 0x400   : > { %5278 = vst [vmem:[%s8675_s11 + $0xc0] sm:$0xff] %v5646_v52  ;;  %v4731_v57 = vadd.f32 %v8652_v60, %v4656_v15  ;;  %v5647_v19 = vpack.c.bf16 %v5049_v7, %v5048_v10  ;;  %v4658_v56 = vmul.f32 %v8648_v39, %v3908_v34  ;;  %v4571_v0 = vpop.f32.mrb[120].mxu0 }
 0x401   : > { %v4794_v2 = vmax.f32 %v4730_v54, 0.0  ;;  %v4732_v33 = vadd.f32 %v8650_v25, %v4657_v3  ;;  %v4989_v51 = vmax.f32 %v4925_v24, 0.0  ;;  %v4862_v35 = vmul.f32 %v8646_v16, %v4571_v0  ;;  %v4573_v49 = vpop.f32.mrb[121].mxu0 }
 0x402   : > { %v4795_v11 = vmax.f32 %v4731_v57, 0.0  ;;  %5279 = vst [vmem:[%s8675_s11 + $0xc8] sm:$0xff] %v5647_v19  ;;  %v4733_v44 = vadd.f32 %v8652_v60, %v4658_v56  ;;  %v4863_v36 = vmul.f32 %v8648_v39, %v4573_v49  ;;  %v4575_v55 = vpop.f32.mrb[122].mxu0 }
 0x403   : > { %v5050_v27 = vmax.f32 %v4794_v2, %v4986_v41  ;;  %v4796_v8 = vmax.f32 %v4732_v33, 0.0  ;;  %v4926_v59 = vadd.f32 %v4862_v35, %v8650_v25  ;;  %v4577_v50 = vpop.f32.mrb[123].mxu0  ;;  %v4864_v42 = vmul.f32 %v8646_v16, %v4575_v55 }
 0x404   : > { %v5051_v63 = vmax.f32 %v4795_v11, %v4987_v6  ;;  %v3912_v13 = vpop.f32.mrb[120].mxu1  ;;  %v4797_v14 = vmax.f32 %v4733_v44, 0.0  ;;  %v4927_v9 = vadd.f32 %v4863_v36, %v8652_v60  ;;  %v4865_v5 = vmul.f32 %v8648_v39, %v4577_v50 }
 0x405   : > { %v5052_v21 = vmax.f32 %v4796_v8, %v4988_v17  ;;  %v4659_v31 = vmul.f32 %v8646_v16, %v3912_v13  ;;  %v3914_v38 = vpop.f32.mrb[121].mxu1  ;;  %v4990_v30 = vmax.f32 %v4926_v59, 0.0  ;;  %v4928_v10 = vadd.f32 %v4864_v42, %v8650_v25 }
 0x406   : > { %v5648_v26 = vpack.c.bf16 %v5051_v63, %v5050_v27  ;;  %v4660_v37 = vmul.f32 %v8648_v39, %v3914_v38  ;;  %v3916_v20 = vpop.f32.mrb[122].mxu1  ;;  %v5053_v18 = vmax.f32 %v4797_v14, %v4989_v51  ;;  %v4991_v4 = vmax.f32 %v4927_v9, 0.0 }
 0x407   : > { %v4734_v47 = vadd.f32 %v8650_v25, %v4659_v31  ;;  %v4661_v40 = vmul.f32 %v8646_v16, %v3916_v20  ;;  %v3918_v62 = vpop.f32.mrb[123].mxu1  ;;  %v4929_v45 = vadd.f32 %v4865_v5, %v8652_v60  ;;  %v4992_v61 = vmax.f32 %v4928_v10, 0.0 }
 0x408   : > { %5280 = vst [vmem:[%s8675_s11 + $0xd0] sm:$0xff] %v5648_v26  ;;  %v4735_v28 = vadd.f32 %v8652_v60, %v4660_v37  ;;  %v5649_v46 = vpack.c.bf16 %v5053_v18, %v5052_v21  ;;  %v4662_v52 = vmul.f32 %v8648_v39, %v3918_v62  ;;  %v4581_v23 = vpop.f32.mrb[124].mxu0 }
 0x409   : > { %v4798_v12 = vmax.f32 %v4734_v47, 0.0  ;;  %v4736_v48 = vadd.f32 %v8650_v25, %v4661_v40  ;;  %v4993_v54 = vmax.f32 %v4929_v45, 0.0  ;;  %v4866_v22 = vmul.f32 %v8646_v16, %v4581_v23  ;;  %v4583_v34 = vpop.f32.mrb[125].mxu0 }
 0x40a   : > { %v4799_v32 = vmax.f32 %v4735_v28, 0.0  ;;  %5281 = vst [vmem:[%s8675_s11 + $0xd8] sm:$0xff] %v5649_v46  ;;  %v4737_v58 = vadd.f32 %v8652_v60, %v4662_v52  ;;  %v4867_v57 = vmul.f32 %v8648_v39, %v4583_v34  ;;  %v4585_v2 = vpop.f32.mrb[126].mxu0 }
 0x40b   : > { %v5054_v29 = vmax.f32 %v4798_v12, %v4990_v30  ;;  %v4800_v15 = vmax.f32 %v4736_v48, 0.0  ;;  %v4930_v33 = vadd.f32 %v4866_v22, %v8650_v25  ;;  %v4587_v24 = vpop.f32.mrb[127].mxu0  ;;  %v4868_v17 = vmul.f32 %v8646_v16, %v4585_v2 }
 0x40c   : > { %v5055_v43 = vmax.f32 %v4799_v32, %v4991_v4  ;;  %v3922_v3 = vpop.f32.mrb[124].mxu1  ;;  %v4801_v53 = vmax.f32 %v4737_v58, 0.0  ;;  %v4931_v27 = vadd.f32 %v4867_v57, %v8652_v60  ;;  %v4869_v35 = vmul.f32 %v8648_v39, %v4587_v24 }
 0x40d   : > { %v5056_v7 = vmax.f32 %v4800_v15, %v4992_v61  ;;  %v4663_v41 = vmul.f32 %v8646_v16, %v3922_v3  ;;  %v3924_v1 = vpop.f32.mrb[125].mxu1  ;;  %v4994_v51 = vmax.f32 %v4930_v33, 0.0  ;;  %v4932_v21 = vadd.f32 %v4868_v17, %v8650_v25 }
 0x40e   : > { %v5650_v6 = vpack.c.bf16 %v5055_v43, %v5054_v29  ;;  %v4664_v19 = vmul.f32 %v8648_v39, %v3924_v1  ;;  %v3926_v11 = vpop.f32.mrb[126].mxu1  ;;  %v5057_v63 = vmax.f32 %v4801_v53, %v4993_v54  ;;  %v4995_v49 = vmax.f32 %v4931_v27, 0.0 }
 0x40f   : > { %v4738_v56 = vadd.f32 %v8650_v25, %v4663_v41  ;;  %v4665_v8 = vmul.f32 %v8646_v16, %v3926_v11  ;;  %v3928_v0 = vpop.f32.mrb[127].mxu1  ;;  %v4933_v16 = vadd.f32 %v4869_v35, %v8652_v60  ;;  %v4996_v14 = vmax.f32 %v4932_v21, 0.0 }
 0x410   : > { %5282 = vst [vmem:[%s8675_s11 + $0xe0] sm:$0xff] %v5650_v6  ;;  %v4739_v44 = vadd.f32 %v8652_v60, %v4664_v19  ;;  %v5651_v36 = vpack.c.bf16 %v5057_v63, %v5056_v7  ;;  %v4666_v55 = vmul.f32 %v8648_v39, %v3928_v0 }
 0x411   : > { %v4802_v13 = vmax.f32 %v4738_v56, 0.0  ;;  %v4740_v31 = vadd.f32 %v8650_v25, %v4665_v8  ;;  %v4997_v20 = vmax.f32 %v4933_v16, 0.0 }
 0x412   : > { %v4803_v38 = vmax.f32 %v4739_v44, 0.0  ;;  %5283 = vst [vmem:[%s8675_s11 + $0xe8] sm:$0xff] %v5651_v36  ;;  %v4741_v50 = vadd.f32 %v8652_v60, %v4666_v55 }
 0x413   : > { %v5058_v26 = vmax.f32 %v4802_v13, %v4994_v51  ;;  %v4804_v59 = vmax.f32 %v4740_v31, 0.0 }
 0x414   : > { %v5059_v37 = vmax.f32 %v4803_v38, %v4995_v49  ;;  %v4805_v42 = vmax.f32 %v4741_v50, 0.0 }
 0x415   : > { %v5060_v47 = vmax.f32 %v4804_v59, %v4996_v14 }
 0x416   : > { %v5652_v9 = vpack.c.bf16 %v5059_v37, %v5058_v26  ;;  %v5061_v25 = vmax.f32 %v4805_v42, %v4997_v20 }
 0x418   : > { %5284 = vst [vmem:[%s8675_s11 + $0xf0] sm:$0xff] %v5652_v9  ;;  %v5653_v40 = vpack.c.bf16 %v5061_v25, %v5060_v47 }
 0x41a   : > { %5285 = vst [vmem:[%s8675_s11 + $0xf8] sm:$0xff] %v5653_v40 }
 0x41b PF: > { %s19_s24 = sadd.s32 1, %s6486_s24  }
 0x41c   : > { %p16_p5 = scmp.ge.s32.totalorder %s19_s24, 4  }
 0x41e   :  { %18 = sbr.rel (!%p16_p5) target bundleno = 2 (0x2), region = 87 }
 0x425   :  { %5307 = vsyncpa [#allocation4], 1 }
 0x426   :  { %5309 = vsyncpa [#allocation4 + $0x1], 1 }
 0x427   :  { %5310 = vsyncpa [#allocation6], 1 }

// kernel: improved_cnn_forward.4
= control target key start
LH: loop header
LB: loop body
LE: loop exit
PB: predicated region body
PF: predicated region fallthrough
CT: control target
= control target key end

     0   :  { %7 = vsyncpa [#allocation4], 0  ;;  %s17150_s0 = inlined_call_operand.vmem [shape: bf16[2,65536], index: 0, kind: input, shape index: {}]   ;;  %s17151_s1 = inlined_call_operand.hbm [shape: bf16[65536,128], index: 1, kind: input, shape index: {}]   ;;  %s17152_s2 = inlined_call_operand.vmem [shape: f32[2,2,128], index: 2, kind: output, shape index: {}]  }
   0x1   :  { %9 = vsyncpa [#allocation4 + $0x1], 0  ;;  %s15701_s9 = smov 0   ;;  %s15703_s10 = smov 0  }
   0x2   :  { %s15705_s11 = smov 0   ;;  %s15707_s12 = smov 0  }
   0x3   :  { %s15709_s13 = smov 0   ;;  %s15711_s14 = smov 0  }
   0x4   :  { %s15713_s15 = smov 0   ;;  %s15715_s16 = smov 0  }
   0x5 LB: > { %s12014_s17 = sadd.s32 4294967295, %s15679_s16   ;;  %s24_s18 = sadd.s32 1, %s15671_s14  ;;  %s15679_s16 = sphi %s15715_s16, %s15_s16   ;;  %s15675_s15 = sphi %s15713_s15, %s17162_s15   ;;  %s15671_s14 = sphi %s15711_s14, %s17161_s14   ;;  %s15667_s13 = sphi %s15709_s13, %s17160_s13   ;;  %s15663_s12 = sphi %s15707_s12, %s17159_s12   ;;  %s15659_s11 = sphi %s15705_s11, %s17158_s11   ;;  %s15655_s10 = sphi %s15703_s10, %s17157_s10   ;;  %s15651_s9 = sphi %s15701_s9, %s17156_s9  }
   0x6   : > { %p25_p0 = scmp.ge.s32.totalorder %s24_s18, 2  ;;  %s27_s19 = sadd.s32 1, %s15675_s15 }
   0x7   : > { %s12018_s20 = sshll.u32 %s15675_s15, 1  ;;  %s68_s21 = sadd.s32 1, %s15659_s11 }
   0x8   : > { %s17164_s18 = smov (%p25_p0, %s24_s18), 0  ;;  %s17166_s19 = smov (!%p25_p0, %s27_s19), %s15675_s15 }
   0x9   : > { %s62_s22 = sadd.s32 %s15671_s14, %s12018_s20  ;;  %p75_p1 = scmp.ne.s32.totalorder %s15659_s11, %s15655_s10 }
   0xa   : > { %p29_p2 = scmp.ge.s32.totalorder %s17166_s19, 2  ;;  %p76_p3 = scmp.eq.s32.totalorder %s15679_s16, 0 }
   0xb   : > { %p81_p4 = scmp.ne.s32.totalorder %s15655_s10, %s15651_s9  ;;  %p82_p5 = scmp.eq.s32.totalorder %s12014_s17, 0 }
   0xc   : > { %s17168_s19 = smov (%p29_p2, %s17166_s19), 0  ;;  %p15754_p6 = por %p76_p3, %p75_p1 }
   0xd   : > { %p15758_p7 = por %p82_p5, %p81_p4  ;;  %s12019_s25 = sshll.u32 %s17168_s19, 1 }
   0xe   : > { %s64_s26 = sadd.s32 %s12019_s25, %s17164_s18  ;;  %p14474_p8 = scmp.lt.s32.totalorder %s15679_s16, 4 }
   0xf   : > { %s65_s27 = ssub.s32 %s62_s22, %s64_s26  ;;  %s143_s28 = sand.u32 1, %s15659_s11  }
  0x10   : > { %p66_p9 = scmp.eq.s32.totalorder %s65_s27, 0  ;;  %s12022_s29 = sshll.u32 %s143_s28, 13 }
  0x11   : > { %s13059_s30 = sshll.u32 %s62_s22, 17  ;;  %s147_s7 = scalar_lea.vmem [#allocation3], %s12022_s29 }
  0x12   : > { %s15767_s3 = scalar_select %p66_p9, %s15659_s11, %s68_s21  }
  0x13   : > { %s15772_s6 = scalar_lea.hbm %s17151_s1, %s13059_s30  ;;  %s156_s8 = sshll.u32 %s147_s7, 4  ;;  %s15780_s8 = int_to_ptr.vmem [resolvable:$true] %s156_s8 }
  0x14   : > { %p15776_p10 = pnand %p14474_p8, %p15754_p6  ;;  %s15782_s17 = scalar_lea.sflag [#allocation4], %s143_s28 }
  0x15   : > { %s15583_s20 = scalar_lea.hbm %s15772_s6, 131072  ;;  %s15588_s23 = scalar_lea.hbm %s17151_s1, 524288 }
  0x16   : > { %p15584_p11 = scmp.ne.s32.totalorder %s15772_s6, %s15583_s20  ;;  %p15585_p12 = pneg %p15776_p10 }
  0x17   : > { %p15589_p1 = scmp.lt.u32.totalorder %s15772_s6, %s17151_s1  ;;  %p15590_p2 = scmp.lt.u32.totalorder %s15588_s23, %s15583_s20 }
  0x18   : > { %p15586_p13 = pnand %p15585_p12, %p15584_p11  ;;  %p15592_p4 = scmp.lt.u32.totalorder %s15583_s20, %s15772_s6 }
  0x19   : > { %p15591_p3 = por %p15590_p2, %p15589_p1 }
  0x1a   : > { %p15587_p0 = pneg %p15586_p13 }
  0x1b   : > { %p15593_p5 = por %p15592_p4, %p15591_p3 }
  0x1d   : > { %p15594_p6 = pnand %p15593_p5, %p15587_p0 }
  0x1f   : > { %15597 = shalt.err (!%p15594_p6)
}
  0x20   : > { %s15598_s27 = scalar_lea.vmem %s15780_s8, 131072  ;;  %s15681_s28 = smov [#allocation3]  }
  0x21   : > { %p15599_p8 = scmp.ne.s32.totalorder %s15780_s8, %s15598_s27  ;;  %s15603_s29 = sshll.u32 %s15681_s28, 4  ;;  %s15604_s29 = int_to_ptr.vmem [resolvable:$false] %s15603_s29 }
  0x22   : > { %s15605_s30 = scalar_lea.vmem %s15604_s29, 262144  ;;  %p15606_p13 = scmp.lt.s32.totalorder %s15780_s8, %s15604_s29 }
  0x23   : > { %p15601_p9 = pnand %p15599_p8, %p15585_p12  ;;  %p15607_p1 = scmp.lt.s32.totalorder %s15605_s30, %s15598_s27 }
  0x25   : > { %p15602_p11 = pneg %p15601_p9  ;;  %p15608_p2 = por %p15607_p1, %p15606_p13 }
  0x27   : > { %p15609_p3 = pnand %p15608_p2, %p15602_p11 }
  0x29   : > { %15612 = shalt.err (!%p15609_p3)
}
  0x2a   : > { %s15682_s4 = smov 64   ;;  %s15683_s5 = smov 4  }
  0x2b   : > { %14473 = dma.hbm_to_vmem [thread:$0]  (!%p15776_p10), %s15772_s6, 131072, %s15780_s8, %s15782_s17, %s15682_s4, %s15682_s4, %s15683_s5  }
  0x2c   : > { %p12026_p12 = scmp.ge.s32.totalorder %s15679_s16, 1  ;;  %p164_p0 = scmp.lt.s32.totalorder %s15679_s16, 5 }
  0x2e   : > { %p165_p4 = pnand %p12026_p12, %p164_p0 }
  0x2f   : > { %s170_s7 = sand.u32 (!%p165_p4), 1, %s15655_s10  }
  0x30   : > { %168 = sbr.rel (%p165_p4) target bundleno = 1323 (0x52b), region = 28  ;;  %s12027_s20 = sshll.u32 (!%p165_p4), %s170_s7, 13 }
  0x31   : > { %s171_s21 = scalar_lea.sflag (!%p165_p4), [#allocation4], %s170_s7  ;;  %s15813_s22 = scalar_lea.vmem (!%p165_p4), [#allocation3], %s12027_s20 }
  0x37   : > { %15646 = dma.done.wait (%p15758_p7), %s171_s21, 131072  }
  0x38   : > { %15648 = vsyncadd (%p15758_p7), %s171_s21, 4294836224  ;;  %s12028_s6 = sshll.u32 %s15667_s13, 1  ;;  %p212_p10 = scmp.lt.s32.totalorder %s15667_s13, 1 }
  0x39   : > { %s201_s8 = sadd.s32 %s15663_s12, %s12028_s6  ;;  %p12031_p7 = scmp.ne.s32.totalorder %s15663_s12, 0 }
  0x3a   : > { %s12029_s9 = sshll.u32 %s201_s8, 7  ;;  %s17170_s13 = smov (!%p212_p10, %s15667_s13), 1  ;;  %v15684_v0 = vmov (!%p12031_p7), 0.0  }
  0x3b   : > { %p203_p5 = scmp.lt.s32.totalorder %s12029_s9, 511  ;;  %s12030_s17 = sshll.u32 %s17170_s13, 1  ;;  %221 = vst [vmem:[#allocation2] sm:$0x3] (!%p12031_p7), %v15684_v0 }
  0x3c   : > { %s15831_s28 = scalar_lea.vmem %s17152_s2, %s12030_s17  ;;  %220 = sbr.rel (%p12031_p7) target bundleno = 67 (0x43), region = 36 }
  0x3d   : > { %s17172_s9 = smov (!%p203_p5, %s12029_s9), 511 }
  0x3e   : > { %s15826_s26 = scalar_lea.vmem %s17150_s0, %s17172_s9 }
  0x43 PF: > { %v14543_v1 = vld [vmem:[%s15813_s22 + $0x40] sm:$0xff]   ;;  %v14547_v5 = vld [vmem:[%s15813_s22 + $0x48] sm:$0xff]   ;;  %v14551_v9 = vld [vmem:[%s15813_s22 + $0x50] sm:$0xff]   ;;  %v2307_v29 = vlaneseq  ;;  %v15685_v37 = vmov 1966171168   ;;  %p13056_p6 = scmp.ne.s32.totalorder %s15663_s12, 1 }
  0x44   : > { %v14544_v2 = vld [vmem:[%s15813_s22 + $0xc0] sm:$0xff]   ;;  %13060 = vmatprep.subr.bf16.mxu0 %v14543_v1  ;;  %v14548_v6 = vld [vmem:[%s15813_s22 + $0xc8] sm:$0xff]   ;;  %v14552_v10 = vld [vmem:[%s15813_s22 + $0xd0] sm:$0xff]   ;;  %v2305_v38 = vunpack.c.l.s4 %v15685_v37 }
  0x45   : > { %v14545_v3 = vld [vmem:[%s15813_s22] sm:$0xff]   ;;  %13082 = vmatprep.subr.bf16.mxu1 %v14544_v2  ;;  %v14549_v7 = vld [vmem:[%s15813_s22 + $0x8] sm:$0xff]   ;;  %v14553_v11 = vld [vmem:[%s15813_s22 + $0x10] sm:$0xff]   ;;  %v2308_v34 = vshrl.u32 %v2307_v29, 7 }
  0x46   : > { %v14546_v4 = vld [vmem:[%s15813_s22 + $0x80] sm:$0xff]   ;;  %13061 = vmatpush3.bf16.msra.mxu0 %v14545_v3  ;;  %v14550_v8 = vld [vmem:[%s15813_s22 + $0x88] sm:$0xff]   ;;  %v14554_v12 = vld [vmem:[%s15813_s22 + $0x90] sm:$0xff]   ;;  %v2306_v41 = vunpack.c.0.s8 %v2305_v38 }
  0x47   : > { %13083 = vmatpush3.bf16.msra.mxu1 %v14546_v4  ;;  %13062 = vmatprep.subr.bf16.mxu0 %v14547_v5  ;;  %v14555_v13 = vld [vmem:[%s15813_s22 + $0x58] sm:$0xff]   ;;  %v14559_v17 = vld [vmem:[%s15813_s22 + $0x60] sm:$0xff]   ;;  %v14563_v21 = vld [vmem:[%s15813_s22 + $0x68] sm:$0xff]  }
  0x48   : > { %13084 = vmatprep.subr.bf16.mxu1 %v14548_v6  ;;  %v14556_v14 = vld [vmem:[%s15813_s22 + $0xd8] sm:$0xff]   ;;  %v14560_v18 = vld [vmem:[%s15813_s22 + $0xe0] sm:$0xff]   ;;  %v14564_v22 = vld [vmem:[%s15813_s22 + $0xe8] sm:$0xff]   ;;  %v15869_v42 = vsub.s32 %v2306_v41, %v2308_v34 }
  0x49   : > { %v14557_v15 = vld [vmem:[%s15813_s22 + $0x18] sm:$0xff]   ;;  %v14561_v19 = vld [vmem:[%s15813_s22 + $0x20] sm:$0xff]   ;;  %v14565_v23 = vld [vmem:[%s15813_s22 + $0x28] sm:$0xff]  }
  0x4a   : > { %13063 = vmatpush3.bf16.msra.mxu0 %v14549_v7  ;;  %v14558_v16 = vld [vmem:[%s15813_s22 + $0x98] sm:$0xff]   ;;  %v14562_v20 = vld [vmem:[%s15813_s22 + $0xa0] sm:$0xff]   ;;  %v14566_v24 = vld [vmem:[%s15813_s22 + $0xa8] sm:$0xff]  }
  0x4b   : > { %13085 = vmatpush3.bf16.msra.mxu1 %v14550_v8  ;;  %13064 = vmatprep.subr.bf16.mxu0 %v14551_v9  ;;  %v14567_v25 = vld [vmem:[%s15813_s22 + $0x70] sm:$0xff]   ;;  %v14571_v30 = vld [vmem:[%s15813_s22 + $0x78] sm:$0xff]   ;;  %v14576_v36 = vld [vmem:[%s15813_s22 + $0x140] sm:$0xff]  }
  0x4c   : > { %13086 = vmatprep.subr.bf16.mxu1 %v14552_v10  ;;  %v14568_v26 = vld [vmem:[%s15813_s22 + $0xf0] sm:$0xff]   ;;  %v14572_v31 = vld [vmem:[%s15813_s22 + $0xf8] sm:$0xff]   ;;  %v14577_v39 = vld [vmem:[%s15813_s22 + $0x1c0] sm:$0xff]  }
  0x4d   : > { %v14569_v27 = vld [vmem:[%s15813_s22 + $0x30] sm:$0xff]   ;;  %v14573_v32 = vld [vmem:[%s15813_s22 + $0x38] sm:$0xff]   ;;  %v14578_v48 = vld [vmem:[%s15813_s22 + $0x100] sm:$0xff]  }
  0x4e   : > { %13065 = vmatpush3.bf16.msra.mxu0 %v14553_v11  ;;  %v14570_v28 = vld [vmem:[%s15813_s22 + $0xb0] sm:$0xff]   ;;  %v14574_v33 = vld [vmem:[%s15813_s22 + $0xb8] sm:$0xff]   ;;  %v14579_v50 = vld [vmem:[%s15813_s22 + $0x180] sm:$0xff]  }
  0x4f   : > { %13087 = vmatpush3.bf16.msra.mxu1 %v14554_v12  ;;  %13066 = vmatprep.subr.bf16.mxu0 %v14555_v13  ;;  %v223_v35 = vld [vmem:[%s15826_s26] sm:$0xff]  ;;  %v14580_v53 = vld [vmem:[%s15813_s22 + $0x148] sm:$0xff]   ;;  %v14584_v59 = vld [vmem:[%s15813_s22 + $0x150] sm:$0xff]  }
  0x50   : > { %13088 = vmatprep.subr.bf16.mxu1 %v14556_v14  ;;  %v2303_v40 = vcombine.high %v223_v35, %v223_v35  ;;  %v2310_v43 = vrot.slane %v223_v35, %v15869_v42  ;;  %v14581_v55 = vld [vmem:[%s15813_s22 + $0x1c8] sm:$0xff]   ;;  %v14585_v60 = vld [vmem:[%s15813_s22 + $0x1d0] sm:$0xff]   ;;  %v14588_v63 = vld [vmem:[%s15813_s22 + $0x158] sm:$0xff]  }
  0x51   : > { %v14582_v56 = vld [vmem:[%s15813_s22 + $0x108] sm:$0xff]   ;;  %v14586_v61 = vld [vmem:[%s15813_s22 + $0x110] sm:$0xff]   ;;  %v14589_v0 = vld [vmem:[%s15813_s22 + $0x1d8] sm:$0xff]  }
  0x52   : > { %13067 = vmatpush3.bf16.msra.mxu0 %v14557_v15  ;;  %v15873_v44 = vrot.slane %v2303_v40, %v15869_v42  ;;  %v2318_v45 = vcombine.high %v2310_v43, %v2310_v43  ;;  %v2326_v46 = vrot.slane %v2310_v43, %v15869_v42  ;;  %v14583_v58 = vld [vmem:[%s15813_s22 + $0x188] sm:$0xff]   ;;  %v14587_v62 = vld [vmem:[%s15813_s22 + $0x190] sm:$0xff]   ;;  %v14590_v1 = vld [vmem:[%s15813_s22 + $0x118] sm:$0xff]  }
  0x53   : > { %13089 = vmatpush3.bf16.msra.mxu1 %v14558_v16  ;;  %13068 = vmatprep.subr.bf16.mxu0 %v14559_v17  ;;  %v14591_v2 = vld [vmem:[%s15813_s22 + $0x198] sm:$0xff]   ;;  %v14592_v3 = vld [vmem:[%s15813_s22 + $0x160] sm:$0xff]   ;;  %v14596_v7 = vld [vmem:[%s15813_s22 + $0x168] sm:$0xff]  }
  0x54   : > { %13090 = vmatprep.subr.bf16.mxu1 %v14560_v18  ;;  %v2319_v47 = vcombine.high %v15873_v44, %v15873_v44  ;;  %v2340_v49 = vrot.slane %v2318_v45, %v15869_v42  ;;  %v2348_v52 = vcombine.high %v2326_v46, %v2326_v46  ;;  %v14593_v4 = vld [vmem:[%s15813_s22 + $0x1e0] sm:$0xff]   ;;  %v14597_v8 = vld [vmem:[%s15813_s22 + $0x1e8] sm:$0xff]   ;;  %v14600_v11 = vld [vmem:[%s15813_s22 + $0x170] sm:$0xff]  }
  0x55   : > { %v14594_v5 = vld [vmem:[%s15813_s22 + $0x120] sm:$0xff]   ;;  %v14598_v9 = vld [vmem:[%s15813_s22 + $0x128] sm:$0xff]   ;;  %v14601_v12 = vld [vmem:[%s15813_s22 + $0x1f0] sm:$0xff]  }
  0x56   : > { %13069 = vmatpush3.bf16.msra.mxu0 %v14561_v19  ;;  %v2347_v51 = vrot.slane %v2319_v47, %v15869_v42  ;;  %9391 = vmatprep.mubr.bf16.mxu0 %v2340_v49  ;;  %v2350_v54 = vcombine.high %v2340_v49, %v2340_v49  ;;  %v14595_v6 = vld [vmem:[%s15813_s22 + $0x1a0] sm:$0xff]   ;;  %v14599_v10 = vld [vmem:[%s15813_s22 + $0x1a8] sm:$0xff]   ;;  %v14602_v13 = vld [vmem:[%s15813_s22 + $0x130] sm:$0xff]   ;;  %v2333_v19 = vrot.slane %v15873_v44, %v15869_v42 }
  0x57   : > { %13091 = vmatpush3.bf16.msra.mxu1 %v14562_v20  ;;  %13070 = vmatprep.subr.bf16.mxu0 %v14563_v21  ;;  %v14603_v14 = vld [vmem:[%s15813_s22 + $0x1b0] sm:$0xff]   ;;  %v14604_v15 = vld [vmem:[%s15813_s22 + $0x178] sm:$0xff]   ;;  %v14608_v20 = vld [vmem:[%s15813_s22 + $0x240] sm:$0xff]  }
  0x58   : > { %13092 = vmatprep.subr.bf16.mxu1 %v14564_v22  ;;  %v2351_v57 = vcombine.high %v2347_v51, %v2347_v51  ;;  %9431 = vmatprep.mubr.bf16.mxu1 %v2350_v54  ;;  %v14605_v16 = vld [vmem:[%s15813_s22 + $0x1f8] sm:$0xff]   ;;  %v14609_v21 = vld [vmem:[%s15813_s22 + $0x2c0] sm:$0xff]   ;;  %v14616_v29 = vld [vmem:[%s15813_s22 + $0x250] sm:$0xff]  }
  0x59   : > { %v14606_v17 = vld [vmem:[%s15813_s22 + $0x138] sm:$0xff]   ;;  %v14610_v22 = vld [vmem:[%s15813_s22 + $0x200] sm:$0xff]   ;;  %v14628_v41 = vld [vmem:[%s15813_s22 + $0x268] sm:$0xff]  }
  0x5a   : > { %13071 = vmatpush3.bf16.msra.mxu0 %v14565_v23  ;;  %v14607_v18 = vld [vmem:[%s15813_s22 + $0x1b8] sm:$0xff]   ;;  %v14611_v23 = vld [vmem:[%s15813_s22 + $0x280] sm:$0xff]   ;;  %v14629_v43 = vld [vmem:[%s15813_s22 + $0x2e8] sm:$0xff]  }
  0x5b   : > { %13093 = vmatpush3.bf16.msra.mxu1 %v14566_v24  ;;  %13072 = vmatprep.subr.bf16.mxu0 %v14567_v25  ;;  %v2349_v24 = vcombine.high %v2333_v19, %v2333_v19  ;;  %v14612_v25 = vld [vmem:[%s15813_s22 + $0x248] sm:$0xff]   ;;  %v14621_v34 = vld [vmem:[%s15813_s22 + $0x2d8] sm:$0xff]   ;;  %v14624_v37 = vld [vmem:[%s15813_s22 + $0x260] sm:$0xff]  }
  0x5c   : > { %13094 = vmatprep.subr.bf16.mxu1 %v14568_v26  ;;  %v14613_v26 = vld [vmem:[%s15813_s22 + $0x2c8] sm:$0xff]   ;;  %v14622_v35 = vld [vmem:[%s15813_s22 + $0x218] sm:$0xff]   ;;  %v14625_v38 = vld [vmem:[%s15813_s22 + $0x2e0] sm:$0xff]  }
  0x5d   : > { %v14627_v40 = vld [vmem:[%s15813_s22 + $0x2a0] sm:$0xff]   ;;  %v14630_v44 = vld [vmem:[%s15813_s22 + $0x228] sm:$0xff]  }
  0x5e   : > { %13073 = vmatpush3.bf16.msra.mxu0 %v14569_v27  ;;  %v14614_v27 = vld [vmem:[%s15813_s22 + $0x208] sm:$0xff]  }
  0x5f   : > { %13095 = vmatpush3.bf16.msra.mxu1 %v14570_v28  ;;  %13074 = vmatprep.subr.bf16.mxu0 %v14571_v30  ;;  %v14615_v28 = vld [vmem:[%s15813_s22 + $0x288] sm:$0xff]   ;;  %v14617_v30 = vld [vmem:[%s15813_s22 + $0x2d0] sm:$0xff]  }
  0x60   : > { %13096 = vmatprep.subr.bf16.mxu1 %v14572_v31  ;;  %v14618_v31 = vld [vmem:[%s15813_s22 + $0x210] sm:$0xff]   ;;  %v14631_v45 = vld [vmem:[%s15813_s22 + $0x2a8] sm:$0xff]  }
  0x61   : > { %v224_v47 = vld [vmem:[%s15826_s26 + $0x8] sm:$0xff] }
  0x62   : > { %13075 = vmatpush3.bf16.msra.mxu0 %v14573_v32  ;;  %v14619_v32 = vld [vmem:[%s15813_s22 + $0x290] sm:$0xff]   ;;  %v2359_v49 = vrot.slane %v224_v47, %v15869_v42 }
  0x63   : > { %13097 = vmatpush3.bf16.msra.mxu1 %v14574_v33  ;;  %13104 = vmatprep.subr.bf16.mxu0 %v14576_v36  ;;  %v14620_v33 = vld [vmem:[%s15813_s22 + $0x258] sm:$0xff]  }
  0x64   : > { %13126 = vmatprep.subr.bf16.mxu1 %v14577_v39  ;;  %v14623_v36 = vld [vmem:[%s15813_s22 + $0x298] sm:$0xff]   ;;  %v14626_v39 = vld [vmem:[%s15813_s22 + $0x220] sm:$0xff]  }
  0x65   : > { %9392 = vmatmul.mubr.bf16.vlgmr.msra.gmra.mrb[0].mxu0 %v2326_v46  ;;  %v14632_v46 = vld [vmem:[%s15813_s22 + $0x270] sm:$0xff]  }
  0x66   : > { %13105 = vmatpush3.bf16.msra.mxu0 %v14578_v48  ;;  %9432 = vmatmul.mubr.bf16.vlgmr.msra.gmra.mrb[0].mxu1 %v2348_v52  ;;  %v14633_v48 = vld [vmem:[%s15813_s22 + $0x2f0] sm:$0xff]  }
  0x67   : > { %13106 = vmatprep.subr.bf16.mxu0 %v14580_v53  ;;  %13127 = vmatpush3.bf16.msra.mxu1 %v14579_v50  ;;  %v2352_v50 = vcombine.high %v224_v47, %v224_v47  ;;  %v14635_v52 = vld [vmem:[%s15813_s22 + $0x2b0] sm:$0xff]   ;;  %v2367_v53 = vcombine.high %v2359_v49, %v2359_v49 }
  0x68   : > { %9471 = vmatprep.mubr.bf16.mxu0 %v2347_v51  ;;  %13128 = vmatprep.subr.bf16.mxu1 %v14581_v55  ;;  %v14634_v51 = vld [vmem:[%s15813_s22 + $0x230] sm:$0xff]   ;;  %v14636_v55 = vld [vmem:[%s15813_s22 + $0x278] sm:$0xff]  }
  0x69   : > { %9511 = vmatprep.mubr.bf16.mxu1 %v2351_v57  ;;  %v15943_v54 = vrot.slane %v2352_v50, %v15869_v42  ;;  %v2389_v57 = vrot.slane %v2367_v53, %v15869_v42  ;;  %v14683_v47 = vld [vmem:[%s15813_s22 + $0x410] sm:$0xff]   ;;  %v14686_v50 = vld [vmem:[%s15813_s22 + $0x4d8] sm:$0xff]   ;;  %v14689_v53 = vld [vmem:[%s15813_s22 + $0x460] sm:$0xff]  }
  0x6a   : > { %13107 = vmatpush3.bf16.msra.mxu0 %v14582_v56  ;;  %v14637_v56 = vld [vmem:[%s15813_s22 + $0x2f8] sm:$0xff]  }
  0x6b   : > { %13108 = vmatprep.subr.bf16.mxu0 %v14584_v59  ;;  %13129 = vmatpush3.bf16.msra.mxu1 %v14583_v58  ;;  %v2368_v58 = vcombine.high %v15943_v54, %v15943_v54  ;;  %v14638_v59 = vld [vmem:[%s15813_s22 + $0x238] sm:$0xff]  }
  0x6c   : > { %13130 = vmatprep.subr.bf16.mxu1 %v14585_v60  ;;  %v14639_v60 = vld [vmem:[%s15813_s22 + $0x2b8] sm:$0xff]  }
  0x6e   : > { %13109 = vmatpush3.bf16.msra.mxu0 %v14586_v61  ;;  %v2399_v61 = vcombine.high %v2389_v57, %v2389_v57 }
  0x6f   : > { %13110 = vmatprep.subr.bf16.mxu0 %v14588_v63  ;;  %13131 = vmatpush3.bf16.msra.mxu1 %v14587_v62  ;;  %v2375_v62 = vrot.slane %v2359_v49, %v15869_v42  ;;  %v14640_v63 = vld [vmem:[%s15813_s22 + $0x340] sm:$0xff]   ;;  %v14685_v49 = vld [vmem:[%s15813_s22 + $0x458] sm:$0xff]  }
  0x70   : > { %13132 = vmatprep.subr.bf16.mxu1 %v14589_v0  ;;  %v14641_v0 = vld [vmem:[%s15813_s22 + $0x3c0] sm:$0xff]  }
  0x72   : > { %13111 = vmatpush3.bf16.msra.mxu0 %v14590_v1  ;;  %v2396_v1 = vrot.slane %v2368_v58, %v15869_v42  ;;  %v14694_v58 = vld [vmem:[%s15813_s22 + $0x4e8] sm:$0xff]  }
  0x73   : > { %13112 = vmatprep.subr.bf16.mxu0 %v14592_v3  ;;  %13133 = vmatpush3.bf16.msra.mxu1 %v14591_v2  ;;  %v14642_v2 = vld [vmem:[%s15813_s22 + $0x300] sm:$0xff]  }
  0x74   : > { %13134 = vmatprep.subr.bf16.mxu1 %v14593_v4  ;;  %v14643_v3 = vld [vmem:[%s15813_s22 + $0x380] sm:$0xff]   ;;  %v2397_v4 = vcombine.high %v2375_v62, %v2375_v62 }
  0x76   : > { %13113 = vmatpush3.bf16.msra.mxu0 %v14594_v5  ;;  %v14644_v5 = vld [vmem:[%s15813_s22 + $0x348] sm:$0xff]  }
  0x77   : > { %13114 = vmatprep.subr.bf16.mxu0 %v14596_v7  ;;  %13135 = vmatpush3.bf16.msra.mxu1 %v14595_v6  ;;  %v14645_v6 = vld [vmem:[%s15813_s22 + $0x3c8] sm:$0xff]   ;;  %v2400_v7 = vcombine.high %v2396_v1, %v2396_v1 }
  0x78   : > { %13136 = vmatprep.subr.bf16.mxu1 %v14597_v8  ;;  %v14646_v8 = vld [vmem:[%s15813_s22 + $0x308] sm:$0xff]  }
  0x7a   : > { %13115 = vmatpush3.bf16.msra.mxu0 %v14598_v9  ;;  %v14647_v9 = vld [vmem:[%s15813_s22 + $0x388] sm:$0xff]  }
  0x7b   : > { %13116 = vmatprep.subr.bf16.mxu0 %v14600_v11  ;;  %13137 = vmatpush3.bf16.msra.mxu1 %v14599_v10  ;;  %v14648_v10 = vld [vmem:[%s15813_s22 + $0x350] sm:$0xff]  }
  0x7c   : > { %13138 = vmatprep.subr.bf16.mxu1 %v14601_v12  ;;  %v14649_v11 = vld [vmem:[%s15813_s22 + $0x3d0] sm:$0xff]  }
  0x7d   : > { %v14650_v12 = vld [vmem:[%s15813_s22 + $0x310] sm:$0xff]  }
  0x7e   : > { %13117 = vmatpush3.bf16.msra.mxu0 %v14602_v13  ;;  %v14651_v13 = vld [vmem:[%s15813_s22 + $0x390] sm:$0xff]  }
  0x7f   : > { %13118 = vmatprep.subr.bf16.mxu0 %v14604_v15  ;;  %13139 = vmatpush3.bf16.msra.mxu1 %v14603_v14  ;;  %v14652_v14 = vld [vmem:[%s15813_s22 + $0x358] sm:$0xff]  }
  0x80   : > { %13140 = vmatprep.subr.bf16.mxu1 %v14605_v16  ;;  %v14653_v15 = vld [vmem:[%s15813_s22 + $0x3d8] sm:$0xff]  }
  0x81   : > { %v14654_v16 = vld [vmem:[%s15813_s22 + $0x318] sm:$0xff]  }
  0x82   : > { %13119 = vmatpush3.bf16.msra.mxu0 %v14606_v17  ;;  %v14655_v17 = vld [vmem:[%s15813_s22 + $0x398] sm:$0xff]  }
  0x83   : > { %13148 = vmatprep.subr.bf16.mxu0 %v14608_v20  ;;  %13141 = vmatpush3.bf16.msra.mxu1 %v14607_v18  ;;  %v14656_v18 = vld [vmem:[%s15813_s22 + $0x360] sm:$0xff]  }
  0x84   : > { %13170 = vmatprep.subr.bf16.mxu1 %v14609_v21  ;;  %v14658_v20 = vld [vmem:[%s15813_s22 + $0x320] sm:$0xff]  }
  0x85   : > { %9472 = vmatmul.mubr.bf16.vlgmr.msra.gmra.mrb[4].mxu0 %v2333_v19  ;;  %v14657_v19 = vld [vmem:[%s15813_s22 + $0x3e0] sm:$0xff]  }
  0x86   : > { %13149 = vmatpush3.bf16.msra.mxu0 %v14610_v22  ;;  %9512 = vmatmul.mubr.bf16.vlgmr.msra.gmra.mrb[4].mxu1 %v2349_v24  ;;  %v14659_v21 = vld [vmem:[%s15813_s22 + $0x3a0] sm:$0xff]   ;;  %v14660_v22 = vld [vmem:[%s15813_s22 + $0x368] sm:$0xff]  }
  0x87   : > { %13150 = vmatprep.subr.bf16.mxu0 %v14612_v25  ;;  %13171 = vmatpush3.bf16.msra.mxu1 %v14611_v23  ;;  %v14661_v23 = vld [vmem:[%s15813_s22 + $0x3e8] sm:$0xff]  }
  0x88   : > { %13172 = vmatprep.subr.bf16.mxu1 %v14613_v26  ;;  %9551 = vmatprep.mubr.bf16.mxu0 %v2389_v57  ;;  %v14662_v24 = vld [vmem:[%s15813_s22 + $0x328] sm:$0xff]   ;;  %v14664_v26 = vld [vmem:[%s15813_s22 + $0x370] sm:$0xff]  }
  0x89   : > { %9591 = vmatprep.mubr.bf16.mxu1 %v2399_v61  ;;  %v14663_v25 = vld [vmem:[%s15813_s22 + $0x3a8] sm:$0xff]   ;;  %v14697_v61 = vld [vmem:[%s15813_s22 + $0x470] sm:$0xff]  }
  0x8a   : > { %13151 = vmatpush3.bf16.msra.mxu0 %v14614_v27  ;;  %v14665_v27 = vld [vmem:[%s15813_s22 + $0x3f0] sm:$0xff]   ;;  %v14693_v57 = vld [vmem:[%s15813_s22 + $0x468] sm:$0xff]  }
  0x8b   : > { %13152 = vmatprep.subr.bf16.mxu0 %v14616_v29  ;;  %13173 = vmatpush3.bf16.msra.mxu1 %v14615_v28  ;;  %v14666_v28 = vld [vmem:[%s15813_s22 + $0x330] sm:$0xff]  }
  0x8c   : > { %13174 = vmatprep.subr.bf16.mxu1 %v14617_v30  ;;  %v14667_v29 = vld [vmem:[%s15813_s22 + $0x3b0] sm:$0xff]   ;;  %v14668_v30 = vld [vmem:[%s15813_s22 + $0x378] sm:$0xff]  }
  0x8e   : > { %13153 = vmatpush3.bf16.msra.mxu0 %v14618_v31  ;;  %v14669_v31 = vld [vmem:[%s15813_s22 + $0x3f8] sm:$0xff]  }
  0x8f   : > { %13154 = vmatprep.subr.bf16.mxu0 %v14620_v33  ;;  %13175 = vmatpush3.bf16.msra.mxu1 %v14619_v32  ;;  %v14670_v32 = vld [vmem:[%s15813_s22 + $0x338] sm:$0xff]  }
  0x90   : > { %13176 = vmatprep.subr.bf16.mxu1 %v14621_v34  ;;  %v14671_v33 = vld [vmem:[%s15813_s22 + $0x3b8] sm:$0xff]   ;;  %v2382_v34 = vrot.slane %v15943_v54, %v15869_v42  ;;  %v14690_v54 = vld [vmem:[%s15813_s22 + $0x4e0] sm:$0xff]  }
  0x92   : > { %13155 = vmatpush3.bf16.msra.mxu0 %v14622_v35  ;;  %v14673_v35 = vld [vmem:[%s15813_s22 + $0x440] sm:$0xff]  }
  0x93   : > { %13156 = vmatprep.subr.bf16.mxu0 %v14624_v37  ;;  %13177 = vmatpush3.bf16.msra.mxu1 %v14623_v36  ;;  %v14674_v36 = vld [vmem:[%s15813_s22 + $0x4c0] sm:$0xff]  }
  0x94   : > { %13178 = vmatprep.subr.bf16.mxu1 %v14625_v38  ;;  %v14675_v37 = vld [vmem:[%s15813_s22 + $0x400] sm:$0xff]  }
  0x95   : > { %v14676_v38 = vld [vmem:[%s15813_s22 + $0x480] sm:$0xff]  }
  0x96   : > { %13157 = vmatpush3.bf16.msra.mxu0 %v14626_v39  ;;  %v2398_v39 = vcombine.high %v2382_v34, %v2382_v34 }
  0x97   : > { %13158 = vmatprep.subr.bf16.mxu0 %v14628_v41  ;;  %13179 = vmatpush3.bf16.msra.mxu1 %v14627_v40  ;;  %v14677_v40 = vld [vmem:[%s15813_s22 + $0x448] sm:$0xff]  }
  0x98   : > { %13180 = vmatprep.subr.bf16.mxu1 %v14629_v43  ;;  %v14678_v41 = vld [vmem:[%s15813_s22 + $0x4c8] sm:$0xff]  }
  0x99   : > { %v14679_v43 = vld [vmem:[%s15813_s22 + $0x408] sm:$0xff]  }
  0x9a   : > { %13159 = vmatpush3.bf16.msra.mxu0 %v14630_v44  ;;  %v14680_v44 = vld [vmem:[%s15813_s22 + $0x488] sm:$0xff]  }
  0x9b   : > { %13160 = vmatprep.subr.bf16.mxu0 %v14632_v46  ;;  %13181 = vmatpush3.bf16.msra.mxu1 %v14631_v45  ;;  %v14681_v45 = vld [vmem:[%s15813_s22 + $0x450] sm:$0xff]  }
  0x9c   : > { %13182 = vmatprep.subr.bf16.mxu1 %v14633_v48  ;;  %v14682_v46 = vld [vmem:[%s15813_s22 + $0x4d0] sm:$0xff]  }
  0x9d   : > { %v14684_v48 = vld [vmem:[%s15813_s22 + $0x490] sm:$0xff]  }
  0x9e   : > { %13161 = vmatpush3.bf16.msra.mxu0 %v14634_v51  ;;  %v14687_v51 = vld [vmem:[%s15813_s22 + $0x418] sm:$0xff]  }
  0x9f   : > { %13162 = vmatprep.subr.bf16.mxu0 %v14636_v55  ;;  %13183 = vmatpush3.bf16.msra.mxu1 %v14635_v52  ;;  %v14688_v52 = vld [vmem:[%s15813_s22 + $0x498] sm:$0xff]   ;;  %v14691_v55 = vld [vmem:[%s15813_s22 + $0x420] sm:$0xff]  }
  0xa0   : > { %13184 = vmatprep.subr.bf16.mxu1 %v14637_v56  ;;  %v14692_v56 = vld [vmem:[%s15813_s22 + $0x4a0] sm:$0xff]  }
  0xa2   : > { %13163 = vmatpush3.bf16.msra.mxu0 %v14638_v59  ;;  %v14695_v59 = vld [vmem:[%s15813_s22 + $0x428] sm:$0xff]  }
  0xa3   : > { %13192 = vmatprep.subr.bf16.mxu0 %v14640_v63  ;;  %13185 = vmatpush3.bf16.msra.mxu1 %v14639_v60  ;;  %v14696_v60 = vld [vmem:[%s15813_s22 + $0x4a8] sm:$0xff]   ;;  %v14698_v63 = vld [vmem:[%s15813_s22 + $0x4f0] sm:$0xff]  }
  0xa4   : > { %13214 = vmatprep.subr.bf16.mxu1 %v14641_v0 }
  0xa5   : > { %9552 = vmatmul.mubr.bf16.vlgmr.msra.gmra.mrb[8].mxu0 %v2375_v62  ;;  %v225_v62 = vld [vmem:[%s15826_s26 + $0x10] sm:$0xff] }
  0xa6   : > { %13193 = vmatpush3.bf16.msra.mxu0 %v14642_v2  ;;  %9631 = vmatprep.mubr.bf16.mxu0 %v2396_v1  ;;  %v2408_v0 = vrot.slane %v225_v62, %v15869_v42  ;;  %v2401_v1 = vcombine.high %v225_v62, %v225_v62  ;;  %v14699_v2 = vld [vmem:[%s15813_s22 + $0x430] sm:$0xff]  }
  0xa7   : > { %9592 = vmatmul.mubr.bf16.vlgmr.msra.gmra.mrb[8].mxu1 %v2397_v4  ;;  %13194 = vmatprep.subr.bf16.mxu0 %v14644_v5  ;;  %v14748_v62 = vld [vmem:[%s15813_s22 + $0x610] sm:$0xff]  }
  0xa8   : > { %13215 = vmatpush3.bf16.msra.mxu1 %v14643_v3  ;;  %9671 = vmatprep.mubr.bf16.mxu1 %v2400_v7  ;;  %v14700_v3 = vld [vmem:[%s15813_s22 + $0x4b0] sm:$0xff]   ;;  %v2416_v4 = vcombine.high %v2408_v0, %v2408_v0  ;;  %v16019_v5 = vrot.slane %v2401_v1, %v15869_v42  ;;  %v14702_v7 = vld [vmem:[%s15813_s22 + $0x4f8] sm:$0xff]  }
  0xa9   : > { %13216 = vmatprep.subr.bf16.mxu1 %v14645_v6  ;;  %v14701_v6 = vld [vmem:[%s15813_s22 + $0x478] sm:$0xff]  }
  0xaa   : > { %13195 = vmatpush3.bf16.msra.mxu0 %v14646_v8  ;;  %v2438_v8 = vrot.slane %v2416_v4, %v15869_v42  ;;  %v14751_v1 = vld [vmem:[%s15813_s22 + $0x6d8] sm:$0xff]   ;;  %v14754_v4 = vld [vmem:[%s15813_s22 + $0x660] sm:$0xff]  }
  0xab   : > { %13196 = vmatprep.subr.bf16.mxu0 %v14648_v10  ;;  %v14703_v10 = vld [vmem:[%s15813_s22 + $0x438] sm:$0xff]  }
  0xac   : > { %13217 = vmatpush3.bf16.msra.mxu1 %v14647_v9  ;;  %v2417_v9 = vcombine.high %v16019_v5, %v16019_v5 }
  0xad   : > { %13218 = vmatprep.subr.bf16.mxu1 %v14649_v11  ;;  %v14704_v11 = vld [vmem:[%s15813_s22 + $0x4b8] sm:$0xff]  }
  0xae   : > { %13197 = vmatpush3.bf16.msra.mxu0 %v14650_v12  ;;  %v2448_v12 = vcombine.high %v2438_v8, %v2438_v8 }
  0xaf   : > { %13198 = vmatprep.subr.bf16.mxu0 %v14652_v14  ;;  %v14705_v14 = vld [vmem:[%s15813_s22 + $0x540] sm:$0xff]  }
  0xb0   : > { %13219 = vmatpush3.bf16.msra.mxu1 %v14651_v13  ;;  %v2424_v13 = vrot.slane %v2408_v0, %v15869_v42  ;;  %v14750_v0 = vld [vmem:[%s15813_s22 + $0x658] sm:$0xff]  }
  0xb1   : > { %13220 = vmatprep.subr.bf16.mxu1 %v14653_v15  ;;  %v14706_v15 = vld [vmem:[%s15813_s22 + $0x5c0] sm:$0xff]  }
  0xb2   : > { %13199 = vmatpush3.bf16.msra.mxu0 %v14654_v16  ;;  %v2445_v16 = vrot.slane %v2417_v9, %v15869_v42  ;;  %v14759_v9 = vld [vmem:[%s15813_s22 + $0x6e8] sm:$0xff]  }
  0xb3   : > { %13200 = vmatprep.subr.bf16.mxu0 %v14656_v18  ;;  %v14708_v18 = vld [vmem:[%s15813_s22 + $0x580] sm:$0xff]  }
  0xb4   : > { %13221 = vmatpush3.bf16.msra.mxu1 %v14655_v17  ;;  %v14707_v17 = vld [vmem:[%s15813_s22 + $0x500] sm:$0xff]  }
  0xb5   : > { %13222 = vmatprep.subr.bf16.mxu1 %v14657_v19  ;;  %v2446_v19 = vcombine.high %v2424_v13, %v2424_v13 }
  0xb6   : > { %13201 = vmatpush3.bf16.msra.mxu0 %v14658_v20  ;;  %v14709_v20 = vld [vmem:[%s15813_s22 + $0x548] sm:$0xff]  }
  0xb7   : > { %13202 = vmatprep.subr.bf16.mxu0 %v14660_v22  ;;  %v2449_v22 = vcombine.high %v2445_v16, %v2445_v16 }
  0xb8   : > { %13223 = vmatpush3.bf16.msra.mxu1 %v14659_v21  ;;  %v14710_v21 = vld [vmem:[%s15813_s22 + $0x5c8] sm:$0xff]  }
  0xb9   : > { %13224 = vmatprep.subr.bf16.mxu1 %v14661_v23  ;;  %v14711_v23 = vld [vmem:[%s15813_s22 + $0x508] sm:$0xff]  }
  0xba   : > { %13203 = vmatpush3.bf16.msra.mxu0 %v14662_v24  ;;  %v14712_v24 = vld [vmem:[%s15813_s22 + $0x588] sm:$0xff]  }
  0xbb   : > { %13204 = vmatprep.subr.bf16.mxu0 %v14664_v26  ;;  %v14714_v26 = vld [vmem:[%s15813_s22 + $0x5d0] sm:$0xff]  }
  0xbc   : > { %13225 = vmatpush3.bf16.msra.mxu1 %v14663_v25  ;;  %v14713_v25 = vld [vmem:[%s15813_s22 + $0x550] sm:$0xff]  }
  0xbd   : > { %13226 = vmatprep.subr.bf16.mxu1 %v14665_v27  ;;  %v14715_v27 = vld [vmem:[%s15813_s22 + $0x510] sm:$0xff]  }
  0xbe   : > { %13205 = vmatpush3.bf16.msra.mxu0 %v14666_v28  ;;  %v14716_v28 = vld [vmem:[%s15813_s22 + $0x590] sm:$0xff]  }
  0xbf   : > { %13206 = vmatprep.subr.bf16.mxu0 %v14668_v30  ;;  %v14718_v30 = vld [vmem:[%s15813_s22 + $0x5d8] sm:$0xff]  }
  0xc0   : > { %13227 = vmatpush3.bf16.msra.mxu1 %v14667_v29  ;;  %v14717_v29 = vld [vmem:[%s15813_s22 + $0x558] sm:$0xff]  }
  0xc1   : > { %13228 = vmatprep.subr.bf16.mxu1 %v14669_v31  ;;  %v14719_v31 = vld [vmem:[%s15813_s22 + $0x518] sm:$0xff]  }
  0xc2   : > { %13207 = vmatpush3.bf16.msra.mxu0 %v14670_v32  ;;  %v14720_v32 = vld [vmem:[%s15813_s22 + $0x598] sm:$0xff]  }
  0xc3   : > { %13236 = vmatprep.subr.bf16.mxu0 %v14673_v35  ;;  %v14723_v35 = vld [vmem:[%s15813_s22 + $0x520] sm:$0xff]  }
  0xc4   : > { %13229 = vmatpush3.bf16.msra.mxu1 %v14671_v33  ;;  %v14721_v33 = vld [vmem:[%s15813_s22 + $0x560] sm:$0xff]  }
  0xc5   : > { %9632 = vmatmul.mubr.bf16.vlgmr.msra.gmra.mrb[12].mxu0 %v2382_v34  ;;  %13258 = vmatprep.subr.bf16.mxu1 %v14674_v36  ;;  %v14722_v34 = vld [vmem:[%s15813_s22 + $0x5e0] sm:$0xff]  }
  0xc6   : > { %13237 = vmatpush3.bf16.msra.mxu0 %v14675_v37  ;;  %9711 = vmatprep.mubr.bf16.mxu0 %v2438_v8  ;;  %v14724_v36 = vld [vmem:[%s15813_s22 + $0x5a0] sm:$0xff]   ;;  %v14725_v37 = vld [vmem:[%s15813_s22 + $0x568] sm:$0xff]  }
  0xc7   : > { %9672 = vmatmul.mubr.bf16.vlgmr.msra.gmra.mrb[12].mxu1 %v2398_v39  ;;  %13238 = vmatprep.subr.bf16.mxu0 %v14677_v40  ;;  %v14727_v39 = vld [vmem:[%s15813_s22 + $0x528] sm:$0xff]  }
  0xc8   : > { %13259 = vmatpush3.bf16.msra.mxu1 %v14676_v38  ;;  %9751 = vmatprep.mubr.bf16.mxu1 %v2448_v12  ;;  %v14726_v38 = vld [vmem:[%s15813_s22 + $0x5e8] sm:$0xff]   ;;  %v14762_v12 = vld [vmem:[%s15813_s22 + $0x670] sm:$0xff]  }
  0xc9   : > { %13260 = vmatprep.subr.bf16.mxu1 %v14678_v41  ;;  %v14728_v40 = vld [vmem:[%s15813_s22 + $0x5a8] sm:$0xff]   ;;  %v14729_v41 = vld [vmem:[%s15813_s22 + $0x570] sm:$0xff]  }
  0xca   : > { %13239 = vmatpush3.bf16.msra.mxu0 %v14679_v43  ;;  %v14730_v43 = vld [vmem:[%s15813_s22 + $0x5f0] sm:$0xff]   ;;  %v14758_v8 = vld [vmem:[%s15813_s22 + $0x668] sm:$0xff]  }
  0xcb   : > { %13240 = vmatprep.subr.bf16.mxu0 %v14681_v45  ;;  %v14732_v45 = vld [vmem:[%s15813_s22 + $0x5b0] sm:$0xff]  }
  0xcc   : > { %13261 = vmatpush3.bf16.msra.mxu1 %v14680_v44  ;;  %v14731_v44 = vld [vmem:[%s15813_s22 + $0x530] sm:$0xff]  }
  0xcd   : > { %13262 = vmatprep.subr.bf16.mxu1 %v14682_v46  ;;  %v14733_v46 = vld [vmem:[%s15813_s22 + $0x578] sm:$0xff]  }
  0xce   : > { %13241 = vmatpush3.bf16.msra.mxu0 %v14683_v47  ;;  %v14734_v47 = vld [vmem:[%s15813_s22 + $0x5f8] sm:$0xff]  }
  0xcf   : > { %13242 = vmatprep.subr.bf16.mxu0 %v14685_v49  ;;  %v14736_v49 = vld [vmem:[%s15813_s22 + $0x5b8] sm:$0xff]  }
  0xd0   : > { %13263 = vmatpush3.bf16.msra.mxu1 %v14684_v48  ;;  %v14735_v48 = vld [vmem:[%s15813_s22 + $0x538] sm:$0xff]  }
  0xd1   : > { %13264 = vmatprep.subr.bf16.mxu1 %v14686_v50  ;;  %v2431_v50 = vrot.slane %v16019_v5, %v15869_v42  ;;  %v14755_v5 = vld [vmem:[%s15813_s22 + $0x6e0] sm:$0xff]  }
  0xd2   : > { %13243 = vmatpush3.bf16.msra.mxu0 %v14687_v51  ;;  %v14738_v51 = vld [vmem:[%s15813_s22 + $0x640] sm:$0xff]  }
  0xd3   : > { %13244 = vmatprep.subr.bf16.mxu0 %v14689_v53  ;;  %v14740_v53 = vld [vmem:[%s15813_s22 + $0x600] sm:$0xff]  }
  0xd4   : > { %13265 = vmatpush3.bf16.msra.mxu1 %v14688_v52  ;;  %v14739_v52 = vld [vmem:[%s15813_s22 + $0x6c0] sm:$0xff]  }
  0xd5   : > { %13266 = vmatprep.subr.bf16.mxu1 %v14690_v54  ;;  %v14741_v54 = vld [vmem:[%s15813_s22 + $0x680] sm:$0xff]  }
  0xd6   : > { %13245 = vmatpush3.bf16.msra.mxu0 %v14691_v55  ;;  %v2447_v55 = vcombine.high %v2431_v50, %v2431_v50 }
  0xd7   : > { %13246 = vmatprep.subr.bf16.mxu0 %v14693_v57  ;;  %v14743_v57 = vld [vmem:[%s15813_s22 + $0x6c8] sm:$0xff]  }
  0xd8   : > { %13267 = vmatpush3.bf16.msra.mxu1 %v14692_v56  ;;  %v14742_v56 = vld [vmem:[%s15813_s22 + $0x648] sm:$0xff]  }
  0xd9   : > { %13268 = vmatprep.subr.bf16.mxu1 %v14694_v58  ;;  %v14744_v58 = vld [vmem:[%s15813_s22 + $0x608] sm:$0xff]  }
  0xda   : > { %13247 = vmatpush3.bf16.msra.mxu0 %v14695_v59  ;;  %v14745_v59 = vld [vmem:[%s15813_s22 + $0x688] sm:$0xff]  }
  0xdb   : > { %13248 = vmatprep.subr.bf16.mxu0 %v14697_v61  ;;  %v14747_v61 = vld [vmem:[%s15813_s22 + $0x6d0] sm:$0xff]  }
  0xdc   : > { %13269 = vmatpush3.bf16.msra.mxu1 %v14696_v60  ;;  %v14746_v60 = vld [vmem:[%s15813_s22 + $0x650] sm:$0xff]  }
  0xdd   : > { %13270 = vmatprep.subr.bf16.mxu1 %v14698_v63  ;;  %v14749_v63 = vld [vmem:[%s15813_s22 + $0x690] sm:$0xff]  }
  0xde   : > { %13249 = vmatpush3.bf16.msra.mxu0 %v14699_v2  ;;  %v14752_v2 = vld [vmem:[%s15813_s22 + $0x618] sm:$0xff]  }
  0xdf   : > { %13250 = vmatprep.subr.bf16.mxu0 %v14701_v6  ;;  %v14756_v6 = vld [vmem:[%s15813_s22 + $0x620] sm:$0xff]  }
  0xe0   : > { %13271 = vmatpush3.bf16.msra.mxu1 %v14700_v3  ;;  %v14753_v3 = vld [vmem:[%s15813_s22 + $0x698] sm:$0xff]  }
  0xe1   : > { %13272 = vmatprep.subr.bf16.mxu1 %v14702_v7  ;;  %v14757_v7 = vld [vmem:[%s15813_s22 + $0x6a0] sm:$0xff]  }
  0xe2   : > { %13251 = vmatpush3.bf16.msra.mxu0 %v14703_v10  ;;  %v14760_v10 = vld [vmem:[%s15813_s22 + $0x628] sm:$0xff]  }
  0xe3   : > { %13280 = vmatprep.subr.bf16.mxu0 %v14705_v14  ;;  %v226_v14 = vld [vmem:[%s15826_s26 + $0x18] sm:$0xff] }
  0xe4   : > { %13273 = vmatpush3.bf16.msra.mxu1 %v14704_v11  ;;  %v14761_v11 = vld [vmem:[%s15813_s22 + $0x6a8] sm:$0xff]  }
  0xe5   : > { %9712 = vmatmul.mubr.bf16.vlgmr.msra.gmra.mrb[16].mxu0 %v2424_v13  ;;  %13302 = vmatprep.subr.bf16.mxu1 %v14706_v15  ;;  %v14763_v13 = vld [vmem:[%s15813_s22 + $0x6f0] sm:$0xff]  }
  0xe6   : > { %13281 = vmatpush3.bf16.msra.mxu0 %v14707_v17  ;;  %9791 = vmatprep.mubr.bf16.mxu0 %v2445_v16  ;;  %v14764_v15 = vld [vmem:[%s15813_s22 + $0x630] sm:$0xff]   ;;  %v2457_v16 = vrot.slane %v226_v14, %v15869_v42  ;;  %v2450_v17 = vcombine.high %v226_v14, %v226_v14  ;;  %v14804_v14 = vld [vmem:[%s15813_s22 + $0x8c0] sm:$0xff]  }
  0xe7   : > { %9752 = vmatmul.mubr.bf16.vlgmr.msra.gmra.mrb[16].mxu1 %v2446_v19  ;;  %13282 = vmatprep.subr.bf16.mxu0 %v14709_v20  ;;  %v14766_v19 = vld [vmem:[%s15813_s22 + $0x678] sm:$0xff]  }
  0xe8   : > { %13303 = vmatpush3.bf16.msra.mxu1 %v14708_v18  ;;  %9831 = vmatprep.mubr.bf16.mxu1 %v2449_v22  ;;  %v14765_v18 = vld [vmem:[%s15813_s22 + $0x6b0] sm:$0xff]   ;;  %v2465_v20 = vcombine.high %v2457_v16, %v2457_v16  ;;  %v14767_v22 = vld [vmem:[%s15813_s22 + $0x6f8] sm:$0xff]  }
  0xe9   : > { %13304 = vmatprep.subr.bf16.mxu1 %v14710_v21  ;;  %v16096_v21 = vrot.slane %v2450_v17, %v15869_v42 }
  0xea   : > { %13283 = vmatpush3.bf16.msra.mxu0 %v14711_v23  ;;  %v14768_v23 = vld [vmem:[%s15813_s22 + $0x638] sm:$0xff]  }
  0xeb   : > { %13284 = vmatprep.subr.bf16.mxu0 %v14713_v25  ;;  %v2466_v25 = vcombine.high %v16096_v21, %v16096_v21 }
  0xec   : > { %13305 = vmatpush3.bf16.msra.mxu1 %v14712_v24  ;;  %v2487_v24 = vrot.slane %v2465_v20, %v15869_v42  ;;  %v14809_v20 = vld [vmem:[%s15813_s22 + $0x808] sm:$0xff]  }
  0xed   : > { %13306 = vmatprep.subr.bf16.mxu1 %v14714_v26  ;;  %v14769_v26 = vld [vmem:[%s15813_s22 + $0x6b8] sm:$0xff]  }
  0xee   : > { %13285 = vmatpush3.bf16.msra.mxu0 %v14715_v27  ;;  %v2497_v27 = vcombine.high %v2487_v24, %v2487_v24 }
  0xef   : > { %13286 = vmatprep.subr.bf16.mxu0 %v14717_v29  ;;  %v14770_v29 = vld [vmem:[%s15813_s22 + $0x740] sm:$0xff]  }
  0xf0   : > { %13307 = vmatpush3.bf16.msra.mxu1 %v14716_v28  ;;  %v2473_v28 = vrot.slane %v2457_v16, %v15869_v42  ;;  %v14806_v16 = vld [vmem:[%s15813_s22 + $0x880] sm:$0xff]  }
  0xf1   : > { %13308 = vmatprep.subr.bf16.mxu1 %v14718_v30  ;;  %v14771_v30 = vld [vmem:[%s15813_s22 + $0x7c0] sm:$0xff]  }
  0xf2   : > { %13287 = vmatpush3.bf16.msra.mxu0 %v14719_v31  ;;  %v2494_v31 = vrot.slane %v2466_v25, %v15869_v42  ;;  %v14814_v25 = vld [vmem:[%s15813_s22 + $0x890] sm:$0xff]  }
  0xf3   : > { %13288 = vmatprep.subr.bf16.mxu0 %v14721_v33  ;;  %v14773_v33 = vld [vmem:[%s15813_s22 + $0x780] sm:$0xff]  }
  0xf4   : > { %13309 = vmatpush3.bf16.msra.mxu1 %v14720_v32  ;;  %v14772_v32 = vld [vmem:[%s15813_s22 + $0x700] sm:$0xff]  }
  0xf5   : > { %13310 = vmatprep.subr.bf16.mxu1 %v14722_v34  ;;  %v2495_v34 = vcombine.high %v2473_v28, %v2473_v28 }
  0xf6   : > { %13289 = vmatpush3.bf16.msra.mxu0 %v14723_v35  ;;  %v14774_v35 = vld [vmem:[%s15813_s22 + $0x748] sm:$0xff]  }
  0xf7   : > { %13290 = vmatprep.subr.bf16.mxu0 %v14725_v37  ;;  %v2498_v37 = vcombine.high %v2494_v31, %v2494_v31 }
  0xf8   : > { %13311 = vmatpush3.bf16.msra.mxu1 %v14724_v36  ;;  %v14775_v36 = vld [vmem:[%s15813_s22 + $0x7c8] sm:$0xff]  }
  0xf9   : > { %13312 = vmatprep.subr.bf16.mxu1 %v14726_v38  ;;  %v14776_v38 = vld [vmem:[%s15813_s22 + $0x708] sm:$0xff]  }
  0xfa   : > { %13291 = vmatpush3.bf16.msra.mxu0 %v14727_v39  ;;  %v14777_v39 = vld [vmem:[%s15813_s22 + $0x788] sm:$0xff]  }
  0xfb   : > { %13292 = vmatprep.subr.bf16.mxu0 %v14729_v41  ;;  %v14779_v41 = vld [vmem:[%s15813_s22 + $0x7d0] sm:$0xff]  }
  0xfc   : > { %13313 = vmatpush3.bf16.msra.mxu1 %v14728_v40  ;;  %v14778_v40 = vld [vmem:[%s15813_s22 + $0x750] sm:$0xff]  }
  0xfd   : > { %13314 = vmatprep.subr.bf16.mxu1 %v14730_v43  ;;  %v14780_v43 = vld [vmem:[%s15813_s22 + $0x710] sm:$0xff]  }
  0xfe   : > { %13293 = vmatpush3.bf16.msra.mxu0 %v14731_v44  ;;  %v14781_v44 = vld [vmem:[%s15813_s22 + $0x790] sm:$0xff]  }
  0xff   : > { %13294 = vmatprep.subr.bf16.mxu0 %v14733_v46  ;;  %v14783_v46 = vld [vmem:[%s15813_s22 + $0x7d8] sm:$0xff]  }
 0x100   : > { %13315 = vmatpush3.bf16.msra.mxu1 %v14732_v45  ;;  %v14782_v45 = vld [vmem:[%s15813_s22 + $0x758] sm:$0xff]  }
 0x101   : > { %13316 = vmatprep.subr.bf16.mxu1 %v14734_v47  ;;  %v14784_v47 = vld [vmem:[%s15813_s22 + $0x718] sm:$0xff]  }
 0x102   : > { %13295 = vmatpush3.bf16.msra.mxu0 %v14735_v48  ;;  %v14785_v48 = vld [vmem:[%s15813_s22 + $0x798] sm:$0xff]  }
 0x103   : > { %13324 = vmatprep.subr.bf16.mxu0 %v14738_v51  ;;  %v14788_v51 = vld [vmem:[%s15813_s22 + $0x720] sm:$0xff]  }
 0x104   : > { %13317 = vmatpush3.bf16.msra.mxu1 %v14736_v49  ;;  %v14786_v49 = vld [vmem:[%s15813_s22 + $0x760] sm:$0xff]  }
 0x105   : > { %9792 = vmatmul.mubr.bf16.vlgmr.msra.gmra.mrb[20].mxu0 %v2431_v50  ;;  %13346 = vmatprep.subr.bf16.mxu1 %v14739_v52  ;;  %v14787_v50 = vld [vmem:[%s15813_s22 + $0x7e0] sm:$0xff]  }
 0x106   : > { %13325 = vmatpush3.bf16.msra.mxu0 %v14740_v53  ;;  %9871 = vmatprep.mubr.bf16.mxu0 %v2487_v24  ;;  %v14789_v52 = vld [vmem:[%s15813_s22 + $0x7a0] sm:$0xff]   ;;  %v14790_v53 = vld [vmem:[%s15813_s22 + $0x768] sm:$0xff]   ;;  %v14813_v24 = vld [vmem:[%s15813_s22 + $0x810] sm:$0xff]  }
 0x107   : > { %9832 = vmatmul.mubr.bf16.vlgmr.msra.gmra.mrb[20].mxu1 %v2447_v55  ;;  %13326 = vmatprep.subr.bf16.mxu0 %v14742_v56  ;;  %v14792_v55 = vld [vmem:[%s15813_s22 + $0x728] sm:$0xff]  }
 0x108   : > { %13347 = vmatpush3.bf16.msra.mxu1 %v14741_v54  ;;  %9911 = vmatprep.mubr.bf16.mxu1 %v2497_v27  ;;  %v14791_v54 = vld [vmem:[%s15813_s22 + $0x7e8] sm:$0xff]   ;;  %v14816_v27 = vld [vmem:[%s15813_s22 + $0x8d8] sm:$0xff]  }
 0x109   : > { %13348 = vmatprep.subr.bf16.mxu1 %v14743_v57  ;;  %v14793_v56 = vld [vmem:[%s15813_s22 + $0x7a8] sm:$0xff]   ;;  %v14794_v57 = vld [vmem:[%s15813_s22 + $0x770] sm:$0xff]  }
 0x10a   : > { %13327 = vmatpush3.bf16.msra.mxu0 %v14744_v58 }
 0x10b   : > { %13328 = vmatprep.subr.bf16.mxu0 %v14746_v60 }
 0x10c   : > { %13349 = vmatpush3.bf16.msra.mxu1 %v14745_v59  ;;  %v14795_v59 = vld [vmem:[%s15813_s22 + $0x7f0] sm:$0xff]  }
 0x10d   : > { %13350 = vmatprep.subr.bf16.mxu1 %v14747_v61  ;;  %v14796_v61 = vld [vmem:[%s15813_s22 + $0x730] sm:$0xff]  }
 0x10e   : > { %13329 = vmatpush3.bf16.msra.mxu0 %v14748_v62 }
 0x10f   : > { %13330 = vmatprep.subr.bf16.mxu0 %v14750_v0 }
 0x110   : > { %13351 = vmatpush3.bf16.msra.mxu1 %v14749_v63 }
 0x111   : > { %13352 = vmatprep.subr.bf16.mxu1 %v14751_v1  ;;  %v14797_v1 = vld [vmem:[%s15813_s22 + $0x7b0] sm:$0xff]  }
 0x112   : > { %13331 = vmatpush3.bf16.msra.mxu0 %v14752_v2  ;;  %v14798_v2 = vld [vmem:[%s15813_s22 + $0x778] sm:$0xff]  }
 0x113   : > { %13332 = vmatprep.subr.bf16.mxu0 %v14754_v4 }
 0x114   : > { %13353 = vmatpush3.bf16.msra.mxu1 %v14753_v3 }
 0x115   : > { %13354 = vmatprep.subr.bf16.mxu1 %v14755_v5 }
 0x116   : > { %13333 = vmatpush3.bf16.msra.mxu0 %v14756_v6 }
 0x117   : > { %13334 = vmatprep.subr.bf16.mxu0 %v14758_v8 }
 0x118   : > { %13355 = vmatpush3.bf16.msra.mxu1 %v14757_v7  ;;  %v14799_v7 = vld [vmem:[%s15813_s22 + $0x7f8] sm:$0xff]  }
 0x119   : > { %13356 = vmatprep.subr.bf16.mxu1 %v14759_v9  ;;  %v14800_v9 = vld [vmem:[%s15813_s22 + $0x738] sm:$0xff]  }
 0x11a   : > { %13335 = vmatpush3.bf16.msra.mxu0 %v14760_v10 }
 0x11b   : > { %13336 = vmatprep.subr.bf16.mxu0 %v14762_v12  ;;  %v2480_v12 = vrot.slane %v16096_v21, %v15869_v42  ;;  %v14810_v21 = vld [vmem:[%s15813_s22 + $0x888] sm:$0xff]  }
 0x11c   : > { %13357 = vmatpush3.bf16.msra.mxu1 %v14761_v11  ;;  %v14801_v11 = vld [vmem:[%s15813_s22 + $0x7b8] sm:$0xff]  }
 0x11d   : > { %13358 = vmatprep.subr.bf16.mxu1 %v14763_v13  ;;  %v14803_v13 = vld [vmem:[%s15813_s22 + $0x840] sm:$0xff]   ;;  %v2496_v17 = vcombine.high %v2480_v12, %v2480_v12 }
 0x11e   : > { %13337 = vmatpush3.bf16.msra.mxu0 %v14764_v15  ;;  %v14805_v15 = vld [vmem:[%s15813_s22 + $0x800] sm:$0xff]  }
 0x11f   : > { %13338 = vmatprep.subr.bf16.mxu0 %v14766_v19  ;;  %v14808_v19 = vld [vmem:[%s15813_s22 + $0x8c8] sm:$0xff]  }
 0x120   : > { %13359 = vmatpush3.bf16.msra.mxu1 %v14765_v18  ;;  %v14807_v18 = vld [vmem:[%s15813_s22 + $0x848] sm:$0xff]  }
 0x121   : > { %13360 = vmatprep.subr.bf16.mxu1 %v14767_v22  ;;  %v14811_v22 = vld [vmem:[%s15813_s22 + $0x850] sm:$0xff]  }
 0x122   : > { %13339 = vmatpush3.bf16.msra.mxu0 %v14768_v23  ;;  %v14812_v23 = vld [vmem:[%s15813_s22 + $0x8d0] sm:$0xff]  }
 0x123   : > { %13368 = vmatprep.subr.bf16.mxu0 %v14770_v29  ;;  %v14818_v29 = vld [vmem:[%s15813_s22 + $0x898] sm:$0xff]  }
 0x124   : > { %13361 = vmatpush3.bf16.msra.mxu1 %v14769_v26  ;;  %v14815_v26 = vld [vmem:[%s15813_s22 + $0x858] sm:$0xff]  }
 0x125   : > { %9872 = vmatmul.mubr.bf16.vlgmr.msra.gmra.mrb[24].mxu0 %v2473_v28  ;;  %13390 = vmatprep.subr.bf16.mxu1 %v14771_v30  ;;  %v14817_v28 = vld [vmem:[%s15813_s22 + $0x818] sm:$0xff]   ;;  %v14819_v30 = vld [vmem:[%s15813_s22 + $0x860] sm:$0xff]  }
 0x126   : > { %13369 = vmatpush3.bf16.msra.mxu0 %v14772_v32  ;;  %9951 = vmatprep.mubr.bf16.mxu0 %v2494_v31  ;;  %v14820_v31 = vld [vmem:[%s15813_s22 + $0x8e0] sm:$0xff]  }
 0x127   : > { %9912 = vmatmul.mubr.bf16.vlgmr.msra.gmra.mrb[24].mxu1 %v2495_v34  ;;  %13370 = vmatprep.subr.bf16.mxu0 %v14774_v35  ;;  %v14821_v32 = vld [vmem:[%s15813_s22 + $0x820] sm:$0xff]   ;;  %v14823_v34 = vld [vmem:[%s15813_s22 + $0x868] sm:$0xff]  }
 0x128   : > { %13391 = vmatpush3.bf16.msra.mxu1 %v14773_v33  ;;  %9991 = vmatprep.mubr.bf16.mxu1 %v2498_v37  ;;  %v14822_v33 = vld [vmem:[%s15813_s22 + $0x8a0] sm:$0xff]   ;;  %v14824_v35 = vld [vmem:[%s15813_s22 + $0x8e8] sm:$0xff]  }
 0x129   : > { %13392 = vmatprep.subr.bf16.mxu1 %v14775_v36  ;;  %v14825_v36 = vld [vmem:[%s15813_s22 + $0x828] sm:$0xff]  }
 0x12a   : > { %13371 = vmatpush3.bf16.msra.mxu0 %v14776_v38  ;;  %v14826_v37 = vld [vmem:[%s15813_s22 + $0x8a8] sm:$0xff]   ;;  %v14827_v38 = vld [vmem:[%s15813_s22 + $0x870] sm:$0xff]  }
 0x12b   : > { %13372 = vmatprep.subr.bf16.mxu0 %v14778_v40  ;;  %v14828_v40 = vld [vmem:[%s15813_s22 + $0x8f0] sm:$0xff]  }
 0x12c   : > { %13393 = vmatpush3.bf16.msra.mxu1 %v14777_v39 }
 0x12d   : > { %13394 = vmatprep.subr.bf16.mxu1 %v14779_v41  ;;  %v227_v41 = vld [vmem:[%s15826_s26 + $0x20] sm:$0xff] }
 0x12e   : > { %13373 = vmatpush3.bf16.msra.mxu0 %v14780_v43 }
 0x12f   : > { %13374 = vmatprep.subr.bf16.mxu0 %v14782_v45  ;;  %v2506_v45 = vrot.slane %v227_v41, %v15869_v42 }
 0x130   : > { %13395 = vmatpush3.bf16.msra.mxu1 %v14781_v44  ;;  %v14829_v44 = vld [vmem:[%s15813_s22 + $0x830] sm:$0xff]  }
 0x131   : > { %13396 = vmatprep.subr.bf16.mxu1 %v14783_v46  ;;  %v2499_v46 = vcombine.high %v227_v41, %v227_v41 }
 0x132   : > { %13375 = vmatpush3.bf16.msra.mxu0 %v14784_v47 }
 0x133   : > { %13376 = vmatprep.subr.bf16.mxu0 %v14786_v49 }
 0x134   : > { %13397 = vmatpush3.bf16.msra.mxu1 %v14785_v48 }
 0x135   : > { %13398 = vmatprep.subr.bf16.mxu1 %v14787_v50 }
 0x136   : > { %13377 = vmatpush3.bf16.msra.mxu0 %v14788_v51 }
 0x137   : > { %13378 = vmatprep.subr.bf16.mxu0 %v14790_v53  ;;  %v14831_v53 = vld [vmem:[%s15813_s22 + $0x878] sm:$0xff]  }
 0x138   : > { %13399 = vmatpush3.bf16.msra.mxu1 %v14789_v52  ;;  %v13076_v58 = vpop.f32.mrb[0].mxu0  ;;  %v14830_v52 = vld [vmem:[%s15813_s22 + $0x8b0] sm:$0xff]  }
 0x139   : > { %v13077_v60 = vpop.f32.mrb[1].mxu0  ;;  %13400 = vmatprep.subr.bf16.mxu1 %v14791_v54  ;;  %v13098_v62 = vpop.f32.mrb[0].mxu1  ;;  %v2514_v54 = vcombine.high %v2506_v45, %v2506_v45 }
 0x13a   : > { %v13078_v63 = vadd.f32 %v13077_v60, %v13076_v58  ;;  %v13079_v0 = vpop.f32.mrb[2].mxu0  ;;  %13379 = vmatpush3.bf16.msra.mxu0 %v14792_v55  ;;  %v13099_v3 = vpop.f32.mrb[1].mxu1  ;;  %v16174_v55 = vrot.slane %v2499_v46, %v15869_v42 }
 0x13b   : > { %v13080_v4 = vpop.f32.mrb[3].mxu0  ;;  %13380 = vmatprep.subr.bf16.mxu0 %v14794_v57  ;;  %v13100_v5 = vadd.f32 %v13099_v3, %v13098_v62  ;;  %v13101_v6 = vpop.f32.mrb[2].mxu1  ;;  %v2536_v62 = vrot.slane %v2514_v54, %v15869_v42  ;;  %v2522_v3 = vrot.slane %v2506_v45, %v15869_v42  ;;  %v14869_v54 = vld [vmem:[%s15813_s22 + $0xac0] sm:$0xff]  }
 0x13c   : > { %13401 = vmatpush3.bf16.msra.mxu1 %v14793_v56  ;;  %v13102_v8 = vpop.f32.mrb[3].mxu1  ;;  %v14835_v4 = vld [vmem:[%s15813_s22 + $0x940] sm:$0xff]  }
 0x13d   : > { %13402 = vmatprep.subr.bf16.mxu1 %v14795_v59  ;;  %v16137_v10 = vadd.f32 %v13100_v5, %v13078_v63  ;;  %v14832_v59 = vld [vmem:[%s15813_s22 + $0x8f8] sm:$0xff]   ;;  %v2515_v63 = vcombine.high %v16174_v55, %v16174_v55  ;;  %v14836_v5 = vld [vmem:[%s15813_s22 + $0x9c0] sm:$0xff]  }
 0x13e   : > { %13381 = vmatpush3.bf16.msra.mxu0 %v14796_v61  ;;  %v14833_v61 = vld [vmem:[%s15813_s22 + $0x838] sm:$0xff]   ;;  %v14838_v8 = vld [vmem:[%s15813_s22 + $0x980] sm:$0xff]  }
 0x13f   : > { %13382 = vmatprep.subr.bf16.mxu0 %v14798_v2  ;;  %v2546_v2 = vcombine.high %v2536_v62, %v2536_v62  ;;  %v2543_v6 = vrot.slane %v2515_v63, %v15869_v42  ;;  %v14877_v63 = vld [vmem:[%s15813_s22 + $0xad0] sm:$0xff]  }
 0x140   : > { %13403 = vmatpush3.bf16.msra.mxu1 %v14797_v1  ;;  %v14834_v1 = vld [vmem:[%s15813_s22 + $0x8b8] sm:$0xff]  }
 0x141   : > { %13404 = vmatprep.subr.bf16.mxu1 %v14799_v7  ;;  %v14837_v7 = vld [vmem:[%s15813_s22 + $0x900] sm:$0xff]  }
 0x142   : > { %13383 = vmatpush3.bf16.msra.mxu0 %v14800_v9  ;;  %v2544_v9 = vcombine.high %v2522_v3, %v2522_v3 }
 0x143   : > { %13412 = vmatprep.subr.bf16.mxu0 %v14803_v13  ;;  %v14841_v13 = vld [vmem:[%s15813_s22 + $0x908] sm:$0xff]  }
 0x144   : > { %13405 = vmatpush3.bf16.msra.mxu1 %v14801_v11  ;;  %v14840_v11 = vld [vmem:[%s15813_s22 + $0x9c8] sm:$0xff]  }
 0x145   : > { %9952 = vmatmul.mubr.bf16.vlgmr.msra.gmra.mrb[28].mxu0 %v2480_v12  ;;  %13434 = vmatprep.subr.bf16.mxu1 %v14804_v14  ;;  %v2547_v12 = vcombine.high %v2543_v6, %v2543_v6  ;;  %v14842_v14 = vld [vmem:[%s15813_s22 + $0x988] sm:$0xff]  }
 0x146   : > { %13413 = vmatpush3.bf16.msra.mxu0 %v14805_v15  ;;  %10031 = vmatprep.mubr.bf16.mxu0 %v2536_v62  ;;  %v14843_v15 = vld [vmem:[%s15813_s22 + $0x950] sm:$0xff]  }
 0x147   : > { %9992 = vmatmul.mubr.bf16.vlgmr.msra.gmra.mrb[28].mxu1 %v2496_v17  ;;  %13414 = vmatprep.subr.bf16.mxu0 %v14807_v18  ;;  %v14845_v17 = vld [vmem:[%s15813_s22 + $0x910] sm:$0xff]  }
 0x148   : > { %13435 = vmatpush3.bf16.msra.mxu1 %v14806_v16  ;;  %10071 = vmatprep.mubr.bf16.mxu1 %v2546_v2  ;;  %v14844_v16 = vld [vmem:[%s15813_s22 + $0x9d0] sm:$0xff]   ;;  %v14880_v2 = vld [vmem:[%s15813_s22 + $0xa58] sm:$0xff]  }
 0x149   : > { %13436 = vmatprep.subr.bf16.mxu1 %v14808_v19  ;;  %v14846_v18 = vld [vmem:[%s15813_s22 + $0x990] sm:$0xff]   ;;  %v14847_v19 = vld [vmem:[%s15813_s22 + $0x958] sm:$0xff]  }
 0x14a   : > { %13415 = vmatpush3.bf16.msra.mxu0 %v14809_v20  ;;  %v14848_v20 = vld [vmem:[%s15813_s22 + $0x9d8] sm:$0xff]   ;;  %v14876_v62 = vld [vmem:[%s15813_s22 + $0xa50] sm:$0xff]  }
 0x14b   : > { %13416 = vmatprep.subr.bf16.mxu0 %v14811_v22  ;;  %v14850_v22 = vld [vmem:[%s15813_s22 + $0x998] sm:$0xff]  }
 0x14c   : > { %13437 = vmatpush3.bf16.msra.mxu1 %v14810_v21  ;;  %v14849_v21 = vld [vmem:[%s15813_s22 + $0x918] sm:$0xff]  }
 0x14d   : > { %13438 = vmatprep.subr.bf16.mxu1 %v14812_v23  ;;  %v14851_v23 = vld [vmem:[%s15813_s22 + $0x960] sm:$0xff]  }
 0x14e   : > { %13417 = vmatpush3.bf16.msra.mxu0 %v14813_v24  ;;  %v14852_v24 = vld [vmem:[%s15813_s22 + $0x9e0] sm:$0xff]  }
 0x14f   : > { %13418 = vmatprep.subr.bf16.mxu0 %v14815_v26  ;;  %v14854_v26 = vld [vmem:[%s15813_s22 + $0x9a0] sm:$0xff]  }
 0x150   : > { %13439 = vmatpush3.bf16.msra.mxu1 %v14814_v25  ;;  %v14853_v25 = vld [vmem:[%s15813_s22 + $0x920] sm:$0xff]  }
 0x151   : > { %13440 = vmatprep.subr.bf16.mxu1 %v14816_v27  ;;  %v14855_v27 = vld [vmem:[%s15813_s22 + $0x968] sm:$0xff]  }
 0x152   : > { %13419 = vmatpush3.bf16.msra.mxu0 %v14817_v28  ;;  %v14856_v28 = vld [vmem:[%s15813_s22 + $0x9e8] sm:$0xff]  }
 0x153   : > { %13420 = vmatprep.subr.bf16.mxu0 %v14819_v30  ;;  %v14858_v30 = vld [vmem:[%s15813_s22 + $0x9a8] sm:$0xff]  }
 0x154   : > { %13441 = vmatpush3.bf16.msra.mxu1 %v14818_v29  ;;  %v14857_v29 = vld [vmem:[%s15813_s22 + $0x928] sm:$0xff]  }
 0x155   : > { %13442 = vmatprep.subr.bf16.mxu1 %v14820_v31  ;;  %v14859_v31 = vld [vmem:[%s15813_s22 + $0x970] sm:$0xff]  }
 0x156   : > { %13421 = vmatpush3.bf16.msra.mxu0 %v14821_v32 }
 0x157   : > { %13422 = vmatprep.subr.bf16.mxu0 %v14823_v34 }
 0x158   : > { %13443 = vmatpush3.bf16.msra.mxu1 %v14822_v33  ;;  %v13120_v39 = vpop.f32.mrb[4].mxu0  ;;  %v14860_v33 = vld [vmem:[%s15813_s22 + $0x9f0] sm:$0xff]  }
 0x159   : > { %v13121_v43 = vpop.f32.mrb[5].mxu0  ;;  %13444 = vmatprep.subr.bf16.mxu1 %v14824_v35  ;;  %v13142_v47 = vpop.f32.mrb[4].mxu1  ;;  %v14861_v35 = vld [vmem:[%s15813_s22 + $0x930] sm:$0xff]  }
 0x15a   : > { %v13122_v48 = vadd.f32 %v13121_v43, %v13120_v39  ;;  %v13123_v49 = vpop.f32.mrb[6].mxu0  ;;  %13423 = vmatpush3.bf16.msra.mxu0 %v14825_v36  ;;  %v13143_v50 = vpop.f32.mrb[5].mxu1  ;;  %v14862_v39 = vld [vmem:[%s15813_s22 + $0x9b0] sm:$0xff]  }
 0x15b   : > { %v13124_v51 = vpop.f32.mrb[7].mxu0  ;;  %13424 = vmatprep.subr.bf16.mxu0 %v14827_v38  ;;  %v13144_v57 = vadd.f32 %v13143_v50, %v13142_v47  ;;  %v13145_v58 = vpop.f32.mrb[6].mxu1  ;;  %v14864_v47 = vld [vmem:[%s15813_s22 + $0x9f8] sm:$0xff]  }
 0x15c   : > { %v9474_v56 = vadd.f32 %v13122_v48, %v16137_v10  ;;  %13445 = vmatpush3.bf16.msra.mxu1 %v14826_v37  ;;  %v13146_v60 = vpop.f32.mrb[7].mxu1  ;;  %v14839_v10 = vld [vmem:[%s15813_s22 + $0x948] sm:$0xff]   ;;  %v14865_v49 = vld [vmem:[%s15813_s22 + $0x938] sm:$0xff]  }
 0x15d   : > { %13446 = vmatprep.subr.bf16.mxu1 %v14828_v40  ;;  %v14863_v40 = vld [vmem:[%s15813_s22 + $0x978] sm:$0xff]   ;;  %v14873_v60 = vld [vmem:[%s15813_s22 + $0xac8] sm:$0xff]  }
 0x15e   : > { %v16182_v0 = vadd.f32 %v13144_v57, %v9474_v56  ;;  %13425 = vmatpush3.bf16.msra.mxu0 %v14829_v44  ;;  %v14866_v51 = vld [vmem:[%s15813_s22 + $0x9b8] sm:$0xff]   ;;  %v14870_v56 = vld [vmem:[%s15813_s22 + $0xa00] sm:$0xff]  }
 0x15f   : > { %13426 = vmatprep.subr.bf16.mxu0 %v14831_v53  ;;  %v14868_v53 = vld [vmem:[%s15813_s22 + $0xa40] sm:$0xff]  }
 0x160   : > { %13447 = vmatpush3.bf16.msra.mxu1 %v14830_v52  ;;  %v2529_v52 = vrot.slane %v16174_v55, %v15869_v42  ;;  %v14871_v57 = vld [vmem:[%s15813_s22 + $0xa80] sm:$0xff]   ;;  %v14874_v55 = vld [vmem:[%s15813_s22 + $0xa08] sm:$0xff]  }
 0x161   : > { %13448 = vmatprep.subr.bf16.mxu1 %v14832_v59  ;;  %v14872_v59 = vld [vmem:[%s15813_s22 + $0xa48] sm:$0xff]  }
 0x162   : > { %13427 = vmatpush3.bf16.msra.mxu0 %v14833_v61  ;;  %v2545_v58 = vcombine.high %v2529_v52, %v2529_v52  ;;  %v14875_v61 = vld [vmem:[%s15813_s22 + $0xa88] sm:$0xff]  }
 0x163   : > { %13456 = vmatprep.subr.bf16.mxu0 %v14835_v4  ;;  %v14882_v4 = vld [vmem:[%s15813_s22 + $0xa18] sm:$0xff]  }
 0x164   : > { %13449 = vmatpush3.bf16.msra.mxu1 %v14834_v1  ;;  %v14879_v1 = vld [vmem:[%s15813_s22 + $0xa90] sm:$0xff]  }
 0x165   : > { %10032 = vmatmul.mubr.bf16.vlgmr.msra.gmra.mrb[32].mxu0 %v2522_v3  ;;  %13478 = vmatprep.subr.bf16.mxu1 %v14836_v5  ;;  %v14881_v3 = vld [vmem:[%s15813_s22 + $0xad8] sm:$0xff]  }
 0x166   : > { %13457 = vmatpush3.bf16.msra.mxu0 %v14837_v7  ;;  %10111 = vmatprep.mubr.bf16.mxu0 %v2543_v6  ;;  %v14883_v5 = vld [vmem:[%s15813_s22 + $0xa98] sm:$0xff]   ;;  %v14884_v6 = vld [vmem:[%s15813_s22 + $0xa60] sm:$0xff]  }
 0x167   : > { %10072 = vmatmul.mubr.bf16.vlgmr.msra.gmra.mrb[32].mxu1 %v2544_v9  ;;  %13458 = vmatprep.subr.bf16.mxu0 %v14839_v10  ;;  %v14885_v7 = vld [vmem:[%s15813_s22 + $0xae0] sm:$0xff]   ;;  %v14888_v10 = vld [vmem:[%s15813_s22 + $0xa68] sm:$0xff]  }
 0x168   : > { %13479 = vmatpush3.bf16.msra.mxu1 %v14838_v8  ;;  %10151 = vmatprep.mubr.bf16.mxu1 %v2547_v12  ;;  %v14886_v8 = vld [vmem:[%s15813_s22 + $0xa20] sm:$0xff]   ;;  %v14890_v12 = vld [vmem:[%s15813_s22 + $0xa28] sm:$0xff]  }
 0x169   : > { %13480 = vmatprep.subr.bf16.mxu1 %v14840_v11  ;;  %v14887_v9 = vld [vmem:[%s15813_s22 + $0xaa0] sm:$0xff]   ;;  %v14889_v11 = vld [vmem:[%s15813_s22 + $0xae8] sm:$0xff]  }
 0x16a   : > { %13459 = vmatpush3.bf16.msra.mxu0 %v14841_v13  ;;  %v14891_v13 = vld [vmem:[%s15813_s22 + $0xaa8] sm:$0xff]  }
 0x16b   : > { %13460 = vmatprep.subr.bf16.mxu0 %v14843_v15 }
 0x16c   : > { %13481 = vmatpush3.bf16.msra.mxu1 %v14842_v14  ;;  %v14892_v14 = vld [vmem:[%s15813_s22 + $0xa70] sm:$0xff]  }
 0x16d   : > { %13482 = vmatprep.subr.bf16.mxu1 %v14844_v16  ;;  %v14893_v16 = vld [vmem:[%s15813_s22 + $0xaf0] sm:$0xff]  }
 0x16e   : > { %13461 = vmatpush3.bf16.msra.mxu0 %v14845_v17 }
 0x16f   : > { %13462 = vmatprep.subr.bf16.mxu0 %v14847_v19  ;;  %v228_v19 = vld [vmem:[%s15826_s26 + $0x28] sm:$0xff] }
 0x170   : > { %13483 = vmatpush3.bf16.msra.mxu1 %v14846_v18  ;;  %v14894_v18 = vld [vmem:[%s15813_s22 + $0xa30] sm:$0xff]  }
 0x171   : > { %13484 = vmatprep.subr.bf16.mxu1 %v14848_v20 }
 0x172   : > { %13463 = vmatpush3.bf16.msra.mxu0 %v14849_v21 }
 0x173   : > { %13464 = vmatprep.subr.bf16.mxu0 %v14851_v23  ;;  %v2555_v23 = vrot.slane %v228_v19, %v15869_v42 }
 0x174   : > { %13485 = vmatpush3.bf16.msra.mxu1 %v14850_v22 }
 0x175   : > { %13486 = vmatprep.subr.bf16.mxu1 %v14852_v24  ;;  %v2548_v24 = vcombine.high %v228_v19, %v228_v19 }
 0x176   : > { %13465 = vmatpush3.bf16.msra.mxu0 %v14853_v25 }
 0x177   : > { %13466 = vmatprep.subr.bf16.mxu0 %v14855_v27  ;;  %v14895_v27 = vld [vmem:[%s15813_s22 + $0xab0] sm:$0xff]  }
 0x178   : > { %13487 = vmatpush3.bf16.msra.mxu1 %v14854_v26  ;;  %v13164_v32 = vpop.f32.mrb[8].mxu0 }
 0x179   : > { %v13165_v34 = vpop.f32.mrb[9].mxu0  ;;  %13488 = vmatprep.subr.bf16.mxu1 %v14856_v28  ;;  %v14896_v28 = vld [vmem:[%s15813_s22 + $0xa78] sm:$0xff]  }
 0x17a   : > { %v13186_v36 = vpop.f32.mrb[8].mxu1  ;;  %v13166_v37 = vadd.f32 %v13165_v34, %v13164_v32  ;;  %v13167_v38 = vpop.f32.mrb[10].mxu0  ;;  %13467 = vmatpush3.bf16.msra.mxu0 %v14857_v29  ;;  %v14897_v32 = vld [vmem:[%s15813_s22 + $0xaf8] sm:$0xff]  }
 0x17b   : > { %v13187_v41 = vpop.f32.mrb[9].mxu1  ;;  %v13168_v43 = vpop.f32.mrb[11].mxu0  ;;  %13468 = vmatprep.subr.bf16.mxu0 %v14859_v31  ;;  %v14899_v38 = vld [vmem:[%s15813_s22 + $0xab8] sm:$0xff]  }
 0x17c   : > { %v9554_v44 = vadd.f32 %v13166_v37, %v16182_v0  ;;  %v13188_v45 = vadd.f32 %v13187_v41, %v13186_v36  ;;  %v13189_v46 = vpop.f32.mrb[10].mxu1  ;;  %13489 = vmatpush3.bf16.msra.mxu1 %v14858_v30  ;;  %v14878_v0 = vld [vmem:[%s15813_s22 + $0xa10] sm:$0xff]   ;;  %v16259_v36 = vrot.slane %v2548_v24, %v15869_v42  ;;  %v14900_v41 = vld [vmem:[%s15813_s22 + $0xb40] sm:$0xff]   ;;  %v14930_v24 = vld [vmem:[%s15813_s22 + $0xb38] sm:$0xff]  }
 0x17d   : > { %v13190_v48 = vpop.f32.mrb[11].mxu1  ;;  %13490 = vmatprep.subr.bf16.mxu1 %v14860_v33  ;;  %v2563_v33 = vcombine.high %v2555_v23, %v2555_v23  ;;  %v14902_v46 = vld [vmem:[%s15813_s22 + $0xb00] sm:$0xff]  }
 0x17e   : > { %v16219_v50 = vadd.f32 %v13188_v45, %v9554_v44  ;;  %13469 = vmatpush3.bf16.msra.mxu0 %v14861_v35  ;;  %v14898_v35 = vld [vmem:[%s15813_s22 + $0xa38] sm:$0xff]   ;;  %v2564_v43 = vcombine.high %v16259_v36, %v16259_v36  ;;  %v14901_v45 = vld [vmem:[%s15813_s22 + $0xbc0] sm:$0xff]  }
 0x17f   : > { %13470 = vmatprep.subr.bf16.mxu0 %v14863_v40  ;;  %v2571_v40 = vrot.slane %v2555_v23, %v15869_v42  ;;  %v14903_v48 = vld [vmem:[%s15813_s22 + $0xb80] sm:$0xff]  }
 0x180   : > { %13491 = vmatpush3.bf16.msra.mxu1 %v14862_v39  ;;  %v2585_v39 = vrot.slane %v2563_v33, %v15869_v42  ;;  %v14937_v33 = vld [vmem:[%s15813_s22 + $0xc48] sm:$0xff]  }
 0x181   : > { %13492 = vmatprep.subr.bf16.mxu1 %v14864_v47  ;;  %v2592_v47 = vrot.slane %v2564_v43, %v15869_v42  ;;  %v14946_v43 = vld [vmem:[%s15813_s22 + $0xcd8] sm:$0xff]  }
 0x182   : > { %13471 = vmatpush3.bf16.msra.mxu0 %v14865_v49  ;;  %v2595_v44 = vcombine.high %v2585_v39, %v2585_v39  ;;  %v2593_v49 = vcombine.high %v2571_v40, %v2571_v40 }
 0x183   : > { %13500 = vmatprep.subr.bf16.mxu0 %v14868_v53  ;;  %v14906_v53 = vld [vmem:[%s15813_s22 + $0xb08] sm:$0xff]  }
 0x184   : > { %13493 = vmatpush3.bf16.msra.mxu1 %v14866_v51  ;;  %v14905_v51 = vld [vmem:[%s15813_s22 + $0xbc8] sm:$0xff]  }
 0x185   : > { %10112 = vmatmul.mubr.bf16.vlgmr.msra.gmra.mrb[36].mxu0 %v2529_v52  ;;  %13522 = vmatprep.subr.bf16.mxu1 %v14869_v54  ;;  %v2596_v52 = vcombine.high %v2592_v47, %v2592_v47  ;;  %v14907_v54 = vld [vmem:[%s15813_s22 + $0xb88] sm:$0xff]  }
 0x186   : > { %13501 = vmatpush3.bf16.msra.mxu0 %v14870_v56  ;;  %10191 = vmatprep.mubr.bf16.mxu0 %v2585_v39  ;;  %v14908_v56 = vld [vmem:[%s15813_s22 + $0xb50] sm:$0xff]  }
 0x187   : > { %10152 = vmatmul.mubr.bf16.vlgmr.msra.gmra.mrb[36].mxu1 %v2545_v58  ;;  %13502 = vmatprep.subr.bf16.mxu0 %v14872_v59  ;;  %v14910_v58 = vld [vmem:[%s15813_s22 + $0xb10] sm:$0xff]  }
 0x188   : > { %13523 = vmatpush3.bf16.msra.mxu1 %v14871_v57  ;;  %10231 = vmatprep.mubr.bf16.mxu1 %v2595_v44  ;;  %v14909_v57 = vld [vmem:[%s15813_s22 + $0xbd0] sm:$0xff]   ;;  %v14947_v44 = vld [vmem:[%s15813_s22 + $0xc18] sm:$0xff]  }
 0x189   : > { %13524 = vmatprep.subr.bf16.mxu1 %v14873_v60  ;;  %v14911_v59 = vld [vmem:[%s15813_s22 + $0xb90] sm:$0xff]   ;;  %v14912_v60 = vld [vmem:[%s15813_s22 + $0xb58] sm:$0xff]  }
 0x18a   : > { %13503 = vmatpush3.bf16.msra.mxu0 %v14874_v55  ;;  %v14913_v55 = vld [vmem:[%s15813_s22 + $0xbd8] sm:$0xff]   ;;  %v14943_v39 = vld [vmem:[%s15813_s22 + $0xc10] sm:$0xff]  }
 0x18b   : > { %13504 = vmatprep.subr.bf16.mxu0 %v14876_v62  ;;  %v14915_v62 = vld [vmem:[%s15813_s22 + $0xb98] sm:$0xff]  }
 0x18c   : > { %13525 = vmatpush3.bf16.msra.mxu1 %v14875_v61  ;;  %v14914_v61 = vld [vmem:[%s15813_s22 + $0xb18] sm:$0xff]  }
 0x18d   : > { %13526 = vmatprep.subr.bf16.mxu1 %v14877_v63  ;;  %v14916_v63 = vld [vmem:[%s15813_s22 + $0xb60] sm:$0xff]  }
 0x18e   : > { %13505 = vmatpush3.bf16.msra.mxu0 %v14878_v0  ;;  %v14917_v0 = vld [vmem:[%s15813_s22 + $0xbe0] sm:$0xff]  }
 0x18f   : > { %13506 = vmatprep.subr.bf16.mxu0 %v14880_v2  ;;  %v14919_v2 = vld [vmem:[%s15813_s22 + $0xba0] sm:$0xff]  }
 0x190   : > { %13527 = vmatpush3.bf16.msra.mxu1 %v14879_v1  ;;  %v14918_v1 = vld [vmem:[%s15813_s22 + $0xb20] sm:$0xff]  }
 0x191   : > { %13528 = vmatprep.subr.bf16.mxu1 %v14881_v3  ;;  %v14920_v3 = vld [vmem:[%s15813_s22 + $0xb68] sm:$0xff]  }
 0x192   : > { %13507 = vmatpush3.bf16.msra.mxu0 %v14882_v4  ;;  %v14921_v4 = vld [vmem:[%s15813_s22 + $0xbe8] sm:$0xff]  }
 0x193   : > { %13508 = vmatprep.subr.bf16.mxu0 %v14884_v6  ;;  %v14923_v6 = vld [vmem:[%s15813_s22 + $0xba8] sm:$0xff]  }
 0x194   : > { %13529 = vmatpush3.bf16.msra.mxu1 %v14883_v5  ;;  %v14922_v5 = vld [vmem:[%s15813_s22 + $0xb28] sm:$0xff]  }
 0x195   : > { %13530 = vmatprep.subr.bf16.mxu1 %v14885_v7  ;;  %v14924_v7 = vld [vmem:[%s15813_s22 + $0xb70] sm:$0xff]  }
 0x196   : > { %13509 = vmatpush3.bf16.msra.mxu0 %v14886_v8 }
 0x197   : > { %13510 = vmatprep.subr.bf16.mxu0 %v14888_v10 }
 0x198   : > { %13531 = vmatpush3.bf16.msra.mxu1 %v14887_v9  ;;  %v13208_v15 = vpop.f32.mrb[12].mxu0  ;;  %v14925_v9 = vld [vmem:[%s15813_s22 + $0xbf0] sm:$0xff]  }
 0x199   : > { %v13209_v17 = vpop.f32.mrb[13].mxu0  ;;  %13532 = vmatprep.subr.bf16.mxu1 %v14889_v11  ;;  %v14926_v11 = vld [vmem:[%s15813_s22 + $0xb30] sm:$0xff]  }
 0x19a   : > { %v13230_v20 = vpop.f32.mrb[12].mxu1  ;;  %v13210_v21 = vadd.f32 %v13209_v17, %v13208_v15  ;;  %v13211_v22 = vpop.f32.mrb[14].mxu0  ;;  %13511 = vmatpush3.bf16.msra.mxu0 %v14890_v12  ;;  %v14927_v15 = vld [vmem:[%s15813_s22 + $0xbb0] sm:$0xff]  }
 0x19b   : > { %v13231_v25 = vpop.f32.mrb[13].mxu1  ;;  %v13212_v26 = vpop.f32.mrb[15].mxu0  ;;  %13512 = vmatprep.subr.bf16.mxu0 %v14892_v14  ;;  %v14929_v22 = vld [vmem:[%s15813_s22 + $0xbf8] sm:$0xff]  }
 0x19c   : > { %v9634_v29 = vadd.f32 %v13210_v21, %v16219_v50  ;;  %v13232_v30 = vadd.f32 %v13231_v25, %v13230_v20  ;;  %v13233_v31 = vpop.f32.mrb[14].mxu1  ;;  %13533 = vmatpush3.bf16.msra.mxu1 %v14891_v13  ;;  %v14904_v50 = vld [vmem:[%s15813_s22 + $0xb48] sm:$0xff]   ;;  %v14931_v26 = vld [vmem:[%s15813_s22 + $0xbb8] sm:$0xff]  }
 0x19d   : > { %v13234_v34 = vpop.f32.mrb[15].mxu1  ;;  %13534 = vmatprep.subr.bf16.mxu1 %v14893_v16  ;;  %v14928_v16 = vld [vmem:[%s15813_s22 + $0xb78] sm:$0xff]   ;;  %v14936_v31 = vld [vmem:[%s15813_s22 + $0xc80] sm:$0xff]  }
 0x19e   : > { %v16261_v37 = vadd.f32 %v13232_v30, %v9634_v29  ;;  %13513 = vmatpush3.bf16.msra.mxu0 %v14894_v18  ;;  %v14934_v29 = vld [vmem:[%s15813_s22 + $0xcc0] sm:$0xff]   ;;  %v14938_v34 = vld [vmem:[%s15813_s22 + $0xcc8] sm:$0xff]  }
 0x19f   : > { %13514 = vmatprep.subr.bf16.mxu0 %v14896_v28  ;;  %v14933_v28 = vld [vmem:[%s15813_s22 + $0xc40] sm:$0xff]  }
 0x1a0   : > { %13535 = vmatpush3.bf16.msra.mxu1 %v14895_v27  ;;  %v2578_v27 = vrot.slane %v16259_v36, %v15869_v42  ;;  %v14935_v30 = vld [vmem:[%s15813_s22 + $0xc00] sm:$0xff]   ;;  %v14940_v36 = vld [vmem:[%s15813_s22 + $0xc88] sm:$0xff]  }
 0x1a1   : > { %13536 = vmatprep.subr.bf16.mxu1 %v14897_v32 }
 0x1a2   : > { %13515 = vmatpush3.bf16.msra.mxu0 %v14898_v35  ;;  %v2594_v32 = vcombine.high %v2578_v27, %v2578_v27  ;;  %v14939_v35 = vld [vmem:[%s15813_s22 + $0xc08] sm:$0xff]  }
 0x1a3   : > { %13544 = vmatprep.subr.bf16.mxu0 %v14900_v41  ;;  %v14945_v41 = vld [vmem:[%s15813_s22 + $0xc58] sm:$0xff]  }
 0x1a4   : > { %13537 = vmatpush3.bf16.msra.mxu1 %v14899_v38  ;;  %v14942_v38 = vld [vmem:[%s15813_s22 + $0xcd0] sm:$0xff]  }
 0x1a5   : > { %10192 = vmatmul.mubr.bf16.vlgmr.msra.gmra.mrb[40].mxu0 %v2571_v40  ;;  %13566 = vmatprep.subr.bf16.mxu1 %v14901_v45  ;;  %v14944_v40 = vld [vmem:[%s15813_s22 + $0xc90] sm:$0xff]   ;;  %v14948_v45 = vld [vmem:[%s15813_s22 + $0xc98] sm:$0xff]  }
 0x1a6   : > { %13545 = vmatpush3.bf16.msra.mxu0 %v14902_v46  ;;  %10271 = vmatprep.mubr.bf16.mxu0 %v2592_v47  ;;  %v14949_v46 = vld [vmem:[%s15813_s22 + $0xc60] sm:$0xff]  }
 0x1a7   : > { %10232 = vmatmul.mubr.bf16.vlgmr.msra.gmra.mrb[40].mxu1 %v2593_v49  ;;  %13546 = vmatprep.subr.bf16.mxu0 %v14904_v50  ;;  %v14950_v47 = vld [vmem:[%s15813_s22 + $0xce0] sm:$0xff]   ;;  %v14953_v50 = vld [vmem:[%s15813_s22 + $0xc68] sm:$0xff]  }
 0x1a8   : > { %13567 = vmatpush3.bf16.msra.mxu1 %v14903_v48  ;;  %10311 = vmatprep.mubr.bf16.mxu1 %v2596_v52  ;;  %v14951_v48 = vld [vmem:[%s15813_s22 + $0xc20] sm:$0xff]   ;;  %v14955_v52 = vld [vmem:[%s15813_s22 + $0xc28] sm:$0xff]  }
 0x1a9   : > { %13568 = vmatprep.subr.bf16.mxu1 %v14905_v51  ;;  %v14952_v49 = vld [vmem:[%s15813_s22 + $0xca0] sm:$0xff]   ;;  %v14954_v51 = vld [vmem:[%s15813_s22 + $0xce8] sm:$0xff]  }
 0x1aa   : > { %13547 = vmatpush3.bf16.msra.mxu0 %v14906_v53  ;;  %v14956_v53 = vld [vmem:[%s15813_s22 + $0xca8] sm:$0xff]  }
 0x1ab   : > { %13548 = vmatprep.subr.bf16.mxu0 %v14908_v56 }
 0x1ac   : > { %13569 = vmatpush3.bf16.msra.mxu1 %v14907_v54  ;;  %v14957_v54 = vld [vmem:[%s15813_s22 + $0xc70] sm:$0xff]  }
 0x1ad   : > { %13570 = vmatprep.subr.bf16.mxu1 %v14909_v57  ;;  %v14958_v57 = vld [vmem:[%s15813_s22 + $0xcf0] sm:$0xff]  }
 0x1ae   : > { %13549 = vmatpush3.bf16.msra.mxu0 %v14910_v58 }
 0x1af   : > { %13550 = vmatprep.subr.bf16.mxu0 %v14912_v60 }
 0x1b0   : > { %13571 = vmatpush3.bf16.msra.mxu1 %v14911_v59  ;;  %v14959_v59 = vld [vmem:[%s15813_s22 + $0xc30] sm:$0xff]  }
 0x1b1   : > { %13572 = vmatprep.subr.bf16.mxu1 %v14913_v55 }
 0x1b2   : > { %13551 = vmatpush3.bf16.msra.mxu0 %v14914_v61 }
 0x1b3   : > { %13552 = vmatprep.subr.bf16.mxu0 %v14916_v63  ;;  %v14961_v63 = vld [vmem:[%s15813_s22 + $0xc78] sm:$0xff]  }
 0x1b4   : > { %13573 = vmatpush3.bf16.msra.mxu1 %v14915_v62  ;;  %v14960_v62 = vld [vmem:[%s15813_s22 + $0xcb0] sm:$0xff]  }
 0x1b5   : > { %13574 = vmatprep.subr.bf16.mxu1 %v14917_v0  ;;  %v229_v0 = vld [vmem:[%s15826_s26 + $0x30] sm:$0xff] }
 0x1b6   : > { %13553 = vmatpush3.bf16.msra.mxu0 %v14918_v1 }
 0x1b7   : > { %13554 = vmatprep.subr.bf16.mxu0 %v14920_v3  ;;  %v2604_v3 = vrot.slane %v229_v0, %v15869_v42 }
 0x1b8   : > { %13575 = vmatpush3.bf16.msra.mxu1 %v14919_v2  ;;  %v13252_v8 = vpop.f32.mrb[16].mxu0 }
 0x1b9   : > { %v13253_v10 = vpop.f32.mrb[17].mxu0  ;;  %13576 = vmatprep.subr.bf16.mxu1 %v14921_v4  ;;  %v2597_v4 = vcombine.high %v229_v0, %v229_v0  ;;  %v14995_v0 = vld [vmem:[%s15813_s22 + $0xd38] sm:$0xff]  }
 0x1ba   : > { %v13274_v12 = vpop.f32.mrb[16].mxu1  ;;  %v13254_v13 = vadd.f32 %v13253_v10, %v13252_v8  ;;  %v13255_v14 = vpop.f32.mrb[18].mxu0  ;;  %13555 = vmatpush3.bf16.msra.mxu0 %v14922_v5  ;;  %v14962_v8 = vld [vmem:[%s15813_s22 + $0xcf8] sm:$0xff]  }
 0x1bb   : > { %v13275_v17 = vpop.f32.mrb[17].mxu1  ;;  %v13256_v18 = vpop.f32.mrb[19].mxu0  ;;  %13556 = vmatprep.subr.bf16.mxu0 %v14924_v7  ;;  %v14963_v10 = vld [vmem:[%s15813_s22 + $0xc38] sm:$0xff]  }
 0x1bc   : > { %v9714_v19 = vadd.f32 %v13254_v13, %v16261_v37  ;;  %v13276_v20 = vadd.f32 %v13275_v17, %v13274_v12  ;;  %v13277_v21 = vpop.f32.mrb[18].mxu1  ;;  %13577 = vmatpush3.bf16.msra.mxu1 %v14923_v6  ;;  %v14941_v37 = vld [vmem:[%s15813_s22 + $0xc50] sm:$0xff]   ;;  %v16341_v12 = vrot.slane %v2597_v4, %v15869_v42  ;;  %v14964_v14 = vld [vmem:[%s15813_s22 + $0xcb8] sm:$0xff]   ;;  %v14965_v17 = vld [vmem:[%s15813_s22 + $0xd40] sm:$0xff]  }
 0x1bd   : > { %v13278_v23 = vpop.f32.mrb[19].mxu1  ;;  %13578 = vmatprep.subr.bf16.mxu1 %v14925_v9  ;;  %v14967_v21 = vld [vmem:[%s15813_s22 + $0xd00] sm:$0xff]  }
 0x1be   : > { %v16301_v25 = vadd.f32 %v13276_v20, %v9714_v19  ;;  %13557 = vmatpush3.bf16.msra.mxu0 %v14926_v11  ;;  %v2612_v11 = vcombine.high %v2604_v3, %v2604_v3  ;;  %v2613_v18 = vcombine.high %v16341_v12, %v16341_v12  ;;  %v14966_v19 = vld [vmem:[%s15813_s22 + $0xdc0] sm:$0xff]  }
 0x1bf   : > { %13558 = vmatprep.subr.bf16.mxu0 %v14928_v16  ;;  %v2620_v16 = vrot.slane %v2604_v3, %v15869_v42  ;;  %v14968_v23 = vld [vmem:[%s15813_s22 + $0xd80] sm:$0xff]   ;;  %v2627_v3 = vrot.slane %v16341_v12, %v15869_v42  ;;  %v15005_v12 = vld [vmem:[%s15813_s22 + $0xe88] sm:$0xff]  }
 0x1c0   : > { %13579 = vmatpush3.bf16.msra.mxu1 %v14927_v15  ;;  %v2634_v15 = vrot.slane %v2612_v11, %v15869_v42  ;;  %v14998_v4 = vld [vmem:[%s15813_s22 + $0xe40] sm:$0xff]   ;;  %v15004_v11 = vld [vmem:[%s15813_s22 + $0xe08] sm:$0xff]  }
 0x1c1   : > { %13580 = vmatprep.subr.bf16.mxu1 %v14929_v22  ;;  %v2641_v22 = vrot.slane %v2613_v18, %v15869_v42  ;;  %v15011_v18 = vld [vmem:[%s15813_s22 + $0xed8] sm:$0xff]  }
 0x1c2   : > { %13559 = vmatpush3.bf16.msra.mxu0 %v14930_v24  ;;  %v2644_v20 = vcombine.high %v2634_v15, %v2634_v15  ;;  %v2642_v24 = vcombine.high %v2620_v16, %v2620_v16 }
 0x1c3   : > { %13588 = vmatprep.subr.bf16.mxu0 %v14933_v28  ;;  %v14971_v28 = vld [vmem:[%s15813_s22 + $0xd08] sm:$0xff]  }
 0x1c4   : > { %13581 = vmatpush3.bf16.msra.mxu1 %v14931_v26  ;;  %v14970_v26 = vld [vmem:[%s15813_s22 + $0xdc8] sm:$0xff]  }
 0x1c5   : > { %10272 = vmatmul.mubr.bf16.vlgmr.msra.gmra.mrb[44].mxu0 %v2578_v27  ;;  %13610 = vmatprep.subr.bf16.mxu1 %v14934_v29  ;;  %v2645_v27 = vcombine.high %v2641_v22, %v2641_v22  ;;  %v14972_v29 = vld [vmem:[%s15813_s22 + $0xd88] sm:$0xff]  }
 0x1c6   : > { %13589 = vmatpush3.bf16.msra.mxu0 %v14935_v30  ;;  %10351 = vmatprep.mubr.bf16.mxu0 %v2634_v15  ;;  %v14973_v30 = vld [vmem:[%s15813_s22 + $0xd50] sm:$0xff]  }
 0x1c7   : > { %10312 = vmatmul.mubr.bf16.vlgmr.msra.gmra.mrb[44].mxu1 %v2594_v32  ;;  %13590 = vmatprep.subr.bf16.mxu0 %v14937_v33  ;;  %v14975_v32 = vld [vmem:[%s15813_s22 + $0xd10] sm:$0xff]  }
 0x1c8   : > { %13611 = vmatpush3.bf16.msra.mxu1 %v14936_v31  ;;  %10391 = vmatprep.mubr.bf16.mxu1 %v2644_v20  ;;  %v14974_v31 = vld [vmem:[%s15813_s22 + $0xdd0] sm:$0xff]   ;;  %v15013_v20 = vld [vmem:[%s15813_s22 + $0xe98] sm:$0xff]  }
 0x1c9   : > { %13612 = vmatprep.subr.bf16.mxu1 %v14938_v34  ;;  %v14976_v33 = vld [vmem:[%s15813_s22 + $0xd90] sm:$0xff]   ;;  %v14977_v34 = vld [vmem:[%s15813_s22 + $0xd58] sm:$0xff]  }
 0x1ca   : > { %13591 = vmatpush3.bf16.msra.mxu0 %v14939_v35  ;;  %v14978_v35 = vld [vmem:[%s15813_s22 + $0xdd8] sm:$0xff]   ;;  %v15008_v15 = vld [vmem:[%s15813_s22 + $0xe10] sm:$0xff]  }
 0x1cb   : > { %13592 = vmatprep.subr.bf16.mxu0 %v14941_v37  ;;  %v14980_v37 = vld [vmem:[%s15813_s22 + $0xd98] sm:$0xff]  }
 0x1cc   : > { %13613 = vmatpush3.bf16.msra.mxu1 %v14940_v36  ;;  %v14979_v36 = vld [vmem:[%s15813_s22 + $0xd18] sm:$0xff]  }
 0x1cd   : > { %13614 = vmatprep.subr.bf16.mxu1 %v14942_v38  ;;  %v14981_v38 = vld [vmem:[%s15813_s22 + $0xd60] sm:$0xff]  }
 0x1ce   : > { %13593 = vmatpush3.bf16.msra.mxu0 %v14943_v39  ;;  %v14982_v39 = vld [vmem:[%s15813_s22 + $0xde0] sm:$0xff]  }
 0x1cf   : > { %13594 = vmatprep.subr.bf16.mxu0 %v14945_v41  ;;  %v14984_v41 = vld [vmem:[%s15813_s22 + $0xda0] sm:$0xff]  }
 0x1d0   : > { %13615 = vmatpush3.bf16.msra.mxu1 %v14944_v40  ;;  %v14983_v40 = vld [vmem:[%s15813_s22 + $0xd20] sm:$0xff]  }
 0x1d1   : > { %13616 = vmatprep.subr.bf16.mxu1 %v14946_v43  ;;  %v14985_v43 = vld [vmem:[%s15813_s22 + $0xd68] sm:$0xff]  }
 0x1d2   : > { %13595 = vmatpush3.bf16.msra.mxu0 %v14947_v44  ;;  %v14986_v44 = vld [vmem:[%s15813_s22 + $0xde8] sm:$0xff]  }
 0x1d3   : > { %13596 = vmatprep.subr.bf16.mxu0 %v14949_v46  ;;  %v14988_v46 = vld [vmem:[%s15813_s22 + $0xda8] sm:$0xff]  }
 0x1d4   : > { %13617 = vmatpush3.bf16.msra.mxu1 %v14948_v45  ;;  %v14987_v45 = vld [vmem:[%s15813_s22 + $0xd28] sm:$0xff]  }
 0x1d5   : > { %13618 = vmatprep.subr.bf16.mxu1 %v14950_v47  ;;  %v14989_v47 = vld [vmem:[%s15813_s22 + $0xd70] sm:$0xff]  }
 0x1d6   : > { %13597 = vmatpush3.bf16.msra.mxu0 %v14951_v48 }
 0x1d7   : > { %13598 = vmatprep.subr.bf16.mxu0 %v14953_v50 }
 0x1d8   : > { %13619 = vmatpush3.bf16.msra.mxu1 %v14952_v49  ;;  %v13296_v56 = vpop.f32.mrb[20].mxu0  ;;  %v14990_v49 = vld [vmem:[%s15813_s22 + $0xdf0] sm:$0xff]  }
 0x1d9   : > { %v13297_v58 = vpop.f32.mrb[21].mxu0  ;;  %13620 = vmatprep.subr.bf16.mxu1 %v14954_v51  ;;  %v14991_v51 = vld [vmem:[%s15813_s22 + $0xd30] sm:$0xff]  }
 0x1da   : > { %v13318_v60 = vpop.f32.mrb[20].mxu1  ;;  %v13298_v55 = vadd.f32 %v13297_v58, %v13296_v56  ;;  %v13299_v61 = vpop.f32.mrb[22].mxu0  ;;  %13599 = vmatpush3.bf16.msra.mxu0 %v14955_v52  ;;  %v14992_v56 = vld [vmem:[%s15813_s22 + $0xdb0] sm:$0xff]  }
 0x1db   : > { %v13319_v1 = vpop.f32.mrb[21].mxu1  ;;  %v13300_v2 = vpop.f32.mrb[23].mxu0  ;;  %13600 = vmatprep.subr.bf16.mxu0 %v14957_v54 }
 0x1dc   : > { %v9794_v5 = vadd.f32 %v13298_v55, %v16301_v25  ;;  %v13320_v6 = vadd.f32 %v13319_v1, %v13318_v60  ;;  %v13321_v7 = vpop.f32.mrb[22].mxu1  ;;  %13621 = vmatpush3.bf16.msra.mxu1 %v14956_v53  ;;  %v14969_v25 = vld [vmem:[%s15813_s22 + $0xd48] sm:$0xff]   ;;  %v14996_v2 = vld [vmem:[%s15813_s22 + $0xdb8] sm:$0xff]  }
 0x1dd   : > { %v13322_v9 = vpop.f32.mrb[23].mxu1  ;;  %13622 = vmatprep.subr.bf16.mxu1 %v14958_v57  ;;  %v14993_v57 = vld [vmem:[%s15813_s22 + $0xd78] sm:$0xff]   ;;  %v15001_v7 = vld [vmem:[%s15813_s22 + $0xe80] sm:$0xff]  }
 0x1de   : > { %v16343_v13 = vadd.f32 %v13320_v6, %v9794_v5  ;;  %13601 = vmatpush3.bf16.msra.mxu0 %v14959_v59  ;;  %v14999_v5 = vld [vmem:[%s15813_s22 + $0xec0] sm:$0xff]   ;;  %v15002_v9 = vld [vmem:[%s15813_s22 + $0xe48] sm:$0xff]  }
 0x1df   : > { %13602 = vmatprep.subr.bf16.mxu0 %v14961_v63  ;;  %v15000_v6 = vld [vmem:[%s15813_s22 + $0xe00] sm:$0xff]  }
 0x1e0   : > { %13623 = vmatpush3.bf16.msra.mxu1 %v14960_v62  ;;  %v14994_v62 = vld [vmem:[%s15813_s22 + $0xdf8] sm:$0xff]  }
 0x1e1   : > { %13624 = vmatprep.subr.bf16.mxu1 %v14962_v8  ;;  %v2643_v8 = vcombine.high %v2627_v3, %v2627_v3 }
 0x1e2   : > { %13603 = vmatpush3.bf16.msra.mxu0 %v14963_v10  ;;  %v15003_v10 = vld [vmem:[%s15813_s22 + $0xec8] sm:$0xff]  }
 0x1e3   : > { %13632 = vmatprep.subr.bf16.mxu0 %v14965_v17  ;;  %v15010_v17 = vld [vmem:[%s15813_s22 + $0xe58] sm:$0xff]  }
 0x1e4   : > { %13625 = vmatpush3.bf16.msra.mxu1 %v14964_v14  ;;  %v15007_v14 = vld [vmem:[%s15813_s22 + $0xed0] sm:$0xff]  }
 0x1e5   : > { %10352 = vmatmul.mubr.bf16.vlgmr.msra.gmra.mrb[48].mxu0 %v2620_v16  ;;  %13654 = vmatprep.subr.bf16.mxu1 %v14966_v19  ;;  %v15009_v16 = vld [vmem:[%s15813_s22 + $0xe90] sm:$0xff]   ;;  %v15012_v19 = vld [vmem:[%s15813_s22 + $0xe18] sm:$0xff]  }
 0x1e6   : > { %13633 = vmatpush3.bf16.msra.mxu0 %v14967_v21  ;;  %10431 = vmatprep.mubr.bf16.mxu0 %v2641_v22  ;;  %v15014_v21 = vld [vmem:[%s15813_s22 + $0xe60] sm:$0xff]  }
 0x1e7   : > { %10392 = vmatmul.mubr.bf16.vlgmr.msra.gmra.mrb[48].mxu1 %v2642_v24  ;;  %13634 = vmatprep.subr.bf16.mxu0 %v14969_v25  ;;  %v15015_v22 = vld [vmem:[%s15813_s22 + $0xee0] sm:$0xff]   ;;  %v15018_v25 = vld [vmem:[%s15813_s22 + $0xe68] sm:$0xff]  }
 0x1e8   : > { %13655 = vmatpush3.bf16.msra.mxu1 %v14968_v23  ;;  %10471 = vmatprep.mubr.bf16.mxu1 %v2645_v27  ;;  %v15016_v23 = vld [vmem:[%s15813_s22 + $0xe20] sm:$0xff]   ;;  %v15020_v27 = vld [vmem:[%s15813_s22 + $0xe28] sm:$0xff]  }
 0x1e9   : > { %13656 = vmatprep.subr.bf16.mxu1 %v14970_v26  ;;  %v15017_v24 = vld [vmem:[%s15813_s22 + $0xea0] sm:$0xff]   ;;  %v15019_v26 = vld [vmem:[%s15813_s22 + $0xee8] sm:$0xff]  }
 0x1ea   : > { %13635 = vmatpush3.bf16.msra.mxu0 %v14971_v28  ;;  %v15021_v28 = vld [vmem:[%s15813_s22 + $0xea8] sm:$0xff]  }
 0x1eb   : > { %13636 = vmatprep.subr.bf16.mxu0 %v14973_v30 }
 0x1ec   : > { %13657 = vmatpush3.bf16.msra.mxu1 %v14972_v29  ;;  %v15022_v29 = vld [vmem:[%s15813_s22 + $0xe70] sm:$0xff]  }
 0x1ed   : > { %13658 = vmatprep.subr.bf16.mxu1 %v14974_v31  ;;  %v15023_v31 = vld [vmem:[%s15813_s22 + $0xef0] sm:$0xff]  }
 0x1ee   : > { %13637 = vmatpush3.bf16.msra.mxu0 %v14975_v32 }
 0x1ef   : > { %13638 = vmatprep.subr.bf16.mxu0 %v14977_v34 }
 0x1f0   : > { %13659 = vmatpush3.bf16.msra.mxu1 %v14976_v33  ;;  %v15024_v33 = vld [vmem:[%s15813_s22 + $0xe30] sm:$0xff]  }
 0x1f1   : > { %13660 = vmatprep.subr.bf16.mxu1 %v14978_v35 }
 0x1f2   : > { %13639 = vmatpush3.bf16.msra.mxu0 %v14979_v36 }
 0x1f3   : > { %13640 = vmatprep.subr.bf16.mxu0 %v14981_v38  ;;  %v15026_v38 = vld [vmem:[%s15813_s22 + $0xe78] sm:$0xff]  }
 0x1f4   : > { %13661 = vmatpush3.bf16.msra.mxu1 %v14980_v37  ;;  %v15025_v37 = vld [vmem:[%s15813_s22 + $0xeb0] sm:$0xff]  }
 0x1f5   : > { %13662 = vmatprep.subr.bf16.mxu1 %v14982_v39 }
 0x1f6   : > { %13641 = vmatpush3.bf16.msra.mxu0 %v14983_v40 }
 0x1f7   : > { %13642 = vmatprep.subr.bf16.mxu0 %v14985_v43 }
 0x1f8   : > { %13663 = vmatpush3.bf16.msra.mxu1 %v14984_v41  ;;  %v13340_v48 = vpop.f32.mrb[24].mxu0  ;;  %v15027_v41 = vld [vmem:[%s15813_s22 + $0xef8] sm:$0xff]  }
 0x1f9   : > { %v13341_v50 = vpop.f32.mrb[25].mxu0  ;;  %13664 = vmatprep.subr.bf16.mxu1 %v14986_v44 }
 0x1fa   : > { %v13362_v52 = vpop.f32.mrb[24].mxu1  ;;  %v13342_v53 = vadd.f32 %v13341_v50, %v13340_v48  ;;  %v13343_v54 = vpop.f32.mrb[26].mxu0  ;;  %13643 = vmatpush3.bf16.msra.mxu0 %v14987_v45  ;;  %v15028_v48 = vld [vmem:[%s15813_s22 + $0xe38] sm:$0xff]  }
 0x1fb   : > { %v13363_v58 = vpop.f32.mrb[25].mxu1  ;;  %v13344_v59 = vpop.f32.mrb[27].mxu0  ;;  %13644 = vmatprep.subr.bf16.mxu0 %v14989_v47 }
 0x1fc   : > { %v9874_v60 = vadd.f32 %v13342_v53, %v16343_v13  ;;  %v13364_v55 = vadd.f32 %v13363_v58, %v13362_v52  ;;  %v13365_v61 = vpop.f32.mrb[26].mxu1  ;;  %13665 = vmatpush3.bf16.msra.mxu1 %v14988_v46  ;;  %v15006_v13 = vld [vmem:[%s15813_s22 + $0xe50] sm:$0xff]   ;;  %v15029_v52 = vld [vmem:[%s15813_s22 + $0xeb8] sm:$0xff]   ;;  %v15031_v58 = vld [vmem:[%s15813_s22 + $0xfc0] sm:$0xff]  }
 0x1fd   : > { %v13366_v63 = vpop.f32.mrb[27].mxu1  ;;  %13666 = vmatprep.subr.bf16.mxu1 %v14990_v49  ;;  %v230_v46 = vld [vmem:[%s15826_s26 + $0x38] sm:$0xff]  ;;  %v15033_v61 = vld [vmem:[%s15813_s22 + $0xf80] sm:$0xff]  }
 0x1fe   : > { %v16383_v1 = vadd.f32 %v13364_v55, %v9874_v60  ;;  %13645 = vmatpush3.bf16.msra.mxu0 %v14991_v51  ;;  %v2653_v49 = vrot.slane %v230_v46, %v15869_v42  ;;  %v2646_v50 = vcombine.high %v230_v46, %v230_v46  ;;  %v15032_v60 = vld [vmem:[%s15813_s22 + $0xf00] sm:$0xff]  }
 0x1ff   : > { %13646 = vmatprep.subr.bf16.mxu0 %v14993_v57  ;;  %v15065_v46 = vld [vmem:[%s15813_s22 + $0x1000] sm:$0xff]  }
 0x200   : > { %13667 = vmatpush3.bf16.msra.mxu1 %v14992_v56  ;;  %v2661_v53 = vcombine.high %v2653_v49, %v2653_v49  ;;  %v2669_v54 = vrot.slane %v2653_v49, %v15869_v42  ;;  %v15030_v56 = vld [vmem:[%s15813_s22 + $0xf40] sm:$0xff]   ;;  %v16428_v57 = vrot.slane %v2646_v50, %v15869_v42  ;;  %v15067_v49 = vld [vmem:[%s15813_s22 + $0x1048] sm:$0xff]  }
 0x201   : > { %13668 = vmatprep.subr.bf16.mxu1 %v14994_v62  ;;  %v15068_v50 = vld [vmem:[%s15813_s22 + $0x10c8] sm:$0xff]  }
 0x202   : > { %13647 = vmatpush3.bf16.msra.mxu0 %v14995_v0  ;;  %v2683_v59 = vrot.slane %v2661_v53, %v15869_v42  ;;  %v2662_v55 = vcombine.high %v16428_v57, %v16428_v57  ;;  %v2691_v63 = vcombine.high %v2669_v54, %v2669_v54  ;;  %v15034_v0 = vld [vmem:[%s15813_s22 + $0xf48] sm:$0xff]   ;;  %v15071_v53 = vld [vmem:[%s15813_s22 + $0x1050] sm:$0xff]  }
 0x203   : > { %13676 = vmatprep.subr.bf16.mxu0 %v14998_v4 }
 0x204   : > { %13669 = vmatpush3.bf16.msra.mxu1 %v14996_v2  ;;  %v2693_v62 = vcombine.high %v2683_v59, %v2683_v59  ;;  %v15035_v2 = vld [vmem:[%s15813_s22 + $0xfc8] sm:$0xff]  }
 0x205   : > { %10432 = vmatmul.mubr.bf16.vlgmr.msra.gmra.mrb[52].mxu0 %v2627_v3  ;;  %13698 = vmatprep.subr.bf16.mxu1 %v14999_v5  ;;  %v15036_v3 = vld [vmem:[%s15813_s22 + $0xf08] sm:$0xff]  }
 0x206   : > { %13677 = vmatpush3.bf16.msra.mxu0 %v15000_v6  ;;  %10511 = vmatprep.mubr.bf16.mxu0 %v2683_v59  ;;  %v15037_v5 = vld [vmem:[%s15813_s22 + $0xf88] sm:$0xff]   ;;  %v15038_v6 = vld [vmem:[%s15813_s22 + $0xf50] sm:$0xff]   ;;  %v15076_v59 = vld [vmem:[%s15813_s22 + $0x10d8] sm:$0xff]  }
 0x207   : > { %10472 = vmatmul.mubr.bf16.vlgmr.msra.gmra.mrb[52].mxu1 %v2643_v8  ;;  %13678 = vmatprep.subr.bf16.mxu0 %v15002_v9  ;;  %v15040_v8 = vld [vmem:[%s15813_s22 + $0xf10] sm:$0xff]  }
 0x208   : > { %13699 = vmatpush3.bf16.msra.mxu1 %v15001_v7  ;;  %10551 = vmatprep.mubr.bf16.mxu1 %v2693_v62  ;;  %v15039_v7 = vld [vmem:[%s15813_s22 + $0xfd0] sm:$0xff]   ;;  %v15080_v62 = vld [vmem:[%s15813_s22 + $0x10e0] sm:$0xff]  }
 0x209   : > { %13700 = vmatprep.subr.bf16.mxu1 %v15003_v10  ;;  %v15041_v9 = vld [vmem:[%s15813_s22 + $0xf90] sm:$0xff]   ;;  %v15042_v10 = vld [vmem:[%s15813_s22 + $0xf58] sm:$0xff]  }
 0x20a   : > { %13679 = vmatpush3.bf16.msra.mxu0 %v15004_v11  ;;  %v15043_v11 = vld [vmem:[%s15813_s22 + $0xfd8] sm:$0xff]  }
 0x20b   : > { %13680 = vmatprep.subr.bf16.mxu0 %v15006_v13  ;;  %v15045_v13 = vld [vmem:[%s15813_s22 + $0xf98] sm:$0xff]  }
 0x20c   : > { %13701 = vmatpush3.bf16.msra.mxu1 %v15005_v12  ;;  %v15044_v12 = vld [vmem:[%s15813_s22 + $0xf18] sm:$0xff]  }
 0x20d   : > { %13702 = vmatprep.subr.bf16.mxu1 %v15007_v14  ;;  %v15046_v14 = vld [vmem:[%s15813_s22 + $0xf60] sm:$0xff]  }
 0x20e   : > { %13681 = vmatpush3.bf16.msra.mxu0 %v15008_v15  ;;  %v15047_v15 = vld [vmem:[%s15813_s22 + $0xfe0] sm:$0xff]  }
 0x20f   : > { %13682 = vmatprep.subr.bf16.mxu0 %v15010_v17  ;;  %v15049_v17 = vld [vmem:[%s15813_s22 + $0xfa0] sm:$0xff]  }
 0x210   : > { %13703 = vmatpush3.bf16.msra.mxu1 %v15009_v16  ;;  %v15048_v16 = vld [vmem:[%s15813_s22 + $0xf20] sm:$0xff]  }
 0x211   : > { %13704 = vmatprep.subr.bf16.mxu1 %v15011_v18  ;;  %v15050_v18 = vld [vmem:[%s15813_s22 + $0xf68] sm:$0xff]  }
 0x212   : > { %13683 = vmatpush3.bf16.msra.mxu0 %v15012_v19  ;;  %v15051_v19 = vld [vmem:[%s15813_s22 + $0xfe8] sm:$0xff]  }
 0x213   : > { %13684 = vmatprep.subr.bf16.mxu0 %v15014_v21  ;;  %v15053_v21 = vld [vmem:[%s15813_s22 + $0xfa8] sm:$0xff]  }
 0x214   : > { %13705 = vmatpush3.bf16.msra.mxu1 %v15013_v20  ;;  %v15052_v20 = vld [vmem:[%s15813_s22 + $0xf28] sm:$0xff]  }
 0x215   : > { %13706 = vmatprep.subr.bf16.mxu1 %v15015_v22  ;;  %v15054_v22 = vld [vmem:[%s15813_s22 + $0xf70] sm:$0xff]  }
 0x216   : > { %13685 = vmatpush3.bf16.msra.mxu0 %v15016_v23 }
 0x217   : > { %13686 = vmatprep.subr.bf16.mxu0 %v15018_v25 }
 0x218   : > { %13707 = vmatpush3.bf16.msra.mxu1 %v15017_v24  ;;  %v13384_v30 = vpop.f32.mrb[28].mxu0  ;;  %v15055_v24 = vld [vmem:[%s15813_s22 + $0xff0] sm:$0xff]  }
 0x219   : > { %v13385_v32 = vpop.f32.mrb[29].mxu0  ;;  %13708 = vmatprep.subr.bf16.mxu1 %v15019_v26  ;;  %v15056_v26 = vld [vmem:[%s15813_s22 + $0xf30] sm:$0xff]  }
 0x21a   : > { %v13406_v34 = vpop.f32.mrb[28].mxu1  ;;  %v13386_v35 = vadd.f32 %v13385_v32, %v13384_v30  ;;  %v13387_v36 = vpop.f32.mrb[30].mxu0  ;;  %13687 = vmatpush3.bf16.msra.mxu0 %v15020_v27  ;;  %v15057_v30 = vld [vmem:[%s15813_s22 + $0xfb0] sm:$0xff]  }
 0x21b   : > { %v13407_v39 = vpop.f32.mrb[29].mxu1  ;;  %v13388_v40 = vpop.f32.mrb[31].mxu0  ;;  %13688 = vmatprep.subr.bf16.mxu0 %v15022_v29 }
 0x21c   : > { %v9954_v43 = vadd.f32 %v13386_v35, %v16383_v1  ;;  %v13408_v44 = vadd.f32 %v13407_v39, %v13406_v34  ;;  %v13409_v45 = vpop.f32.mrb[30].mxu1  ;;  %13709 = vmatpush3.bf16.msra.mxu1 %v15021_v28  ;;  %v2690_v1 = vrot.slane %v2662_v55, %v15869_v42  ;;  %v15060_v39 = vld [vmem:[%s15813_s22 + $0xf38] sm:$0xff]  }
 0x21d   : > { %v13410_v47 = vpop.f32.mrb[31].mxu1  ;;  %13710 = vmatprep.subr.bf16.mxu1 %v15023_v31  ;;  %v15058_v31 = vld [vmem:[%s15813_s22 + $0xf78] sm:$0xff]   ;;  %v15064_v45 = vld [vmem:[%s15813_s22 + $0x10c0] sm:$0xff]  }
 0x21e   : > { %v16422_v51 = vadd.f32 %v13408_v44, %v9954_v43  ;;  %13689 = vmatpush3.bf16.msra.mxu0 %v15024_v33  ;;  %v2694_v4 = vcombine.high %v2690_v1, %v2690_v1  ;;  %v2676_v43 = vrot.slane %v16428_v57, %v15869_v42  ;;  %v15063_v44 = vld [vmem:[%s15813_s22 + $0x1040] sm:$0xff]   ;;  %v15074_v57 = vld [vmem:[%s15813_s22 + $0x1090] sm:$0xff]   ;;  %v15078_v55 = vld [vmem:[%s15813_s22 + $0x1098] sm:$0xff]  }
 0x21f   : > { %13690 = vmatprep.subr.bf16.mxu0 %v15026_v38  ;;  %v15066_v47 = vld [vmem:[%s15813_s22 + $0x1080] sm:$0xff]  }
 0x220   : > { %13711 = vmatpush3.bf16.msra.mxu1 %v15025_v37  ;;  %v15059_v37 = vld [vmem:[%s15813_s22 + $0xff8] sm:$0xff]  }
 0x221   : > { %13712 = vmatprep.subr.bf16.mxu1 %v15027_v41  ;;  %v15061_v41 = vld [vmem:[%s15813_s22 + $0xfb8] sm:$0xff]  }
 0x222   : > { %13691 = vmatpush3.bf16.msra.mxu0 %v15028_v48  ;;  %v2692_v48 = vcombine.high %v2676_v43, %v2676_v43 }
 0x223   : > { %13720 = vmatprep.subr.bf16.mxu0 %v15030_v56  ;;  %v15073_v56 = vld [vmem:[%s15813_s22 + $0x1010] sm:$0xff]  }
 0x224   : > { %13713 = vmatpush3.bf16.msra.mxu1 %v15029_v52  ;;  %v15070_v52 = vld [vmem:[%s15813_s22 + $0x1088] sm:$0xff]  }
 0x225   : > { %10512 = vmatmul.mubr.bf16.vlgmr.msra.gmra.mrb[56].mxu0 %v2669_v54  ;;  %13742 = vmatprep.subr.bf16.mxu1 %v15031_v58  ;;  %v15072_v54 = vld [vmem:[%s15813_s22 + $0x10d0] sm:$0xff]   ;;  %v15075_v58 = vld [vmem:[%s15813_s22 + $0x1058] sm:$0xff]  }
 0x226   : > { %13721 = vmatpush3.bf16.msra.mxu0 %v15032_v60  ;;  %10591 = vmatprep.mubr.bf16.mxu0 %v2690_v1  ;;  %v15077_v60 = vld [vmem:[%s15813_s22 + $0x1018] sm:$0xff]   ;;  %v15083_v1 = vld [vmem:[%s15813_s22 + $0x1068] sm:$0xff]  }
 0x227   : > { %10552 = vmatmul.mubr.bf16.vlgmr.msra.gmra.mrb[56].mxu1 %v2691_v63  ;;  %13722 = vmatprep.subr.bf16.mxu0 %v15034_v0  ;;  %v15081_v63 = vld [vmem:[%s15813_s22 + $0x1020] sm:$0xff]  }
 0x228   : > { %13743 = vmatpush3.bf16.msra.mxu1 %v15033_v61  ;;  %10631 = vmatprep.mubr.bf16.mxu1 %v2694_v4  ;;  %v15079_v61 = vld [vmem:[%s15813_s22 + $0x1060] sm:$0xff]   ;;  %v15086_v4 = vld [vmem:[%s15813_s22 + $0x10a8] sm:$0xff]  }
 0x229   : > { %13744 = vmatprep.subr.bf16.mxu1 %v15035_v2  ;;  %v15082_v0 = vld [vmem:[%s15813_s22 + $0x10a0] sm:$0xff]   ;;  %v15084_v2 = vld [vmem:[%s15813_s22 + $0x10e8] sm:$0xff]  }
 0x22a   : > { %13723 = vmatpush3.bf16.msra.mxu0 %v15036_v3  ;;  %v15085_v3 = vld [vmem:[%s15813_s22 + $0x1028] sm:$0xff]  }
 0x22b   : > { %13724 = vmatprep.subr.bf16.mxu0 %v15038_v6 }
 0x22c   : > { %13745 = vmatpush3.bf16.msra.mxu1 %v15037_v5  ;;  %v15087_v5 = vld [vmem:[%s15813_s22 + $0x1070] sm:$0xff]  }
 0x22d   : > { %13746 = vmatprep.subr.bf16.mxu1 %v15039_v7  ;;  %v15088_v7 = vld [vmem:[%s15813_s22 + $0x10f0] sm:$0xff]  }
 0x22e   : > { %13725 = vmatpush3.bf16.msra.mxu0 %v15040_v8 }
 0x22f   : > { %13726 = vmatprep.subr.bf16.mxu0 %v15042_v10 }
 0x230   : > { %13747 = vmatpush3.bf16.msra.mxu1 %v15041_v9  ;;  %v15089_v9 = vld [vmem:[%s15813_s22 + $0x1030] sm:$0xff]  }
 0x231   : > { %13748 = vmatprep.subr.bf16.mxu1 %v15043_v11 }
 0x232   : > { %13727 = vmatpush3.bf16.msra.mxu0 %v15044_v12 }
 0x233   : > { %13728 = vmatprep.subr.bf16.mxu0 %v15046_v14  ;;  %v15091_v14 = vld [vmem:[%s15813_s22 + $0x1078] sm:$0xff]  }
 0x234   : > { %13749 = vmatpush3.bf16.msra.mxu1 %v15045_v13  ;;  %v15090_v13 = vld [vmem:[%s15813_s22 + $0x10b0] sm:$0xff]  }
 0x235   : > { %13750 = vmatprep.subr.bf16.mxu1 %v15047_v15 }
 0x236   : > { %13729 = vmatpush3.bf16.msra.mxu0 %v15048_v16 }
 0x237   : > { %13730 = vmatprep.subr.bf16.mxu0 %v15050_v18 }
 0x238   : > { %13751 = vmatpush3.bf16.msra.mxu1 %v15049_v17  ;;  %v13428_v23 = vpop.f32.mrb[32].mxu0  ;;  %v15092_v17 = vld [vmem:[%s15813_s22 + $0x10f8] sm:$0xff]  }
 0x239   : > { %v13429_v25 = vpop.f32.mrb[33].mxu0  ;;  %13752 = vmatprep.subr.bf16.mxu1 %v15051_v19 }
 0x23a   : > { %v13450_v27 = vpop.f32.mrb[32].mxu1  ;;  %v13430_v28 = vadd.f32 %v13429_v25, %v13428_v23  ;;  %v13431_v29 = vpop.f32.mrb[34].mxu0  ;;  %13731 = vmatpush3.bf16.msra.mxu0 %v15052_v20  ;;  %v231_v23 = vld [vmem:[%s15826_s26 + $0x40] sm:$0xff] }
 0x23b   : > { %v13451_v32 = vpop.f32.mrb[33].mxu1  ;;  %v13432_v33 = vpop.f32.mrb[35].mxu0  ;;  %13732 = vmatprep.subr.bf16.mxu0 %v15054_v22  ;;  %v15094_v25 = vld [vmem:[%s15813_s22 + $0x10b8] sm:$0xff]  }
 0x23c   : > { %v10034_v34 = vadd.f32 %v13430_v28, %v16422_v51  ;;  %v13452_v35 = vadd.f32 %v13451_v32, %v13450_v27  ;;  %v13453_v36 = vpop.f32.mrb[34].mxu1  ;;  %13753 = vmatpush3.bf16.msra.mxu1 %v15053_v21  ;;  %v15069_v51 = vld [vmem:[%s15813_s22 + $0x1008] sm:$0xff]   ;;  %v15093_v21 = vld [vmem:[%s15813_s22 + $0x1038] sm:$0xff]   ;;  %v2695_v27 = vcombine.high %v231_v23, %v231_v23  ;;  %v15095_v28 = vld [vmem:[%s15813_s22 + $0x1140] sm:$0xff]  }
 0x23d   : > { %v13454_v38 = vpop.f32.mrb[35].mxu1  ;;  %13754 = vmatprep.subr.bf16.mxu1 %v15055_v24  ;;  %v15097_v33 = vld [vmem:[%s15813_s22 + $0x1100] sm:$0xff]  }
 0x23e   : > { %v16465_v40 = vadd.f32 %v13452_v35, %v10034_v34  ;;  %13733 = vmatpush3.bf16.msra.mxu0 %v15056_v26  ;;  %v2702_v26 = vrot.slane %v231_v23, %v15869_v42  ;;  %v16511_v32 = vrot.slane %v2695_v27, %v15869_v42  ;;  %v15098_v35 = vld [vmem:[%s15813_s22 + $0x1180] sm:$0xff]   ;;  %v15099_v38 = vld [vmem:[%s15813_s22 + $0x1148] sm:$0xff]  }
 0x23f   : > { %13734 = vmatprep.subr.bf16.mxu0 %v15058_v31  ;;  %v15096_v31 = vld [vmem:[%s15813_s22 + $0x11c0] sm:$0xff]   ;;  %v15135_v27 = vld [vmem:[%s15813_s22 + $0x1288] sm:$0xff]  }
 0x240   : > { %13755 = vmatpush3.bf16.msra.mxu1 %v15057_v30  ;;  %v2710_v29 = vcombine.high %v2702_v26, %v2702_v26  ;;  %v2718_v30 = vrot.slane %v2702_v26, %v15869_v42  ;;  %v2711_v36 = vcombine.high %v16511_v32, %v16511_v32  ;;  %v15134_v26 = vld [vmem:[%s15813_s22 + $0x1208] sm:$0xff]  }
 0x241   : > { %13756 = vmatprep.subr.bf16.mxu1 %v15059_v37 }
 0x242   : > { %13735 = vmatpush3.bf16.msra.mxu0 %v15060_v39  ;;  %v2732_v34 = vrot.slane %v2710_v29, %v15869_v42  ;;  %v2740_v37 = vcombine.high %v2718_v30, %v2718_v30  ;;  %v15137_v29 = vld [vmem:[%s15813_s22 + $0x12d0] sm:$0xff]  }
 0x243   : > { %13764 = vmatprep.subr.bf16.mxu0 %v15063_v44  ;;  %v15102_v44 = vld [vmem:[%s15813_s22 + $0x1188] sm:$0xff]  }
 0x244   : > { %13757 = vmatpush3.bf16.msra.mxu1 %v15061_v41  ;;  %v2742_v39 = vcombine.high %v2732_v34, %v2732_v34  ;;  %v2739_v41 = vrot.slane %v2711_v36, %v15869_v42  ;;  %v15144_v36 = vld [vmem:[%s15813_s22 + $0x1260] sm:$0xff]  }
 0x245   : > { %10592 = vmatmul.mubr.bf16.vlgmr.msra.gmra.mrb[60].mxu0 %v2676_v43  ;;  %13786 = vmatprep.subr.bf16.mxu1 %v15064_v45  ;;  %v15101_v43 = vld [vmem:[%s15813_s22 + $0x1108] sm:$0xff]  }
 0x246   : > { %13765 = vmatpush3.bf16.msra.mxu0 %v15065_v46  ;;  %10671 = vmatprep.mubr.bf16.mxu0 %v2732_v34  ;;  %v2743_v45 = vcombine.high %v2739_v41, %v2739_v41  ;;  %v15103_v46 = vld [vmem:[%s15813_s22 + $0x1150] sm:$0xff]   ;;  %v15142_v34 = vld [vmem:[%s15813_s22 + $0x1218] sm:$0xff]  }
 0x247   : > { %10632 = vmatmul.mubr.bf16.vlgmr.msra.gmra.mrb[60].mxu1 %v2692_v48  ;;  %13766 = vmatprep.subr.bf16.mxu0 %v15067_v49  ;;  %v15105_v48 = vld [vmem:[%s15813_s22 + $0x1110] sm:$0xff]  }
 0x248   : > { %13787 = vmatpush3.bf16.msra.mxu1 %v15066_v47  ;;  %10711 = vmatprep.mubr.bf16.mxu1 %v2742_v39  ;;  %v15104_v47 = vld [vmem:[%s15813_s22 + $0x11d0] sm:$0xff]   ;;  %v15147_v39 = vld [vmem:[%s15813_s22 + $0x12a0] sm:$0xff]  }
 0x249   : > { %13788 = vmatprep.subr.bf16.mxu1 %v15068_v50  ;;  %v15106_v49 = vld [vmem:[%s15813_s22 + $0x1190] sm:$0xff]   ;;  %v15107_v50 = vld [vmem:[%s15813_s22 + $0x1158] sm:$0xff]  }
 0x24a   : > { %13767 = vmatpush3.bf16.msra.mxu0 %v15069_v51  ;;  %v15108_v51 = vld [vmem:[%s15813_s22 + $0x11d8] sm:$0xff]  }
 0x24b   : > { %13768 = vmatprep.subr.bf16.mxu0 %v15071_v53  ;;  %v15110_v53 = vld [vmem:[%s15813_s22 + $0x1198] sm:$0xff]  }
 0x24c   : > { %13789 = vmatpush3.bf16.msra.mxu1 %v15070_v52  ;;  %v15109_v52 = vld [vmem:[%s15813_s22 + $0x1118] sm:$0xff]  }
 0x24d   : > { %13790 = vmatprep.subr.bf16.mxu1 %v15072_v54  ;;  %v15111_v54 = vld [vmem:[%s15813_s22 + $0x1160] sm:$0xff]  }
 0x24e   : > { %13769 = vmatpush3.bf16.msra.mxu0 %v15073_v56  ;;  %v15112_v56 = vld [vmem:[%s15813_s22 + $0x11e0] sm:$0xff]  }
 0x24f   : > { %13770 = vmatprep.subr.bf16.mxu0 %v15075_v58  ;;  %v15114_v58 = vld [vmem:[%s15813_s22 + $0x11a0] sm:$0xff]  }
 0x250   : > { %13791 = vmatpush3.bf16.msra.mxu1 %v15074_v57  ;;  %v15113_v57 = vld [vmem:[%s15813_s22 + $0x1120] sm:$0xff]  }
 0x251   : > { %13792 = vmatprep.subr.bf16.mxu1 %v15076_v59  ;;  %v15115_v59 = vld [vmem:[%s15813_s22 + $0x1168] sm:$0xff]  }
 0x252   : > { %13771 = vmatpush3.bf16.msra.mxu0 %v15077_v60  ;;  %v15116_v60 = vld [vmem:[%s15813_s22 + $0x11e8] sm:$0xff]  }
 0x253   : > { %13772 = vmatprep.subr.bf16.mxu0 %v15079_v61  ;;  %v15118_v61 = vld [vmem:[%s15813_s22 + $0x11a8] sm:$0xff]  }
 0x254   : > { %13793 = vmatpush3.bf16.msra.mxu1 %v15078_v55  ;;  %v15117_v55 = vld [vmem:[%s15813_s22 + $0x1128] sm:$0xff]  }
 0x255   : > { %13794 = vmatprep.subr.bf16.mxu1 %v15080_v62  ;;  %v15119_v62 = vld [vmem:[%s15813_s22 + $0x1170] sm:$0xff]  }
 0x256   : > { %13773 = vmatpush3.bf16.msra.mxu0 %v15081_v63 }
 0x257   : > { %13774 = vmatprep.subr.bf16.mxu0 %v15083_v1 }
 0x258   : > { %13795 = vmatpush3.bf16.msra.mxu1 %v15082_v0  ;;  %v13472_v6 = vpop.f32.mrb[36].mxu0  ;;  %v15120_v0 = vld [vmem:[%s15813_s22 + $0x11f0] sm:$0xff]  }
 0x259   : > { %v13473_v8 = vpop.f32.mrb[37].mxu0  ;;  %13796 = vmatprep.subr.bf16.mxu1 %v15084_v2  ;;  %v15121_v2 = vld [vmem:[%s15813_s22 + $0x1130] sm:$0xff]  }
 0x25a   : > { %v13494_v10 = vpop.f32.mrb[36].mxu1  ;;  %v13474_v11 = vadd.f32 %v13473_v8, %v13472_v6  ;;  %v13475_v12 = vpop.f32.mrb[38].mxu0  ;;  %13775 = vmatpush3.bf16.msra.mxu0 %v15085_v3  ;;  %v15122_v6 = vld [vmem:[%s15813_s22 + $0x11b0] sm:$0xff]  }
 0x25b   : > { %v13495_v15 = vpop.f32.mrb[37].mxu1  ;;  %v13476_v16 = vpop.f32.mrb[39].mxu0  ;;  %13776 = vmatprep.subr.bf16.mxu0 %v15087_v5 }
 0x25c   : > { %v10114_v18 = vadd.f32 %v13474_v11, %v16465_v40  ;;  %v13496_v19 = vadd.f32 %v13495_v15, %v13494_v10  ;;  %v13497_v20 = vpop.f32.mrb[38].mxu1  ;;  %13797 = vmatpush3.bf16.msra.mxu1 %v15086_v4  ;;  %v15100_v40 = vld [vmem:[%s15813_s22 + $0x11c8] sm:$0xff]   ;;  %v15125_v15 = vld [vmem:[%s15813_s22 + $0x1138] sm:$0xff]  }
 0x25d   : > { %v13498_v22 = vpop.f32.mrb[39].mxu1  ;;  %13798 = vmatprep.subr.bf16.mxu1 %v15088_v7  ;;  %v15123_v7 = vld [vmem:[%s15813_s22 + $0x1178] sm:$0xff]   ;;  %v15129_v20 = vld [vmem:[%s15813_s22 + $0x12c0] sm:$0xff]  }
 0x25e   : > { %v16503_v24 = vadd.f32 %v13496_v19, %v10114_v18  ;;  %13777 = vmatpush3.bf16.msra.mxu0 %v15089_v9  ;;  %v2725_v18 = vrot.slane %v16511_v32, %v15869_v42  ;;  %v15128_v19 = vld [vmem:[%s15813_s22 + $0x1240] sm:$0xff]   ;;  %v15140_v32 = vld [vmem:[%s15813_s22 + $0x1258] sm:$0xff]  }
 0x25f   : > { %13778 = vmatprep.subr.bf16.mxu0 %v15091_v14  ;;  %v15131_v22 = vld [vmem:[%s15813_s22 + $0x1280] sm:$0xff]  }
 0x260   : > { %13799 = vmatpush3.bf16.msra.mxu1 %v15090_v13  ;;  %v15124_v13 = vld [vmem:[%s15813_s22 + $0x11f8] sm:$0xff]   ;;  %v2741_v23 = vcombine.high %v2725_v18, %v2725_v18 }
 0x261   : > { %13800 = vmatprep.subr.bf16.mxu1 %v15092_v17  ;;  %v15126_v17 = vld [vmem:[%s15813_s22 + $0x11b8] sm:$0xff]  }
 0x262   : > { %13779 = vmatpush3.bf16.msra.mxu0 %v15093_v21  ;;  %v15130_v21 = vld [vmem:[%s15813_s22 + $0x1200] sm:$0xff]  }
 0x263   : > { %13808 = vmatprep.subr.bf16.mxu0 %v15095_v28  ;;  %v15136_v28 = vld [vmem:[%s15813_s22 + $0x1250] sm:$0xff]  }
 0x264   : > { %13801 = vmatpush3.bf16.msra.mxu1 %v15094_v25  ;;  %v15133_v25 = vld [vmem:[%s15813_s22 + $0x12c8] sm:$0xff]  }
 0x265   : > { %10672 = vmatmul.mubr.bf16.vlgmr.msra.gmra.mrb[64].mxu0 %v2718_v30  ;;  %13830 = vmatprep.subr.bf16.mxu1 %v15096_v31  ;;  %v15138_v30 = vld [vmem:[%s15813_s22 + $0x1210] sm:$0xff]  }
 0x266   : > { %13809 = vmatpush3.bf16.msra.mxu0 %v15097_v33  ;;  %10751 = vmatprep.mubr.bf16.mxu0 %v2739_v41  ;;  %v15139_v31 = vld [vmem:[%s15813_s22 + $0x1290] sm:$0xff]   ;;  %v15141_v33 = vld [vmem:[%s15813_s22 + $0x12d8] sm:$0xff]   ;;  %v15149_v41 = vld [vmem:[%s15813_s22 + $0x12e8] sm:$0xff]  }
 0x267   : > { %10712 = vmatmul.mubr.bf16.vlgmr.msra.gmra.mrb[64].mxu1 %v2740_v37  ;;  %13810 = vmatprep.subr.bf16.mxu0 %v15099_v38  ;;  %v15145_v37 = vld [vmem:[%s15813_s22 + $0x12e0] sm:$0xff]  }
 0x268   : > { %13831 = vmatpush3.bf16.msra.mxu1 %v15098_v35  ;;  %10791 = vmatprep.mubr.bf16.mxu1 %v2743_v45  ;;  %v15143_v35 = vld [vmem:[%s15813_s22 + $0x1298] sm:$0xff]   ;;  %v15146_v38 = vld [vmem:[%s15813_s22 + $0x1220] sm:$0xff]   ;;  %v15152_v45 = vld [vmem:[%s15813_s22 + $0x1270] sm:$0xff]  }
 0x269   : > { %13832 = vmatprep.subr.bf16.mxu1 %v15100_v40  ;;  %v15148_v40 = vld [vmem:[%s15813_s22 + $0x1268] sm:$0xff]  }
 0x26a   : > { %13811 = vmatpush3.bf16.msra.mxu0 %v15101_v43  ;;  %v15150_v43 = vld [vmem:[%s15813_s22 + $0x1228] sm:$0xff]  }
 0x26b   : > { %13812 = vmatprep.subr.bf16.mxu0 %v15103_v46 }
 0x26c   : > { %13833 = vmatpush3.bf16.msra.mxu1 %v15102_v44  ;;  %v15151_v44 = vld [vmem:[%s15813_s22 + $0x12a8] sm:$0xff]  }
 0x26d   : > { %13834 = vmatprep.subr.bf16.mxu1 %v15104_v47  ;;  %v15153_v47 = vld [vmem:[%s15813_s22 + $0x12f0] sm:$0xff]  }
 0x26e   : > { %13813 = vmatpush3.bf16.msra.mxu0 %v15105_v48 }
 0x26f   : > { %13814 = vmatprep.subr.bf16.mxu0 %v15107_v50 }
 0x270   : > { %13835 = vmatpush3.bf16.msra.mxu1 %v15106_v49  ;;  %v15154_v49 = vld [vmem:[%s15813_s22 + $0x1230] sm:$0xff]  }
 0x271   : > { %13836 = vmatprep.subr.bf16.mxu1 %v15108_v51 }
 0x272   : > { %13815 = vmatpush3.bf16.msra.mxu0 %v15109_v52 }
 0x273   : > { %13816 = vmatprep.subr.bf16.mxu0 %v15111_v54  ;;  %v15156_v54 = vld [vmem:[%s15813_s22 + $0x1278] sm:$0xff]  }
 0x274   : > { %13837 = vmatpush3.bf16.msra.mxu1 %v15110_v53  ;;  %v15155_v53 = vld [vmem:[%s15813_s22 + $0x12b0] sm:$0xff]  }
 0x275   : > { %13838 = vmatprep.subr.bf16.mxu1 %v15112_v56 }
 0x276   : > { %13817 = vmatpush3.bf16.msra.mxu0 %v15113_v57 }
 0x277   : > { %13818 = vmatprep.subr.bf16.mxu0 %v15115_v59 }
 0x278   : > { %13839 = vmatpush3.bf16.msra.mxu1 %v15114_v58  ;;  %v13516_v63 = vpop.f32.mrb[40].mxu0 }
 0x279   : > { %v13517_v1 = vpop.f32.mrb[41].mxu0  ;;  %13840 = vmatprep.subr.bf16.mxu1 %v15116_v60 }
 0x27a   : > { %v13538_v3 = vpop.f32.mrb[40].mxu1  ;;  %v13518_v4 = vadd.f32 %v13517_v1, %v13516_v63  ;;  %v13519_v5 = vpop.f32.mrb[42].mxu0  ;;  %13819 = vmatpush3.bf16.msra.mxu0 %v15117_v55  ;;  %v15157_v55 = vld [vmem:[%s15813_s22 + $0x12f8] sm:$0xff]  }
 0x27b   : > { %v13539_v8 = vpop.f32.mrb[41].mxu1  ;;  %v13520_v9 = vpop.f32.mrb[43].mxu0  ;;  %13820 = vmatprep.subr.bf16.mxu0 %v15119_v62  ;;  %v15158_v62 = vld [vmem:[%s15813_s22 + $0x1238] sm:$0xff]  }
 0x27c   : > { %v10194_v10 = vadd.f32 %v13518_v4, %v16503_v24  ;;  %v13540_v11 = vadd.f32 %v13539_v8, %v13538_v3  ;;  %v13541_v12 = vpop.f32.mrb[42].mxu1  ;;  %13841 = vmatpush3.bf16.msra.mxu1 %v15118_v61  ;;  %v15132_v24 = vld [vmem:[%s15813_s22 + $0x1248] sm:$0xff]   ;;  %v15159_v4 = vld [vmem:[%s15813_s22 + $0x12b8] sm:$0xff]  }
 0x27d   : > { %v13542_v14 = vpop.f32.mrb[43].mxu1  ;;  %13842 = vmatprep.subr.bf16.mxu1 %v15120_v0  ;;  %v232_v0 = vld [vmem:[%s15826_s26 + $0x48] sm:$0xff] }
 0x27e   : > { %v16547_v16 = vadd.f32 %v13540_v11, %v10194_v10  ;;  %13821 = vmatpush3.bf16.msra.mxu0 %v15121_v2  ;;  %v2751_v1 = vrot.slane %v232_v0, %v15869_v42  ;;  %v15160_v2 = vld [vmem:[%s15813_s22 + $0x1340] sm:$0xff]   ;;  %v2744_v3 = vcombine.high %v232_v0, %v232_v0 }
 0x27f   : > { %13822 = vmatprep.subr.bf16.mxu0 %v15123_v7  ;;  %v15161_v7 = vld [vmem:[%s15813_s22 + $0x13c0] sm:$0xff]  }
 0x280   : > { %13843 = vmatpush3.bf16.msra.mxu1 %v15122_v6  ;;  %v2759_v5 = vcombine.high %v2751_v1, %v2751_v1  ;;  %v2767_v6 = vrot.slane %v2751_v1, %v15869_v42  ;;  %v16593_v8 = vrot.slane %v2744_v3, %v15869_v42  ;;  %v15162_v10 = vld [vmem:[%s15813_s22 + $0x1300] sm:$0xff]   ;;  %v15198_v1 = vld [vmem:[%s15813_s22 + $0x14c8] sm:$0xff]   ;;  %v15201_v3 = vld [vmem:[%s15813_s22 + $0x1450] sm:$0xff]  }
 0x281   : > { %13844 = vmatprep.subr.bf16.mxu1 %v15124_v13  ;;  %v15164_v13 = vld [vmem:[%s15813_s22 + $0x1348] sm:$0xff]   ;;  %v15196_v0 = vld [vmem:[%s15813_s22 + $0x1480] sm:$0xff]  }
 0x282   : > { %13823 = vmatpush3.bf16.msra.mxu0 %v15125_v15  ;;  %v2781_v9 = vrot.slane %v2759_v5, %v15869_v42  ;;  %v2760_v11 = vcombine.high %v16593_v8, %v16593_v8  ;;  %v2789_v12 = vcombine.high %v2767_v6, %v2767_v6  ;;  %v15163_v15 = vld [vmem:[%s15813_s22 + $0x1380] sm:$0xff]   ;;  %v15202_v5 = vld [vmem:[%s15813_s22 + $0x14d0] sm:$0xff]  }
 0x283   : > { %13852 = vmatprep.subr.bf16.mxu0 %v15128_v19 }
 0x284   : > { %13845 = vmatpush3.bf16.msra.mxu1 %v15126_v17  ;;  %v2791_v14 = vcombine.high %v2781_v9, %v2781_v9  ;;  %v15165_v17 = vld [vmem:[%s15813_s22 + $0x13c8] sm:$0xff]  }
 0x285   : > { %10752 = vmatmul.mubr.bf16.vlgmr.msra.gmra.mrb[68].mxu0 %v2725_v18  ;;  %13874 = vmatprep.subr.bf16.mxu1 %v15129_v20  ;;  %v15166_v18 = vld [vmem:[%s15813_s22 + $0x1308] sm:$0xff]   ;;  %v15168_v20 = vld [vmem:[%s15813_s22 + $0x1350] sm:$0xff]  }
 0x286   : > { %13853 = vmatpush3.bf16.msra.mxu0 %v15130_v21  ;;  %10831 = vmatprep.mubr.bf16.mxu0 %v2781_v9  ;;  %v15167_v21 = vld [vmem:[%s15813_s22 + $0x1388] sm:$0xff]   ;;  %v15206_v9 = vld [vmem:[%s15813_s22 + $0x14d8] sm:$0xff]  }
 0x287   : > { %10792 = vmatmul.mubr.bf16.vlgmr.msra.gmra.mrb[68].mxu1 %v2741_v23  ;;  %13854 = vmatprep.subr.bf16.mxu0 %v15132_v24  ;;  %v15170_v23 = vld [vmem:[%s15813_s22 + $0x1310] sm:$0xff]   ;;  %v15172_v24 = vld [vmem:[%s15813_s22 + $0x1358] sm:$0xff]  }
 0x288   : > { %13875 = vmatpush3.bf16.msra.mxu1 %v15131_v22  ;;  %10871 = vmatprep.mubr.bf16.mxu1 %v2791_v14  ;;  %v15169_v22 = vld [vmem:[%s15813_s22 + $0x13d0] sm:$0xff]   ;;  %v15211_v14 = vld [vmem:[%s15813_s22 + $0x1420] sm:$0xff]  }
 0x289   : > { %13876 = vmatprep.subr.bf16.mxu1 %v15133_v25  ;;  %v15171_v25 = vld [vmem:[%s15813_s22 + $0x1390] sm:$0xff]  }
 0x28a   : > { %13855 = vmatpush3.bf16.msra.mxu0 %v15134_v26  ;;  %v15173_v26 = vld [vmem:[%s15813_s22 + $0x13d8] sm:$0xff]  }
 0x28b   : > { %13856 = vmatprep.subr.bf16.mxu0 %v15136_v28  ;;  %v15176_v28 = vld [vmem:[%s15813_s22 + $0x1360] sm:$0xff]  }
 0x28c   : > { %13877 = vmatpush3.bf16.msra.mxu1 %v15135_v27  ;;  %v15174_v27 = vld [vmem:[%s15813_s22 + $0x1318] sm:$0xff]  }
 0x28d   : > { %13878 = vmatprep.subr.bf16.mxu1 %v15137_v29  ;;  %v15175_v29 = vld [vmem:[%s15813_s22 + $0x1398] sm:$0xff]  }
 0x28e   : > { %13857 = vmatpush3.bf16.msra.mxu0 %v15138_v30  ;;  %v15177_v30 = vld [vmem:[%s15813_s22 + $0x13e0] sm:$0xff]  }
 0x28f   : > { %13858 = vmatprep.subr.bf16.mxu0 %v15140_v32  ;;  %v15180_v32 = vld [vmem:[%s15813_s22 + $0x1368] sm:$0xff]  }
 0x290   : > { %13879 = vmatpush3.bf16.msra.mxu1 %v15139_v31  ;;  %v15178_v31 = vld [vmem:[%s15813_s22 + $0x1320] sm:$0xff]  }
 0x291   : > { %13880 = vmatprep.subr.bf16.mxu1 %v15141_v33  ;;  %v15179_v33 = vld [vmem:[%s15813_s22 + $0x13a0] sm:$0xff]  }
 0x292   : > { %13859 = vmatpush3.bf16.msra.mxu0 %v15142_v34  ;;  %v15181_v34 = vld [vmem:[%s15813_s22 + $0x13e8] sm:$0xff]  }
 0x293   : > { %13860 = vmatprep.subr.bf16.mxu0 %v15144_v36 }
 0x294   : > { %13881 = vmatpush3.bf16.msra.mxu1 %v15143_v35  ;;  %v15182_v35 = vld [vmem:[%s15813_s22 + $0x1328] sm:$0xff]  }
 0x295   : > { %13882 = vmatprep.subr.bf16.mxu1 %v15145_v37  ;;  %v15184_v37 = vld [vmem:[%s15813_s22 + $0x1370] sm:$0xff]  }
 0x296   : > { %13861 = vmatpush3.bf16.msra.mxu0 %v15146_v38 }
 0x297   : > { %13862 = vmatprep.subr.bf16.mxu0 %v15148_v40 }
 0x298   : > { %13883 = vmatpush3.bf16.msra.mxu1 %v15147_v39  ;;  %v13560_v46 = vpop.f32.mrb[44].mxu0  ;;  %v15183_v39 = vld [vmem:[%s15813_s22 + $0x13a8] sm:$0xff]  }
 0x299   : > { %v13561_v48 = vpop.f32.mrb[45].mxu0  ;;  %13884 = vmatprep.subr.bf16.mxu1 %v15149_v41 }
 0x29a   : > { %v13582_v50 = vpop.f32.mrb[44].mxu1  ;;  %v13562_v51 = vadd.f32 %v13561_v48, %v13560_v46  ;;  %v13563_v52 = vpop.f32.mrb[46].mxu0  ;;  %13863 = vmatpush3.bf16.msra.mxu0 %v15150_v43 }
 0x29b   : > { %v13583_v56 = vpop.f32.mrb[45].mxu1  ;;  %v13564_v57 = vpop.f32.mrb[47].mxu0  ;;  %13864 = vmatprep.subr.bf16.mxu0 %v15152_v45  ;;  %v15186_v45 = vld [vmem:[%s15813_s22 + $0x1330] sm:$0xff]  }
 0x29c   : > { %v10274_v58 = vadd.f32 %v13562_v51, %v16547_v16  ;;  %v13584_v59 = vadd.f32 %v13583_v56, %v13582_v50  ;;  %v13585_v60 = vpop.f32.mrb[46].mxu1  ;;  %13885 = vmatpush3.bf16.msra.mxu1 %v15151_v44  ;;  %v2788_v16 = vrot.slane %v2760_v11, %v15869_v42  ;;  %v15185_v44 = vld [vmem:[%s15813_s22 + $0x13f0] sm:$0xff]   ;;  %v15188_v51 = vld [vmem:[%s15813_s22 + $0x1378] sm:$0xff]   ;;  %v15209_v11 = vld [vmem:[%s15813_s22 + $0x1460] sm:$0xff]  }
 0x29d   : > { %v13586_v61 = vpop.f32.mrb[47].mxu1  ;;  %13886 = vmatprep.subr.bf16.mxu1 %v15153_v47  ;;  %v15189_v56 = vld [vmem:[%s15813_s22 + $0x13f8] sm:$0xff]  }
 0x29e   : > { %v16584_v63 = vadd.f32 %v13584_v59, %v10274_v58  ;;  %13865 = vmatpush3.bf16.msra.mxu0 %v15154_v49  ;;  %v2792_v19 = vcombine.high %v2788_v16, %v2788_v16  ;;  %v15190_v57 = vld [vmem:[%s15813_s22 + $0x1338] sm:$0xff]   ;;  %v2774_v58 = vrot.slane %v16593_v8, %v15869_v42  ;;  %v15193_v59 = vld [vmem:[%s15813_s22 + $0x1440] sm:$0xff]   ;;  %v15204_v8 = vld [vmem:[%s15813_s22 + $0x1490] sm:$0xff]  }
 0x29f   : > { %13866 = vmatprep.subr.bf16.mxu0 %v15156_v54  ;;  %v15191_v60 = vld [vmem:[%s15813_s22 + $0x13b8] sm:$0xff]   ;;  %v15195_v61 = vld [vmem:[%s15813_s22 + $0x1400] sm:$0xff]  }
 0x2a0   : > { %13887 = vmatpush3.bf16.msra.mxu1 %v15155_v53  ;;  %v15187_v53 = vld [vmem:[%s15813_s22 + $0x13b0] sm:$0xff]  }
 0x2a1   : > { %13888 = vmatprep.subr.bf16.mxu1 %v15157_v55  ;;  %v15194_v55 = vld [vmem:[%s15813_s22 + $0x14c0] sm:$0xff]  }
 0x2a2   : > { %13867 = vmatpush3.bf16.msra.mxu0 %v15158_v62  ;;  %v2790_v62 = vcombine.high %v2774_v58, %v2774_v58 }
 0x2a3   : > { %13896 = vmatprep.subr.bf16.mxu0 %v15160_v2  ;;  %v15199_v2 = vld [vmem:[%s15813_s22 + $0x1408] sm:$0xff]  }
 0x2a4   : > { %13889 = vmatpush3.bf16.msra.mxu1 %v15159_v4  ;;  %v15200_v4 = vld [vmem:[%s15813_s22 + $0x1488] sm:$0xff]  }
 0x2a5   : > { %13918 = vmatprep.subr.bf16.mxu1 %v15161_v7  ;;  %10832 = vmatmul.mubr.bf16.vlgmr.msra.gmra.mrb[72].mxu0 %v2767_v6  ;;  %v15203_v6 = vld [vmem:[%s15813_s22 + $0x1410] sm:$0xff]   ;;  %v15205_v7 = vld [vmem:[%s15813_s22 + $0x1458] sm:$0xff]  }
 0x2a6   : > { %13897 = vmatpush3.bf16.msra.mxu0 %v15162_v10  ;;  %10911 = vmatprep.mubr.bf16.mxu0 %v2788_v16  ;;  %v15207_v10 = vld [vmem:[%s15813_s22 + $0x1418] sm:$0xff]   ;;  %v15212_v16 = vld [vmem:[%s15813_s22 + $0x14a0] sm:$0xff]  }
 0x2a7   : > { %10872 = vmatmul.mubr.bf16.vlgmr.msra.gmra.mrb[72].mxu1 %v2789_v12  ;;  %13898 = vmatprep.subr.bf16.mxu0 %v15164_v13  ;;  %v15208_v12 = vld [vmem:[%s15813_s22 + $0x1498] sm:$0xff]   ;;  %v15210_v13 = vld [vmem:[%s15813_s22 + $0x14e0] sm:$0xff]  }
 0x2a8   : > { %13919 = vmatpush3.bf16.msra.mxu1 %v15163_v15  ;;  %10951 = vmatprep.mubr.bf16.mxu1 %v2792_v19  ;;  %v15213_v15 = vld [vmem:[%s15813_s22 + $0x1468] sm:$0xff]  }
 0x2a9   : > { %13920 = vmatprep.subr.bf16.mxu1 %v15165_v17  ;;  %v15214_v17 = vld [vmem:[%s15813_s22 + $0x14e8] sm:$0xff]  }
 0x2aa   : > { %13899 = vmatpush3.bf16.msra.mxu0 %v15166_v18  ;;  %v15215_v18 = vld [vmem:[%s15813_s22 + $0x1428] sm:$0xff]  }
 0x2ab   : > { %13900 = vmatprep.subr.bf16.mxu0 %v15168_v20  ;;  %v15217_v20 = vld [vmem:[%s15813_s22 + $0x1470] sm:$0xff]  }
 0x2ac   : > { %13921 = vmatpush3.bf16.msra.mxu1 %v15167_v21 }
 0x2ad   : > { %13922 = vmatprep.subr.bf16.mxu1 %v15169_v22  ;;  %v15216_v22 = vld [vmem:[%s15813_s22 + $0x14a8] sm:$0xff]  }
 0x2ae   : > { %13901 = vmatpush3.bf16.msra.mxu0 %v15170_v23 }
 0x2af   : > { %13902 = vmatprep.subr.bf16.mxu0 %v15172_v24 }
 0x2b0   : > { %13923 = vmatpush3.bf16.msra.mxu1 %v15171_v25 }
 0x2b1   : > { %13924 = vmatprep.subr.bf16.mxu1 %v15173_v26  ;;  %v15218_v26 = vld [vmem:[%s15813_s22 + $0x14f0] sm:$0xff]  }
 0x2b2   : > { %13903 = vmatpush3.bf16.msra.mxu0 %v15174_v27  ;;  %v15219_v27 = vld [vmem:[%s15813_s22 + $0x1430] sm:$0xff]  }
 0x2b3   : > { %13904 = vmatprep.subr.bf16.mxu0 %v15176_v28 }
 0x2b4   : > { %13925 = vmatpush3.bf16.msra.mxu1 %v15175_v29 }
 0x2b5   : > { %13926 = vmatprep.subr.bf16.mxu1 %v15177_v30  ;;  %v15220_v30 = vld [vmem:[%s15813_s22 + $0x14b0] sm:$0xff]  }
 0x2b6   : > { %13905 = vmatpush3.bf16.msra.mxu0 %v15178_v31 }
 0x2b7   : > { %13906 = vmatprep.subr.bf16.mxu0 %v15180_v32 }
 0x2b8   : > { %v13604_v36 = vpop.f32.mrb[48].mxu0  ;;  %13927 = vmatpush3.bf16.msra.mxu1 %v15179_v33 }
 0x2b9   : > { %v13605_v38 = vpop.f32.mrb[49].mxu0  ;;  %13928 = vmatprep.subr.bf16.mxu1 %v15181_v34  ;;  %v15221_v34 = vld [vmem:[%s15813_s22 + $0x1478] sm:$0xff]  }
 0x2ba   : > { %v13626_v40 = vpop.f32.mrb[48].mxu1  ;;  %v13606_v41 = vadd.f32 %v13605_v38, %v13604_v36  ;;  %v13607_v43 = vpop.f32.mrb[50].mxu0  ;;  %13907 = vmatpush3.bf16.msra.mxu0 %v15182_v35  ;;  %v15222_v36 = vld [vmem:[%s15813_s22 + $0x14f8] sm:$0xff]  }
 0x2bb   : > { %v13627_v46 = vpop.f32.mrb[49].mxu1  ;;  %v13608_v47 = vpop.f32.mrb[51].mxu0  ;;  %13908 = vmatprep.subr.bf16.mxu0 %v15184_v37  ;;  %v15223_v38 = vld [vmem:[%s15813_s22 + $0x1438] sm:$0xff]  }
 0x2bc   : > { %v10354_v48 = vadd.f32 %v13606_v41, %v16584_v63  ;;  %v13628_v49 = vadd.f32 %v13627_v46, %v13626_v40  ;;  %v13629_v50 = vpop.f32.mrb[50].mxu1  ;;  %13929 = vmatpush3.bf16.msra.mxu1 %v15183_v39  ;;  %v15197_v63 = vld [vmem:[%s15813_s22 + $0x1448] sm:$0xff]   ;;  %v15225_v41 = vld [vmem:[%s15813_s22 + $0x1540] sm:$0xff]  }
 0x2bd   : > { %v13630_v52 = vpop.f32.mrb[51].mxu1  ;;  %13930 = vmatprep.subr.bf16.mxu1 %v15185_v44  ;;  %v233_v39 = vld [vmem:[%s15826_s26 + $0x50] sm:$0xff]  ;;  %v15224_v44 = vld [vmem:[%s15813_s22 + $0x14b8] sm:$0xff]   ;;  %v15226_v47 = vld [vmem:[%s15813_s22 + $0x15c0] sm:$0xff]  }
 0x2be   : > { %v16627_v54 = vadd.f32 %v13628_v49, %v10354_v48  ;;  %13909 = vmatpush3.bf16.msra.mxu0 %v15186_v45  ;;  %v2800_v40 = vrot.slane %v233_v39, %v15869_v42  ;;  %v2793_v43 = vcombine.high %v233_v39, %v233_v39  ;;  %v15227_v49 = vld [vmem:[%s15813_s22 + $0x1500] sm:$0xff]   ;;  %v15262_v39 = vld [vmem:[%s15813_s22 + $0x1648] sm:$0xff]  }
 0x2bf   : > { %13910 = vmatprep.subr.bf16.mxu0 %v15188_v51  ;;  %v15228_v51 = vld [vmem:[%s15813_s22 + $0x1580] sm:$0xff]  }
 0x2c0   : > { %13931 = vmatpush3.bf16.msra.mxu1 %v15187_v53  ;;  %v2808_v45 = vcombine.high %v2800_v40, %v2800_v40  ;;  %v2816_v46 = vrot.slane %v2800_v40, %v15869_v42  ;;  %v16675_v48 = vrot.slane %v2793_v43, %v15869_v42  ;;  %v15263_v40 = vld [vmem:[%s15813_s22 + $0x16c8] sm:$0xff]  }
 0x2c1   : > { %13932 = vmatprep.subr.bf16.mxu1 %v15189_v56  ;;  %v15265_v43 = vld [vmem:[%s15813_s22 + $0x1688] sm:$0xff]  }
 0x2c2   : > { %13911 = vmatpush3.bf16.msra.mxu0 %v15190_v57  ;;  %v2830_v50 = vrot.slane %v2808_v45, %v15869_v42  ;;  %v2809_v52 = vcombine.high %v16675_v48, %v16675_v48  ;;  %v2838_v53 = vcombine.high %v2816_v46, %v2816_v46  ;;  %v15230_v57 = vld [vmem:[%s15813_s22 + $0x15c8] sm:$0xff]   ;;  %v15267_v45 = vld [vmem:[%s15813_s22 + $0x16d0] sm:$0xff]  }
 0x2c3   : > { %13940 = vmatprep.subr.bf16.mxu0 %v15193_v59  ;;  %v15231_v59 = vld [vmem:[%s15813_s22 + $0x1508] sm:$0xff]  }
 0x2c4   : > { %13933 = vmatpush3.bf16.msra.mxu1 %v15191_v60  ;;  %v2840_v56 = vcombine.high %v2830_v50, %v2830_v50  ;;  %v15232_v60 = vld [vmem:[%s15813_s22 + $0x1588] sm:$0xff]  }
 0x2c5   : > { %10912 = vmatmul.mubr.bf16.vlgmr.msra.gmra.mrb[76].mxu0 %v2774_v58  ;;  %13962 = vmatprep.subr.bf16.mxu1 %v15194_v55  ;;  %v2837_v58 = vrot.slane %v2809_v52, %v15869_v42  ;;  %v15274_v52 = vld [vmem:[%s15813_s22 + $0x1660] sm:$0xff]  }
 0x2c6   : > { %13941 = vmatpush3.bf16.msra.mxu0 %v15195_v61  ;;  %10991 = vmatprep.mubr.bf16.mxu0 %v2830_v50  ;;  %v15233_v61 = vld [vmem:[%s15813_s22 + $0x1550] sm:$0xff]   ;;  %v15272_v50 = vld [vmem:[%s15813_s22 + $0x1618] sm:$0xff]  }
 0x2c7   : > { %10952 = vmatmul.mubr.bf16.vlgmr.msra.gmra.mrb[76].mxu1 %v2790_v62  ;;  %13942 = vmatprep.subr.bf16.mxu0 %v15197_v63  ;;  %v2841_v55 = vcombine.high %v2837_v58, %v2837_v58  ;;  %v15234_v62 = vld [vmem:[%s15813_s22 + $0x15d0] sm:$0xff]  }
 0x2c8   : > { %13963 = vmatpush3.bf16.msra.mxu1 %v15196_v0  ;;  %11031 = vmatprep.mubr.bf16.mxu1 %v2840_v56  ;;  %v15235_v63 = vld [vmem:[%s15813_s22 + $0x1510] sm:$0xff]   ;;  %v15277_v56 = vld [vmem:[%s15813_s22 + $0x16a0] sm:$0xff]  }
 0x2c9   : > { %13964 = vmatprep.subr.bf16.mxu1 %v15198_v1  ;;  %v15236_v0 = vld [vmem:[%s15813_s22 + $0x1590] sm:$0xff]   ;;  %v15237_v1 = vld [vmem:[%s15813_s22 + $0x1558] sm:$0xff]  }
 0x2ca   : > { %13943 = vmatpush3.bf16.msra.mxu0 %v15199_v2  ;;  %v15238_v2 = vld [vmem:[%s15813_s22 + $0x15d8] sm:$0xff]  }
 0x2cb   : > { %13944 = vmatprep.subr.bf16.mxu0 %v15201_v3  ;;  %v15239_v3 = vld [vmem:[%s15813_s22 + $0x1518] sm:$0xff]  }
 0x2cc   : > { %13965 = vmatpush3.bf16.msra.mxu1 %v15200_v4  ;;  %v15240_v4 = vld [vmem:[%s15813_s22 + $0x1598] sm:$0xff]  }
 0x2cd   : > { %13966 = vmatprep.subr.bf16.mxu1 %v15202_v5  ;;  %v15241_v5 = vld [vmem:[%s15813_s22 + $0x1560] sm:$0xff]  }
 0x2ce   : > { %13945 = vmatpush3.bf16.msra.mxu0 %v15203_v6  ;;  %v15242_v6 = vld [vmem:[%s15813_s22 + $0x15e0] sm:$0xff]  }
 0x2cf   : > { %13946 = vmatprep.subr.bf16.mxu0 %v15205_v7  ;;  %v15243_v7 = vld [vmem:[%s15813_s22 + $0x1520] sm:$0xff]  }
 0x2d0   : > { %13967 = vmatpush3.bf16.msra.mxu1 %v15204_v8  ;;  %v15244_v8 = vld [vmem:[%s15813_s22 + $0x15a0] sm:$0xff]  }
 0x2d1   : > { %13968 = vmatprep.subr.bf16.mxu1 %v15206_v9  ;;  %v15245_v9 = vld [vmem:[%s15813_s22 + $0x1568] sm:$0xff]  }
 0x2d2   : > { %13947 = vmatpush3.bf16.msra.mxu0 %v15207_v10  ;;  %v15246_v10 = vld [vmem:[%s15813_s22 + $0x15e8] sm:$0xff]  }
 0x2d3   : > { %13948 = vmatprep.subr.bf16.mxu0 %v15209_v11  ;;  %v15247_v11 = vld [vmem:[%s15813_s22 + $0x1528] sm:$0xff]  }
 0x2d4   : > { %13969 = vmatpush3.bf16.msra.mxu1 %v15208_v12 }
 0x2d5   : > { %13970 = vmatprep.subr.bf16.mxu1 %v15210_v13  ;;  %v15248_v13 = vld [vmem:[%s15813_s22 + $0x15a8] sm:$0xff]  }
 0x2d6   : > { %13949 = vmatpush3.bf16.msra.mxu0 %v15211_v14 }
 0x2d7   : > { %13950 = vmatprep.subr.bf16.mxu0 %v15213_v15  ;;  %v15249_v15 = vld [vmem:[%s15813_s22 + $0x1570] sm:$0xff]  }
 0x2d8   : > { %v13648_v19 = vpop.f32.mrb[52].mxu0  ;;  %13971 = vmatpush3.bf16.msra.mxu1 %v15212_v16 }
 0x2d9   : > { %v13649_v21 = vpop.f32.mrb[53].mxu0  ;;  %13972 = vmatprep.subr.bf16.mxu1 %v15214_v17 }
 0x2da   : > { %v13670_v23 = vpop.f32.mrb[52].mxu1  ;;  %v13650_v24 = vadd.f32 %v13649_v21, %v13648_v19  ;;  %v13651_v25 = vpop.f32.mrb[54].mxu0  ;;  %13951 = vmatpush3.bf16.msra.mxu0 %v15215_v18  ;;  %v15250_v19 = vld [vmem:[%s15813_s22 + $0x15f0] sm:$0xff]  }
 0x2db   : > { %v13671_v28 = vpop.f32.mrb[53].mxu1  ;;  %v13652_v29 = vpop.f32.mrb[55].mxu0  ;;  %13952 = vmatprep.subr.bf16.mxu0 %v15217_v20  ;;  %v15251_v20 = vld [vmem:[%s15813_s22 + $0x1530] sm:$0xff]  }
 0x2dc   : > { %v10434_v31 = vadd.f32 %v13650_v24, %v16627_v54  ;;  %v13672_v32 = vadd.f32 %v13671_v28, %v13670_v23  ;;  %v13673_v33 = vpop.f32.mrb[54].mxu1  ;;  %13973 = vmatpush3.bf16.msra.mxu1 %v15216_v22  ;;  %v15229_v54 = vld [vmem:[%s15813_s22 + $0x1548] sm:$0xff]   ;;  %v15253_v28 = vld [vmem:[%s15813_s22 + $0x1578] sm:$0xff]  }
 0x2dd   : > { %v13674_v35 = vpop.f32.mrb[55].mxu1  ;;  %13974 = vmatprep.subr.bf16.mxu1 %v15218_v26  ;;  %v15252_v26 = vld [vmem:[%s15813_s22 + $0x15b0] sm:$0xff]   ;;  %v2823_v33 = vrot.slane %v16675_v48, %v15869_v42  ;;  %v15270_v48 = vld [vmem:[%s15813_s22 + $0x1658] sm:$0xff]  }
 0x2de   : > { %v16665_v37 = vadd.f32 %v13672_v32, %v10434_v31  ;;  %13953 = vmatpush3.bf16.msra.mxu0 %v15219_v27  ;;  %v15255_v31 = vld [vmem:[%s15813_s22 + $0x1538] sm:$0xff]   ;;  %v15259_v35 = vld [vmem:[%s15813_s22 + $0x16c0] sm:$0xff]  }
 0x2df   : > { %13954 = vmatprep.subr.bf16.mxu0 %v15221_v34  ;;  %v15256_v32 = vld [vmem:[%s15813_s22 + $0x15b8] sm:$0xff]   ;;  %v15258_v34 = vld [vmem:[%s15813_s22 + $0x1640] sm:$0xff]  }
 0x2e0   : > { %13975 = vmatpush3.bf16.msra.mxu1 %v15220_v30  ;;  %v15254_v30 = vld [vmem:[%s15813_s22 + $0x15f8] sm:$0xff]  }
 0x2e1   : > { %13976 = vmatprep.subr.bf16.mxu1 %v15222_v36  ;;  %v15260_v36 = vld [vmem:[%s15813_s22 + $0x1600] sm:$0xff]  }
 0x2e2   : > { %13955 = vmatpush3.bf16.msra.mxu0 %v15223_v38  ;;  %v2839_v38 = vcombine.high %v2823_v33, %v2823_v33 }
 0x2e3   : > { %13984 = vmatprep.subr.bf16.mxu0 %v15225_v41  ;;  %v15264_v41 = vld [vmem:[%s15813_s22 + $0x1608] sm:$0xff]  }
 0x2e4   : > { %13977 = vmatpush3.bf16.msra.mxu1 %v15224_v44  ;;  %v15266_v44 = vld [vmem:[%s15813_s22 + $0x1650] sm:$0xff]  }
 0x2e5   : > { %14006 = vmatprep.subr.bf16.mxu1 %v15226_v47  ;;  %10992 = vmatmul.mubr.bf16.vlgmr.msra.gmra.mrb[80].mxu0 %v2816_v46  ;;  %v15268_v46 = vld [vmem:[%s15813_s22 + $0x1610] sm:$0xff]  }
 0x2e6   : > { %13985 = vmatpush3.bf16.msra.mxu0 %v15227_v49  ;;  %11071 = vmatprep.mubr.bf16.mxu0 %v2837_v58  ;;  %v15269_v47 = vld [vmem:[%s15813_s22 + $0x1690] sm:$0xff]   ;;  %v15271_v49 = vld [vmem:[%s15813_s22 + $0x16d8] sm:$0xff]   ;;  %v15279_v58 = vld [vmem:[%s15813_s22 + $0x16e8] sm:$0xff]  }
 0x2e7   : > { %11032 = vmatmul.mubr.bf16.vlgmr.msra.gmra.mrb[80].mxu1 %v2838_v53  ;;  %13986 = vmatprep.subr.bf16.mxu0 %v15229_v54  ;;  %v15275_v53 = vld [vmem:[%s15813_s22 + $0x16e0] sm:$0xff]  }
 0x2e8   : > { %14007 = vmatpush3.bf16.msra.mxu1 %v15228_v51  ;;  %11111 = vmatprep.mubr.bf16.mxu1 %v2841_v55  ;;  %v15273_v51 = vld [vmem:[%s15813_s22 + $0x1698] sm:$0xff]   ;;  %v15276_v54 = vld [vmem:[%s15813_s22 + $0x1620] sm:$0xff]   ;;  %v15281_v55 = vld [vmem:[%s15813_s22 + $0x16a8] sm:$0xff]  }
 0x2e9   : > { %14008 = vmatprep.subr.bf16.mxu1 %v15230_v57  ;;  %v15278_v57 = vld [vmem:[%s15813_s22 + $0x1668] sm:$0xff]  }
 0x2ea   : > { %13987 = vmatpush3.bf16.msra.mxu0 %v15231_v59  ;;  %v15280_v59 = vld [vmem:[%s15813_s22 + $0x1628] sm:$0xff]  }
 0x2eb   : > { %13988 = vmatprep.subr.bf16.mxu0 %v15233_v61 }
 0x2ec   : > { %14009 = vmatpush3.bf16.msra.mxu1 %v15232_v60 }
 0x2ed   : > { %14010 = vmatprep.subr.bf16.mxu1 %v15234_v62  ;;  %v15282_v62 = vld [vmem:[%s15813_s22 + $0x1670] sm:$0xff]  }
 0x2ee   : > { %13989 = vmatpush3.bf16.msra.mxu0 %v15235_v63 }
 0x2ef   : > { %13990 = vmatprep.subr.bf16.mxu0 %v15237_v1 }
 0x2f0   : > { %14011 = vmatpush3.bf16.msra.mxu1 %v15236_v0 }
 0x2f1   : > { %14012 = vmatprep.subr.bf16.mxu1 %v15238_v2  ;;  %v15283_v2 = vld [vmem:[%s15813_s22 + $0x16f0] sm:$0xff]  }
 0x2f2   : > { %13991 = vmatpush3.bf16.msra.mxu0 %v15239_v3  ;;  %v15284_v3 = vld [vmem:[%s15813_s22 + $0x1630] sm:$0xff]  }
 0x2f3   : > { %13992 = vmatprep.subr.bf16.mxu0 %v15241_v5 }
 0x2f4   : > { %14013 = vmatpush3.bf16.msra.mxu1 %v15240_v4 }
 0x2f5   : > { %14014 = vmatprep.subr.bf16.mxu1 %v15242_v6 }
 0x2f6   : > { %13993 = vmatpush3.bf16.msra.mxu0 %v15243_v7 }
 0x2f7   : > { %13994 = vmatprep.subr.bf16.mxu0 %v15245_v9  ;;  %v15285_v9 = vld [vmem:[%s15813_s22 + $0x16b0] sm:$0xff]  }
 0x2f8   : > { %v13692_v12 = vpop.f32.mrb[56].mxu0  ;;  %14015 = vmatpush3.bf16.msra.mxu1 %v15244_v8 }
 0x2f9   : > { %v13693_v14 = vpop.f32.mrb[57].mxu0  ;;  %14016 = vmatprep.subr.bf16.mxu1 %v15246_v10 }
 0x2fa   : > { %v13714_v16 = vpop.f32.mrb[56].mxu1  ;;  %v13694_v17 = vadd.f32 %v13693_v14, %v13692_v12  ;;  %v13695_v18 = vpop.f32.mrb[58].mxu0  ;;  %13995 = vmatpush3.bf16.msra.mxu0 %v15247_v11  ;;  %v15286_v11 = vld [vmem:[%s15813_s22 + $0x1678] sm:$0xff]  }
 0x2fb   : > { %v13715_v21 = vpop.f32.mrb[57].mxu1  ;;  %v13696_v22 = vpop.f32.mrb[59].mxu0  ;;  %13996 = vmatprep.subr.bf16.mxu0 %v15249_v15  ;;  %v15288_v14 = vld [vmem:[%s15813_s22 + $0x1638] sm:$0xff]  }
 0x2fc   : > { %v10514_v23 = vadd.f32 %v13694_v17, %v16665_v37  ;;  %v13716_v24 = vadd.f32 %v13715_v21, %v13714_v16  ;;  %v13717_v25 = vpop.f32.mrb[58].mxu1  ;;  %14017 = vmatpush3.bf16.msra.mxu1 %v15248_v13  ;;  %v15261_v37 = vld [vmem:[%s15813_s22 + $0x1680] sm:$0xff]   ;;  %v15287_v13 = vld [vmem:[%s15813_s22 + $0x16f8] sm:$0xff]  }
 0x2fd   : > { %v13718_v27 = vpop.f32.mrb[59].mxu1  ;;  %14018 = vmatprep.subr.bf16.mxu1 %v15250_v19  ;;  %v234_v15 = vld [vmem:[%s15826_s26 + $0x58] sm:$0xff]  ;;  %v15290_v17 = vld [vmem:[%s15813_s22 + $0x1740] sm:$0xff]  }
 0x2fe   : > { %v16709_v29 = vadd.f32 %v13716_v24, %v10514_v23  ;;  %13997 = vmatpush3.bf16.msra.mxu0 %v15251_v20  ;;  %v2849_v16 = vrot.slane %v234_v15, %v15869_v42  ;;  %v2842_v18 = vcombine.high %v234_v15, %v234_v15  ;;  %v15289_v19 = vld [vmem:[%s15813_s22 + $0x16b8] sm:$0xff]   ;;  %v15291_v22 = vld [vmem:[%s15813_s22 + $0x17c0] sm:$0xff]   ;;  %v15327_v15 = vld [vmem:[%s15813_s22 + $0x1848] sm:$0xff]  }
 0x2ff   : > { %13998 = vmatprep.subr.bf16.mxu0 %v15253_v28  ;;  %v15292_v24 = vld [vmem:[%s15813_s22 + $0x1700] sm:$0xff]  }
 0x300   : > { %14019 = vmatpush3.bf16.msra.mxu1 %v15252_v26  ;;  %v2857_v20 = vcombine.high %v2849_v16, %v2849_v16  ;;  %v2865_v21 = vrot.slane %v2849_v16, %v15869_v42  ;;  %v16757_v23 = vrot.slane %v2842_v18, %v15869_v42  ;;  %v15293_v26 = vld [vmem:[%s15813_s22 + $0x1780] sm:$0xff]   ;;  %v15328_v16 = vld [vmem:[%s15813_s22 + $0x18c8] sm:$0xff]  }
 0x301   : > { %14020 = vmatprep.subr.bf16.mxu1 %v15254_v30  ;;  %v15330_v18 = vld [vmem:[%s15813_s22 + $0x1888] sm:$0xff]  }
 0x302   : > { %13999 = vmatpush3.bf16.msra.mxu0 %v15255_v31  ;;  %v2879_v25 = vrot.slane %v2857_v20, %v15869_v42  ;;  %v2858_v27 = vcombine.high %v16757_v23, %v16757_v23  ;;  %v2887_v28 = vcombine.high %v2865_v21, %v2865_v21  ;;  %v15295_v31 = vld [vmem:[%s15813_s22 + $0x17c8] sm:$0xff]   ;;  %v15332_v20 = vld [vmem:[%s15813_s22 + $0x18d0] sm:$0xff]  }
 0x303   : > { %14028 = vmatprep.subr.bf16.mxu0 %v15258_v34  ;;  %v15297_v34 = vld [vmem:[%s15813_s22 + $0x1788] sm:$0xff]  }
 0x304   : > { %14021 = vmatpush3.bf16.msra.mxu1 %v15256_v32  ;;  %v2889_v30 = vcombine.high %v2879_v25, %v2879_v25  ;;  %v2886_v32 = vrot.slane %v2858_v27, %v15869_v42  ;;  %v15339_v27 = vld [vmem:[%s15813_s22 + $0x1860] sm:$0xff]  }
 0x305   : > { %11072 = vmatmul.mubr.bf16.vlgmr.msra.gmra.mrb[84].mxu0 %v2823_v33  ;;  %14050 = vmatprep.subr.bf16.mxu1 %v15259_v35  ;;  %v15296_v33 = vld [vmem:[%s15813_s22 + $0x1708] sm:$0xff]  }
 0x306   : > { %14029 = vmatpush3.bf16.msra.mxu0 %v15260_v36  ;;  %11151 = vmatprep.mubr.bf16.mxu0 %v2879_v25  ;;  %v2890_v35 = vcombine.high %v2886_v32, %v2886_v32  ;;  %v15298_v36 = vld [vmem:[%s15813_s22 + $0x1750] sm:$0xff]   ;;  %v15337_v25 = vld [vmem:[%s15813_s22 + $0x1818] sm:$0xff]  }
 0x307   : > { %11112 = vmatmul.mubr.bf16.vlgmr.msra.gmra.mrb[84].mxu1 %v2839_v38  ;;  %14030 = vmatprep.subr.bf16.mxu0 %v15262_v39  ;;  %v15300_v38 = vld [vmem:[%s15813_s22 + $0x1710] sm:$0xff]  }
 0x308   : > { %14051 = vmatpush3.bf16.msra.mxu1 %v15261_v37  ;;  %11191 = vmatprep.mubr.bf16.mxu1 %v2889_v30  ;;  %v15299_v37 = vld [vmem:[%s15813_s22 + $0x17d0] sm:$0xff]   ;;  %v15342_v30 = vld [vmem:[%s15813_s22 + $0x18a0] sm:$0xff]  }
 0x309   : > { %14052 = vmatprep.subr.bf16.mxu1 %v15263_v40  ;;  %v15301_v39 = vld [vmem:[%s15813_s22 + $0x1790] sm:$0xff]   ;;  %v15302_v40 = vld [vmem:[%s15813_s22 + $0x1758] sm:$0xff]  }
 0x30a   : > { %14031 = vmatpush3.bf16.msra.mxu0 %v15264_v41  ;;  %v15303_v41 = vld [vmem:[%s15813_s22 + $0x17d8] sm:$0xff]  }
 0x30b   : > { %14032 = vmatprep.subr.bf16.mxu0 %v15266_v44  ;;  %v15305_v44 = vld [vmem:[%s15813_s22 + $0x1798] sm:$0xff]  }
 0x30c   : > { %14053 = vmatpush3.bf16.msra.mxu1 %v15265_v43  ;;  %v15304_v43 = vld [vmem:[%s15813_s22 + $0x1718] sm:$0xff]  }
 0x30d   : > { %14054 = vmatprep.subr.bf16.mxu1 %v15267_v45  ;;  %v15306_v45 = vld [vmem:[%s15813_s22 + $0x1760] sm:$0xff]  }
 0x30e   : > { %14033 = vmatpush3.bf16.msra.mxu0 %v15268_v46  ;;  %v15307_v46 = vld [vmem:[%s15813_s22 + $0x17e0] sm:$0xff]  }
 0x30f   : > { %14034 = vmatprep.subr.bf16.mxu0 %v15270_v48  ;;  %v15309_v48 = vld [vmem:[%s15813_s22 + $0x17a0] sm:$0xff]  }
 0x310   : > { %14055 = vmatpush3.bf16.msra.mxu1 %v15269_v47  ;;  %v15308_v47 = vld [vmem:[%s15813_s22 + $0x1720] sm:$0xff]  }
 0x311   : > { %14056 = vmatprep.subr.bf16.mxu1 %v15271_v49  ;;  %v15310_v49 = vld [vmem:[%s15813_s22 + $0x1768] sm:$0xff]  }
 0x312   : > { %14035 = vmatpush3.bf16.msra.mxu0 %v15272_v50  ;;  %v15311_v50 = vld [vmem:[%s15813_s22 + $0x17e8] sm:$0xff]  }
 0x313   : > { %14036 = vmatprep.subr.bf16.mxu0 %v15274_v52  ;;  %v15312_v52 = vld [vmem:[%s15813_s22 + $0x1728] sm:$0xff]  }
 0x314   : > { %14057 = vmatpush3.bf16.msra.mxu1 %v15273_v51 }
 0x315   : > { %14058 = vmatprep.subr.bf16.mxu1 %v15275_v53 }
 0x316   : > { %14037 = vmatpush3.bf16.msra.mxu0 %v15276_v54  ;;  %v15313_v54 = vld [vmem:[%s15813_s22 + $0x17a8] sm:$0xff]  }
 0x317   : > { %14038 = vmatprep.subr.bf16.mxu0 %v15278_v57 }
 0x318   : > { %v13736_v60 = vpop.f32.mrb[60].mxu0  ;;  %14059 = vmatpush3.bf16.msra.mxu1 %v15277_v56 }
 0x319   : > { %v13737_v61 = vpop.f32.mrb[61].mxu0  ;;  %14060 = vmatprep.subr.bf16.mxu1 %v15279_v58 }
 0x31a   : > { %v13758_v63 = vpop.f32.mrb[60].mxu1  ;;  %v13738_v0 = vadd.f32 %v13737_v61, %v13736_v60  ;;  %v13739_v1 = vpop.f32.mrb[62].mxu0  ;;  %14039 = vmatpush3.bf16.msra.mxu0 %v15280_v59  ;;  %v15314_v59 = vld [vmem:[%s15813_s22 + $0x1770] sm:$0xff]  }
 0x31b   : > { %v13759_v4 = vpop.f32.mrb[61].mxu1  ;;  %v13740_v5 = vpop.f32.mrb[63].mxu0  ;;  %14040 = vmatprep.subr.bf16.mxu0 %v15282_v62  ;;  %v15315_v60 = vld [vmem:[%s15813_s22 + $0x17f0] sm:$0xff]  }
 0x31c   : > { %v10594_v6 = vadd.f32 %v13738_v0, %v16709_v29  ;;  %v13760_v7 = vadd.f32 %v13759_v4, %v13758_v63  ;;  %v13761_v8 = vpop.f32.mrb[62].mxu1  ;;  %14061 = vmatpush3.bf16.msra.mxu1 %v15281_v55  ;;  %v15294_v29 = vld [vmem:[%s15813_s22 + $0x1748] sm:$0xff]   ;;  %v15316_v1 = vld [vmem:[%s15813_s22 + $0x1730] sm:$0xff]   ;;  %v15318_v5 = vld [vmem:[%s15813_s22 + $0x1778] sm:$0xff]  }
 0x31d   : > { %v13762_v10 = vpop.f32.mrb[63].mxu1  ;;  %14062 = vmatprep.subr.bf16.mxu1 %v15283_v2  ;;  %v15321_v8 = vld [vmem:[%s15813_s22 + $0x17b8] sm:$0xff]  }
 0x31e   : > { %v16746_v12 = vadd.f32 %v13760_v7, %v10594_v6  ;;  %14041 = vmatpush3.bf16.msra.mxu0 %v15284_v3  ;;  %v15317_v3 = vld [vmem:[%s15813_s22 + $0x17b0] sm:$0xff]   ;;  %v15319_v6 = vld [vmem:[%s15813_s22 + $0x17f8] sm:$0xff]   ;;  %v15323_v10 = vld [vmem:[%s15813_s22 + $0x1840] sm:$0xff]  }
 0x31f   : > { %14042 = vmatprep.subr.bf16.mxu0 %v15286_v11  ;;  %v15320_v7 = vld [vmem:[%s15813_s22 + $0x1738] sm:$0xff]   ;;  %v15324_v11 = vld [vmem:[%s15813_s22 + $0x18c0] sm:$0xff]  }
 0x320   : > { %14063 = vmatpush3.bf16.msra.mxu1 %v15285_v9  ;;  %v2872_v9 = vrot.slane %v16757_v23, %v15869_v42  ;;  %v15335_v23 = vld [vmem:[%s15813_s22 + $0x1858] sm:$0xff]  }
 0x321   : > { %14064 = vmatprep.subr.bf16.mxu1 %v15287_v13  ;;  %v15326_v13 = vld [vmem:[%s15813_s22 + $0x1880] sm:$0xff]  }
 0x322   : > { %14043 = vmatpush3.bf16.msra.mxu0 %v15288_v14  ;;  %v2888_v14 = vcombine.high %v2872_v9, %v2872_v9 }
 0x323   : > { %14072 = vmatprep.subr.bf16.mxu0 %v15290_v17  ;;  %v15329_v17 = vld [vmem:[%s15813_s22 + $0x1808] sm:$0xff]  }
 0x324   : > { %14065 = vmatpush3.bf16.msra.mxu1 %v15289_v19  ;;  %v15331_v19 = vld [vmem:[%s15813_s22 + $0x1850] sm:$0xff]  }
 0x325   : > { %14094 = vmatprep.subr.bf16.mxu1 %v15291_v22  ;;  %11152 = vmatmul.mubr.bf16.vlgmr.msra.gmra.mrb[88].mxu0 %v2865_v21  ;;  %v15333_v21 = vld [vmem:[%s15813_s22 + $0x1810] sm:$0xff]  }
 0x326   : > { %14073 = vmatpush3.bf16.msra.mxu0 %v15292_v24  ;;  %11231 = vmatprep.mubr.bf16.mxu0 %v2886_v32  ;;  %v15334_v22 = vld [vmem:[%s15813_s22 + $0x1890] sm:$0xff]   ;;  %v15336_v24 = vld [vmem:[%s15813_s22 + $0x18d8] sm:$0xff]   ;;  %v15344_v32 = vld [vmem:[%s15813_s22 + $0x18e8] sm:$0xff]  }
 0x327   : > { %11192 = vmatmul.mubr.bf16.vlgmr.msra.gmra.mrb[88].mxu1 %v2887_v28  ;;  %14074 = vmatprep.subr.bf16.mxu0 %v15294_v29  ;;  %v15340_v28 = vld [vmem:[%s15813_s22 + $0x18e0] sm:$0xff]  }
 0x328   : > { %14095 = vmatpush3.bf16.msra.mxu1 %v15293_v26  ;;  %11271 = vmatprep.mubr.bf16.mxu1 %v2890_v35  ;;  %v15338_v26 = vld [vmem:[%s15813_s22 + $0x1898] sm:$0xff]   ;;  %v15341_v29 = vld [vmem:[%s15813_s22 + $0x1820] sm:$0xff]  }
 0x329   : > { %14096 = vmatprep.subr.bf16.mxu1 %v15295_v31  ;;  %v15343_v31 = vld [vmem:[%s15813_s22 + $0x1868] sm:$0xff]  }
 0x32a   : > { %14075 = vmatpush3.bf16.msra.mxu0 %v15296_v33 }
 0x32b   : > { %14076 = vmatprep.subr.bf16.mxu0 %v15298_v36  ;;  %v15346_v36 = vld [vmem:[%s15813_s22 + $0x18a8] sm:$0xff]  }
 0x32c   : > { %14097 = vmatpush3.bf16.msra.mxu1 %v15297_v34  ;;  %v15345_v34 = vld [vmem:[%s15813_s22 + $0x1828] sm:$0xff]  }
 0x32d   : > { %14098 = vmatprep.subr.bf16.mxu1 %v15299_v37 }
 0x32e   : > { %14077 = vmatpush3.bf16.msra.mxu0 %v15300_v38 }
 0x32f   : > { %14078 = vmatprep.subr.bf16.mxu0 %v15302_v40  ;;  %v15347_v40 = vld [vmem:[%s15813_s22 + $0x1870] sm:$0xff]  }
 0x330   : > { %14099 = vmatpush3.bf16.msra.mxu1 %v15301_v39 }
 0x331   : > { %14100 = vmatprep.subr.bf16.mxu1 %v15303_v41  ;;  %v15348_v41 = vld [vmem:[%s15813_s22 + $0x18f0] sm:$0xff]  }
 0x332   : > { %14079 = vmatpush3.bf16.msra.mxu0 %v15304_v43 }
 0x333   : > { %14080 = vmatprep.subr.bf16.mxu0 %v15306_v45 }
 0x334   : > { %14101 = vmatpush3.bf16.msra.mxu1 %v15305_v44 }
 0x335   : > { %14102 = vmatprep.subr.bf16.mxu1 %v15307_v46 }
 0x336   : > { %14081 = vmatpush3.bf16.msra.mxu0 %v15308_v47 }
 0x337   : > { %14082 = vmatprep.subr.bf16.mxu0 %v15310_v49 }
 0x338   : > { %v13780_v51 = vpop.f32.mrb[64].mxu0  ;;  %14103 = vmatpush3.bf16.msra.mxu1 %v15309_v48  ;;  %v15349_v48 = vld [vmem:[%s15813_s22 + $0x1830] sm:$0xff]  }
 0x339   : > { %v13781_v53 = vpop.f32.mrb[65].mxu0  ;;  %14104 = vmatprep.subr.bf16.mxu1 %v15311_v50  ;;  %v15350_v50 = vld [vmem:[%s15813_s22 + $0x18b0] sm:$0xff]  }
 0x33a   : > { %v13802_v56 = vpop.f32.mrb[64].mxu1  ;;  %v13782_v57 = vadd.f32 %v13781_v53, %v13780_v51  ;;  %v13783_v58 = vpop.f32.mrb[66].mxu0  ;;  %14083 = vmatpush3.bf16.msra.mxu0 %v15312_v52  ;;  %v15351_v52 = vld [vmem:[%s15813_s22 + $0x1878] sm:$0xff]  }
 0x33b   : > { %v13803_v55 = vpop.f32.mrb[65].mxu1  ;;  %v13784_v61 = vpop.f32.mrb[67].mxu0  ;;  %14084 = vmatprep.subr.bf16.mxu0 %v15314_v59  ;;  %v15352_v53 = vld [vmem:[%s15813_s22 + $0x18f8] sm:$0xff]   ;;  %v15355_v58 = vld [vmem:[%s15813_s22 + $0x1940] sm:$0xff]  }
 0x33c   : > { %v10674_v62 = vadd.f32 %v13782_v57, %v16746_v12  ;;  %v13804_v63 = vadd.f32 %v13803_v55, %v13802_v56  ;;  %v13805_v0 = vpop.f32.mrb[66].mxu1  ;;  %14105 = vmatpush3.bf16.msra.mxu1 %v15313_v54  ;;  %v15325_v12 = vld [vmem:[%s15813_s22 + $0x1800] sm:$0xff]   ;;  %v15353_v54 = vld [vmem:[%s15813_s22 + $0x1838] sm:$0xff]  }
 0x33d   : > { %v13806_v2 = vpop.f32.mrb[67].mxu1  ;;  %14106 = vmatprep.subr.bf16.mxu1 %v15315_v60  ;;  %v235_v56 = vld [vmem:[%s15826_s26 + $0x60] sm:$0xff] }
 0x33e   : > { %v16790_v4 = vadd.f32 %v13804_v63, %v10674_v62  ;;  %14085 = vmatpush3.bf16.msra.mxu0 %v15316_v1  ;;  %v2898_v57 = vrot.slane %v235_v56, %v15869_v42  ;;  %v2891_v59 = vcombine.high %v235_v56, %v235_v56  ;;  %v15354_v60 = vld [vmem:[%s15813_s22 + $0x18b8] sm:$0xff]   ;;  %v15356_v62 = vld [vmem:[%s15813_s22 + $0x19c0] sm:$0xff]   ;;  %v15392_v56 = vld [vmem:[%s15813_s22 + $0x1a48] sm:$0xff]  }
 0x33f   : > { %14086 = vmatprep.subr.bf16.mxu0 %v15318_v5  ;;  %v15357_v0 = vld [vmem:[%s15813_s22 + $0x1900] sm:$0xff]   ;;  %v15359_v5 = vld [vmem:[%s15813_s22 + $0x1948] sm:$0xff]  }
 0x340   : > { %14107 = vmatpush3.bf16.msra.mxu1 %v15317_v3  ;;  %v2906_v55 = vcombine.high %v2898_v57, %v2898_v57  ;;  %v2914_v61 = vrot.slane %v2898_v57, %v15869_v42  ;;  %v16839_v63 = vrot.slane %v2891_v59, %v15869_v42  ;;  %v15358_v2 = vld [vmem:[%s15813_s22 + $0x1980] sm:$0xff]   ;;  %v15393_v57 = vld [vmem:[%s15813_s22 + $0x1ac8] sm:$0xff]  }
 0x341   : > { %14108 = vmatprep.subr.bf16.mxu1 %v15319_v6  ;;  %v15395_v59 = vld [vmem:[%s15813_s22 + $0x1a88] sm:$0xff]  }
 0x342   : > { %14087 = vmatpush3.bf16.msra.mxu0 %v15320_v7  ;;  %v2928_v1 = vrot.slane %v2906_v55, %v15869_v42  ;;  %v2907_v3 = vcombine.high %v16839_v63, %v16839_v63  ;;  %v15360_v7 = vld [vmem:[%s15813_s22 + $0x19c8] sm:$0xff]   ;;  %v15397_v55 = vld [vmem:[%s15813_s22 + $0x1ad0] sm:$0xff]  }
 0x343   : > { %14116 = vmatprep.subr.bf16.mxu0 %v15323_v10  ;;  %v15362_v10 = vld [vmem:[%s15813_s22 + $0x1988] sm:$0xff]  }
 0x344   : > { %14109 = vmatpush3.bf16.msra.mxu1 %v15321_v8  ;;  %v2938_v6 = vcombine.high %v2928_v1, %v2928_v1  ;;  %v2935_v8 = vrot.slane %v2907_v3, %v15869_v42  ;;  %v15404_v3 = vld [vmem:[%s15813_s22 + $0x1a60] sm:$0xff]  }
 0x345   : > { %11232 = vmatmul.mubr.bf16.vlgmr.msra.gmra.mrb[92].mxu0 %v2872_v9  ;;  %14138 = vmatprep.subr.bf16.mxu1 %v15324_v11  ;;  %v15361_v9 = vld [vmem:[%s15813_s22 + $0x1908] sm:$0xff]  }
 0x346   : > { %14117 = vmatpush3.bf16.msra.mxu0 %v15325_v12  ;;  %11311 = vmatprep.mubr.bf16.mxu0 %v2928_v1  ;;  %v2939_v11 = vcombine.high %v2935_v8, %v2935_v8  ;;  %v15363_v12 = vld [vmem:[%s15813_s22 + $0x1950] sm:$0xff]   ;;  %v15402_v1 = vld [vmem:[%s15813_s22 + $0x1a18] sm:$0xff]  }
 0x347   : > { %11272 = vmatmul.mubr.bf16.vlgmr.msra.gmra.mrb[92].mxu1 %v2888_v14  ;;  %14118 = vmatprep.subr.bf16.mxu0 %v15327_v15  ;;  %v15365_v14 = vld [vmem:[%s15813_s22 + $0x1910] sm:$0xff]  }
 0x348   : > { %14139 = vmatpush3.bf16.msra.mxu1 %v15326_v13  ;;  %11351 = vmatprep.mubr.bf16.mxu1 %v2938_v6  ;;  %v15364_v13 = vld [vmem:[%s15813_s22 + $0x19d0] sm:$0xff]   ;;  %v15407_v6 = vld [vmem:[%s15813_s22 + $0x1aa0] sm:$0xff]  }
 0x349   : > { %14140 = vmatprep.subr.bf16.mxu1 %v15328_v16  ;;  %v15366_v15 = vld [vmem:[%s15813_s22 + $0x1990] sm:$0xff]   ;;  %v15367_v16 = vld [vmem:[%s15813_s22 + $0x1958] sm:$0xff]  }
 0x34a   : > { %14119 = vmatpush3.bf16.msra.mxu0 %v15329_v17  ;;  %v15368_v17 = vld [vmem:[%s15813_s22 + $0x19d8] sm:$0xff]  }
 0x34b   : > { %14120 = vmatprep.subr.bf16.mxu0 %v15331_v19  ;;  %v15370_v19 = vld [vmem:[%s15813_s22 + $0x1998] sm:$0xff]  }
 0x34c   : > { %14141 = vmatpush3.bf16.msra.mxu1 %v15330_v18  ;;  %v15369_v18 = vld [vmem:[%s15813_s22 + $0x1918] sm:$0xff]  }
 0x34d   : > { %14142 = vmatprep.subr.bf16.mxu1 %v15332_v20  ;;  %v15371_v20 = vld [vmem:[%s15813_s22 + $0x1960] sm:$0xff]  }
 0x34e   : > { %14121 = vmatpush3.bf16.msra.mxu0 %v15333_v21  ;;  %v15372_v21 = vld [vmem:[%s15813_s22 + $0x19e0] sm:$0xff]  }
 0x34f   : > { %14122 = vmatprep.subr.bf16.mxu0 %v15335_v23  ;;  %v15374_v23 = vld [vmem:[%s15813_s22 + $0x19a0] sm:$0xff]  }
 0x350   : > { %14143 = vmatpush3.bf16.msra.mxu1 %v15334_v22  ;;  %v15373_v22 = vld [vmem:[%s15813_s22 + $0x1920] sm:$0xff]  }
 0x351   : > { %14144 = vmatprep.subr.bf16.mxu1 %v15336_v24  ;;  %v15375_v24 = vld [vmem:[%s15813_s22 + $0x1968] sm:$0xff]  }
 0x352   : > { %14123 = vmatpush3.bf16.msra.mxu0 %v15337_v25  ;;  %v15376_v25 = vld [vmem:[%s15813_s22 + $0x19e8] sm:$0xff]  }
 0x353   : > { %14124 = vmatprep.subr.bf16.mxu0 %v15339_v27  ;;  %v15377_v27 = vld [vmem:[%s15813_s22 + $0x1928] sm:$0xff]  }
 0x354   : > { %14145 = vmatpush3.bf16.msra.mxu1 %v15338_v26 }
 0x355   : > { %14146 = vmatprep.subr.bf16.mxu1 %v15340_v28 }
 0x356   : > { %14125 = vmatpush3.bf16.msra.mxu0 %v15341_v29  ;;  %v15378_v29 = vld [vmem:[%s15813_s22 + $0x19a8] sm:$0xff]  }
 0x357   : > { %14126 = vmatprep.subr.bf16.mxu0 %v15343_v31 }
 0x358   : > { %v13824_v33 = vpop.f32.mrb[68].mxu0  ;;  %14147 = vmatpush3.bf16.msra.mxu1 %v15342_v30 }
 0x359   : > { %v13825_v35 = vpop.f32.mrb[69].mxu0  ;;  %14148 = vmatprep.subr.bf16.mxu1 %v15344_v32 }
 0x35a   : > { %v13846_v37 = vpop.f32.mrb[68].mxu1  ;;  %v13826_v38 = vadd.f32 %v13825_v35, %v13824_v33  ;;  %v13827_v39 = vpop.f32.mrb[70].mxu0  ;;  %14127 = vmatpush3.bf16.msra.mxu0 %v15345_v34  ;;  %v15379_v33 = vld [vmem:[%s15813_s22 + $0x1970] sm:$0xff]  }
 0x35b   : > { %v13847_v43 = vpop.f32.mrb[69].mxu1  ;;  %v13828_v44 = vpop.f32.mrb[71].mxu0  ;;  %14128 = vmatprep.subr.bf16.mxu0 %v15347_v40  ;;  %v15380_v34 = vld [vmem:[%s15813_s22 + $0x19f0] sm:$0xff]  }
 0x35c   : > { %v10754_v45 = vadd.f32 %v13826_v38, %v16790_v4  ;;  %v13848_v46 = vadd.f32 %v13847_v43, %v13846_v37  ;;  %v13849_v47 = vpop.f32.mrb[70].mxu1  ;;  %14149 = vmatpush3.bf16.msra.mxu1 %v15346_v36  ;;  %v2936_v4 = vcombine.high %v2914_v61, %v2914_v61  ;;  %v15381_v40 = vld [vmem:[%s15813_s22 + $0x1930] sm:$0xff]  }
 0x35d   : > { %v13850_v49 = vpop.f32.mrb[71].mxu1  ;;  %14150 = vmatprep.subr.bf16.mxu1 %v15348_v41  ;;  %v15382_v43 = vld [vmem:[%s15813_s22 + $0x19b0] sm:$0xff]   ;;  %v15385_v47 = vld [vmem:[%s15813_s22 + $0x1938] sm:$0xff]  }
 0x35e   : > { %v16827_v51 = vadd.f32 %v13848_v46, %v10754_v45  ;;  %14129 = vmatpush3.bf16.msra.mxu0 %v15349_v48  ;;  %v15383_v45 = vld [vmem:[%s15813_s22 + $0x1978] sm:$0xff]   ;;  %v2921_v49 = vrot.slane %v16839_v63, %v15869_v42 }
 0x35f   : > { %14130 = vmatprep.subr.bf16.mxu0 %v15351_v52  ;;  %v15384_v46 = vld [vmem:[%s15813_s22 + $0x19f8] sm:$0xff]   ;;  %v15390_v52 = vld [vmem:[%s15813_s22 + $0x1a00] sm:$0xff]  }
 0x360   : > { %14151 = vmatpush3.bf16.msra.mxu1 %v15350_v50  ;;  %v15386_v48 = vld [vmem:[%s15813_s22 + $0x19b8] sm:$0xff]   ;;  %v15388_v50 = vld [vmem:[%s15813_s22 + $0x1a40] sm:$0xff]  }
 0x361   : > { %14152 = vmatprep.subr.bf16.mxu1 %v15352_v53  ;;  %v15391_v53 = vld [vmem:[%s15813_s22 + $0x1a80] sm:$0xff]   ;;  %v15400_v63 = vld [vmem:[%s15813_s22 + $0x1a58] sm:$0xff]  }
 0x362   : > { %14131 = vmatpush3.bf16.msra.mxu0 %v15353_v54  ;;  %v2937_v54 = vcombine.high %v2921_v49, %v2921_v49 }
 0x363   : > { %14160 = vmatprep.subr.bf16.mxu0 %v15355_v58  ;;  %v15394_v58 = vld [vmem:[%s15813_s22 + $0x1a08] sm:$0xff]  }
 0x364   : > { %14153 = vmatpush3.bf16.msra.mxu1 %v15354_v60  ;;  %v15396_v60 = vld [vmem:[%s15813_s22 + $0x1a50] sm:$0xff]  }
 0x365   : > { %14182 = vmatprep.subr.bf16.mxu1 %v15356_v62  ;;  %11312 = vmatmul.mubr.bf16.vlgmr.msra.gmra.mrb[96].mxu0 %v2914_v61  ;;  %v15398_v61 = vld [vmem:[%s15813_s22 + $0x1a10] sm:$0xff]  }
 0x366   : > { %14161 = vmatpush3.bf16.msra.mxu0 %v15357_v0  ;;  %11391 = vmatprep.mubr.bf16.mxu0 %v2935_v8  ;;  %v15399_v62 = vld [vmem:[%s15813_s22 + $0x1a90] sm:$0xff]   ;;  %v15401_v0 = vld [vmem:[%s15813_s22 + $0x1ad8] sm:$0xff]   ;;  %v15409_v8 = vld [vmem:[%s15813_s22 + $0x1ae8] sm:$0xff]  }
 0x367   : > { %11352 = vmatmul.mubr.bf16.vlgmr.msra.gmra.mrb[96].mxu1 %v2936_v4  ;;  %14162 = vmatprep.subr.bf16.mxu0 %v15359_v5  ;;  %v15405_v4 = vld [vmem:[%s15813_s22 + $0x1ae0] sm:$0xff]  }
 0x368   : > { %14183 = vmatpush3.bf16.msra.mxu1 %v15358_v2  ;;  %11431 = vmatprep.mubr.bf16.mxu1 %v2939_v11  ;;  %v15403_v2 = vld [vmem:[%s15813_s22 + $0x1a98] sm:$0xff]   ;;  %v15406_v5 = vld [vmem:[%s15813_s22 + $0x1a20] sm:$0xff]  }
 0x369   : > { %14184 = vmatprep.subr.bf16.mxu1 %v15360_v7  ;;  %v15408_v7 = vld [vmem:[%s15813_s22 + $0x1a68] sm:$0xff]  }
 0x36a   : > { %14163 = vmatpush3.bf16.msra.mxu0 %v15361_v9 }
 0x36b   : > { %14164 = vmatprep.subr.bf16.mxu0 %v15363_v12  ;;  %v15411_v12 = vld [vmem:[%s15813_s22 + $0x1aa8] sm:$0xff]  }
 0x36c   : > { %14185 = vmatpush3.bf16.msra.mxu1 %v15362_v10  ;;  %v15410_v10 = vld [vmem:[%s15813_s22 + $0x1a28] sm:$0xff]  }
 0x36d   : > { %14186 = vmatprep.subr.bf16.mxu1 %v15364_v13 }
 0x36e   : > { %14165 = vmatpush3.bf16.msra.mxu0 %v15365_v14 }
 0x36f   : > { %14166 = vmatprep.subr.bf16.mxu0 %v15367_v16  ;;  %v15412_v16 = vld [vmem:[%s15813_s22 + $0x1a70] sm:$0xff]  }
 0x370   : > { %14187 = vmatpush3.bf16.msra.mxu1 %v15366_v15 }
 0x371   : > { %14188 = vmatprep.subr.bf16.mxu1 %v15368_v17  ;;  %v15413_v17 = vld [vmem:[%s15813_s22 + $0x1af0] sm:$0xff]  }
 0x372   : > { %14167 = vmatpush3.bf16.msra.mxu0 %v15369_v18 }
 0x373   : > { %14168 = vmatprep.subr.bf16.mxu0 %v15371_v20 }
 0x374   : > { %14189 = vmatpush3.bf16.msra.mxu1 %v15370_v19 }
 0x375   : > { %14190 = vmatprep.subr.bf16.mxu1 %v15372_v21 }
 0x376   : > { %14169 = vmatpush3.bf16.msra.mxu0 %v15373_v22 }
 0x377   : > { %14170 = vmatprep.subr.bf16.mxu0 %v15375_v24 }
 0x378   : > { %v13868_v26 = vpop.f32.mrb[72].mxu0  ;;  %14191 = vmatpush3.bf16.msra.mxu1 %v15374_v23  ;;  %v15414_v23 = vld [vmem:[%s15813_s22 + $0x1a30] sm:$0xff]  }
 0x379   : > { %v13869_v28 = vpop.f32.mrb[73].mxu0  ;;  %14192 = vmatprep.subr.bf16.mxu1 %v15376_v25  ;;  %v15415_v25 = vld [vmem:[%s15813_s22 + $0x1ab0] sm:$0xff]  }
 0x37a   : > { %v13890_v30 = vpop.f32.mrb[72].mxu1  ;;  %v13870_v31 = vadd.f32 %v13869_v28, %v13868_v26  ;;  %v13871_v32 = vpop.f32.mrb[74].mxu0  ;;  %14171 = vmatpush3.bf16.msra.mxu0 %v15377_v27  ;;  %v15416_v27 = vld [vmem:[%s15813_s22 + $0x1a78] sm:$0xff]  }
 0x37b   : > { %v13891_v35 = vpop.f32.mrb[73].mxu1  ;;  %v13872_v36 = vpop.f32.mrb[75].mxu0  ;;  %14172 = vmatprep.subr.bf16.mxu0 %v15379_v33  ;;  %v15417_v28 = vld [vmem:[%s15813_s22 + $0x1af8] sm:$0xff]   ;;  %v15420_v32 = vld [vmem:[%s15813_s22 + $0x1b40] sm:$0xff]  }
 0x37c   : > { %v10834_v37 = vadd.f32 %v13870_v31, %v16827_v51  ;;  %v13892_v38 = vadd.f32 %v13891_v35, %v13890_v30  ;;  %v13893_v39 = vpop.f32.mrb[74].mxu1  ;;  %14193 = vmatpush3.bf16.msra.mxu1 %v15378_v29  ;;  %v15389_v51 = vld [vmem:[%s15813_s22 + $0x1ac0] sm:$0xff]   ;;  %v15418_v29 = vld [vmem:[%s15813_s22 + $0x1a38] sm:$0xff]  }
 0x37d   : > { %v13894_v41 = vpop.f32.mrb[75].mxu1  ;;  %14194 = vmatprep.subr.bf16.mxu1 %v15380_v34  ;;  %v236_v30 = vld [vmem:[%s15826_s26 + $0x68] sm:$0xff]  ;;  %v15419_v34 = vld [vmem:[%s15813_s22 + $0x1ab8] sm:$0xff]  }
 0x37e   : > { %v16872_v44 = vadd.f32 %v13892_v38, %v10834_v37  ;;  %14173 = vmatpush3.bf16.msra.mxu0 %v15381_v40  ;;  %v2947_v31 = vrot.slane %v236_v30, %v15869_v42  ;;  %v2940_v33 = vcombine.high %v236_v30, %v236_v30  ;;  %v15421_v37 = vld [vmem:[%s15813_s22 + $0x1bc0] sm:$0xff]   ;;  %v15457_v30 = vld [vmem:[%s15813_s22 + $0x1c48] sm:$0xff]  }
 0x37f   : > { %14174 = vmatprep.subr.bf16.mxu0 %v15383_v45  ;;  %v15422_v39 = vld [vmem:[%s15813_s22 + $0x1b00] sm:$0xff]   ;;  %v15424_v45 = vld [vmem:[%s15813_s22 + $0x1b48] sm:$0xff]  }
 0x380   : > { %14195 = vmatpush3.bf16.msra.mxu1 %v15382_v43  ;;  %v2955_v35 = vcombine.high %v2947_v31, %v2947_v31  ;;  %v2963_v36 = vrot.slane %v2947_v31, %v15869_v42  ;;  %v16921_v38 = vrot.slane %v2940_v33, %v15869_v42  ;;  %v15423_v41 = vld [vmem:[%s15813_s22 + $0x1b80] sm:$0xff]   ;;  %v15458_v31 = vld [vmem:[%s15813_s22 + $0x1cc8] sm:$0xff]  }
 0x381   : > { %14196 = vmatprep.subr.bf16.mxu1 %v15384_v46  ;;  %v15460_v33 = vld [vmem:[%s15813_s22 + $0x1c88] sm:$0xff]  }
 0x382   : > { %14175 = vmatpush3.bf16.msra.mxu0 %v15385_v47  ;;  %v2977_v40 = vrot.slane %v2955_v35, %v15869_v42  ;;  %v2956_v43 = vcombine.high %v16921_v38, %v16921_v38  ;;  %v15425_v47 = vld [vmem:[%s15813_s22 + $0x1bc8] sm:$0xff]   ;;  %v15462_v35 = vld [vmem:[%s15813_s22 + $0x1cd0] sm:$0xff]  }
 0x383   : > { %14204 = vmatprep.subr.bf16.mxu0 %v15388_v50  ;;  %v15427_v50 = vld [vmem:[%s15813_s22 + $0x1b88] sm:$0xff]  }
 0x384   : > { %14197 = vmatpush3.bf16.msra.mxu1 %v15386_v48  ;;  %v2987_v46 = vcombine.high %v2977_v40, %v2977_v40  ;;  %v2984_v48 = vrot.slane %v2956_v43, %v15869_v42  ;;  %v15469_v43 = vld [vmem:[%s15813_s22 + $0x1c60] sm:$0xff]  }
 0x385   : > { %11392 = vmatmul.mubr.bf16.vlgmr.msra.gmra.mrb[100].mxu0 %v2921_v49  ;;  %14226 = vmatprep.subr.bf16.mxu1 %v15389_v51  ;;  %v15426_v49 = vld [vmem:[%s15813_s22 + $0x1b08] sm:$0xff]  }
 0x386   : > { %14205 = vmatpush3.bf16.msra.mxu0 %v15390_v52  ;;  %11471 = vmatprep.mubr.bf16.mxu0 %v2977_v40  ;;  %v2988_v51 = vcombine.high %v2984_v48, %v2984_v48  ;;  %v15428_v52 = vld [vmem:[%s15813_s22 + $0x1b50] sm:$0xff]   ;;  %v15467_v40 = vld [vmem:[%s15813_s22 + $0x1c18] sm:$0xff]  }
 0x387   : > { %11432 = vmatmul.mubr.bf16.vlgmr.msra.gmra.mrb[100].mxu1 %v2937_v54  ;;  %14206 = vmatprep.subr.bf16.mxu0 %v15392_v56  ;;  %v15430_v54 = vld [vmem:[%s15813_s22 + $0x1b10] sm:$0xff]  }
 0x388   : > { %14227 = vmatpush3.bf16.msra.mxu1 %v15391_v53  ;;  %11511 = vmatprep.mubr.bf16.mxu1 %v2987_v46  ;;  %v15429_v53 = vld [vmem:[%s15813_s22 + $0x1bd0] sm:$0xff]   ;;  %v15472_v46 = vld [vmem:[%s15813_s22 + $0x1ca0] sm:$0xff]  }
 0x389   : > { %14228 = vmatprep.subr.bf16.mxu1 %v15393_v57  ;;  %v15431_v56 = vld [vmem:[%s15813_s22 + $0x1b90] sm:$0xff]   ;;  %v15432_v57 = vld [vmem:[%s15813_s22 + $0x1b58] sm:$0xff]  }
 0x38a   : > { %14207 = vmatpush3.bf16.msra.mxu0 %v15394_v58  ;;  %v15433_v58 = vld [vmem:[%s15813_s22 + $0x1bd8] sm:$0xff]  }
 0x38b   : > { %14208 = vmatprep.subr.bf16.mxu0 %v15396_v60  ;;  %v15435_v60 = vld [vmem:[%s15813_s22 + $0x1b98] sm:$0xff]  }
 0x38c   : > { %14229 = vmatpush3.bf16.msra.mxu1 %v15395_v59  ;;  %v15434_v59 = vld [vmem:[%s15813_s22 + $0x1b18] sm:$0xff]  }
 0x38d   : > { %14230 = vmatprep.subr.bf16.mxu1 %v15397_v55  ;;  %v15436_v55 = vld [vmem:[%s15813_s22 + $0x1b60] sm:$0xff]  }
 0x38e   : > { %14209 = vmatpush3.bf16.msra.mxu0 %v15398_v61  ;;  %v15437_v61 = vld [vmem:[%s15813_s22 + $0x1be0] sm:$0xff]  }
 0x38f   : > { %14210 = vmatprep.subr.bf16.mxu0 %v15400_v63  ;;  %v15439_v63 = vld [vmem:[%s15813_s22 + $0x1ba0] sm:$0xff]  }
 0x390   : > { %14231 = vmatpush3.bf16.msra.mxu1 %v15399_v62  ;;  %v15438_v62 = vld [vmem:[%s15813_s22 + $0x1b20] sm:$0xff]  }
 0x391   : > { %14232 = vmatprep.subr.bf16.mxu1 %v15401_v0  ;;  %v15440_v0 = vld [vmem:[%s15813_s22 + $0x1b68] sm:$0xff]  }
 0x392   : > { %14211 = vmatpush3.bf16.msra.mxu0 %v15402_v1  ;;  %v15441_v1 = vld [vmem:[%s15813_s22 + $0x1be8] sm:$0xff]  }
 0x393   : > { %14212 = vmatprep.subr.bf16.mxu0 %v15404_v3  ;;  %v15442_v3 = vld [vmem:[%s15813_s22 + $0x1b28] sm:$0xff]  }
 0x394   : > { %14233 = vmatpush3.bf16.msra.mxu1 %v15403_v2 }
 0x395   : > { %14234 = vmatprep.subr.bf16.mxu1 %v15405_v4 }
 0x396   : > { %14213 = vmatpush3.bf16.msra.mxu0 %v15406_v5  ;;  %v15443_v5 = vld [vmem:[%s15813_s22 + $0x1ba8] sm:$0xff]  }
 0x397   : > { %14214 = vmatprep.subr.bf16.mxu0 %v15408_v7 }
 0x398   : > { %v13912_v9 = vpop.f32.mrb[76].mxu0  ;;  %14235 = vmatpush3.bf16.msra.mxu1 %v15407_v6 }
 0x399   : > { %v13913_v11 = vpop.f32.mrb[77].mxu0  ;;  %14236 = vmatprep.subr.bf16.mxu1 %v15409_v8 }
 0x39a   : > { %v13934_v13 = vpop.f32.mrb[76].mxu1  ;;  %v13914_v14 = vadd.f32 %v13913_v11, %v13912_v9  ;;  %v13915_v15 = vpop.f32.mrb[78].mxu0  ;;  %14215 = vmatpush3.bf16.msra.mxu0 %v15410_v10  ;;  %v15444_v9 = vld [vmem:[%s15813_s22 + $0x1b70] sm:$0xff]  }
 0x39b   : > { %v13935_v18 = vpop.f32.mrb[77].mxu1  ;;  %v13916_v19 = vpop.f32.mrb[79].mxu0  ;;  %14216 = vmatprep.subr.bf16.mxu0 %v15412_v16  ;;  %v15445_v10 = vld [vmem:[%s15813_s22 + $0x1bf0] sm:$0xff]  }
 0x39c   : > { %v10914_v20 = vadd.f32 %v13914_v14, %v16872_v44  ;;  %v13936_v21 = vadd.f32 %v13935_v18, %v13934_v13  ;;  %v13937_v22 = vpop.f32.mrb[78].mxu1  ;;  %14237 = vmatpush3.bf16.msra.mxu1 %v15411_v12  ;;  %v2985_v44 = vcombine.high %v2963_v36, %v2963_v36  ;;  %v15446_v16 = vld [vmem:[%s15813_s22 + $0x1b30] sm:$0xff]  }
 0x39d   : > { %v13938_v24 = vpop.f32.mrb[79].mxu1  ;;  %14238 = vmatprep.subr.bf16.mxu1 %v15413_v17  ;;  %v15447_v18 = vld [vmem:[%s15813_s22 + $0x1bb0] sm:$0xff]   ;;  %v15450_v22 = vld [vmem:[%s15813_s22 + $0x1b38] sm:$0xff]  }
 0x39e   : > { %v16909_v26 = vadd.f32 %v13936_v21, %v10914_v20  ;;  %14217 = vmatpush3.bf16.msra.mxu0 %v15414_v23  ;;  %v15448_v20 = vld [vmem:[%s15813_s22 + $0x1b78] sm:$0xff]   ;;  %v2970_v24 = vrot.slane %v16921_v38, %v15869_v42 }
 0x39f   : > { %14218 = vmatprep.subr.bf16.mxu0 %v15416_v27  ;;  %v15449_v21 = vld [vmem:[%s15813_s22 + $0x1bf8] sm:$0xff]   ;;  %v15455_v27 = vld [vmem:[%s15813_s22 + $0x1c00] sm:$0xff]  }
 0x3a0   : > { %14239 = vmatpush3.bf16.msra.mxu1 %v15415_v25  ;;  %v15451_v23 = vld [vmem:[%s15813_s22 + $0x1bb8] sm:$0xff]   ;;  %v15453_v25 = vld [vmem:[%s15813_s22 + $0x1c40] sm:$0xff]  }
 0x3a1   : > { %14240 = vmatprep.subr.bf16.mxu1 %v15417_v28  ;;  %v15456_v28 = vld [vmem:[%s15813_s22 + $0x1c80] sm:$0xff]   ;;  %v15465_v38 = vld [vmem:[%s15813_s22 + $0x1c58] sm:$0xff]  }
 0x3a2   : > { %14219 = vmatpush3.bf16.msra.mxu0 %v15418_v29  ;;  %v2986_v29 = vcombine.high %v2970_v24, %v2970_v24 }
 0x3a3   : > { %14248 = vmatprep.subr.bf16.mxu0 %v15420_v32  ;;  %v15459_v32 = vld [vmem:[%s15813_s22 + $0x1c08] sm:$0xff]  }
 0x3a4   : > { %14241 = vmatpush3.bf16.msra.mxu1 %v15419_v34  ;;  %v15461_v34 = vld [vmem:[%s15813_s22 + $0x1c50] sm:$0xff]  }
 0x3a5   : > { %14270 = vmatprep.subr.bf16.mxu1 %v15421_v37  ;;  %11472 = vmatmul.mubr.bf16.vlgmr.msra.gmra.mrb[104].mxu0 %v2963_v36  ;;  %v15463_v36 = vld [vmem:[%s15813_s22 + $0x1c10] sm:$0xff]  }
 0x3a6   : > { %14249 = vmatpush3.bf16.msra.mxu0 %v15422_v39  ;;  %11551 = vmatprep.mubr.bf16.mxu0 %v2984_v48  ;;  %v15464_v37 = vld [vmem:[%s15813_s22 + $0x1c90] sm:$0xff]   ;;  %v15466_v39 = vld [vmem:[%s15813_s22 + $0x1cd8] sm:$0xff]   ;;  %v15474_v48 = vld [vmem:[%s15813_s22 + $0x1ce8] sm:$0xff]  }
 0x3a7   : > { %11512 = vmatmul.mubr.bf16.vlgmr.msra.gmra.mrb[104].mxu1 %v2985_v44  ;;  %14250 = vmatprep.subr.bf16.mxu0 %v15424_v45  ;;  %v15470_v44 = vld [vmem:[%s15813_s22 + $0x1ce0] sm:$0xff]  }
 0x3a8   : > { %14271 = vmatpush3.bf16.msra.mxu1 %v15423_v41  ;;  %11591 = vmatprep.mubr.bf16.mxu1 %v2988_v51  ;;  %v15468_v41 = vld [vmem:[%s15813_s22 + $0x1c98] sm:$0xff]   ;;  %v15471_v45 = vld [vmem:[%s15813_s22 + $0x1c20] sm:$0xff]  }
 0x3a9   : > { %14272 = vmatprep.subr.bf16.mxu1 %v15425_v47  ;;  %v15473_v47 = vld [vmem:[%s15813_s22 + $0x1c68] sm:$0xff]  }
 0x3aa   : > { %14251 = vmatpush3.bf16.msra.mxu0 %v15426_v49 }
 0x3ab   : > { %14252 = vmatprep.subr.bf16.mxu0 %v15428_v52  ;;  %v15476_v52 = vld [vmem:[%s15813_s22 + $0x1ca8] sm:$0xff]  }
 0x3ac   : > { %14273 = vmatpush3.bf16.msra.mxu1 %v15427_v50  ;;  %v15475_v50 = vld [vmem:[%s15813_s22 + $0x1c28] sm:$0xff]  }
 0x3ad   : > { %14274 = vmatprep.subr.bf16.mxu1 %v15429_v53 }
 0x3ae   : > { %14253 = vmatpush3.bf16.msra.mxu0 %v15430_v54 }
 0x3af   : > { %14254 = vmatprep.subr.bf16.mxu0 %v15432_v57  ;;  %v15477_v57 = vld [vmem:[%s15813_s22 + $0x1c70] sm:$0xff]  }
 0x3b0   : > { %14275 = vmatpush3.bf16.msra.mxu1 %v15431_v56 }
 0x3b1   : > { %14276 = vmatprep.subr.bf16.mxu1 %v15433_v58  ;;  %v15478_v58 = vld [vmem:[%s15813_s22 + $0x1cf0] sm:$0xff]  }
 0x3b2   : > { %14255 = vmatpush3.bf16.msra.mxu0 %v15434_v59 }
 0x3b3   : > { %14256 = vmatprep.subr.bf16.mxu0 %v15436_v55 }
 0x3b4   : > { %14277 = vmatpush3.bf16.msra.mxu1 %v15435_v60 }
 0x3b5   : > { %14278 = vmatprep.subr.bf16.mxu1 %v15437_v61 }
 0x3b6   : > { %14257 = vmatpush3.bf16.msra.mxu0 %v15438_v62 }
 0x3b7   : > { %14258 = vmatprep.subr.bf16.mxu0 %v15440_v0 }
 0x3b8   : > { %v13956_v2 = vpop.f32.mrb[80].mxu0  ;;  %14279 = vmatpush3.bf16.msra.mxu1 %v15439_v63  ;;  %v15479_v63 = vld [vmem:[%s15813_s22 + $0x1c30] sm:$0xff]  }
 0x3b9   : > { %v13957_v4 = vpop.f32.mrb[81].mxu0  ;;  %14280 = vmatprep.subr.bf16.mxu1 %v15441_v1  ;;  %v15480_v1 = vld [vmem:[%s15813_s22 + $0x1cb0] sm:$0xff]  }
 0x3ba   : > { %v13978_v6 = vpop.f32.mrb[80].mxu1  ;;  %v13958_v7 = vadd.f32 %v13957_v4, %v13956_v2  ;;  %v13959_v8 = vpop.f32.mrb[82].mxu0  ;;  %14259 = vmatpush3.bf16.msra.mxu0 %v15442_v3  ;;  %v15481_v3 = vld [vmem:[%s15813_s22 + $0x1c78] sm:$0xff]  }
 0x3bb   : > { %v13979_v11 = vpop.f32.mrb[81].mxu1  ;;  %v13960_v12 = vpop.f32.mrb[83].mxu0  ;;  %14260 = vmatprep.subr.bf16.mxu0 %v15444_v9  ;;  %v15482_v4 = vld [vmem:[%s15813_s22 + $0x1cf8] sm:$0xff]   ;;  %v15485_v8 = vld [vmem:[%s15813_s22 + $0x1d40] sm:$0xff]  }
 0x3bc   : > { %v10994_v13 = vadd.f32 %v13958_v7, %v16909_v26  ;;  %v13980_v14 = vadd.f32 %v13979_v11, %v13978_v6  ;;  %v13981_v15 = vpop.f32.mrb[82].mxu1  ;;  %14281 = vmatpush3.bf16.msra.mxu1 %v15443_v5  ;;  %v15454_v26 = vld [vmem:[%s15813_s22 + $0x1cc0] sm:$0xff]   ;;  %v15483_v5 = vld [vmem:[%s15813_s22 + $0x1c38] sm:$0xff]   ;;  %v237_v6 = vld [vmem:[%s15826_s26 + $0x70] sm:$0xff] }
 0x3bd   : > { %v13982_v17 = vpop.f32.mrb[83].mxu1  ;;  %14282 = vmatprep.subr.bf16.mxu1 %v15445_v10  ;;  %v2996_v7 = vrot.slane %v237_v6, %v15869_v42  ;;  %v2989_v9 = vcombine.high %v237_v6, %v237_v6  ;;  %v15484_v10 = vld [vmem:[%s15813_s22 + $0x1cb8] sm:$0xff]   ;;  %v15487_v15 = vld [vmem:[%s15813_s22 + $0x1d00] sm:$0xff]   ;;  %v15522_v6 = vld [vmem:[%s15813_s22 + $0x1e48] sm:$0xff]  }
 0x3be   : > { %v16954_v19 = vadd.f32 %v13980_v14, %v10994_v13  ;;  %14261 = vmatpush3.bf16.msra.mxu0 %v15446_v16  ;;  %v15486_v13 = vld [vmem:[%s15813_s22 + $0x1dc0] sm:$0xff]  }
 0x3bf   : > { %14262 = vmatprep.subr.bf16.mxu0 %v15448_v20  ;;  %v3004_v11 = vcombine.high %v2996_v7, %v2996_v7  ;;  %v3012_v12 = vrot.slane %v2996_v7, %v15869_v42  ;;  %v17003_v14 = vrot.slane %v2989_v9, %v15869_v42  ;;  %v15488_v17 = vld [vmem:[%s15813_s22 + $0x1d80] sm:$0xff]   ;;  %v15489_v20 = vld [vmem:[%s15813_s22 + $0x1d48] sm:$0xff]  }
 0x3c0   : > { %14283 = vmatpush3.bf16.msra.mxu1 %v15447_v18  ;;  %v15523_v7 = vld [vmem:[%s15813_s22 + $0x1ec8] sm:$0xff]  }
 0x3c1   : > { %14284 = vmatprep.subr.bf16.mxu1 %v15449_v21  ;;  %v3026_v16 = vrot.slane %v3004_v11, %v15869_v42  ;;  %v3005_v18 = vcombine.high %v17003_v14, %v17003_v14  ;;  %v15525_v9 = vld [vmem:[%s15813_s22 + $0x1e88] sm:$0xff]   ;;  %v15527_v11 = vld [vmem:[%s15813_s22 + $0x1ed0] sm:$0xff]  }
 0x3c2   : > { %14263 = vmatpush3.bf16.msra.mxu0 %v15450_v22  ;;  %v15490_v22 = vld [vmem:[%s15813_s22 + $0x1dc8] sm:$0xff]  }
 0x3c3   : > { %14292 = vmatprep.subr.bf16.mxu0 %v15453_v25  ;;  %v3036_v21 = vcombine.high %v3026_v16, %v3026_v16  ;;  %v15492_v25 = vld [vmem:[%s15813_s22 + $0x1d88] sm:$0xff]  }
 0x3c4   : > { %14285 = vmatpush3.bf16.msra.mxu1 %v15451_v23  ;;  %v3033_v23 = vrot.slane %v3005_v18, %v15869_v42  ;;  %v15534_v18 = vld [vmem:[%s15813_s22 + $0x1e60] sm:$0xff]  }
 0x3c5   : > { %11552 = vmatmul.mubr.bf16.vlgmr.msra.gmra.mrb[108].mxu0 %v2970_v24  ;;  %14314 = vmatprep.subr.bf16.mxu1 %v15454_v26  ;;  %v15491_v24 = vld [vmem:[%s15813_s22 + $0x1d08] sm:$0xff]  }
 0x3c6   : > { %14293 = vmatpush3.bf16.msra.mxu0 %v15455_v27  ;;  %11631 = vmatprep.mubr.bf16.mxu0 %v3026_v16  ;;  %v3037_v26 = vcombine.high %v3033_v23, %v3033_v23  ;;  %v15493_v27 = vld [vmem:[%s15813_s22 + $0x1d50] sm:$0xff]   ;;  %v15532_v16 = vld [vmem:[%s15813_s22 + $0x1e18] sm:$0xff]  }
 0x3c7   : > { %11592 = vmatmul.mubr.bf16.vlgmr.msra.gmra.mrb[108].mxu1 %v2986_v29  ;;  %14294 = vmatprep.subr.bf16.mxu0 %v15457_v30  ;;  %v15495_v29 = vld [vmem:[%s15813_s22 + $0x1d10] sm:$0xff]  }
 0x3c8   : > { %14315 = vmatpush3.bf16.msra.mxu1 %v15456_v28  ;;  %11671 = vmatprep.mubr.bf16.mxu1 %v3036_v21  ;;  %v15494_v28 = vld [vmem:[%s15813_s22 + $0x1dd0] sm:$0xff]   ;;  %v15537_v21 = vld [vmem:[%s15813_s22 + $0x1ea0] sm:$0xff]  }
 0x3c9   : > { %14316 = vmatprep.subr.bf16.mxu1 %v15458_v31  ;;  %v15496_v30 = vld [vmem:[%s15813_s22 + $0x1d90] sm:$0xff]   ;;  %v15497_v31 = vld [vmem:[%s15813_s22 + $0x1d58] sm:$0xff]  }
 0x3ca   : > { %14295 = vmatpush3.bf16.msra.mxu0 %v15459_v32  ;;  %v15498_v32 = vld [vmem:[%s15813_s22 + $0x1dd8] sm:$0xff]  }
 0x3cb   : > { %14296 = vmatprep.subr.bf16.mxu0 %v15461_v34  ;;  %v15500_v34 = vld [vmem:[%s15813_s22 + $0x1d98] sm:$0xff]  }
 0x3cc   : > { %14317 = vmatpush3.bf16.msra.mxu1 %v15460_v33  ;;  %v15499_v33 = vld [vmem:[%s15813_s22 + $0x1d18] sm:$0xff]  }
 0x3cd   : > { %14318 = vmatprep.subr.bf16.mxu1 %v15462_v35  ;;  %v15501_v35 = vld [vmem:[%s15813_s22 + $0x1d60] sm:$0xff]  }
 0x3ce   : > { %14297 = vmatpush3.bf16.msra.mxu0 %v15463_v36  ;;  %v15502_v36 = vld [vmem:[%s15813_s22 + $0x1de0] sm:$0xff]  }
 0x3cf   : > { %14298 = vmatprep.subr.bf16.mxu0 %v15465_v38  ;;  %v15504_v38 = vld [vmem:[%s15813_s22 + $0x1da0] sm:$0xff]  }
 0x3d0   : > { %14319 = vmatpush3.bf16.msra.mxu1 %v15464_v37  ;;  %v15503_v37 = vld [vmem:[%s15813_s22 + $0x1d20] sm:$0xff]  }
 0x3d1   : > { %14320 = vmatprep.subr.bf16.mxu1 %v15466_v39  ;;  %v15505_v39 = vld [vmem:[%s15813_s22 + $0x1d68] sm:$0xff]  }
 0x3d2   : > { %14299 = vmatpush3.bf16.msra.mxu0 %v15467_v40  ;;  %v15506_v40 = vld [vmem:[%s15813_s22 + $0x1de8] sm:$0xff]  }
 0x3d3   : > { %14300 = vmatprep.subr.bf16.mxu0 %v15469_v43  ;;  %v15507_v43 = vld [vmem:[%s15813_s22 + $0x1d28] sm:$0xff]  }
 0x3d4   : > { %14321 = vmatpush3.bf16.msra.mxu1 %v15468_v41 }
 0x3d5   : > { %14322 = vmatprep.subr.bf16.mxu1 %v15470_v44 }
 0x3d6   : > { %14301 = vmatpush3.bf16.msra.mxu0 %v15471_v45  ;;  %v15508_v45 = vld [vmem:[%s15813_s22 + $0x1da8] sm:$0xff]  }
 0x3d7   : > { %14302 = vmatprep.subr.bf16.mxu0 %v15473_v47 }
 0x3d8   : > { %v14000_v49 = vpop.f32.mrb[84].mxu0  ;;  %14323 = vmatpush3.bf16.msra.mxu1 %v15472_v46 }
 0x3d9   : > { %v14001_v51 = vpop.f32.mrb[85].mxu0  ;;  %14324 = vmatprep.subr.bf16.mxu1 %v15474_v48 }
 0x3da   : > { %v14022_v53 = vpop.f32.mrb[84].mxu1  ;;  %v14002_v54 = vadd.f32 %v14001_v51, %v14000_v49  ;;  %v14003_v56 = vpop.f32.mrb[86].mxu0  ;;  %14303 = vmatpush3.bf16.msra.mxu0 %v15475_v50  ;;  %v15509_v49 = vld [vmem:[%s15813_s22 + $0x1d70] sm:$0xff]  }
 0x3db   : > { %v14023_v59 = vpop.f32.mrb[85].mxu1  ;;  %v14004_v60 = vpop.f32.mrb[87].mxu0  ;;  %14304 = vmatprep.subr.bf16.mxu0 %v15477_v57  ;;  %v15510_v50 = vld [vmem:[%s15813_s22 + $0x1df0] sm:$0xff]  }
 0x3dc   : > { %v11074_v55 = vadd.f32 %v14002_v54, %v16954_v19  ;;  %v14024_v61 = vadd.f32 %v14023_v59, %v14022_v53  ;;  %v14025_v62 = vpop.f32.mrb[86].mxu1  ;;  %14325 = vmatpush3.bf16.msra.mxu1 %v15476_v52  ;;  %v3034_v19 = vcombine.high %v3012_v12, %v3012_v12  ;;  %v15511_v57 = vld [vmem:[%s15813_s22 + $0x1d30] sm:$0xff]  }
 0x3dd   : > { %v14026_v0 = vpop.f32.mrb[87].mxu1  ;;  %14326 = vmatprep.subr.bf16.mxu1 %v15478_v58  ;;  %v15512_v59 = vld [vmem:[%s15813_s22 + $0x1db0] sm:$0xff]   ;;  %v15515_v62 = vld [vmem:[%s15813_s22 + $0x1d38] sm:$0xff]  }
 0x3de   : > { %v16991_v2 = vadd.f32 %v14024_v61, %v11074_v55  ;;  %14305 = vmatpush3.bf16.msra.mxu0 %v15479_v63  ;;  %v15513_v55 = vld [vmem:[%s15813_s22 + $0x1d78] sm:$0xff]   ;;  %v3019_v0 = vrot.slane %v17003_v14, %v15869_v42 }
 0x3df   : > { %14306 = vmatprep.subr.bf16.mxu0 %v15481_v3  ;;  %v15514_v61 = vld [vmem:[%s15813_s22 + $0x1df8] sm:$0xff]   ;;  %v15520_v3 = vld [vmem:[%s15813_s22 + $0x1e00] sm:$0xff]  }
 0x3e0   : > { %14327 = vmatpush3.bf16.msra.mxu1 %v15480_v1  ;;  %v15516_v63 = vld [vmem:[%s15813_s22 + $0x1db8] sm:$0xff]   ;;  %v15518_v1 = vld [vmem:[%s15813_s22 + $0x1e40] sm:$0xff]  }
 0x3e1   : > { %14328 = vmatprep.subr.bf16.mxu1 %v15482_v4  ;;  %v15521_v4 = vld [vmem:[%s15813_s22 + $0x1e80] sm:$0xff]   ;;  %v15530_v14 = vld [vmem:[%s15813_s22 + $0x1e58] sm:$0xff]  }
 0x3e2   : > { %14307 = vmatpush3.bf16.msra.mxu0 %v15483_v5  ;;  %v3035_v5 = vcombine.high %v3019_v0, %v3019_v0 }
 0x3e3   : > { %14336 = vmatprep.subr.bf16.mxu0 %v15485_v8  ;;  %v15524_v8 = vld [vmem:[%s15813_s22 + $0x1e08] sm:$0xff]  }
 0x3e4   : > { %14329 = vmatpush3.bf16.msra.mxu1 %v15484_v10  ;;  %v15526_v10 = vld [vmem:[%s15813_s22 + $0x1e50] sm:$0xff]  }
 0x3e5   : > { %14358 = vmatprep.subr.bf16.mxu1 %v15486_v13  ;;  %11632 = vmatmul.mubr.bf16.vlgmr.msra.gmra.mrb[112].mxu0 %v3012_v12  ;;  %v15528_v12 = vld [vmem:[%s15813_s22 + $0x1e10] sm:$0xff]  }
 0x3e6   : > { %14337 = vmatpush3.bf16.msra.mxu0 %v15487_v15  ;;  %11711 = vmatprep.mubr.bf16.mxu0 %v3033_v23  ;;  %v15529_v13 = vld [vmem:[%s15813_s22 + $0x1e90] sm:$0xff]   ;;  %v15531_v15 = vld [vmem:[%s15813_s22 + $0x1ed8] sm:$0xff]   ;;  %v15539_v23 = vld [vmem:[%s15813_s22 + $0x1ee8] sm:$0xff]  }
 0x3e7   : > { %11672 = vmatmul.mubr.bf16.vlgmr.msra.gmra.mrb[112].mxu1 %v3034_v19  ;;  %14338 = vmatprep.subr.bf16.mxu0 %v15489_v20  ;;  %v15535_v19 = vld [vmem:[%s15813_s22 + $0x1ee0] sm:$0xff]  }
 0x3e8   : > { %14359 = vmatpush3.bf16.msra.mxu1 %v15488_v17  ;;  %11751 = vmatprep.mubr.bf16.mxu1 %v3037_v26  ;;  %v15533_v17 = vld [vmem:[%s15813_s22 + $0x1e98] sm:$0xff]   ;;  %v15536_v20 = vld [vmem:[%s15813_s22 + $0x1e20] sm:$0xff]  }
 0x3e9   : > { %14360 = vmatprep.subr.bf16.mxu1 %v15490_v22  ;;  %v15538_v22 = vld [vmem:[%s15813_s22 + $0x1e68] sm:$0xff]  }
 0x3ea   : > { %14339 = vmatpush3.bf16.msra.mxu0 %v15491_v24 }
 0x3eb   : > { %14340 = vmatprep.subr.bf16.mxu0 %v15493_v27  ;;  %v15541_v27 = vld [vmem:[%s15813_s22 + $0x1ea8] sm:$0xff]  }
 0x3ec   : > { %14361 = vmatpush3.bf16.msra.mxu1 %v15492_v25  ;;  %v15540_v25 = vld [vmem:[%s15813_s22 + $0x1e28] sm:$0xff]  }
 0x3ed   : > { %14362 = vmatprep.subr.bf16.mxu1 %v15494_v28 }
 0x3ee   : > { %14341 = vmatpush3.bf16.msra.mxu0 %v15495_v29 }
 0x3ef   : > { %14342 = vmatprep.subr.bf16.mxu0 %v15497_v31  ;;  %v15542_v31 = vld [vmem:[%s15813_s22 + $0x1e70] sm:$0xff]  }
 0x3f0   : > { %14363 = vmatpush3.bf16.msra.mxu1 %v15496_v30 }
 0x3f1   : > { %14364 = vmatprep.subr.bf16.mxu1 %v15498_v32  ;;  %v15543_v32 = vld [vmem:[%s15813_s22 + $0x1ef0] sm:$0xff]  }
 0x3f2   : > { %14343 = vmatpush3.bf16.msra.mxu0 %v15499_v33 }
 0x3f3   : > { %14344 = vmatprep.subr.bf16.mxu0 %v15501_v35 }
 0x3f4   : > { %14365 = vmatpush3.bf16.msra.mxu1 %v15500_v34 }
 0x3f5   : > { %14366 = vmatprep.subr.bf16.mxu1 %v15502_v36 }
 0x3f6   : > { %14345 = vmatpush3.bf16.msra.mxu0 %v15503_v37 }
 0x3f7   : > { %14346 = vmatprep.subr.bf16.mxu0 %v15505_v39 }
 0x3f8   : > { %v14044_v41 = vpop.f32.mrb[88].mxu0  ;;  %14367 = vmatpush3.bf16.msra.mxu1 %v15504_v38  ;;  %v15544_v38 = vld [vmem:[%s15813_s22 + $0x1e30] sm:$0xff]  }
 0x3f9   : > { %v14045_v44 = vpop.f32.mrb[89].mxu0  ;;  %14368 = vmatprep.subr.bf16.mxu1 %v15506_v40  ;;  %v15545_v40 = vld [vmem:[%s15813_s22 + $0x1eb0] sm:$0xff]  }
 0x3fa   : > { %v14066_v46 = vpop.f32.mrb[88].mxu1  ;;  %v14046_v47 = vadd.f32 %v14045_v44, %v14044_v41  ;;  %v14047_v48 = vpop.f32.mrb[90].mxu0  ;;  %14347 = vmatpush3.bf16.msra.mxu0 %v15507_v43  ;;  %v15546_v43 = vld [vmem:[%s15813_s22 + $0x1e78] sm:$0xff]  }
 0x3fb   : > { %v14067_v51 = vpop.f32.mrb[89].mxu1  ;;  %v14048_v52 = vpop.f32.mrb[91].mxu0  ;;  %14348 = vmatprep.subr.bf16.mxu0 %v15509_v49  ;;  %v15547_v44 = vld [vmem:[%s15813_s22 + $0x1ef8] sm:$0xff]   ;;  %v15550_v48 = vld [vmem:[%s15813_s22 + $0x1f40] sm:$0xff]  }
 0x3fc   : > { %v11154_v53 = vadd.f32 %v14046_v47, %v16991_v2  ;;  %v14068_v54 = vadd.f32 %v14067_v51, %v14066_v46  ;;  %v14069_v56 = vpop.f32.mrb[90].mxu1  ;;  %14369 = vmatpush3.bf16.msra.mxu1 %v15508_v45  ;;  %v15519_v2 = vld [vmem:[%s15813_s22 + $0x1ec0] sm:$0xff]   ;;  %v15548_v45 = vld [vmem:[%s15813_s22 + $0x1e38] sm:$0xff]  }
 0x3fd   : > { %v14070_v58 = vpop.f32.mrb[91].mxu1  ;;  %14370 = vmatprep.subr.bf16.mxu1 %v15510_v50  ;;  %v238_v46 = vld [vmem:[%s15826_s26 + $0x78] sm:$0xff] }
 0x3fe   : > { %v17036_v60 = vadd.f32 %v14068_v54, %v11154_v53  ;;  %14349 = vmatpush3.bf16.msra.mxu0 %v15511_v57  ;;  %v3045_v47 = vrot.slane %v238_v46, %v15869_v42  ;;  %v3038_v49 = vcombine.high %v238_v46, %v238_v46  ;;  %v15549_v50 = vld [vmem:[%s15813_s22 + $0x1eb8] sm:$0xff]   ;;  %v15551_v53 = vld [vmem:[%s15813_s22 + $0x1fc0] sm:$0xff]  }
 0x3ff   : > { %14350 = vmatprep.subr.bf16.mxu0 %v15513_v55  ;;  %v15552_v57 = vld [vmem:[%s15813_s22 + $0x1f00] sm:$0xff]  }
 0x400   : > { %14371 = vmatpush3.bf16.msra.mxu1 %v15512_v59  ;;  %v3053_v51 = vcombine.high %v3045_v47, %v3045_v47  ;;  %v3061_v52 = vrot.slane %v3045_v47, %v15869_v42  ;;  %v17085_v54 = vrot.slane %v3038_v49, %v15869_v42 }
 0x401   : > { %14372 = vmatprep.subr.bf16.mxu1 %v15514_v61  ;;  %v15553_v61 = vld [vmem:[%s15813_s22 + $0x1f80] sm:$0xff]  }
 0x402   : > { %14351 = vmatpush3.bf16.msra.mxu0 %v15515_v62  ;;  %v3075_v56 = vrot.slane %v3053_v51, %v15869_v42  ;;  %v3054_v58 = vcombine.high %v17085_v54, %v17085_v54  ;;  %v3083_v59 = vcombine.high %v3061_v52, %v3061_v52 }
 0x403   : > { %14380 = vmatprep.subr.bf16.mxu0 %v15518_v1 }
 0x404   : > { %14373 = vmatpush3.bf16.msra.mxu1 %v15516_v63  ;;  %v3085_v55 = vcombine.high %v3075_v56, %v3075_v56  ;;  %v3082_v62 = vrot.slane %v3054_v58, %v15869_v42  ;;  %v15555_v63 = vld [vmem:[%s15813_s22 + $0x1fc8] sm:$0xff]  }
 0x405   : > { %11712 = vmatmul.mubr.bf16.vlgmr.msra.gmra.mrb[116].mxu0 %v3019_v0  ;;  %14402 = vmatprep.subr.bf16.mxu1 %v15519_v2  ;;  %v15556_v0 = vld [vmem:[%s15813_s22 + $0x1f08] sm:$0xff]   ;;  %v15558_v2 = vld [vmem:[%s15813_s22 + $0x1f50] sm:$0xff]  }
 0x406   : > { %14381 = vmatpush3.bf16.msra.mxu0 %v15520_v3  ;;  %11791 = vmatprep.mubr.bf16.mxu0 %v3075_v56  ;;  %v3086_v1 = vcombine.high %v3082_v62, %v3082_v62  ;;  %v15557_v3 = vld [vmem:[%s15813_s22 + $0x1f88] sm:$0xff]  }
 0x407   : > { %11752 = vmatmul.mubr.bf16.vlgmr.msra.gmra.mrb[116].mxu1 %v3035_v5  ;;  %14382 = vmatprep.subr.bf16.mxu0 %v15522_v6  ;;  %v15560_v5 = vld [vmem:[%s15813_s22 + $0x1f10] sm:$0xff]   ;;  %v15562_v6 = vld [vmem:[%s15813_s22 + $0x1f58] sm:$0xff]  }
 0x408   : > { %14403 = vmatpush3.bf16.msra.mxu1 %v15521_v4  ;;  %11831 = vmatprep.mubr.bf16.mxu1 %v3085_v55  ;;  %v15559_v4 = vld [vmem:[%s15813_s22 + $0x1fd0] sm:$0xff]  }
 0x409   : > { %14404 = vmatprep.subr.bf16.mxu1 %v15523_v7  ;;  %v15561_v7 = vld [vmem:[%s15813_s22 + $0x1f90] sm:$0xff]  }
 0x40a   : > { %14383 = vmatpush3.bf16.msra.mxu0 %v15524_v8  ;;  %v15563_v8 = vld [vmem:[%s15813_s22 + $0x1fd8] sm:$0xff]  }
 0x40b   : > { %14384 = vmatprep.subr.bf16.mxu0 %v15526_v10  ;;  %v15566_v10 = vld [vmem:[%s15813_s22 + $0x1f60] sm:$0xff]  }
 0x40c   : > { %14405 = vmatpush3.bf16.msra.mxu1 %v15525_v9  ;;  %v15564_v9 = vld [vmem:[%s15813_s22 + $0x1f18] sm:$0xff]  }
 0x40d   : > { %14406 = vmatprep.subr.bf16.mxu1 %v15527_v11  ;;  %v15565_v11 = vld [vmem:[%s15813_s22 + $0x1f98] sm:$0xff]  }
 0x40e   : > { %14385 = vmatpush3.bf16.msra.mxu0 %v15528_v12  ;;  %v15567_v12 = vld [vmem:[%s15813_s22 + $0x1fe0] sm:$0xff]  }
 0x40f   : > { %14386 = vmatprep.subr.bf16.mxu0 %v15530_v14  ;;  %v15570_v14 = vld [vmem:[%s15813_s22 + $0x1f68] sm:$0xff]  }
 0x410   : > { %14407 = vmatpush3.bf16.msra.mxu1 %v15529_v13  ;;  %v15568_v13 = vld [vmem:[%s15813_s22 + $0x1f20] sm:$0xff]  }
 0x411   : > { %14408 = vmatprep.subr.bf16.mxu1 %v15531_v15  ;;  %v15569_v15 = vld [vmem:[%s15813_s22 + $0x1fa0] sm:$0xff]  }
 0x412   : > { %14387 = vmatpush3.bf16.msra.mxu0 %v15532_v16 }
 0x413   : > { %14388 = vmatprep.subr.bf16.mxu0 %v15534_v18 }
 0x414   : > { %14409 = vmatpush3.bf16.msra.mxu1 %v15533_v17  ;;  %v15571_v17 = vld [vmem:[%s15813_s22 + $0x1fe8] sm:$0xff]  }
 0x415   : > { %14410 = vmatprep.subr.bf16.mxu1 %v15535_v19  ;;  %v15572_v19 = vld [vmem:[%s15813_s22 + $0x1f28] sm:$0xff]  }
 0x416   : > { %14389 = vmatpush3.bf16.msra.mxu0 %v15536_v20 }
 0x417   : > { %14390 = vmatprep.subr.bf16.mxu0 %v15538_v22 }
 0x418   : > { %v14088_v24 = vpop.f32.mrb[92].mxu0  ;;  %14411 = vmatpush3.bf16.msra.mxu1 %v15537_v21 }
 0x419   : > { %v14089_v26 = vpop.f32.mrb[93].mxu0  ;;  %14412 = vmatprep.subr.bf16.mxu1 %v15539_v23  ;;  %v15573_v23 = vld [vmem:[%s15813_s22 + $0x1fa8] sm:$0xff]  }
 0x41a   : > { %v14110_v28 = vpop.f32.mrb[92].mxu1  ;;  %v14090_v29 = vadd.f32 %v14089_v26, %v14088_v24  ;;  %v14091_v30 = vpop.f32.mrb[94].mxu0  ;;  %14391 = vmatpush3.bf16.msra.mxu0 %v15540_v25  ;;  %v15574_v24 = vld [vmem:[%s15813_s22 + $0x1f70] sm:$0xff]  }
 0x41b   : > { %v14111_v33 = vpop.f32.mrb[93].mxu1  ;;  %v14092_v34 = vpop.f32.mrb[95].mxu0  ;;  %14392 = vmatprep.subr.bf16.mxu0 %v15542_v31  ;;  %v15575_v30 = vld [vmem:[%s15813_s22 + $0x1ff0] sm:$0xff]  }
 0x41c   : > { %v11234_v35 = vadd.f32 %v14090_v29, %v17036_v60  ;;  %v14112_v36 = vadd.f32 %v14111_v33, %v14110_v28  ;;  %v14113_v37 = vpop.f32.mrb[94].mxu1  ;;  %14413 = vmatpush3.bf16.msra.mxu1 %v15541_v27  ;;  %v15554_v60 = vld [vmem:[%s15813_s22 + $0x1f48] sm:$0xff]   ;;  %v15578_v34 = vld [vmem:[%s15813_s22 + $0x1f78] sm:$0xff]  }
 0x41d   : > { %v14114_v39 = vpop.f32.mrb[95].mxu1  ;;  %14414 = vmatprep.subr.bf16.mxu1 %v15543_v32  ;;  %v15576_v32 = vld [vmem:[%s15813_s22 + $0x1f30] sm:$0xff]   ;;  %v15580_v37 = vld [vmem:[%s15813_s22 + $0x1f38] sm:$0xff]  }
 0x41e   : > { %v17073_v41 = vadd.f32 %v14112_v36, %v11234_v35  ;;  %14393 = vmatpush3.bf16.msra.mxu0 %v15544_v38  ;;  %v15577_v35 = vld [vmem:[%s15813_s22 + $0x1fb0] sm:$0xff]   ;;  %v15579_v36 = vld [vmem:[%s15813_s22 + $0x1ff8] sm:$0xff]   ;;  %v3068_v38 = vrot.slane %v17085_v54, %v15869_v42 }
 0x41f   : > { %14394 = vmatprep.subr.bf16.mxu0 %v15546_v43  ;;  %v15581_v39 = vld [vmem:[%s15813_s22 + $0x1fb8] sm:$0xff]  }
 0x420   : > { %14415 = vmatpush3.bf16.msra.mxu1 %v15545_v40  ;;  %v3084_v40 = vcombine.high %v3068_v38, %v3068_v38 }
 0x421   : > { %14416 = vmatprep.subr.bf16.mxu1 %v15547_v44 }
 0x422   : > { %14395 = vmatpush3.bf16.msra.mxu0 %v15548_v45 }
 0x423   : > { %14424 = vmatprep.subr.bf16.mxu0 %v15550_v48 }
 0x424   : > { %14417 = vmatpush3.bf16.msra.mxu1 %v15549_v50 }
 0x425   : > { %14446 = vmatprep.subr.bf16.mxu1 %v15551_v53  ;;  %11792 = vmatmul.mubr.bf16.vlgmr.msra.gmra.mrb[120].mxu0 %v3061_v52 }
 0x426   : > { %14425 = vmatpush3.bf16.msra.mxu0 %v15552_v57  ;;  %11871 = vmatprep.mubr.bf16.mxu0 %v3082_v62 }
 0x427   : > { %11832 = vmatmul.mubr.bf16.vlgmr.msra.gmra.mrb[120].mxu1 %v3083_v59  ;;  %14426 = vmatprep.subr.bf16.mxu0 %v15554_v60 }
 0x428   : > { %14447 = vmatpush3.bf16.msra.mxu1 %v15553_v61  ;;  %11911 = vmatprep.mubr.bf16.mxu1 %v3086_v1 }
 0x429   : > { %14448 = vmatprep.subr.bf16.mxu1 %v15555_v63 }
 0x42a   : > { %14427 = vmatpush3.bf16.msra.mxu0 %v15556_v0 }
 0x42b   : > { %14428 = vmatprep.subr.bf16.mxu0 %v15558_v2 }
 0x42c   : > { %14449 = vmatpush3.bf16.msra.mxu1 %v15557_v3 }
 0x42d   : > { %14450 = vmatprep.subr.bf16.mxu1 %v15559_v4 }
 0x42e   : > { %14429 = vmatpush3.bf16.msra.mxu0 %v15560_v5 }
 0x42f   : > { %14430 = vmatprep.subr.bf16.mxu0 %v15562_v6 }
 0x430   : > { %14451 = vmatpush3.bf16.msra.mxu1 %v15561_v7 }
 0x431   : > { %14452 = vmatprep.subr.bf16.mxu1 %v15563_v8 }
 0x432   : > { %14431 = vmatpush3.bf16.msra.mxu0 %v15564_v9 }
 0x433   : > { %14432 = vmatprep.subr.bf16.mxu0 %v15566_v10 }
 0x434   : > { %14453 = vmatpush3.bf16.msra.mxu1 %v15565_v11 }
 0x435   : > { %14454 = vmatprep.subr.bf16.mxu1 %v15567_v12 }
 0x436   : > { %14433 = vmatpush3.bf16.msra.mxu0 %v15568_v13 }
 0x437   : > { %14434 = vmatprep.subr.bf16.mxu0 %v15570_v14 }
 0x438   : > { %v14132_v16 = vpop.f32.mrb[96].mxu0  ;;  %14455 = vmatpush3.bf16.msra.mxu1 %v15569_v15 }
 0x439   : > { %v14133_v18 = vpop.f32.mrb[97].mxu0  ;;  %14456 = vmatprep.subr.bf16.mxu1 %v15571_v17 }
 0x43a   : > { %v14154_v20 = vpop.f32.mrb[96].mxu1  ;;  %v14134_v21 = vadd.f32 %v14133_v18, %v14132_v16  ;;  %v14135_v22 = vpop.f32.mrb[98].mxu0  ;;  %14435 = vmatpush3.bf16.msra.mxu0 %v15572_v19 }
 0x43b   : > { %v14155_v25 = vpop.f32.mrb[97].mxu1  ;;  %v14136_v26 = vpop.f32.mrb[99].mxu0  ;;  %14436 = vmatprep.subr.bf16.mxu0 %v15574_v24 }
 0x43c   : > { %v11314_v27 = vadd.f32 %v14134_v21, %v17073_v41  ;;  %v14156_v28 = vadd.f32 %v14155_v25, %v14154_v20  ;;  %v14157_v29 = vpop.f32.mrb[98].mxu1  ;;  %14457 = vmatpush3.bf16.msra.mxu1 %v15573_v23 }
 0x43d   : > { %v14158_v31 = vpop.f32.mrb[99].mxu1  ;;  %14458 = vmatprep.subr.bf16.mxu1 %v15575_v30 }
 0x43e   : > { %v11354_v33 = vadd.f32 %v14156_v28, %v11314_v27  ;;  %14437 = vmatpush3.bf16.msra.mxu0 %v15576_v32 }
 0x43f   : > { %14438 = vmatprep.subr.bf16.mxu0 %v15578_v34 }
 0x440   : > { %14459 = vmatpush3.bf16.msra.mxu1 %v15577_v35 }
 0x441   : > { %14460 = vmatprep.subr.bf16.mxu1 %v15579_v36 }
 0x442   : > { %14439 = vmatpush3.bf16.msra.mxu0 %v15580_v37 }
 0x444   : > { %14461 = vmatpush3.bf16.msra.mxu1 %v15581_v39 }
 0x445   : > { %11872 = vmatmul.mubr.bf16.vlgmr.msra.gmra.mrb[124].mxu0 %v3068_v38 }
 0x447   : > { %11912 = vmatmul.mubr.bf16.vlgmr.msra.gmra.mrb[124].mxu1 %v3084_v40 }
 0x458   : > { %v14176_v41 = vpop.f32.mrb[100].mxu0 }
 0x459   : > { %v14177_v43 = vpop.f32.mrb[101].mxu0 }
 0x45a   : > { %v14198_v44 = vpop.f32.mrb[100].mxu1  ;;  %v14178_v45 = vadd.f32 %v14177_v43, %v14176_v41  ;;  %v14179_v46 = vpop.f32.mrb[102].mxu0 }
 0x45b   : > { %v14199_v47 = vpop.f32.mrb[101].mxu1  ;;  %v14180_v48 = vpop.f32.mrb[103].mxu0 }
 0x45c   : > { %v11394_v49 = vadd.f32 %v14178_v45, %v11354_v33  ;;  %v14200_v50 = vadd.f32 %v14199_v47, %v14198_v44  ;;  %v14201_v51 = vpop.f32.mrb[102].mxu1 }
 0x45d   : > { %v14202_v52 = vpop.f32.mrb[103].mxu1 }
 0x45e   : > { %v11434_v42 = vadd.f32 %v14200_v50, %v11394_v49 }
 0x478   : > { %v14220_v53 = vpop.f32.mrb[104].mxu0 }
 0x479   : > { %v14221_v54 = vpop.f32.mrb[105].mxu0 }
 0x47a   : > { %v14242_v56 = vpop.f32.mrb[104].mxu1  ;;  %v14222_v57 = vadd.f32 %v14221_v54, %v14220_v53  ;;  %v14223_v58 = vpop.f32.mrb[106].mxu0 }
 0x47b   : > { %v14243_v59 = vpop.f32.mrb[105].mxu1  ;;  %v14224_v60 = vpop.f32.mrb[107].mxu0 }
 0x47c   : > { %v11474_v55 = vadd.f32 %v14222_v57, %v11434_v42  ;;  %v14244_v61 = vadd.f32 %v14243_v59, %v14242_v56  ;;  %v14245_v62 = vpop.f32.mrb[106].mxu1  ;;  %v222_v60 = vld [vmem:[#allocation2] sm:$0x3] }
 0x47d   : > { %v14246_v63 = vpop.f32.mrb[107].mxu1 }
 0x47e   : > { %v11514_v0 = vadd.f32 %v14244_v61, %v11474_v55 }
 0x498   : > { %v14264_v1 = vpop.f32.mrb[108].mxu0 }
 0x499   : > { %v14265_v2 = vpop.f32.mrb[109].mxu0 }
 0x49a   : > { %v14286_v3 = vpop.f32.mrb[108].mxu1  ;;  %v14266_v4 = vadd.f32 %v14265_v2, %v14264_v1  ;;  %v14267_v5 = vpop.f32.mrb[110].mxu0 }
 0x49b   : > { %v14287_v6 = vpop.f32.mrb[109].mxu1  ;;  %v14268_v7 = vpop.f32.mrb[111].mxu0 }
 0x49c   : > { %v11554_v8 = vadd.f32 %v14266_v4, %v11514_v0  ;;  %v14288_v9 = vadd.f32 %v14287_v6, %v14286_v3  ;;  %v14289_v10 = vpop.f32.mrb[110].mxu1 }
 0x49d   : > { %v14290_v11 = vpop.f32.mrb[111].mxu1 }
 0x49e   : > { %v11594_v12 = vadd.f32 %v14288_v9, %v11554_v8 }
 0x4b8   : > { %v14308_v13 = vpop.f32.mrb[112].mxu0 }
 0x4b9   : > { %v14309_v14 = vpop.f32.mrb[113].mxu0 }
 0x4ba   : > { %v14330_v15 = vpop.f32.mrb[112].mxu1  ;;  %v14310_v16 = vadd.f32 %v14309_v14, %v14308_v13  ;;  %v14311_v17 = vpop.f32.mrb[114].mxu0 }
 0x4bb   : > { %v14331_v18 = vpop.f32.mrb[113].mxu1  ;;  %v14312_v19 = vpop.f32.mrb[115].mxu0 }
 0x4bc   : > { %v11634_v20 = vadd.f32 %v14310_v16, %v11594_v12  ;;  %v14332_v21 = vadd.f32 %v14331_v18, %v14330_v15  ;;  %v14333_v22 = vpop.f32.mrb[114].mxu1 }
 0x4bd   : > { %v14334_v23 = vpop.f32.mrb[115].mxu1 }
 0x4be   : > { %v11674_v24 = vadd.f32 %v14332_v21, %v11634_v20 }
 0x4d8   : > { %v14352_v25 = vpop.f32.mrb[116].mxu0 }
 0x4d9   : > { %v14353_v26 = vpop.f32.mrb[117].mxu0 }
 0x4da   : > { %v14374_v27 = vpop.f32.mrb[116].mxu1  ;;  %v14354_v28 = vadd.f32 %v14353_v26, %v14352_v25  ;;  %v14355_v29 = vpop.f32.mrb[118].mxu0 }
 0x4db   : > { %v14375_v30 = vpop.f32.mrb[117].mxu1  ;;  %v14356_v31 = vpop.f32.mrb[119].mxu0 }
 0x4dc   : > { %v11714_v32 = vadd.f32 %v14354_v28, %v11674_v24  ;;  %v14376_v33 = vadd.f32 %v14375_v30, %v14374_v27  ;;  %v14377_v34 = vpop.f32.mrb[118].mxu1 }
 0x4dd   : > { %v14378_v35 = vpop.f32.mrb[119].mxu1 }
 0x4de   : > { %v11754_v36 = vadd.f32 %v14376_v33, %v11714_v32 }
 0x4f8   : > { %v14396_v37 = vpop.f32.mrb[120].mxu0 }
 0x4f9   : > { %v14397_v38 = vpop.f32.mrb[121].mxu0 }
 0x4fa   : > { %v14418_v39 = vpop.f32.mrb[120].mxu1  ;;  %v14398_v40 = vadd.f32 %v14397_v38, %v14396_v37  ;;  %v14399_v41 = vpop.f32.mrb[122].mxu0 }
 0x4fb   : > { %v14419_v43 = vpop.f32.mrb[121].mxu1  ;;  %v14400_v44 = vpop.f32.mrb[123].mxu0 }
 0x4fc   : > { %v11794_v45 = vadd.f32 %v14398_v40, %v11754_v36  ;;  %v14420_v46 = vadd.f32 %v14419_v43, %v14418_v39  ;;  %v14421_v47 = vpop.f32.mrb[122].mxu1 }
 0x4fd   : > { %v14422_v48 = vpop.f32.mrb[123].mxu1 }
 0x4fe   : > { %v11834_v49 = vadd.f32 %v14420_v46, %v11794_v45 }
 0x518   : > { %v14440_v50 = vpop.f32.mrb[124].mxu0 }
 0x519   : > { %v14441_v51 = vpop.f32.mrb[125].mxu0 }
 0x51a   : > { %v14462_v52 = vpop.f32.mrb[124].mxu1  ;;  %v14442_v42 = vadd.f32 %v14441_v51, %v14440_v50  ;;  %v14443_v53 = vpop.f32.mrb[126].mxu0 }
 0x51b   : > { %v14463_v54 = vpop.f32.mrb[125].mxu1  ;;  %v14444_v56 = vpop.f32.mrb[127].mxu0 }
 0x51c   : > { %v11874_v57 = vadd.f32 %v14442_v42, %v11834_v49  ;;  %v14464_v58 = vadd.f32 %v14463_v54, %v14462_v52  ;;  %v14465_v59 = vpop.f32.mrb[126].mxu1  ;;  %11924 = sbr.rel (%p13056_p6) target bundleno = 1323 (0x52b), region = 40 }
 0x51d   : > { %v14466_v55 = vpop.f32.mrb[127].mxu1 }
 0x51e   : > { %v11914_v61 = vadd.f32 %v14464_v58, %v11874_v57 }
 0x520   : > { %v11919_v62 = vadd.f32 %v11914_v61, %v222_v60 }
 0x522   : > { %11920 = vst [vmem:[#allocation2] sm:$0x3] %v11919_v62 }
 0x529   : > { %v11925_v63 = vld [vmem:[#allocation2] sm:$0x3] }
 0x52a   : > { %11926 = vst [vmem:[%s15831_s28] sm:$0x3] %v11925_v63 }
 0x52b PF: > { %s15_s16 = sadd.s32 1, %s15679_s16   ;;  %s17156_s9 = smov %s15655_s10 }
 0x52c   : > { %p12_p8 = scmp.ge.s32.totalorder %s15_s16, 6   ;;  %s17157_s10 = smov %s15659_s11 }
 0x52d   : > { %s17158_s11 = smov %s15767_s3  ;;  %s17159_s12 = smov %s15671_s14 }
 0x52e   : > { %s17160_s13 = smov %s15675_s15  ;;  %s17161_s14 = smov %s17164_s18 }
 0x52f   : > { %s17162_s15 = smov %s17168_s19  ;;  %14 = sbr.rel (!%p12_p8) target bundleno = 5 (0x5), region = 79 }
 0x536   :  { %11946 = vsyncpa [#allocation4], 1 }
 0x537   :  { %11948 = vsyncpa [#allocation4 + $0x1], 1 }

</bundles_post_ra>
